<compile_context>
chip_gen: v6e
topology: v6e:2x2x1
jax: 0.10.0
libtpu: 0.0.40
codegen_flags: <defaults>
</compile_context>

<pallas_src>
import jax
import jax.numpy as jnp
from jax.experimental import pallas as pl
from jax.experimental.pallas import tpu as pltpu

KSIZE = 7
PAD = 3
LANES = 128
BAND_K = 3 * LANES          # 384: input columns feeding one 128-lane output tile


def _round_up(v, m):
    return -(-v // m) * m


def _make_band_blocks(w2d):
    """Block-banded (Toeplitz) form of the 7x7 conv along the width axis.

    B[dy][m, n] = w2d[dy, m - n - (LANES - PAD)] when that tap is in [0, 7),
    else 0, with m in [0, 384) indexing the input columns of a 3-block slab and
    n in [0, 128) indexing the output columns of one 128-lane tile.  With the
    max image placed at columns [128, 128 + W) of a zeroed pad scratch,
    sum_dy pad[dy:dy+H, t*128 : t*128+384] @ B[dy] reproduces the 7x7
    cross-correlation with zero padding 3 for output columns [t*128, t*128+128).
    """
    m = jnp.arange(BAND_K)[:, None]
    n = jnp.arange(LANES)[None, :]
    tap = m - n - (LANES - PAD)
    valid = (tap >= 0) & (tap < KSIZE)
    bands = w2d[:, jnp.clip(tap, 0, KSIZE - 1)]            # (KSIZE, 384, 128)
    return jnp.where(valid[None], bands, 0.0).astype(jnp.float32)


def _vmem_capacity():
    """Per-core VMEM bytes, with a conservative fallback (v7x: 64 MiB)."""
    try:
        return int(pltpu.get_tpu_info().vmem_capacity_bytes)
    except Exception:
        return 64 << 20


def _choose_channel_tile(C, per_channel_bytes, budget):
    """Largest channel tile whose x-block stays under `budget` VMEM bytes and is
    legal (tc == C, or tc a multiple of 8 <= C).  Never degrades below 8 and
    never returns an illegal non-multiple-of-8 partial tile."""
    if C * per_channel_bytes <= budget or C <= 8:
        return C
    tc = int(budget // max(per_channel_bytes, 1)) // 8 * 8
    tc = max(tc, 8)
    tc = min(tc, (C // 8) * 8)
    return tc


def _build_kernel(*, C, H, W, tc, num_k, use_2d, ragged, precision):
    Wp = _round_up(W, LANES)
    num_wt = Wp // LANES

    def kernel(band_ref, x_ref, o_ref, max_ref, pad_ref):
        # band_ref: (7, 384, 128) VMEM  block-banded conv weights (constant map)
        # x_ref:    (1, tc, H*W) or (1, tc, H, W) VMEM  current channel slab
        # o_ref:    (1, 1, H, W) VMEM  output block (resident across k)
        # max_ref:  (1, H*W) or (H, W) f32 VMEM  running channel max
        # pad_ref:  (H + 6, Wp + 256) f32 VMEM  zero-padded max image
        k = pl.program_id(1)

        # ---- streaming channel-max fold ----------------------------------
        xb = x_ref[0]                                     # (tc, HW) or (tc, H, W)
        if ragged:
            # Mask channels beyond true C in the (possibly garbage-padded)
            # ragged last block.  Static flag: divisible C pays nothing.
            ch = jax.lax.broadcasted_iota(jnp.int32, xb.shape, 0) + k * tc
            xb = jnp.where(ch < C, xb, -jnp.inf)
        blk_max = jnp.max(xb.astype(jnp.float32), axis=0)
        if not use_2d:
            blk_max = blk_max[None, :]                    # (1, H*W)

        @pl.when(k == 0)
        def _init():
            # Per-batch init: megacore safe (runs on whichever core owns b).
            pad_ref[...] = jnp.zeros_like(pad_ref)
            max_ref[...] = blk_max

        @pl.when(k > 0)
        def _fold():
            max_ref[...] = jnp.maximum(max_ref[...], blk_max)

        # ---- epilogue: 7x7 conv (block-banded MXU) + sigmoid + store ------
        @pl.when(k == num_k - 1)
        def _conv_and_store():
            # Place the channel max at rows [PAD, PAD+H), cols [128, 128+W)
            # of the zeroed pad image.
            if use_2d:
                pad_ref[PAD:PAD + H, LANES:LANES + W] = max_ref[...]
            else:
                for i in range(H):
                    pad_ref[PAD + i:PAD + i + 1, LANES:LANES + W] = (
                        max_ref[:, i * W:(i + 1) * W])

            for t in range(num_wt):
                c0 = t * LANES
                # Register (value) accumulation across the 7 kernel rows: lets
                # Mosaic chain MXU accumulation, no scratch round-trips.
                acc = jnp.dot(pad_ref[0:H, c0:c0 + BAND_K], band_ref[0],
                              preferred_element_type=jnp.float32,
                              precision=precision)
                for dy in range(1, KSIZE):
                    acc = acc + jnp.dot(pad_ref[dy:dy + H, c0:c0 + BAND_K],
                                        band_ref[dy],
                                        preferred_element_type=jnp.float32,
                                        precision=precision)
                w_hi = min(W, c0 + LANES)
                o_ref[0, 0, :, c0:w_hi] = jax.nn.sigmoid(
                    acc[:, :w_hi - c0]).astype(o_ref.dtype)

    return kernel


def spatial_attention(x, weight, *, precision=jax.lax.Precision.HIGHEST):
    """x: (N, C, H, W), weight: (1, 1, 7, 7) -> (N, 1, H, W).

    `precision` applies only to the banded conv matmuls; Precision.HIGH is a
    cheaper knob (~half the f32 MXU passes) if the application tolerates it.
    """
    N, C, H, W = x.shape
    HW = H * W
    Wp = _round_up(W, LANES)
    use_2d = (W % LANES == 0)
    itemsize = x.dtype.itemsize

    w2d = weight.reshape(KSIZE, KSIZE).astype(jnp.float32)
    bands = _make_band_blocks(w2d)                         # (7, 384, 128), ~1.3 MiB

    # ---- generation-aware block / VMEM budgeting --------------------------
    vmem_cap = _vmem_capacity()
    x_block_budget = max(min(vmem_cap // 16, 8 << 20), 1 << 20)
    if use_2d:
        per_ch = _round_up(H, 8) * W * itemsize            # VMEM bytes per channel
    else:
        per_ch = _round_up(HW, LANES) * itemsize
    tc = _choose_channel_tile(C, per_ch, x_block_budget)
    num_k = -(-C // tc)
    ragged = (C % tc) != 0

    x_block_bytes = _round_up(tc, 8) * per_ch
    band_bytes = KSIZE * BAND_K * LANES * 4
    out_block_bytes = _round_up(H, 8) * _round_up(W, LANES) * 4
    max_bytes = (_round_up(H, 8) * W * 4) if use_2d else (8 * _round_up(HW, LANES) * 4)
    pad_bytes = _round_up(H + 2 * PAD, 8) * (Wp + 2 * LANES) * 4
    total = (2 * x_block_bytes + 2 * band_bytes + 2 * out_block_bytes
             + max_bytes + pad_bytes)
    vmem_limit = int(min(max(total + (4 << 20), 32 << 20), vmem_cap))

    # ---- specs -------------------------------------------------------------
    if use_2d:
        x_in = x
        x_spec = pl.BlockSpec((1, tc, H, W), lambda b, k: (b, k, 0, 0))
        max_scratch = pltpu.VMEM((H, W), jnp.float32)
    else:
        x_in = x.reshape(N, C, HW)                         # lane-dense streaming view
        x_spec = pl.BlockSpec((1, tc, HW), lambda b, k: (b, k, 0))
        max_scratch = pltpu.VMEM((1, HW), jnp.float32)

    kernel = _build_kernel(C=C, H=H, W=W, tc=tc, num_k=num_k,
                           use_2d=use_2d, ragged=ragged, precision=precision)

    return pl.pallas_call(
        kernel,
        out_shape=jax.ShapeDtypeStruct((N, 1, H, W), x.dtype),
        grid_spec=pltpu.PrefetchScalarGridSpec(
            num_scalar_prefetch=0,
            grid=(N, num_k),
            in_specs=[
                # block-banded conv weights: constant index map -> DMA'd once
                pl.BlockSpec((KSIZE, BAND_K, LANES), lambda b, k: (0, 0, 0)),
                x_spec,
            ],
            out_specs=pl.BlockSpec((1, 1, H, W), lambda b, k: (b, 0, 0, 0)),
            scratch_shapes=[
                max_scratch,                                          # running max
                pltpu.VMEM((H + 2 * PAD, Wp + 2 * LANES), jnp.float32),  # padded image
            ],
        ),
        compiler_params=pltpu.CompilerParams(
            dimension_semantics=("parallel", "arbitrary"),
            vmem_limit_bytes=vmem_limit),
    )(bands, x_in)


def _reference(x, weight):
    """Pure-JAX reference matching the PyTorch forward."""
    mx = jnp.max(x, axis=1, keepdims=True)                 # (N, 1, H, W)
    out = jax.lax.conv_general_dilated(
        mx, weight, window_strides=(1, 1), padding=((PAD, PAD), (PAD, PAD)),
        dimension_numbers=("NCHW", "OIHW", "NCHW"),
        precision=jax.lax.Precision.HIGHEST)
    return jax.nn.sigmoid(out)


if __name__ == "__main__":
    key = jax.random.PRNGKey(0)
    kx, kw = jax.random.split(key)

    N, C, H, W = 2, 4, 16, 16
    x = jax.random.normal(kx, (N, C, H, W), dtype=jnp.float32)
    # deterministic conv1 weight, shape (1, 1, 7, 7), bias=False
    weight = jax.random.normal(kw, (1, 1, KSIZE, KSIZE), dtype=jnp.float32) * 0.1

    out = jax.block_until_ready(spatial_attention(x, weight))
    ref = _reference(x, weight)

    assert out.shape == (N, 1, H, W)
    assert jnp.allclose(out, ref, atol=1e-5, rtol=1e-5), "mismatch vs reference"
    print("KERNEL_OK")
</pallas_src>

<mosaic_0001>
module attributes {stable_mosaic.version = 11 : i64} {
  func.func @kernel(%arg0: i32, %arg1: i32, %arg2: memref<7x384x128xf32, #tpu.memory_space<vmem>>, %arg3: memref<1x4x256xf32, #tpu.memory_space<vmem>>, %arg4: memref<1x1x16x16xf32, #tpu.memory_space<vmem>>, %arg5: memref<1x256xf32, #tpu.memory_space<vmem>>, %arg6: memref<22x384xf32, #tpu.memory_space<vmem>>) attributes {dimension_semantics = [#tpu.dimension_semantics<parallel>, #tpu.dimension_semantics<arbitrary>], iteration_bounds = array<i64: 2, 1>, scalar_prefetch = 0 : i64, scratch_operands = 2 : i64, tpu.core_type = #tpu.core_type<tc>, window_params = [{pipeline_mode = #tpu.pipeline_mode<synchronous>, transform_indices = @transform_0, window_bounds = array<i64: 7, 384, 128>}, {transform_indices = @transform_1, window_bounds = array<i64: 1, 4, 256>}, {transform_indices = @transform_2, window_bounds = array<i64: 1, 1, 16, 16>}]} {
    %c0 = arith.constant 0 : index
    %c0_0 = arith.constant 0 : index
    %c0_1 = arith.constant 0 : index
    %0 = vector.load %arg3[%c0, %c0_0, %c0_1] : memref<1x4x256xf32, #tpu.memory_space<vmem>>, vector<1x4x256xf32>
    %1 = vector.shape_cast %0 : vector<1x4x256xf32> to vector<4x256xf32>
    %cst = arith.constant dense<0xFF800000> : vector<256xf32>
    %2 = vector.multi_reduction <maximumf>, %1, %cst [0] : vector<4x256xf32> to vector<256xf32>
    %3 = vector.shape_cast %2 : vector<256xf32> to vector<1x256xf32>
    %c0_i32 = arith.constant 0 : i32
    %4 = arith.cmpi eq, %arg1, %c0_i32 : i32
    %5 = arith.extui %4 : i1 to i32
    %c0_i32_2 = arith.constant 0 : i32
    %6 = arith.cmpi ne, %5, %c0_i32_2 : i32
    scf.if %6 {
      %cst_7 = arith.constant 0.000000e+00 : f32
      %13 = vector.broadcast %cst_7 : f32 to vector<22x384xf32>
      %c0_8 = arith.constant 0 : index
      %c0_9 = arith.constant 0 : index
      %14 = vector.load %arg6[%c0_8, %c0_9] : memref<22x384xf32, #tpu.memory_space<vmem>>, vector<22x384xf32>
      tpu.vector_store %arg6[%c0_8, %c0_9], %13 {strides = array<i32>} : memref<22x384xf32, #tpu.memory_space<vmem>>, vector<22x384xf32>,
      %c0_10 = arith.constant 0 : index
      %c0_11 = arith.constant 0 : index
      %15 = vector.load %arg5[%c0_10, %c0_11] : memref<1x256xf32, #tpu.memory_space<vmem>>, vector<1x256xf32>
      tpu.vector_store %arg5[%c0_10, %c0_11], %3 {strides = array<i32>} : memref<1x256xf32, #tpu.memory_space<vmem>>, vector<1x256xf32>,
    } else {
    }
    %c0_i32_3 = arith.constant 0 : i32
    %7 = arith.cmpi sgt, %arg1, %c0_i32_3 : i32
    %8 = arith.extui %7 : i1 to i32
    %c0_i32_4 = arith.constant 0 : i32
    %9 = arith.cmpi ne, %8, %c0_i32_4 : i32
    scf.if %9 {
      %c0_7 = arith.constant 0 : index
      %c0_8 = arith.constant 0 : index
      %13 = vector.load %arg5[%c0_7, %c0_8] : memref<1x256xf32, #tpu.memory_space<vmem>>, vector<1x256xf32>
      %14 = arith.maximumf %13, %3 : vector<1x256xf32>
      %c0_9 = arith.constant 0 : index
      %c0_10 = arith.constant 0 : index
      %15 = vector.load %arg5[%c0_9, %c0_10] : memref<1x256xf32, #tpu.memory_space<vmem>>, vector<1x256xf32>
      tpu.vector_store %arg5[%c0_9, %c0_10], %14 {strides = array<i32>} : memref<1x256xf32, #tpu.memory_space<vmem>>, vector<1x256xf32>,
    } else {
    }
    %c0_i32_5 = arith.constant 0 : i32
    %10 = arith.cmpi eq, %arg1, %c0_i32_5 : i32
    %11 = arith.extui %10 : i1 to i32
    %c0_i32_6 = arith.constant 0 : i32
    %12 = arith.cmpi ne, %11, %c0_i32_6 : i32
    scf.if %12 {
      %c0_7 = arith.constant 0 : index
      %c0_8 = arith.constant 0 : index
      %13 = vector.load %arg5[%c0_7, %c0_8] : memref<1x256xf32, #tpu.memory_space<vmem>>, vector<1x16xf32>
      %c3 = arith.constant 3 : index
      %c128 = arith.constant 128 : index
      %14 = vector.load %arg6[%c3, %c128] : memref<22x384xf32, #tpu.memory_space<vmem>>, vector<1x16xf32>
      tpu.vector_store %arg6[%c3, %c128], %13 {strides = array<i32>} : memref<22x384xf32, #tpu.memory_space<vmem>>, vector<1x16xf32>,
      %c0_9 = arith.constant 0 : index
      %c16 = arith.constant 16 : index
      %15 = vector.load %arg5[%c0_9, %c16] : memref<1x256xf32, #tpu.memory_space<vmem>>, vector<1x16xf32>
      %c4 = arith.constant 4 : index
      %c128_10 = arith.constant 128 : index
      %16 = vector.load %arg6[%c4, %c128_10] : memref<22x384xf32, #tpu.memory_space<vmem>>, vector<1x16xf32>
      tpu.vector_store %arg6[%c4, %c128_10], %15 {strides = array<i32>} : memref<22x384xf32, #tpu.memory_space<vmem>>, vector<1x16xf32>,
      %c0_11 = arith.constant 0 : index
      %c32 = arith.constant 32 : index
      %17 = vector.load %arg5[%c0_11, %c32] : memref<1x256xf32, #tpu.memory_space<vmem>>, vector<1x16xf32>
      %c5 = arith.constant 5 : index
      %c128_12 = arith.constant 128 : index
      %18 = vector.load %arg6[%c5, %c128_12] : memref<22x384xf32, #tpu.memory_space<vmem>>, vector<1x16xf32>
      tpu.vector_store %arg6[%c5, %c128_12], %17 {strides = array<i32>} : memref<22x384xf32, #tpu.memory_space<vmem>>, vector<1x16xf32>,
      %c0_13 = arith.constant 0 : index
      %c48 = arith.constant 48 : index
      %19 = vector.load %arg5[%c0_13, %c48] : memref<1x256xf32, #tpu.memory_space<vmem>>, vector<1x16xf32>
      %c6 = arith.constant 6 : index
      %c128_14 = arith.constant 128 : index
      %20 = vector.load %arg6[%c6, %c128_14] : memref<22x384xf32, #tpu.memory_space<vmem>>, vector<1x16xf32>
      tpu.vector_store %arg6[%c6, %c128_14], %19 {strides = array<i32>} : memref<22x384xf32, #tpu.memory_space<vmem>>, vector<1x16xf32>,
      %c0_15 = arith.constant 0 : index
      %c64 = arith.constant 64 : index
      %21 = vector.load %arg5[%c0_15, %c64] : memref<1x256xf32, #tpu.memory_space<vmem>>, vector<1x16xf32>
      %c7 = arith.constant 7 : index
      %c128_16 = arith.constant 128 : index
      %22 = vector.load %arg6[%c7, %c128_16] : memref<22x384xf32, #tpu.memory_space<vmem>>, vector<1x16xf32>
      tpu.vector_store %arg6[%c7, %c128_16], %21 {strides = array<i32>} : memref<22x384xf32, #tpu.memory_space<vmem>>, vector<1x16xf32>,
      %c0_17 = arith.constant 0 : index
      %c80 = arith.constant 80 : index
      %23 = vector.load %arg5[%c0_17, %c80] : memref<1x256xf32, #tpu.memory_space<vmem>>, vector<1x16xf32>
      %c8 = arith.constant 8 : index
      %c128_18 = arith.constant 128 : index
      %24 = vector.load %arg6[%c8, %c128_18] : memref<22x384xf32, #tpu.memory_space<vmem>>, vector<1x16xf32>
      tpu.vector_store %arg6[%c8, %c128_18], %23 {strides = array<i32>} : memref<22x384xf32, #tpu.memory_space<vmem>>, vector<1x16xf32>,
      %c0_19 = arith.constant 0 : index
      %c96 = arith.constant 96 : index
      %25 = vector.load %arg5[%c0_19, %c96] : memref<1x256xf32, #tpu.memory_space<vmem>>, vector<1x16xf32>
      %c9 = arith.constant 9 : index
      %c128_20 = arith.constant 128 : index
      %26 = vector.load %arg6[%c9, %c128_20] : memref<22x384xf32, #tpu.memory_space<vmem>>, vector<1x16xf32>
      tpu.vector_store %arg6[%c9, %c128_20], %25 {strides = array<i32>} : memref<22x384xf32, #tpu.memory_space<vmem>>, vector<1x16xf32>,
      %c0_21 = arith.constant 0 : index
      %c112 = arith.constant 112 : index
      %27 = vector.load %arg5[%c0_21, %c112] : memref<1x256xf32, #tpu.memory_space<vmem>>, vector<1x16xf32>
      %c10 = arith.constant 10 : index
      %c128_22 = arith.constant 128 : index
      %28 = vector.load %arg6[%c10, %c128_22] : memref<22x384xf32, #tpu.memory_space<vmem>>, vector<1x16xf32>
      tpu.vector_store %arg6[%c10, %c128_22], %27 {strides = array<i32>} : memref<22x384xf32, #tpu.memory_space<vmem>>, vector<1x16xf32>,
      %c0_23 = arith.constant 0 : index
      %c128_24 = arith.constant 128 : index
      %29 = vector.load %arg5[%c0_23, %c128_24] : memref<1x256xf32, #tpu.memory_space<vmem>>, vector<1x16xf32>
      %c11 = arith.constant 11 : index
      %c128_25 = arith.constant 128 : index
      %30 = vector.load %arg6[%c11, %c128_25] : memref<22x384xf32, #tpu.memory_space<vmem>>, vector<1x16xf32>
      tpu.vector_store %arg6[%c11, %c128_25], %29 {strides = array<i32>} : memref<22x384xf32, #tpu.memory_space<vmem>>, vector<1x16xf32>,
      %c0_26 = arith.constant 0 : index
      %c144 = arith.constant 144 : index
      %31 = vector.load %arg5[%c0_26, %c144] : memref<1x256xf32, #tpu.memory_space<vmem>>, vector<1x16xf32>
      %c12 = arith.constant 12 : index
      %c128_27 = arith.constant 128 : index
      %32 = vector.load %arg6[%c12, %c128_27] : memref<22x384xf32, #tpu.memory_space<vmem>>, vector<1x16xf32>
      tpu.vector_store %arg6[%c12, %c128_27], %31 {strides = array<i32>} : memref<22x384xf32, #tpu.memory_space<vmem>>, vector<1x16xf32>,
      %c0_28 = arith.constant 0 : index
      %c160 = arith.constant 160 : index
      %33 = vector.load %arg5[%c0_28, %c160] : memref<1x256xf32, #tpu.memory_space<vmem>>, vector<1x16xf32>
      %c13 = arith.constant 13 : index
      %c128_29 = arith.constant 128 : index
      %34 = vector.load %arg6[%c13, %c128_29] : memref<22x384xf32, #tpu.memory_space<vmem>>, vector<1x16xf32>
      tpu.vector_store %arg6[%c13, %c128_29], %33 {strides = array<i32>} : memref<22x384xf32, #tpu.memory_space<vmem>>, vector<1x16xf32>,
      %c0_30 = arith.constant 0 : index
      %c176 = arith.constant 176 : index
      %35 = vector.load %arg5[%c0_30, %c176] : memref<1x256xf32, #tpu.memory_space<vmem>>, vector<1x16xf32>
      %c14 = arith.constant 14 : index
      %c128_31 = arith.constant 128 : index
      %36 = vector.load %arg6[%c14, %c128_31] : memref<22x384xf32, #tpu.memory_space<vmem>>, vector<1x16xf32>
      tpu.vector_store %arg6[%c14, %c128_31], %35 {strides = array<i32>} : memref<22x384xf32, #tpu.memory_space<vmem>>, vector<1x16xf32>,
      %c0_32 = arith.constant 0 : index
      %c192 = arith.constant 192 : index
      %37 = vector.load %arg5[%c0_32, %c192] : memref<1x256xf32, #tpu.memory_space<vmem>>, vector<1x16xf32>
      %c15 = arith.constant 15 : index
      %c128_33 = arith.constant 128 : index
      %38 = vector.load %arg6[%c15, %c128_33] : memref<22x384xf32, #tpu.memory_space<vmem>>, vector<1x16xf32>
      tpu.vector_store %arg6[%c15, %c128_33], %37 {strides = array<i32>} : memref<22x384xf32, #tpu.memory_space<vmem>>, vector<1x16xf32>,
      %c0_34 = arith.constant 0 : index
      %c208 = arith.constant 208 : index
      %39 = vector.load %arg5[%c0_34, %c208] : memref<1x256xf32, #tpu.memory_space<vmem>>, vector<1x16xf32>
      %c16_35 = arith.constant 16 : index
      %c128_36 = arith.constant 128 : index
      %40 = vector.load %arg6[%c16_35, %c128_36] : memref<22x384xf32, #tpu.memory_space<vmem>>, vector<1x16xf32>
      tpu.vector_store %arg6[%c16_35, %c128_36], %39 {strides = array<i32>} : memref<22x384xf32, #tpu.memory_space<vmem>>, vector<1x16xf32>,
      %c0_37 = arith.constant 0 : index
      %c224 = arith.constant 224 : index
      %41 = vector.load %arg5[%c0_37, %c224] : memref<1x256xf32, #tpu.memory_space<vmem>>, vector<1x16xf32>
      %c17 = arith.constant 17 : index
      %c128_38 = arith.constant 128 : index
      %42 = vector.load %arg6[%c17, %c128_38] : memref<22x384xf32, #tpu.memory_space<vmem>>, vector<1x16xf32>
      tpu.vector_store %arg6[%c17, %c128_38], %41 {strides = array<i32>} : memref<22x384xf32, #tpu.memory_space<vmem>>, vector<1x16xf32>,
      %c0_39 = arith.constant 0 : index
      %c240 = arith.constant 240 : index
      %43 = vector.load %arg5[%c0_39, %c240] : memref<1x256xf32, #tpu.memory_space<vmem>>, vector<1x16xf32>
      %c18 = arith.constant 18 : index
      %c128_40 = arith.constant 128 : index
      %44 = vector.load %arg6[%c18, %c128_40] : memref<22x384xf32, #tpu.memory_space<vmem>>, vector<1x16xf32>
      tpu.vector_store %arg6[%c18, %c128_40], %43 {strides = array<i32>} : memref<22x384xf32, #tpu.memory_space<vmem>>, vector<1x16xf32>,
      %c0_41 = arith.constant 0 : index
      %c0_42 = arith.constant 0 : index
      %45 = vector.load %arg6[%c0_41, %c0_42] : memref<22x384xf32, #tpu.memory_space<vmem>>, vector<16x384xf32>
      %c0_43 = arith.constant 0 : index
      %c0_44 = arith.constant 0 : index
      %c0_45 = arith.constant 0 : index
      %46 = vector.load %arg2[%c0_43, %c0_44, %c0_45] : memref<7x384x128xf32, #tpu.memory_space<vmem>>, vector<1x384x128xf32>
      %47 = vector.shape_cast %46 : vector<1x384x128xf32> to vector<384x128xf32>
      %cst_46 = arith.constant dense<0.000000e+00> : vector<16x128xf32>
      %48 = tpu.matmul %45, %47, %cst_46 {dimension_numbers = #tpu.dot_dimension_numbers<[1], [0], [0], [1], [0, 0, 1, 1], [], []>, precision = #tpu.contract_precision<fp32>} : vector<16x384xf32>, vector<384x128xf32>, vector<16x128xf32> -> vector<16x128xf32>
      %c1 = arith.constant 1 : index
      %c0_47 = arith.constant 0 : index
      %49 = vector.load %arg6[%c1, %c0_47] : memref<22x384xf32, #tpu.memory_space<vmem>>, vector<16x384xf32>
      %c1_48 = arith.constant 1 : index
      %c0_49 = arith.constant 0 : index
      %c0_50 = arith.constant 0 : index
      %50 = vector.load %arg2[%c1_48, %c0_49, %c0_50] : memref<7x384x128xf32, #tpu.memory_space<vmem>>, vector<1x384x128xf32>
      %51 = vector.shape_cast %50 : vector<1x384x128xf32> to vector<384x128xf32>
      %cst_51 = arith.constant dense<0.000000e+00> : vector<16x128xf32>
      %52 = tpu.matmul %49, %51, %cst_51 {dimension_numbers = #tpu.dot_dimension_numbers<[1], [0], [0], [1], [0, 0, 1, 1], [], []>, precision = #tpu.contract_precision<fp32>} : vector<16x384xf32>, vector<384x128xf32>, vector<16x128xf32> -> vector<16x128xf32>
      %53 = arith.addf %48, %52 : vector<16x128xf32>
      %c2 = arith.constant 2 : index
      %c0_52 = arith.constant 0 : index
      %54 = vector.load %arg6[%c2, %c0_52] : memref<22x384xf32, #tpu.memory_space<vmem>>, vector<16x384xf32>
      %c2_53 = arith.constant 2 : index
      %c0_54 = arith.constant 0 : index
      %c0_55 = arith.constant 0 : index
      %55 = vector.load %arg2[%c2_53, %c0_54, %c0_55] : memref<7x384x128xf32, #tpu.memory_space<vmem>>, vector<1x384x128xf32>
      %56 = vector.shape_cast %55 : vector<1x384x128xf32> to vector<384x128xf32>
      %cst_56 = arith.constant dense<0.000000e+00> : vector<16x128xf32>
      %57 = tpu.matmul %54, %56, %cst_56 {dimension_numbers = #tpu.dot_dimension_numbers<[1], [0], [0], [1], [0, 0, 1, 1], [], []>, precision = #tpu.contract_precision<fp32>} : vector<16x384xf32>, vector<384x128xf32>, vector<16x128xf32> -> vector<16x128xf32>
      %58 = arith.addf %53, %57 : vector<16x128xf32>
      %c3_57 = arith.constant 3 : index
      %c0_58 = arith.constant 0 : index
      %59 = vector.load %arg6[%c3_57, %c0_58] : memref<22x384xf32, #tpu.memory_space<vmem>>, vector<16x384xf32>
      %c3_59 = arith.constant 3 : index
      %c0_60 = arith.constant 0 : index
      %c0_61 = arith.constant 0 : index
      %60 = vector.load %arg2[%c3_59, %c0_60, %c0_61] : memref<7x384x128xf32, #tpu.memory_space<vmem>>, vector<1x384x128xf32>
      %61 = vector.shape_cast %60 : vector<1x384x128xf32> to vector<384x128xf32>
      %cst_62 = arith.constant dense<0.000000e+00> : vector<16x128xf32>
      %62 = tpu.matmul %59, %61, %cst_62 {dimension_numbers = #tpu.dot_dimension_numbers<[1], [0], [0], [1], [0, 0, 1, 1], [], []>, precision = #tpu.contract_precision<fp32>} : vector<16x384xf32>, vector<384x128xf32>, vector<16x128xf32> -> vector<16x128xf32>
      %63 = arith.addf %58, %62 : vector<16x128xf32>
      %c4_63 = arith.constant 4 : index
      %c0_64 = arith.constant 0 : index
      %64 = vector.load %arg6[%c4_63, %c0_64] : memref<22x384xf32, #tpu.memory_space<vmem>>, vector<16x384xf32>
      %c4_65 = arith.constant 4 : index
      %c0_66 = arith.constant 0 : index
      %c0_67 = arith.constant 0 : index
      %65 = vector.load %arg2[%c4_65, %c0_66, %c0_67] : memref<7x384x128xf32, #tpu.memory_space<vmem>>, vector<1x384x128xf32>
      %66 = vector.shape_cast %65 : vector<1x384x128xf32> to vector<384x128xf32>
      %cst_68 = arith.constant dense<0.000000e+00> : vector<16x128xf32>
      %67 = tpu.matmul %64, %66, %cst_68 {dimension_numbers = #tpu.dot_dimension_numbers<[1], [0], [0], [1], [0, 0, 1, 1], [], []>, precision = #tpu.contract_precision<fp32>} : vector<16x384xf32>, vector<384x128xf32>, vector<16x128xf32> -> vector<16x128xf32>
      %68 = arith.addf %63, %67 : vector<16x128xf32>
      %c5_69 = arith.constant 5 : index
      %c0_70 = arith.constant 0 : index
      %69 = vector.load %arg6[%c5_69, %c0_70] : memref<22x384xf32, #tpu.memory_space<vmem>>, vector<16x384xf32>
      %c5_71 = arith.constant 5 : index
      %c0_72 = arith.constant 0 : index
      %c0_73 = arith.constant 0 : index
      %70 = vector.load %arg2[%c5_71, %c0_72, %c0_73] : memref<7x384x128xf32, #tpu.memory_space<vmem>>, vector<1x384x128xf32>
      %71 = vector.shape_cast %70 : vector<1x384x128xf32> to vector<384x128xf32>
      %cst_74 = arith.constant dense<0.000000e+00> : vector<16x128xf32>
      %72 = tpu.matmul %69, %71, %cst_74 {dimension_numbers = #tpu.dot_dimension_numbers<[1], [0], [0], [1], [0, 0, 1, 1], [], []>, precision = #tpu.contract_precision<fp32>} : vector<16x384xf32>, vector<384x128xf32>, vector<16x128xf32> -> vector<16x128xf32>
      %73 = arith.addf %68, %72 : vector<16x128xf32>
      %c6_75 = arith.constant 6 : index
      %c0_76 = arith.constant 0 : index
      %74 = vector.load %arg6[%c6_75, %c0_76] : memref<22x384xf32, #tpu.memory_space<vmem>>, vector<16x384xf32>
      %c6_77 = arith.constant 6 : index
      %c0_78 = arith.constant 0 : index
      %c0_79 = arith.constant 0 : index
      %75 = vector.load %arg2[%c6_77, %c0_78, %c0_79] : memref<7x384x128xf32, #tpu.memory_space<vmem>>, vector<1x384x128xf32>
      %76 = vector.shape_cast %75 : vector<1x384x128xf32> to vector<384x128xf32>
      %cst_80 = arith.constant dense<0.000000e+00> : vector<16x128xf32>
      %77 = tpu.matmul %74, %76, %cst_80 {dimension_numbers = #tpu.dot_dimension_numbers<[1], [0], [0], [1], [0, 0, 1, 1], [], []>, precision = #tpu.contract_precision<fp32>} : vector<16x384xf32>, vector<384x128xf32>, vector<16x128xf32> -> vector<16x128xf32>
      %78 = arith.addf %73, %77 : vector<16x128xf32>
      %79 = vector.extract_strided_slice %78 {offsets = [0, 0], sizes = [16, 16], strides = [1, 1]} : vector<16x128xf32> to vector<16x16xf32>
      %80 = arith.negf %79 : vector<16x16xf32>
      %81 = math.exp %80 : vector<16x16xf32>
      %cst_81 = arith.constant 1.000000e+00 : f32
      %82 = vector.broadcast %cst_81 : f32 to vector<16x16xf32>
      %83 = arith.addf %82, %81 : vector<16x16xf32>
      %84 = arith.divf %82, %83 : vector<16x16xf32>
      %c0_82 = arith.constant 0 : index
      %c0_83 = arith.constant 0 : index
      %c0_84 = arith.constant 0 : index
      %c0_85 = arith.constant 0 : index
      %85 = vector.load %arg4[%c0_82, %c0_83, %c0_84, %c0_85] : memref<1x1x16x16xf32, #tpu.memory_space<vmem>>, vector<1x1x16x16xf32>
      %86 = vector.shape_cast %85 : vector<1x1x16x16xf32> to vector<16x16xf32>
      %87 = vector.shape_cast %84 : vector<16x16xf32> to vector<1x1x16x16xf32>
      tpu.vector_store %arg4[%c0_82, %c0_83, %c0_84, %c0_85], %87 {strides = array<i32>} : memref<1x1x16x16xf32, #tpu.memory_space<vmem>>, vector<1x1x16x16xf32>,
    } else {
    }
    return
  }
  func.func @transform_0(%arg0: i32, %arg1: i32) -> (i32, i32, i32) {
    %c0_i32 = arith.constant 0 : i32
    %c0_i32_0 = arith.constant 0 : i32
    %c0_i32_1 = arith.constant 0 : i32
    %c0_i32_2 = arith.constant 0 : i32
    return %c0_i32, %c0_i32_0, %c0_i32_1 : i32, i32, i32
  }
  func.func @transform_1(%arg0: i32, %arg1: i32) -> (i32, i32, i32) {
    %c0_i32 = arith.constant 0 : i32
    %c0_i32_0 = arith.constant 0 : i32
    return %arg0, %arg1, %c0_i32 : i32, i32, i32
  }
  func.func @transform_2(%arg0: i32, %arg1: i32) -> (i32, i32, i32, i32) {
    %c0_i32 = arith.constant 0 : i32
    %c0_i32_0 = arith.constant 0 : i32
    %c0_i32_1 = arith.constant 0 : i32
    %c0_i32_2 = arith.constant 0 : i32
    return %arg0, %c0_i32, %c0_i32_0, %c0_i32_1 : i32, i32, i32, i32
  }
}

</mosaic_0001>

<bundles_post_ra>
// kernel: tpu_custom_call.1
= control target key start
LH: loop header
LB: loop body
LE: loop exit
PB: predicated region body
PF: predicated region fallthrough
CT: control target
= control target key end

     0   :  { %7 = vsyncpa [#allocation5], 0  ;;  %s23635_s0 = inlined_call_operand.hbm [shape: f32[7,384,128], index: 0, kind: input, shape index: {}]   ;;  %s23636_s1 = inlined_call_operand.hbm [shape: f32[2,4,256], index: 1, kind: input, shape index: {}]   ;;  %s23637_s2 = inlined_call_operand.hbm [shape: f32[2,1,16,16], index: 2, kind: output, shape index: {}]  }
   0x1   :  { %8 = vsyncpa [#allocation8], 0 }
   0x2   :  { %10 = vsyncpa [#allocation8 + $0x1], 0 }
   0x3   :  { %11 = vsyncpa [#allocation6], 0 }
   0x4   :  { %13 = vsyncpa [#allocation6 + $0x1], 0  ;;  %s16460_s9 = smov 0   ;;  %s16462_s10 = smov 0  }
   0x5   :  { %s16464_s11 = smov 0   ;;  %s16466_s12 = smov 0  }
   0x6   :  { %s16468_s13 = smov 0   ;;  %s16470_s14 = smov 0  }
   0x7 LB: > { %s12326_s15 = sadd.s32 4294967295, %s16427_s14   ;;  %s12327_s16 = sadd.s32 4294967294, %s16427_s14   ;;  %s16427_s14 = sphi %s16470_s14, %s19_s14   ;;  %s16423_s13 = sphi %s16468_s13, %s25239_s13   ;;  %s16419_s12 = sphi %s16466_s12, %s25238_s12   ;;  %s16415_s11 = sphi %s16464_s11, %s25237_s11   ;;  %s16411_s10 = sphi %s16462_s10, %s25236_s10   ;;  %s16407_s9 = sphi %s16460_s9, %s25235_s9  }
   0x8   : > { %p74_p0 = scmp.ne.s32.totalorder %s16411_s10, %s16407_s9  ;;  %p16494_p1 = scmp.eq.s32.totalorder %s12326_s15, 0 }
   0x9   : > { %p16498_p2 = scmp.eq.s32.totalorder %s12326_s15, 1  ;;  %p104_p3 = scmp.eq.s32.totalorder %s12327_s16, 1 }
   0xa   : > { %p16504_p4 = por %p16494_p1, %p74_p0  ;;  %p12328_p5 = scmp.ge.s32.totalorder %s16427_s14, 1 }
   0xb   : > { %p16509_p6 = por %p104_p3, %p74_p0  ;;  %p111_p7 = scmp.lt.s32.totalorder %s16427_s14, 3 }
   0xc   : > { %s24234_s19 = scalar_select %p16504_p4, 1, 0 }
   0xd   : > { %s24235_s20 = scalar_select %p16509_p6, 1, 0 }
   0xe   : > { %p16514_p8 = pnand %p12328_p5, %p111_p7  ;;  %s16429_s22 = smov [#allocation4]  }
   0xf   : > { %s123_s23 = sshll.u32 %s16429_s22, 4  ;;  %s31_s25 = sadd.s32 1, %s16423_s13  ;;  %s124_s23 = int_to_ptr.vmem [resolvable:$true] %s123_s23 }
  0x10   : > { %p16191_p9 = pneg %p16514_p8  ;;  %s16300_s26 = scalar_lea.vmem %s124_s23, 43008 }
  0x11   : > { %p16301_p13 = scmp.ne.s32.totalorder %s124_s23, %s16300_s26  ;;  %p16308_p5 = scmp.lt.s32.totalorder %s124_s23, %s124_s23 }
  0x12   : > { %p16523_p11 = pnand %p16191_p9, %p16494_p1  ;;  %p16309_p7 = scmp.lt.s32.totalorder %s16300_s26, %s16300_s26 }
  0x14   : > { %p16291_p12 = pneg %p16523_p11  ;;  %p16310_p6 = por %p16309_p7, %p16308_p5 }
  0x16   : > { %p16303_p0 = pnand %p16301_p13, %p16291_p12 }
  0x18   : > { %p16304_p3 = pneg %p16303_p0 }
  0x1a   : > { %p16311_p4 = pnand %p16310_p6, %p16304_p3 }
  0x1c   : > { %16314 = shalt.err (!%p16311_p4)
}
  0x1d   : > { %s16430_s27 = smov 128   ;;  %s16431_s28 = smov 8  }
  0x1e   : > { %16194 = dma.hbm_to_vmem [thread:$0]  (!%p16523_p11), %s23635_s0, 43008, %s124_s23, [#allocation5], %s16430_s27, %s16430_s27, %s16431_s28  }
  0x1f   : > { %p33_p6 = scmp.ge.s32.totalorder %s31_s25, 2  ;;  %s61_s3 = sadd.s32 1, %s16415_s11 }
  0x20   : > { %p68_p4 = scmp.ne.s32.totalorder %s16415_s11, %s16411_s10  ;;  %p69_p9 = scmp.eq.s32.totalorder %s16427_s14, 0 }
  0x21   : > { %s25241_s25 = smov (%p33_p6, %s31_s25), 0  ;;  %p16204_p0 = scmp.lt.s32.totalorder %s16427_s14, 2 }
  0x22   : > { %p16541_p12 = por %p69_p9, %p68_p4  ;;  %p16547_p13 = por %p16498_p2, %p68_p4 }
  0x23   : > { %s56_s6 = ssub.s32 %s16423_s13, %s25241_s25  ;;  %s137_s7 = sand.u32 1, %s16415_s11  }
  0x24   : > { %p59_p11 = scmp.eq.s32.totalorder %s56_s6, 0  ;;  %s12331_s8 = sshll.u32 %s137_s7, 3 }
  0x25   : > { %s12359_s16 = sshll.u32 %s16423_s13, 7  ;;  %s141_s26 = scalar_lea.vmem [#allocation7], %s12331_s8 }
  0x26   : > { %s16556_s15 = scalar_select %p59_p11, %s16415_s11, %s61_s3  }
  0x27   : > { %s149_s24 = scalar_lea.hbm %s23636_s1, %s12359_s16  ;;  %s151_s27 = sshll.u32 %s141_s26, 4  ;;  %s152_s27 = int_to_ptr.vmem [resolvable:$true] %s151_s27 }
  0x28   : > { %p16564_p2 = pnand %p16204_p0, %p16541_p12  ;;  %s138_s28 = scalar_lea.sflag [#allocation8], %s137_s7 }
  0x29   : > { %s16328_s29 = scalar_lea.vmem %s152_s27, 128  ;;  %s16432_s30 = smov [#allocation7]  }
  0x2a   : > { %p16317_p3 = pneg %p16564_p2  ;;  %p16329_p5 = scmp.ne.s32.totalorder %s152_s27, %s16328_s29 }
  0x2b   : > { %s16333_s3 = sshll.u32 %s16432_s30, 4  ;;  %s16334_s3 = int_to_ptr.vmem [resolvable:$false] %s16333_s3 }
  0x2c   : > { %p16331_p7 = pnand %p16329_p5, %p16317_p3  ;;  %s16335_s6 = scalar_lea.vmem %s16334_s3, 256 }
  0x2d   : > { %p16336_p4 = scmp.lt.s32.totalorder %s152_s27, %s16334_s3  ;;  %p16337_p9 = scmp.lt.s32.totalorder %s16335_s6, %s16328_s29 }
  0x2e   : > { %p16332_p6 = pneg %p16331_p7 }
  0x2f   : > { %p16338_p11 = por %p16337_p9, %p16336_p4 }
  0x31   : > { %p16339_p10 = pnand %p16338_p11, %p16332_p6 }
  0x33   : > { %16342 = shalt.err (!%p16339_p10)
}
  0x34   : > { %16198 = dma.hbm_to_vmem [thread:$0]  (!%p16564_p2), %s149_s24, 128, %s152_s27, %s138_s28  }
  0x35   : > { %160 = sbr.rel (%p16514_p8) target bundleno = 1929 (0x789), region = 28 }
  0x3a   : > { %16394 = dma.done.wait (%p16494_p1), [#allocation5], 43008  }
  0x3b   : > { %16396 = vsyncadd (%p16494_p1), [#allocation5], 4294924288  ;;  %s16579_s4 = sand.u32 1, %s16411_s10   ;;  %p24241_p10 = scmp.ne.s32.totalorder %s24234_s19, 0 }
  0x3c   : > { %s12336_s7 = sshll.u32 %s16579_s4, 3  ;;  %s167_s8 = scalar_lea.sflag [#allocation8], %s16579_s4 }
  0x3d   : > { %s170_s16 = scalar_lea.vmem [#allocation7], %s12336_s7 }
  0x3e   : > { %16398 = dma.done.wait (%p24241_p10), %s167_s8, 128  }
  0x3f   : > { %16400 = vsyncadd (%p24241_p10), %s167_s8, 4294967168  ;;  %v23657_v0 = vmov 0.0   ;;  %vm195_vm0 = vcmask 1043456   ;;  %v191_v1 = vld [vmem:[%s170_s16] sm:$0xff]  ;;  %v16434_v6 = vmov 1966171168   ;;  %v229_v8 = vlaneseq }
  0x40   : > { %215 = vst [vmem:[#allocation3 + $0x8] sm:$0xff] %v23657_v0  ;;  %217 = vst [vmem:[#allocation3 + $0x18] sm:$0xff] %v23657_v0  ;;  %v193_v2 = vcombine.high %v191_v1, %v191_v1  ;;  %v196_v3 = vsel %vm195_vm0, %v191_v1, -inf  ;;  %v227_v7 = vunpack.c.l.s4 %v16434_v6  ;;  %v515_v15 = vld [vmem:[#allocation4 + $0x278] sm:$0xff]  ;;  %v514_v21 = vld [vmem:[#allocation4 + $0x270] sm:$0xff]  ;;  %vm279_vm2 = vcmask 122880  }
  0x41   : > { %214 = vst [vmem:[#allocation3] sm:$0xff] %v23657_v0  ;;  %216 = vst [vmem:[#allocation3 + $0x10] sm:$0xff] %v23657_v0  ;;  %v197_v4 = vrot.slane %v196_v3, 4  ;;  %v230_v14 = vshrl.u32 %v229_v8, 7  ;;  %v16597_v18 = vand.u32 4294901760, %v515_v15  ;;  %v499_v19 = vld [vmem:[#allocation4 + $0x1f8] sm:$0xff] }
  0x42   : > { %218 = vst [vmem:[#allocation3 + $0x20] sm:$0xff] %v23657_v0  ;;  %220 = vst [vmem:[#allocation3 + $0x30] sm:$0x3f] %v23657_v0  ;;  %v203_v5 = vsel %vm195_vm0, %v193_v2, -inf  ;;  %v228_v13 = vunpack.c.0.s8 %v227_v7  ;;  %v16599_v20 = vand.u32 4294901760, %v499_v19  ;;  %v16604_v25 = vand.u32 4294901760, %v514_v21 }
  0x43   : > { %221 = vst [vmem:[#allocation3 + $0x38] sm:$0x3f] %v23657_v0  ;;  %222 = vst [vmem:[#allocation3 + $0x40] sm:$0x3f] %v23657_v0  ;;  %v198_v9 = vmax.f32 %v196_v3, %v197_v4  ;;  %v204_v10 = vrot.slane %v203_v5, 4  ;;  %v16602_v24 = vsub.f32 %v515_v15, %v16597_v18  ;;  %v498_v26 = vld [vmem:[#allocation4 + $0x1f0] sm:$0xff]  ;;  %12361 = vmatprep.subr.mxu0 %v16597_v18 }
  0x44   : > { %v16607_v27 = vsub.s32 %v228_v13, %v230_v14  ;;  %vm16609_vm1 = vcmp.lt.s32.totalorder %v229_v8, 256  ;;  %v16614_v29 = vsub.f32 %v499_v19, %v16599_v20  ;;  %v16616_v30 = vand.u32 4294901760, %v498_v26  ;;  %v513_v31 = vld [vmem:[#allocation4 + $0x268] sm:$0xff]  ;;  %12362 = vmatpush3.msra.mxu0 %v16599_v20  ;;  %v512_v41 = vld [vmem:[#allocation4 + $0x260] sm:$0xff]  ;;  %v511_v55 = vld [vmem:[#allocation4 + $0x258] sm:$0xff]  ;;  %s16435_s17 = smov 80  }
  0x45   : > { %v199_v11 = vrot.slane %v198_v9, 2  ;;  %v205_v12 = vmax.f32 %v203_v5, %v204_v10  ;;  %24242 = vst [vmem:[#allocation13_spill] sm:$0xff] %v16602_v24  ;;  %v23656_v34 = vand.u32 4294901760, %v16602_v24  ;;  %v16621_v35 = vsub.f32 %v514_v21, %v16604_v25  ;;  %v497_v36 = vld [vmem:[#allocation4 + $0x1e8] sm:$0xff]  ;;  %12363 = vmatprep.subr.mxu0 %v16604_v25  ;;  %v496_v50 = vld [vmem:[#allocation4 + $0x1e0] sm:$0xff]  ;;  %v495_v60 = vld [vmem:[#allocation4 + $0x1d8] sm:$0xff] }
  0x46   : > { %v23655_v37 = vand.u32 4294901760, %v16614_v29  ;;  %v16626_v38 = vsub.f32 %v498_v26, %v16616_v30  ;;  %v16628_v39 = vand.u32 4294901760, %v513_v31  ;;  %v16630_v40 = vand.u32 4294901760, %v497_v36  ;;  %12364 = vmatpush3.msra.mxu0 %v16616_v30  ;;  %v510_v2 = vld [vmem:[#allocation4 + $0x250] sm:$0xff]  ;;  %v493_v13 = vld [vmem:[#allocation4 + $0x1c8] sm:$0xff]  ;;  %v508_v19 = vld [vmem:[#allocation4 + $0x240] sm:$0xff] }
  0x47   : > { %v200_v16 = vmax.f32 %v198_v9, %v199_v11  ;;  %v206_v17 = vrot.slane %v205_v12, 2  ;;  %v806_v43 = vsub.f32 %v16602_v24, %v23656_v34  ;;  %v23654_v44 = vand.u32 4294901760, %v16621_v35  ;;  %v494_v7 = vld [vmem:[#allocation4 + $0x1d0] sm:$0xff]  ;;  %s16436_s19 = smov 112   ;;  %s16437_s21 = smov 64  }
  0x48   : > { %v16637_v45 = vand.u32 4294901760, %v512_v41  ;;  %v694_v46 = vsub.f32 %v16614_v29, %v23655_v37  ;;  %v23653_v47 = vand.u32 4294901760, %v16626_v38  ;;  %v16644_v48 = vsub.f32 %v513_v31, %v16628_v39  ;;  %12365 = vmatprep.subr.mxu0 %v16628_v39  ;;  %s16438_s22 = smov 96   ;;  %s16439_s23 = smov 32  }
  0x49   : > { %v201_v22 = vrot.slane %v200_v16, 1  ;;  %v207_v23 = vmax.f32 %v205_v12, %v206_v17  ;;  %v16647_v49 = vsub.f32 %v497_v36, %v16630_v40  ;;  %v807_v52 = vand.u32 4294901760, %v806_v43  ;;  %12366 = vmatpush3.msra.mxu0 %v16630_v40  ;;  %v509_v12 = vld [vmem:[#allocation4 + $0x248] sm:$0xff]  ;;  %s16440_s24 = smov 48   ;;  %s16441_s26 = smov 16  }
  0x4a   : > { %v813_v53 = vsub.f32 %v16621_v35, %v23654_v44  ;;  %v16654_v54 = vsub.f32 %v512_v41, %v16637_v45  ;;  %v695_v56 = vand.u32 4294901760, %v694_v46  ;;  %v701_v57 = vsub.f32 %v16626_v38, %v23653_v47  ;;  %12367 = vmatprep.subr.mxu0 %v16637_v45  ;;  %v503_v47 = vld [vmem:[#allocation4 + $0x218] sm:$0xff]  ;;  %s12337_s27 = sshll.u32 %s16579_s4, 4  ;;  %s12360_s18 = sshll.u32 %s16419_s12, 8 }
  0x4b   : > { %v202_v32 = vmax.f32 %v200_v16, %v201_v22  ;;  %v208_v33 = vrot.slane %v207_v23, 1  ;;  %v23650_v58 = vand.u32 4294901760, %v16644_v48  ;;  %v23648_v59 = vand.u32 4294901760, %v16647_v49  ;;  %12399 = vmatprep.subr.mxu1 %v807_v52  ;;  %v492_v52 = vld [vmem:[#allocation4 + $0x1c0] sm:$0xff]  ;;  %v487_v44 = vld [vmem:[#allocation4 + $0x198] sm:$0xff]  ;;  %s190_s28 = scalar_lea.vmem [#allocation9], %s12337_s27  ;;  %s23585_s6 = scalar_lea.hbm %s23637_s2, %s12360_s18 }
  0x4c   : > { %v814_v62 = vand.u32 4294901760, %v813_v53  ;;  %v23647_v63 = vand.u32 4294901760, %v16654_v54  ;;  %v16665_v1 = vand.u32 4294901760, %v496_v50  ;;  %12400 = vmatpush3.msra.mxu1 %v695_v56  ;;  %v702_v3 = vand.u32 4294901760, %v701_v57  ;;  %s12230_s29 = sshll.u32 %s190_s28, 4  ;;  %s12217_s7 = scalar_lea.sflag [#allocation6], %s16579_s4  ;;  %s23587_s29 = int_to_ptr.vmem [resolvable:$true] %s12230_s29 }
  0x4d   : > { %v209_v42 = vmax.f32 %v207_v23, %v208_v33  ;;  %v820_v4 = vsub.f32 %v16644_v48, %v23650_v58  ;;  %v708_v5 = vsub.f32 %v16647_v49, %v23648_v59  ;;  %v16673_v6 = vand.u32 4294901760, %v511_v55  ;;  %s16343_s8 = scalar_lea.vmem %s23587_s29, 256  ;;  %s16442_s12 = smov [#allocation9]  }
  0x4e   : > { %12401 = vmatprep.subr.mxu1 %v814_v62  ;;  %v827_v9 = vsub.f32 %v16654_v54, %v23647_v63  ;;  %v16680_v10 = vsub.f32 %v496_v50, %v16665_v1  ;;  %v16682_v11 = vand.u32 4294901760, %v495_v60  ;;  %12368 = vmatpush3.msra.mxu0 %v16665_v1  ;;  %v16688_v17 = vand.u32 4294901760, %v510_v2  ;;  %p16344_p1 = scmp.ne.s32.totalorder %s23587_s29, %s16343_s8  ;;  %s16347_s16 = sshll.u32 %s16442_s12, 4  ;;  %s16348_s16 = int_to_ptr.vmem [resolvable:$false] %s16347_s16 }
  0x4f   : > { %v225_v51 = vcombine.low %v202_v32, %v209_v42  ;;  %12402 = vmatpush3.msra.mxu1 %v702_v3  ;;  %v821_v14 = vand.u32 4294901760, %v820_v4  ;;  %v709_v15 = vand.u32 4294901760, %v708_v5  ;;  %v16686_v16 = vsub.f32 %v511_v55, %v16673_v6  ;;  %12369 = vmatprep.subr.mxu0 %v16673_v6  ;;  %p16350_p0 = scmp.lt.s32.totalorder %s23587_s29, %s16348_s16 }
  0x50   : > { %v828_v21 = vand.u32 4294901760, %v827_v9  ;;  %v23646_v22 = vand.u32 4294901760, %v16680_v10  ;;  %v16695_v23 = vsub.f32 %v495_v60, %v16682_v11  ;;  %v16697_v26 = vand.u32 4294901760, %v494_v7  ;;  %12370 = vmatpush3.msra.mxu0 %v16682_v11  ;;  %v491_v9 = vld [vmem:[#allocation4 + $0x1b8] sm:$0xff]  ;;  %p16345_p8 = pnand %p16344_p1, %p16547_p13 }
  0x51   : > { %v232_v61 = vrot.slane %v225_v51, %v16607_v27  ;;  %12403 = vmatprep.subr.mxu1 %v821_v14  ;;  %v16702_v31 = vsub.f32 %v510_v2, %v16688_v17  ;;  %v16704_v32 = vand.u32 4294901760, %v509_v12  ;;  %v16706_v28 = vand.u32 4294901760, %v493_v13  ;;  %12371 = vmatprep.subr.mxu0 %v16688_v17 }
  0x52   : > { %12404 = vmatpush3.msra.mxu1 %v709_v15  ;;  %v715_v33 = vsub.f32 %v16680_v10, %v23646_v22  ;;  %v23643_v36 = vand.u32 4294901760, %v16695_v23  ;;  %v16714_v41 = vsub.f32 %v494_v7, %v16697_v26  ;;  %v16716_v42 = vand.u32 4294901760, %v508_v19  ;;  %12372 = vmatpush3.msra.mxu0 %v16697_v26  ;;  %p16346_p12 = pneg %p16345_p8 }
  0x53   : > { %v239_v8 = vrot.slane %v232_v61, %v16607_v27  ;;  %v23645_v27 = vand.u32 4294901760, %v16686_v16  ;;  %12405 = vmatprep.subr.mxu1 %v828_v21  ;;  %v23642_v46 = vand.u32 4294901760, %v16702_v31  ;;  %v16724_v50 = vsub.f32 %v509_v12, %v16704_v32  ;;  %12373 = vmatprep.subr.mxu0 %v16704_v32  ;;  %v506_v12 = vld [vmem:[#allocation4 + $0x230] sm:$0xff] }
  0x54   : > { %v16727_v51 = vsub.f32 %v493_v13, %v16706_v28  ;;  %v716_v53 = vand.u32 4294901760, %v715_v33  ;;  %v722_v55 = vsub.f32 %v16695_v23, %v23643_v36  ;;  %v23641_v56 = vand.u32 4294901760, %v16714_v41  ;;  %12374 = vmatpush3.msra.mxu0 %v16706_v28  ;;  %v490_v21 = vld [vmem:[#allocation4 + $0x1b0] sm:$0xff] }
  0x55   : > { %245 = vst.msk [vmem:[#allocation2] sm:$0x3] %vm16609_vm1, %v239_v8  ;;  %v834_v43 = vsub.f32 %v16686_v16, %v23645_v27  ;;  %v16735_v57 = vsub.f32 %v508_v19, %v16716_v42  ;;  %v841_v61 = vsub.f32 %v16702_v31, %v23642_v46  ;;  %v23640_v62 = vand.u32 4294901760, %v16724_v50  ;;  %12375 = vmatprep.subr.mxu0 %v16716_v42  ;;  %v507_v8 = vld [vmem:[#allocation4 + $0x238] sm:$0xff] }
  0x56   : > { %v23639_v2 = vand.u32 4294901760, %v16727_v51  ;;  %12406 = vmatpush3.msra.mxu1 %v716_v53  ;;  %v723_v3 = vand.u32 4294901760, %v722_v55  ;;  %v729_v4 = vsub.f32 %v16714_v41, %v23641_v56  ;;  %v16748_v7 = vand.u32 4294901760, %v492_v52 }
  0x57   : > { %v835_v60 = vand.u32 4294901760, %v834_v43  ;;  %v23644_v5 = vand.u32 4294901760, %v16735_v57  ;;  %v848_v15 = vsub.f32 %v16724_v50, %v23640_v62  ;;  %v842_v43 = vand.u32 4294901760, %v841_v61  ;;  %v489_v62 = vld [vmem:[#allocation4 + $0x1a8] sm:$0xff]  ;;  %v504_v61 = vld [vmem:[#allocation4 + $0x220] sm:$0xff] }
  0x58   : > { %v736_v19 = vsub.f32 %v16727_v51, %v23639_v2  ;;  %v730_v53 = vand.u32 4294901760, %v729_v4  ;;  %v505_v2 = vld [vmem:[#allocation4 + $0x228] sm:$0xff]  ;;  %v16770_v36 = vand.u32 4294901760, %v507_v8  ;;  %12376 = vmatpush3.msra.mxu0 %v16748_v7  ;;  %v16778_v27 = vand.u32 4294901760, %v490_v21 }
  0x59   : > { %12407 = vmatprep.subr.mxu1 %v835_v60  ;;  %v855_v55 = vsub.f32 %v16735_v57, %v23644_v5  ;;  %v16767_v60 = vsub.f32 %v492_v52, %v16748_v7  ;;  %v849_v56 = vand.u32 4294901760, %v848_v15  ;;  %v16776_v52 = vand.u32 4294901760, %v506_v12 }
  0x5a   : > { %12408 = vmatpush3.msra.mxu1 %v723_v3  ;;  %v737_v46 = vand.u32 4294901760, %v736_v19  ;;  %v16781_v3 = vsub.f32 %v507_v8, %v16770_v36  ;;  %v16786_v19 = vand.u32 4294901760, %v505_v2  ;;  %12377 = vmatprep.subr.mxu0 %v16770_v36  ;;  %vm541_vm3 = vcmask 1046528  }
  0x5b   : > { %24245 = vst [vmem:[#allocation14_spill] sm:$0xff] %v16767_v60  ;;  %12409 = vmatprep.subr.mxu1 %v842_v43  ;;  %v856_v4 = vand.u32 4294901760, %v855_v55  ;;  %v23649_v5 = vand.u32 4294901760, %v16767_v60  ;;  %v16802_v43 = vsub.f32 %v490_v21, %v16778_v27  ;;  %vm3828_vm4 = vcmask 1045504  }
  0x5c   : > { %v16750_v13 = vld [vmem:[#allocation2] ss:$0 sm:$0xff]  ;;  %v351_v33 = vld [vmem:[#allocation2 + $0x1] sm:$0x1]  ;;  %12410 = vmatpush3.msra.mxu1 %v730_v53  ;;  %24246 = vst [vmem:[#allocation15_spill] sm:$0xff] %v16781_v3  ;;  %v16804_v53 = vand.u32 4294901760, %v504_v61  ;;  %v16809_v63 = vsub.f32 %v505_v2, %v16786_v19 }
  0x5d   : > { %v278_v14 = vld [vmem:[#allocation2] sm:$0x1]  ;;  %307 = vrot.lane.b32.xlu1 %v16750_v13, %s16435_s17  ;;  %287 = vrot.lane.b32.xlu0 %v16750_v13, %s16436_s19  ;;  %352 = vst.msk [vmem:[#allocation3 + $0x23] sm:$0x1] %vm279_vm2, %v351_v33  ;;  %v16788_v33 = vand.u32 4294901760, %v489_v62  ;;  %v743_v8 = vsub.f32 %v16767_v60, %v23649_v5  ;;  %24249 = vst [vmem:[#allocation18_spill] sm:$0xff] %v16802_v43 }
  0x5e   : > { %280 = vst.msk [vmem:[#allocation3 + $0xb] sm:$0x1] %vm279_vm2, %v278_v14  ;;  %v16772_v14 = vand.u32 4294901760, %v491_v9  ;;  %24250 = vst [vmem:[#allocation19_spill] sm:$0xff] %v16804_v53  ;;  %12411 = vmatprep.subr.mxu1 %v849_v56  ;;  %v23652_v55 = vand.u32 4294901760, %v16781_v3  ;;  %v488_v5 = vld [vmem:[#allocation4 + $0x1a0] sm:$0xff]  ;;  %v16818_v56 = vsub.f32 %v504_v61, %v16804_v53 }
  0x5f   : > { %24251 = vst [vmem:[#allocation20_spill] sm:$0xff] %v16809_v63  ;;  %v16812_v59 = vsub.f32 %v489_v62, %v16788_v33  ;;  %12412 = vmatpush3.msra.mxu1 %v737_v46  ;;  %v23661_v58 = vand.u32 4294901760, %v16802_v43  ;;  %v23668_v46 = vand.u32 4294901760, %v16809_v63  ;;  %v16843_v37 = vld [vmem:[#allocation2 + $0x1] ss:$0 sm:$0xff]  ;;  %v16861_v60 = vand.u32 4294901760, %v487_v44 }
  0x60   : > { %v16784_v15 = vsub.f32 %v491_v9, %v16772_v14  ;;  %v16799_v9 = vsub.f32 %v506_v12, %v16776_v52  ;;  %12378 = vmatpush3.msra.mxu0 %v16772_v14  ;;  %v744_v12 = vand.u32 4294901760, %v743_v8  ;;  %24253 = vst [vmem:[#allocation22_spill] sm:$0xff] %v16818_v56  ;;  %12413 = vmatprep.subr.mxu1 %v856_v4  ;;  %vm5515_vm5 = vcmask 1044480  }
  0x61   : > { %317 = vrot.lane.b32.xlu1 %v16750_v13, %s16437_s21  ;;  %297 = vrot.lane.b32.xlu0 %v16750_v13, %s16438_s22  ;;  %24252 = vst [vmem:[#allocation21_spill] sm:$0xff] %v16812_v59  ;;  %v862_v62 = vsub.f32 %v16781_v3, %v23652_v55  ;;  %v757_v4 = vsub.f32 %v16802_v43, %v23661_v58  ;;  %v16841_v55 = vand.u32 4294901760, %v488_v5  ;;  %v502_v58 = vld [vmem:[#allocation4 + $0x210] sm:$0xff]  ;;  %v24256_v3 = vand.u32 4294901760, %v16818_v56 }
  0x62   : > { %24247 = vst [vmem:[#allocation16_spill] sm:$0xff] %v16784_v15  ;;  %24248 = vst [vmem:[#allocation17_spill] sm:$0xff] %v16799_v9  ;;  %v23651_v22 = vand.u32 4294901760, %v16784_v15  ;;  %v23658_v21 = vand.u32 4294901760, %v16799_v9  ;;  %12379 = vmatprep.subr.mxu0 %v16776_v52  ;;  %12414 = vmatpush3.msra.mxu1 %v744_v12  ;;  %v876_v8 = vsub.f32 %v16809_v63, %v23668_v46  ;;  %v486_v43 = vld [vmem:[#allocation4 + $0x190] sm:$0xff]  ;;  %v485_v46 = vld [vmem:[#allocation4 + $0x188] sm:$0xff] }
  0x63   : > { %12380 = vmatpush3.msra.mxu0 %v16778_v27  ;;  %24254 = vst [vmem:[#allocation23_spill] sm:$0xff] %v16841_v55  ;;  %v863_v34 = vand.u32 4294901760, %v862_v62  ;;  %v883_v12 = vsub.f32 %v16818_v56, %v24256_v3  ;;  %v16856_v62 = vsub.f32 %v488_v5, %v16841_v55  ;;  %24259 = vst [vmem:[#allocation26_spill] sm:$0xff] %v16861_v60  ;;  %vm8888_vm6 = vcmask 1042432  }
  0x64   : > { %v750_v2 = vsub.f32 %v16784_v15, %v23651_v22  ;;  %v869_v61 = vsub.f32 %v16799_v9, %v23658_v21  ;;  %v24255_v21 = vand.u32 4294901760, %v16812_v59  ;;  %12381 = vmatprep.subr.mxu0 %v16786_v19  ;;  %v758_v15 = vand.u32 4294901760, %v757_v4 }
  0x65   : > { %337 = vrot.lane.b32.xlu1 %v16750_v13, %s16439_s23  ;;  %327 = vrot.lane.b32.xlu0 %v16750_v13, %s16440_s24  ;;  %24257 = vst [vmem:[#allocation24_spill] sm:$0xff] %v16856_v62  ;;  %v877_v63 = vand.u32 4294901760, %v876_v8  ;;  %v884_v5 = vand.u32 4294901760, %v883_v12  ;;  %v23681_v3 = vand.u32 4294901760, %v16856_v62  ;;  %v16877_v4 = vsub.f32 %v487_v44, %v16861_v60 }
  0x66   : > { %v751_v0 = vand.u32 4294901760, %v750_v2  ;;  %v764_v9 = vsub.f32 %v16812_v59, %v24255_v21  ;;  %v870_v22 = vand.u32 4294901760, %v869_v61  ;;  %v501_v2 = vld [vmem:[#allocation4 + $0x208] sm:$0xff]  ;;  %12382 = vmatpush3.msra.mxu0 %v16788_v33  ;;  %12415 = vmatprep.subr.mxu1 %v863_v34  ;;  %v16859_v59 = vand.u32 4294901760, %v503_v47  ;;  %v500_v61 = vld [vmem:[#allocation4 + $0x200] sm:$0xff] }
  0x67   : > { %12383 = vmatprep.subr.mxu0 %v16804_v53  ;;  %v16869_v34 = vand.u32 4294901760, %v502_v58  ;;  %v16879_v56 = vand.u32 4294901760, %v501_v2  ;;  %v16881_v53 = vand.u32 4294901760, %v485_v46  ;;  %vm10575_vm7 = vcmask 1041408  }
  0x68   : > { %v765_v21 = vand.u32 4294901760, %v764_v9  ;;  %24258 = vst [vmem:[#allocation25_spill] sm:$0xff] %v16859_v59  ;;  %v16871_v9 = vand.u32 4294901760, %v486_v43  ;;  %12416 = vmatpush3.msra.mxu1 %v751_v0  ;;  %v16874_v8 = vsub.f32 %v503_v47, %v16859_v59  ;;  %12384 = vmatpush3.msra.mxu0 %v16841_v55  ;;  %v16893_v47 = vand.u32 4294901760, %v500_v61 }
  0x69   : > { %359 = vrot.lane.b32.xlu1 %v16843_v37, %s16436_s19  ;;  %347 = vrot.lane.b32.xlu0 %v16750_v13, %s16441_s26  ;;  %24260 = vst [vmem:[#allocation27_spill] sm:$0xff] %v16869_v34  ;;  %v771_v13 = vsub.f32 %v16856_v62, %v23681_v3  ;;  %v16888_v12 = vsub.f32 %v502_v58, %v16869_v34  ;;  %v484_v58 = vld [vmem:[#allocation4 + $0x180] sm:$0xff]  ;;  %v24265_v62 = vand.u32 4294901760, %v16877_v4  ;;  %vm12213_vm8 = vcmask 130048  }
  0x6a   : > { %24261 = vst [vmem:[#allocation28_spill] sm:$0xff] %v16871_v9  ;;  %24262 = vst [vmem:[#allocation29_spill] sm:$0xff] %v16874_v8  ;;  %12417 = vmatprep.subr.mxu1 %v870_v22  ;;  %v16891_v0 = vsub.f32 %v486_v43, %v16871_v9  ;;  %12385 = vmatprep.subr.mxu0 %v16859_v59  ;;  %v23688_v44 = vand.u32 4294901760, %v16874_v8  ;;  %v16899_v22 = vsub.f32 %v501_v2, %v16879_v56 }
  0x6b   : > { %12418 = vmatpush3.msra.mxu1 %v758_v15  ;;  %v16902_v3 = vsub.f32 %v485_v46, %v16881_v53  ;;  %12386 = vmatpush3.msra.mxu0 %v16861_v60  ;;  %v772_v15 = vand.u32 4294901760, %v771_v13  ;;  %v23692_v43 = vand.u32 4294901760, %v16888_v12  ;;  %v16912_v2 = vsub.f32 %v500_v61, %v16893_v47 }
  0x6c   : > { %24263 = vst [vmem:[#allocation30_spill] sm:$0xff] %v16891_v0  ;;  %24264 = vst [vmem:[#allocation31_spill] sm:$0xff] %v16899_v22  ;;  %v23691_v55 = vand.u32 4294901760, %v16891_v0  ;;  %12419 = vmatprep.subr.mxu1 %v877_v63  ;;  %v890_v46 = vsub.f32 %v16874_v8, %v23688_v44  ;;  %v778_v60 = vsub.f32 %v16877_v4, %v24265_v62  ;;  %v23693_v59 = vand.u32 4294901760, %v16899_v22 }
  0x6d   : > { %379 = vrot.lane.b32.xlu1 %v16843_v37, %s16435_s17  ;;  %369 = vrot.lane.b32.xlu0 %v16843_v37, %s16438_s22  ;;  %v897_v61 = vsub.f32 %v16888_v12, %v23692_v43  ;;  %v23699_v44 = vand.u32 4294901760, %v16912_v2  ;;  %v16930_v8 = vand.u32 4294901760, %v484_v58  ;;  %s16349_s17 = scalar_lea.vmem %s16348_s16, 512 }
  0x6e   : > { %12387 = vmatprep.subr.mxu0 %v16869_v34  ;;  %12420 = vmatpush3.msra.mxu1 %v765_v21  ;;  %v785_v63 = vsub.f32 %v16891_v0, %v23691_v55  ;;  %v891_v62 = vand.u32 4294901760, %v890_v46  ;;  %v779_v13 = vand.u32 4294901760, %v778_v60  ;;  %v904_v21 = vsub.f32 %v16899_v22, %v23693_v59  ;;  %p16351_p2 = scmp.lt.s32.totalorder %s16349_s17, %s16343_s8 }
  0x6f   : > { %12388 = vmatpush3.msra.mxu0 %v16871_v9  ;;  %12421 = vmatprep.subr.mxu1 %v884_v5  ;;  %v24266_v55 = vand.u32 4294901760, %v16902_v3  ;;  %v16945_v5 = vsub.f32 %v484_v58, %v16930_v8  ;;  %v898_v60 = vand.u32 4294901760, %v897_v61  ;;  %v911_v46 = vsub.f32 %v16912_v2, %v23699_v44 }
  0x70   : > { %12389 = vmatprep.subr.mxu0 %v16879_v56  ;;  %12422 = vmatpush3.msra.mxu1 %v772_v15  ;;  %v786_v59 = vand.u32 4294901760, %v785_v63  ;;  %v905_v0 = vand.u32 4294901760, %v904_v21  ;;  %p16352_p3 = por %p16351_p2, %p16350_p0 }
  0x71   : > { %399 = vrot.lane.b32.xlu1 %v16843_v37, %s16440_s24  ;;  %389 = vrot.lane.b32.xlu0 %v16843_v37, %s16437_s21  ;;  %v792_v43 = vsub.f32 %v16902_v3, %v24266_v55  ;;  %v23698_v22 = vand.u32 4294901760, %v16945_v5  ;;  %v912_v15 = vand.u32 4294901760, %v911_v46 }
  0x72   : > { %12390 = vmatpush3.msra.mxu0 %v16881_v53  ;;  %12423 = vmatprep.subr.mxu1 %v891_v62  ;;  %p16353_p5 = pnand %p16352_p3, %p16346_p12 }
  0x73   : > { %12391 = vmatprep.subr.mxu0 %v16893_v47  ;;  %12424 = vmatpush3.msra.mxu1 %v779_v13  ;;  %v793_v55 = vand.u32 4294901760, %v792_v43  ;;  %v799_v58 = vsub.f32 %v16945_v5, %v23698_v22 }
  0x74   : > { %12392 = vmatpush3.msra.mxu0 %v16930_v8  ;;  %12425 = vmatprep.subr.mxu1 %v898_v60  ;;  %v477_v60 = vld [vmem:[#allocation3] sm:$0xfe] }
  0x75   : > { %419 = vrot.lane.b32.xlu1 %v16843_v37, %s16441_s26  ;;  %409 = vrot.lane.b32.xlu0 %v16843_v37, %s16439_s23  ;;  %v800_v13 = vand.u32 4294901760, %v799_v58  ;;  %v542_v58 = vrot.slane %v477_v60, 1 }
  0x76   : > { %12437 = vmatprep.subr.mxu0 %v16602_v24  ;;  %12426 = vmatpush3.msra.mxu1 %v786_v59 }
  0x77   : > { %12427 = vmatprep.subr.mxu1 %v905_v0 }
  0x78   : > { %12428 = vmatpush3.msra.mxu1 %v793_v55 }
  0x79   : > { %12429 = vmatprep.subr.mxu1 %v912_v15  ;;  %v24267_v15 = vmov 0.0  }
  0x7a   : > { %12430 = vmatpush3.msra.mxu1 %v800_v13  ;;  %v16972_v13 = vrot.slane %v24267_v15, 1 }
  0x7b   : > { %12475 = vmatprep.subr.mxu1 %v16597_v18 }
  0x7c   : > { %24268 = vst [vmem:[#allocation32_spill] sm:$0xff] %v16972_v13 }
  0xcf   : > { %v308_v61 = vpop.permute.xlu1 %307  ;;  %v288_v63 = vpop.permute.xlu0 %287 }
  0xd0   : > { %310 = vst.msk [vmem:[#allocation3 + $0xe] sm:$0x1] %vm279_vm2, %v308_v61  ;;  %290 = vst.msk [vmem:[#allocation3 + $0xc] sm:$0x1] %vm279_vm2, %v288_v63  ;;  %v480_v61 = vld [vmem:[#allocation3 + $0x30] sm:$0x1] }
  0xd3   : > { %v318_v37 = vpop.permute.xlu1 %317  ;;  %v298_v43 = vpop.permute.xlu0 %297 }
  0xd4   : > { %320 = vst.msk [vmem:[#allocation3 + $0xf] sm:$0x1] %vm279_vm2, %v318_v37  ;;  %300 = vst.msk [vmem:[#allocation3 + $0xd] sm:$0x1] %vm279_vm2, %v298_v43  ;;  %v544_v43 = vsel %vm541_vm3, %v542_v58, %v16972_v13 }
  0xd7   : > { %v338_v59 = vpop.permute.xlu1 %337  ;;  %v328_v62 = vpop.permute.xlu0 %327 }
  0xd8   : > { %340 = vst.msk [vmem:[#allocation3 + $0x21] sm:$0x1] %vm279_vm2, %v338_v59  ;;  %330 = vst.msk [vmem:[#allocation3 + $0x20] sm:$0x1] %vm279_vm2, %v328_v62  ;;  %v551_v59 = vrot.slane %v480_v61, 1  ;;  %v16980_v62 = vand.u32 4294901760, %v544_v43 }
  0xda   : > { %24269 = vst [vmem:[#allocation33_spill] sm:$0xff] %v16980_v62  ;;  %v552_v60 = vsel %vm541_vm3, %v16972_v13, %v551_v59 }
  0xdb   : > { %v360_v0 = vpop.permute.xlu1 %359  ;;  %v348_v21 = vpop.permute.xlu0 %347 }
  0xdc   : > { %362 = vst.msk [vmem:[#allocation3 + $0x24] sm:$0x1] %vm279_vm2, %v360_v0  ;;  %350 = vst.msk [vmem:[#allocation3 + $0x22] sm:$0x1] %vm279_vm2, %v348_v21 }
  0xdf   : > { %v380_v46 = vpop.permute.xlu1 %379  ;;  %v370_v55 = vpop.permute.xlu0 %369 }
  0xe0   : > { %382 = vst.msk [vmem:[#allocation3 + $0x26] sm:$0x1] %vm279_vm2, %v380_v46  ;;  %372 = vst.msk [vmem:[#allocation3 + $0x25] sm:$0x1] %vm279_vm2, %v370_v55  ;;  %v478_v46 = vld [vmem:[#allocation3 + $0x8] sm:$0xfe]  ;;  %v16987_v55 = vsub.f32 %v544_v43, %v16980_v62 }
  0xe1   : > { %v545_v61 = vrot.slane %v478_v46, 1 }
  0xe3   : > { %v400_v63 = vpop.permute.xlu1 %399  ;;  %v390_v37 = vpop.permute.xlu0 %389 }
  0xe4   : > { %402 = vst.msk [vmem:[#allocation3 + $0x38] sm:$0x1] %vm279_vm2, %v400_v63  ;;  %392 = vst.msk [vmem:[#allocation3 + $0x27] sm:$0x1] %vm279_vm2, %v390_v37  ;;  %v16989_v63 = vand.u32 4294901760, %v552_v60 }
  0xe6   : > { %24270 = vst [vmem:[#allocation34_spill] sm:$0xff] %v16989_v63  ;;  %v16999_v43 = vsub.f32 %v552_v60, %v16989_v63 }
  0xe7   : > { %v420_v0 = vpop.permute.xlu1 %419  ;;  %v410_v21 = vpop.permute.xlu0 %409 }
  0xe8   : > { %422 = vst.msk [vmem:[#allocation3 + $0x3a] sm:$0x1] %vm279_vm2, %v420_v0  ;;  %412 = vst.msk [vmem:[#allocation3 + $0x39] sm:$0x1] %vm279_vm2, %v410_v21  ;;  %v23703_v21 = vand.u32 4294901760, %v16987_v55 }
  0xeb   : > { %v427_v58 = vld [vmem:[#allocation3 + $0x20] sm:$0xff]  ;;  %v481_v15 = vld [vmem:[#allocation3 + $0x38] sm:$0x1] }
  0xec   : > { %v546_v37 = vrot.slane %v427_v58, 1  ;;  %v553_v22 = vrot.slane %v481_v15, 1  ;;  %v23705_v15 = vand.u32 4294901760, %v16999_v43 }
  0xee   : > { %v547_v44 = vsel %vm541_vm3, %v545_v61, %v546_v37  ;;  %v554_v0 = vsel %vm541_vm3, %v546_v37, %v553_v22  ;;  %v668_v22 = vsub.f32 %v16987_v55, %v23703_v21  ;;  %v683_v21 = vsub.f32 %v16999_v43, %v23705_v15  ;;  %v24281_v15 = vld [vmem:[#allocation20_spill] sm:$0xff] }
  0xef   : > { %v16994_v24 = vand.u32 4294901760, %v547_v44  ;;  %v16996_v59 = vand.u32 4294901760, %v554_v0 }
  0xf0   : > { %v669_v61 = vand.u32 4294901760, %v668_v22 }
  0xf1   : > { %24271 = vst [vmem:[#allocation35_spill] sm:$0xff] %v16996_v59  ;;  %915 = vmatprep.mubr.f32.mxu1 %v16994_v24  ;;  %v660_v13 = vsub.f32 %v547_v44, %v16994_v24  ;;  %v17004_v46 = vsub.f32 %v554_v0, %v16996_v59 }
  0xf2   : > { %917 = vmatmul.mubr.f32.vlgmr.msra.gmra.mxu1 %v16980_v62  ;;  %v24284_v62 = vld [vmem:[#allocation24_spill] sm:$0xff] }
  0xf3   : > { %12476 = vmatpush3.msra.mxu1 %v16599_v20  ;;  %922 = vmatprep.mubr.f32.mxu1 %v16996_v59  ;;  %v661_v58 = vand.u32 4294901760, %v660_v13  ;;  %v23704_v60 = vand.u32 4294901760, %v17004_v46  ;;  %v24283_v59 = vld [vmem:[#allocation22_spill] sm:$0xff] }
  0xf4   : > { %12477 = vmatprep.subr.mxu1 %v16604_v25 }
  0xf5   : > { %12478 = vmatpush3.msra.mxu1 %v16616_v30  ;;  %v662_v44 = vsub.f32 %v660_v13, %v661_v58  ;;  %v677_v37 = vsub.f32 %v17004_v46, %v23704_v60  ;;  %v684_v60 = vand.u32 4294901760, %v683_v21  ;;  %v24273_v21 = vld [vmem:[#allocation14_spill] sm:$0xff] }
  0xf6   : > { %12479 = vmatprep.subr.mxu1 %v16628_v39  ;;  %924 = vmatmul.mubr.f32.gmra.mxu1 %v16989_v63  ;;  %v24282_v63 = vld [vmem:[#allocation21_spill] sm:$0xff] }
  0xf7   : > { %12480 = vmatpush3.msra.mxu1 %v16630_v40  ;;  %1175 = vmatprep.mubr.f32.mxu1 %v661_v58  ;;  %v663_v0 = vand.u32 4294901760, %v662_v44  ;;  %v678_v22 = vand.u32 4294901760, %v677_v37  ;;  %v24274_v58 = vld [vmem:[#allocation23_spill] sm:$0xff]  ;;  %v24276_v44 = vld [vmem:[#allocation25_spill] sm:$0xff]  ;;  %v24278_v37 = vld [vmem:[#allocation26_spill] sm:$0xff] }
  0xf8   : > { %12481 = vmatprep.subr.mxu1 %v16637_v45 }
  0xf9   : > { %12482 = vmatpush3.msra.mxu1 %v16665_v1  ;;  %664 = vmatprep.mubr.f32.mxu0 %v663_v0  ;;  %v24279_v0 = vld [vmem:[#allocation17_spill] sm:$0xff] }
  0xfa   : > { %12483 = vmatprep.subr.mxu1 %v16673_v6  ;;  %670 = vmatmul.mubr.f32.vlgmr.msra.gmra.mxu0 %v669_v61  ;;  %v24277_v61 = vld [vmem:[#allocation16_spill] sm:$0xff] }
  0xfb   : > { %12438 = vmatpush3.msra.mxu0 %v16614_v29  ;;  %12484 = vmatpush3.msra.mxu1 %v16682_v11 }
  0xfc   : > { %679 = vmatprep.mubr.f32.mxu0 %v678_v22  ;;  %12439 = vmatprep.subr.mxu0 %v16621_v35  ;;  %v24280_v22 = vld [vmem:[#allocation18_spill] sm:$0xff] }
  0xfd   : > { %12485 = vmatprep.subr.mxu1 %v16688_v17  ;;  %12440 = vmatpush3.msra.mxu0 %v16626_v38 }
  0xfe   : > { %12486 = vmatpush3.msra.mxu1 %v16697_v26  ;;  %12441 = vmatprep.subr.mxu0 %v16644_v48 }
  0xff   : > { %12487 = vmatprep.subr.mxu1 %v16704_v32  ;;  %685 = vmatmul.mubr.f32.gmra.mxu0 %v684_v60  ;;  %v24275_v60 = vld [vmem:[#allocation15_spill] sm:$0xff] }
 0x100   : > { %12442 = vmatpush3.msra.mxu0 %v16647_v49  ;;  %12488 = vmatpush3.msra.mxu1 %v16706_v28 }
 0x101   : > { %12443 = vmatprep.subr.mxu0 %v16654_v54  ;;  %1059 = vmatprep.mubr.f32.mxu0 %v660_v13  ;;  %v24272_v13 = vld [vmem:[#allocation19_spill] sm:$0xff] }
 0x102   : > { %12489 = vmatprep.subr.mxu1 %v16716_v42  ;;  %12444 = vmatpush3.msra.mxu0 %v16680_v10 }
 0x103   : > { %12490 = vmatpush3.msra.mxu1 %v16748_v7  ;;  %12445 = vmatprep.subr.mxu0 %v16686_v16 }
 0x104   : > { %12491 = vmatprep.subr.mxu1 %v16770_v36  ;;  %12446 = vmatpush3.msra.mxu0 %v16695_v23 }
 0x105   : > { %12492 = vmatpush3.msra.mxu1 %v16772_v14  ;;  %12447 = vmatprep.subr.mxu0 %v16702_v31 }
 0x106   : > { %12493 = vmatprep.subr.mxu1 %v16776_v52  ;;  %12448 = vmatpush3.msra.mxu0 %v16714_v41 }
 0x107   : > { %12494 = vmatpush3.msra.mxu1 %v16778_v27  ;;  %12449 = vmatprep.subr.mxu0 %v16724_v50 }
 0x108   : > { %12495 = vmatprep.subr.mxu1 %v16786_v19  ;;  %12450 = vmatpush3.msra.mxu0 %v16727_v51 }
 0x109   : > { %12496 = vmatpush3.msra.mxu1 %v16788_v33  ;;  %12451 = vmatprep.subr.mxu0 %v16735_v57 }
 0x10a   : > { %12497 = vmatprep.subr.mxu1 %v24272_v13  ;;  %12452 = vmatpush3.msra.mxu0 %v24273_v21 }
 0x10b   : > { %12498 = vmatpush3.msra.mxu1 %v24274_v58  ;;  %12453 = vmatprep.subr.mxu0 %v24275_v60 }
 0x10c   : > { %12499 = vmatprep.subr.mxu1 %v24276_v44  ;;  %12454 = vmatpush3.msra.mxu0 %v24277_v61 }
 0x10d   : > { %12500 = vmatpush3.msra.mxu1 %v24278_v37  ;;  %12455 = vmatprep.subr.mxu0 %v24279_v0 }
 0x10e   : > { %12501 = vmatprep.subr.mxu1 %v16869_v34  ;;  %12456 = vmatpush3.msra.mxu0 %v24280_v22  ;;  %v24285_v34 = vld [vmem:[#allocation29_spill] sm:$0xff] }
 0x10f   : > { %12502 = vmatpush3.msra.mxu1 %v16871_v9  ;;  %12457 = vmatprep.subr.mxu0 %v24281_v15  ;;  %v24286_v9 = vand.u32 4294901760, %v16987_v55 }
 0x110   : > { %12503 = vmatprep.subr.mxu1 %v16879_v56  ;;  %12458 = vmatpush3.msra.mxu0 %v24282_v63  ;;  %v24287_v63 = vand.u32 4294901760, %v17004_v46 }
 0x111   : > { %12504 = vmatpush3.msra.mxu1 %v16881_v53  ;;  %12459 = vmatprep.subr.mxu0 %v24283_v59 }
 0x112   : > { %12505 = vmatprep.subr.mxu1 %v16893_v47  ;;  %12460 = vmatpush3.msra.mxu0 %v24284_v62  ;;  %v24288_v62 = vld [vmem:[#allocation30_spill] sm:$0xff] }
 0x113   : > { %12506 = vmatpush3.msra.mxu1 %v16930_v8  ;;  %12461 = vmatprep.subr.mxu0 %v24285_v34  ;;  %v24289_v34 = vld [vmem:[#allocation31_spill] sm:$0xff] }
 0x114   : > { %1179 = vmatmul.mubr.f32.vlgmr.msra.gmra.mxu1 %v24286_v9  ;;  %12551 = vmatprep.subr.mxu1 %v16597_v18  ;;  %v24290_v9 = vand.u32 4294901760, %v16999_v43  ;;  %v24291_v18 = vld [vmem:[#allocation13_spill] sm:$0xff] }
 0x115   : > { %12462 = vmatpush3.msra.mxu0 %v16877_v4  ;;  %1186 = vmatprep.mubr.f32.mxu1 %v24287_v63 }
 0x116   : > { %12552 = vmatpush3.msra.mxu1 %v16599_v20  ;;  %12463 = vmatprep.subr.mxu0 %v16888_v12  ;;  %v24292_v20 = vand.u32 4294901760, %v24291_v18  ;;  %v24315_v18 = vld [vmem:[#allocation21_spill] sm:$0xff] }
 0x117   : > { %12553 = vmatprep.subr.mxu1 %v16604_v25  ;;  %12464 = vmatpush3.msra.mxu0 %v24288_v62  ;;  %v24293_v25 = vand.u32 4294901760, %v16614_v29  ;;  %v24297_v29 = vand.u32 4294901760, %v16647_v49  ;;  %v24300_v49 = vand.u32 4294901760, %v16686_v16  ;;  %v24303_v16 = vand.u32 4294901760, %v16714_v41 }
 0x118   : > { %12554 = vmatpush3.msra.mxu1 %v16616_v30  ;;  %12465 = vmatprep.subr.mxu0 %v24289_v34  ;;  %v24294_v30 = vand.u32 4294901760, %v16621_v35 }
 0x119   : > { %1190 = vmatmul.mubr.f32.gmra.mxu1 %v24290_v9  ;;  %12555 = vmatprep.subr.mxu1 %v16628_v39  ;;  %v24295_v39 = vand.u32 4294901760, %v16626_v38  ;;  %v24298_v38 = vand.u32 4294901760, %v16654_v54 }
 0x11a   : > { %12466 = vmatpush3.msra.mxu0 %v16902_v3  ;;  %12556 = vmatpush3.msra.mxu1 %v16630_v40  ;;  %v531_v40 = vld [vmem:[#allocation4 + $0x2f8] sm:$0xff] }
 0x11b   : > { %1467 = vmatprep.mubr.f32.mxu1 %v16994_v24  ;;  %12467 = vmatprep.subr.mxu0 %v16912_v2  ;;  %v17118_v35 = vand.u32 4294901760, %v531_v40 }
 0x11c   : > { %12557 = vmatprep.subr.mxu1 %v16637_v45  ;;  %12468 = vmatpush3.msra.mxu0 %v16945_v5  ;;  %v24296_v45 = vand.u32 4294901760, %v16644_v48  ;;  %v24299_v48 = vand.u32 4294901760, %v16680_v10  ;;  %v24302_v10 = vand.u32 4294901760, %v16702_v31  ;;  %v24305_v31 = vand.u32 4294901760, %v16727_v51 }
 0x11d   : > { %12558 = vmatpush3.msra.mxu1 %v16665_v1  ;;  %1062 = vmatmul.mubr.f32.vlgmr.msra.gmra.mxu0 %v16987_v55  ;;  %v530_v1 = vld [vmem:[#allocation4 + $0x2f0] sm:$0xff]  ;;  %v17135_v54 = vsub.f32 %v531_v40, %v17118_v35  ;;  %v24308_v51 = vand.u32 4294901760, %v24275_v60 }
 0x11e   : > { %12513 = vmatprep.subr.mxu0 %v24292_v20  ;;  %12559 = vmatprep.subr.mxu1 %v16673_v6  ;;  %v529_v6 = vld [vmem:[#allocation4 + $0x2e8] sm:$0xff]  ;;  %v24316_v20 = vand.u32 4294901760, %v24315_v18  ;;  %v24330_v18 = vand.u32 4294901760, %v16945_v5 }
 0x11f   : > { %1068 = vmatprep.mubr.f32.mxu0 %v17004_v46  ;;  %12514 = vmatpush3.msra.mxu0 %v24293_v25 }
 0x120   : > { %12560 = vmatpush3.msra.mxu1 %v16682_v11  ;;  %12515 = vmatprep.subr.mxu0 %v24294_v30  ;;  %v24301_v11 = vand.u32 4294901760, %v16695_v23  ;;  %v24304_v23 = vand.u32 4294901760, %v16724_v50  ;;  %v523_v30 = vld [vmem:[#allocation4 + $0x2b8] sm:$0xff] }
 0x121   : > { %12561 = vmatprep.subr.mxu1 %v16688_v17  ;;  %12516 = vmatpush3.msra.mxu0 %v24295_v39  ;;  %v528_v17 = vld [vmem:[#allocation4 + $0x2e0] sm:$0xff] }
 0x122   : > { %12562 = vmatpush3.msra.mxu1 %v16697_v26  ;;  %1071 = vmatmul.mubr.f32.gmra.mxu0 %v16999_v43  ;;  %v17140_v26 = vand.u32 4294901760, %v529_v6  ;;  %v24310_v43 = vand.u32 4294901760, %v24279_v0 }
 0x123   : > { %12517 = vmatprep.subr.mxu0 %v24296_v45  ;;  %12563 = vmatprep.subr.mxu1 %v16704_v32  ;;  %v527_v32 = vld [vmem:[#allocation4 + $0x2d8] sm:$0xff]  ;;  %v522_v45 = vld [vmem:[#allocation4 + $0x2b0] sm:$0xff] }
 0x124   : > { %12518 = vmatpush3.msra.mxu0 %v24297_v29  ;;  %1356 = vmatprep.mubr.f32.mxu0 %v16994_v24  ;;  %v17129_v24 = vand.u32 4294901760, %v530_v1  ;;  %v17163_v41 = vsub.f32 %v529_v6, %v17140_v26  ;;  %v17165_v50 = vand.u32 4294901760, %v527_v32  ;;  %v24318_v29 = vld [vmem:[#allocation24_spill] sm:$0xff] }
 0x125   : > { %12564 = vmatpush3.msra.mxu1 %v16706_v28  ;;  %12519 = vmatprep.subr.mxu0 %v24298_v38 }
 0x126   : > { %12565 = vmatprep.subr.mxu1 %v16716_v42  ;;  %12520 = vmatpush3.msra.mxu0 %v24299_v48  ;;  %v17149_v28 = vsub.f32 %v530_v1, %v17129_v24  ;;  %v17157_v42 = vand.u32 4294901760, %v17135_v54  ;;  %v17190_v46 = vand.u32 4294901760, %v17163_v41  ;;  %v24319_v1 = vand.u32 4294901760, %v24318_v29 }
 0x127   : > { %12566 = vmatpush3.msra.mxu1 %v16748_v7  ;;  %12521 = vmatprep.subr.mxu0 %v24300_v49  ;;  %v526_v7 = vld [vmem:[#allocation4 + $0x2d0] sm:$0xff]  ;;  %v17235_v49 = vand.u32 4294901760, %v523_v30 }
 0x128   : > { %12567 = vmatprep.subr.mxu1 %v16770_v36  ;;  %12522 = vmatpush3.msra.mxu0 %v24301_v11  ;;  %v17151_v36 = vand.u32 4294901760, %v528_v17  ;;  %v1586_v55 = vsub.f32 %v17135_v54, %v17157_v42  ;;  %v17184_v63 = vand.u32 4294901760, %v526_v7  ;;  %v1600_v39 = vsub.f32 %v17163_v41, %v17190_v46  ;;  %v24322_v11 = vld [vmem:[#allocation33_spill] sm:$0xff] }
 0x129   : > { %12568 = vmatpush3.msra.mxu1 %v16772_v14  ;;  %12523 = vmatprep.subr.mxu0 %v24302_v10  ;;  %v24307_v14 = vand.u32 4294901760, %v24273_v21  ;;  %v24311_v21 = vld [vmem:[#allocation27_spill] sm:$0xff]  ;;  %v521_v10 = vld [vmem:[#allocation4 + $0x2a8] sm:$0xff] }
 0x12a   : > { %12569 = vmatprep.subr.mxu1 %v16776_v52  ;;  %12524 = vmatpush3.msra.mxu0 %v24303_v16  ;;  %v17174_v52 = vand.u32 4294901760, %v17149_v28  ;;  %v17212_v25 = vsub.f32 %v526_v7, %v17184_v63  ;;  %v24324_v16 = vld [vmem:[#allocation35_spill] sm:$0xff] }
 0x12b   : > { %12570 = vmatpush3.msra.mxu1 %v16778_v27  ;;  %12525 = vmatprep.subr.mxu0 %v24304_v23  ;;  %v24306_v27 = vand.u32 4294901760, %v16735_v57  ;;  %v17177_v57 = vsub.f32 %v528_v17, %v17151_v36  ;;  %v17241_v17 = vand.u32 4294901760, %v522_v45 }
 0x12c   : > { %12571 = vmatprep.subr.mxu1 %v16786_v19  ;;  %12526 = vmatpush3.msra.mxu0 %v24305_v31  ;;  %v525_v19 = vld [vmem:[#allocation4 + $0x2c8] sm:$0xff]  ;;  %v1593_v0 = vsub.f32 %v17149_v28, %v17174_v52 }
 0x12d   : > { %12572 = vmatpush3.msra.mxu1 %v16788_v33  ;;  %12527 = vmatprep.subr.mxu0 %v24306_v27  ;;  %v24309_v33 = vand.u32 4294901760, %v24277_v61  ;;  %v17198_v60 = vand.u32 4294901760, %v525_v19  ;;  %v24313_v61 = vld [vmem:[#allocation28_spill] sm:$0xff]  ;;  %v17206_v9 = vand.u32 4294901760, %v17177_v57  ;;  %v24325_v27 = vand.u32 4294901760, %v16888_v12 }
 0x12e   : > { %12573 = vmatprep.subr.mxu1 %v24272_v13  ;;  %12528 = vmatpush3.msra.mxu0 %v24307_v14  ;;  %v17193_v13 = vsub.f32 %v527_v32, %v17165_v50  ;;  %v1594_v48 = vand.u32 4294901760, %v1593_v0  ;;  %v1601_v32 = vand.u32 4294901760, %v1600_v39  ;;  %v520_v14 = vld [vmem:[#allocation4 + $0x2a0] sm:$0xff]  ;;  %v518_v0 = vld [vmem:[#allocation4 + $0x290] sm:$0xff] }
 0x12f   : > { %12574 = vmatpush3.msra.mxu1 %v24274_v58  ;;  %12529 = vmatprep.subr.mxu0 %v24308_v51  ;;  %v24312_v58 = vand.u32 4294901760, %v24280_v22  ;;  %v1587_v22 = vand.u32 4294901760, %v1586_v55  ;;  %v17228_v38 = vsub.f32 %v525_v19, %v17198_v60  ;;  %v1607_v6 = vsub.f32 %v17177_v57, %v17206_v9 }
 0x130   : > { %12575 = vmatprep.subr.mxu1 %v24276_v44  ;;  %12530 = vmatpush3.msra.mxu0 %v24309_v33  ;;  %v524_v44 = vld [vmem:[#allocation4 + $0x2c0] sm:$0xff]  ;;  %v17220_v40 = vand.u32 4294901760, %v17193_v13  ;;  %v17259_v19 = vsub.f32 %v523_v30, %v17235_v49  ;;  %v17261_v33 = vand.u32 4294901760, %v521_v10  ;;  %v24327_v55 = vand.u32 4294901760, %v24289_v34 }
 0x131   : > { %12576 = vmatpush3.msra.mxu1 %v24278_v37  ;;  %12531 = vmatprep.subr.mxu0 %v24310_v43  ;;  %v24314_v37 = vand.u32 4294901760, %v24281_v15  ;;  %v24317_v15 = vand.u32 4294901760, %v24283_v59  ;;  %v17254_v7 = vand.u32 4294901760, %v17228_v38  ;;  %v1608_v51 = vand.u32 4294901760, %v1607_v6 }
 0x132   : > { %12577 = vmatprep.subr.mxu1 %v24311_v21  ;;  %12532 = vmatpush3.msra.mxu0 %v24312_v58  ;;  %v1614_v23 = vsub.f32 %v17193_v13, %v17220_v40  ;;  %v17268_v43 = vsub.f32 %v522_v45, %v17241_v17  ;;  %v519_v21 = vld [vmem:[#allocation4 + $0x298] sm:$0xff]  ;;  %v24329_v34 = vand.u32 4294901760, %v16912_v2  ;;  %v17301_v45 = vand.u32 4294901760, %v518_v0 }
 0x133   : > { %12578 = vmatpush3.msra.mxu1 %v24313_v61  ;;  %12533 = vmatprep.subr.mxu0 %v24314_v37  ;;  %v17275_v61 = vand.u32 4294901760, %v520_v14  ;;  %v1628_v37 = vsub.f32 %v17228_v38, %v17254_v7 }
 0x134   : > { %12579 = vmatprep.subr.mxu1 %v16879_v56  ;;  %12534 = vmatpush3.msra.mxu0 %v24316_v20  ;;  %v17222_v56 = vand.u32 4294901760, %v524_v44  ;;  %v1615_v58 = vand.u32 4294901760, %v1614_v23  ;;  %v17287_v20 = vsub.f32 %v521_v10, %v17261_v33  ;;  %v17293_v30 = vand.u32 4294901760, %v17268_v43  ;;  %v24331_v10 = vld [vmem:[#allocation34_spill] sm:$0xff] }
 0x135   : > { %12580 = vmatpush3.msra.mxu1 %v16881_v53  ;;  %12535 = vmatprep.subr.mxu0 %v24317_v15  ;;  %v24320_v53 = vld [vmem:[#allocation29_spill] sm:$0xff]  ;;  %v517_v15 = vld [vmem:[#allocation4 + $0x288] sm:$0xff]  ;;  %v17299_v39 = vsub.f32 %v520_v14, %v17275_v61  ;;  %v1629_v29 = vand.u32 4294901760, %v1628_v37  ;;  %v482_v14 = vld [vmem:[#allocation3 + $0x40] sm:$0x1] }
 0x136   : > { %12581 = vmatprep.subr.mxu1 %v16893_v47  ;;  %12536 = vmatpush3.msra.mxu0 %v24319_v1  ;;  %v24321_v59 = vand.u32 4294901760, %v24320_v53  ;;  %v17239_v47 = vand.u32 4294901760, %v17212_v25  ;;  %v17249_v31 = vsub.f32 %v524_v44, %v17222_v56  ;;  %v516_v1 = vld [vmem:[#allocation4 + $0x280] sm:$0xff]  ;;  %v17314_v6 = vand.u32 4294901760, %v517_v15 }
 0x137   : > { %12582 = vmatpush3.msra.mxu1 %v16930_v8  ;;  %v24323_v8 = vand.u32 4294901760, %v16877_v4  ;;  %v24326_v4 = vand.u32 4294901760, %v24288_v62  ;;  %v24328_v62 = vand.u32 4294901760, %v16902_v3  ;;  %v17284_v3 = vand.u32 4294901760, %v17259_v19 }
 0x138   : > { %12537 = vmatprep.subr.mxu0 %v24321_v59  ;;  %1469 = vmatmul.mubr.f32.vlgmr.msra.gmra.mxu1 %v24322_v11  ;;  %v1621_v12 = vsub.f32 %v17212_v25, %v17239_v47  ;;  %v17273_v44 = vand.u32 4294901760, %v17249_v31  ;;  %v17309_v59 = vand.u32 4294901760, %v17287_v20  ;;  %v17326_v23 = vand.u32 4294901760, %v516_v1 }
 0x139   : > { %14748 = vmatprep.subr.mxu1 %v1587_v22  ;;  %12538 = vmatpush3.msra.mxu0 %v24323_v8  ;;  %v1642_v53 = vsub.f32 %v17259_v19, %v17284_v3 }
 0x13a   : > { %1474 = vmatprep.mubr.f32.mxu1 %v24324_v16  ;;  %14749 = vmatpush3.msra.mxu1 %v1587_v22  ;;  %v17289_v22 = vand.u32 4294901760, %v519_v21  ;;  %v1622_v2 = vand.u32 4294901760, %v1621_v12  ;;  %v1635_v5 = vsub.f32 %v17249_v31, %v17273_v44  ;;  %v17336_v12 = vsub.f32 %v517_v15, %v17314_v6 }
 0x13b   : > { %12539 = vmatprep.subr.mxu0 %v24325_v27  ;;  %14750 = vmatprep.subr.mxu1 %v1594_v48  ;;  %v479_v27 = vld [vmem:[#allocation3 + $0x10] sm:$0xfe]  ;;  %v17347_v37 = vsub.f32 %v516_v1, %v17326_v23 }
 0x13c   : > { %12540 = vmatpush3.msra.mxu0 %v24326_v4  ;;  %14751 = vmatpush3.msra.mxu1 %v1594_v48  ;;  %v17312_v48 = vsub.f32 %v519_v21, %v17289_v22  ;;  %v1636_v8 = vand.u32 4294901760, %v1635_v5  ;;  %v1643_v4 = vand.u32 4294901760, %v1642_v53  ;;  %v17354_v15 = vand.u32 4294901760, %v17336_v12  ;;  %v24332_v5 = vld [vmem:[#allocation32_spill] sm:$0xff] }
 0x13d   : > { %12541 = vmatprep.subr.mxu0 %v24327_v55  ;;  %14752 = vmatprep.subr.mxu1 %v1601_v32 }
 0x13e   : > { %12542 = vmatpush3.msra.mxu0 %v24328_v62  ;;  %14753 = vmatpush3.msra.mxu1 %v1601_v32  ;;  %v17324_v32 = vsub.f32 %v518_v0, %v17301_v45  ;;  %v17333_v55 = vand.u32 4294901760, %v17312_v48  ;;  %v548_v62 = vrot.slane %v479_v27, 1  ;;  %v555_v0 = vrot.slane %v482_v14, 1 }
 0x13f   : > { %12543 = vmatprep.subr.mxu0 %v24329_v34  ;;  %14754 = vmatprep.subr.mxu1 %v1608_v51  ;;  %v1684_v27 = vsub.f32 %v17336_v12, %v17354_v15 }
 0x140   : > { %12544 = vmatpush3.msra.mxu0 %v24330_v18  ;;  %14755 = vmatpush3.msra.mxu1 %v1608_v51  ;;  %v1656_v51 = vsub.f32 %v17287_v20, %v17309_v59  ;;  %v17344_v34 = vand.u32 4294901760, %v17324_v32 }
 0x141   : > { %1358 = vmatmul.mubr.f32.vlgmr.msra.gmra.mxu0 %v24322_v11  ;;  %14713 = vmatprep.subr.mxu0 %v17118_v35  ;;  %v1649_v11 = vsub.f32 %v17268_v43, %v17293_v30 }
 0x142   : > { %14756 = vmatprep.subr.mxu1 %v1615_v58  ;;  %1363 = vmatprep.mubr.f32.mxu0 %v24324_v16  ;;  %v17321_v16 = vand.u32 4294901760, %v17299_v39  ;;  %v1657_v18 = vand.u32 4294901760, %v1656_v51  ;;  %v1677_v53 = vsub.f32 %v17324_v32, %v17344_v34 }
 0x143   : > { %14714 = vmatpush3.msra.mxu0 %v17118_v35  ;;  %14757 = vmatpush3.msra.mxu1 %v1615_v58  ;;  %v1650_v21 = vand.u32 4294901760, %v1649_v11  ;;  %v17363_v11 = vand.u32 4294901760, %v17347_v37 }
 0x144   : > { %14715 = vmatprep.subr.mxu0 %v17129_v24  ;;  %14758 = vmatprep.subr.mxu1 %v1622_v2  ;;  %v1663_v58 = vsub.f32 %v17299_v39, %v17321_v16  ;;  %v1678_v51 = vand.u32 4294901760, %v1677_v53 }
 0x145   : > { %14716 = vmatpush3.msra.mxu0 %v17129_v24  ;;  %14759 = vmatpush3.msra.mxu1 %v1622_v2  ;;  %v1670_v2 = vsub.f32 %v17312_v48, %v17333_v55 }
 0x146   : > { %1365 = vmatmul.mubr.f32.gmra.mxu0 %v24331_v10  ;;  %14717 = vmatprep.subr.mxu0 %v17140_v26  ;;  %v1664_v1 = vand.u32 4294901760, %v1663_v58 }
 0x147   : > { %14760 = vmatprep.subr.mxu1 %v1629_v29  ;;  %14718 = vmatpush3.msra.mxu0 %v17140_v26 }
 0x148   : > { %14761 = vmatpush3.msra.mxu1 %v1629_v29  ;;  %14719 = vmatprep.subr.mxu0 %v17151_v36  ;;  %v550_v29 = vsel %vm541_vm3, %v548_v62, %v24332_v5  ;;  %v1685_v62 = vand.u32 4294901760, %v1684_v27 }
 0x149   : > { %1476 = vmatmul.mubr.f32.gmra.mxu1 %v24331_v10  ;;  %14762 = vmatprep.subr.mxu1 %v1636_v8  ;;  %v556_v10 = vsel %vm541_vm3, %v24332_v5, %v555_v0  ;;  %v17371_v14 = vand.u32 4294901760, %v550_v29 }
 0x14a   : > { %14720 = vmatpush3.msra.mxu0 %v17151_v36  ;;  %14763 = vmatpush3.msra.mxu1 %v1636_v8  ;;  %v1671_v8 = vand.u32 4294901760, %v1670_v2 }
 0x14b   : > { %14721 = vmatprep.subr.mxu0 %v17165_v50  ;;  %14764 = vmatprep.subr.mxu1 %v1643_v4  ;;  %v17382_v58 = vsub.f32 %v550_v29, %v17371_v14 }
 0x14c   : > { %14722 = vmatpush3.msra.mxu0 %v17165_v50  ;;  %14765 = vmatpush3.msra.mxu1 %v1643_v4  ;;  %v17374_v4 = vand.u32 4294901760, %v556_v10 }
 0x14d   : > { %14723 = vmatprep.subr.mxu0 %v17184_v63  ;;  %14766 = vmatprep.subr.mxu1 %v1650_v21  ;;  %v1564_v2 = vand.u32 4294901760, %v17382_v58 }
 0x14e   : > { %14724 = vmatpush3.msra.mxu0 %v17184_v63  ;;  %14767 = vmatpush3.msra.mxu1 %v1650_v21  ;;  %v1691_v21 = vsub.f32 %v17347_v37, %v17363_v11  ;;  %v17386_v0 = vsub.f32 %v556_v10, %v17374_v4 }
 0x14f   : > { %14725 = vmatprep.subr.mxu0 %v17198_v60  ;;  %14768 = vmatprep.subr.mxu1 %v1657_v18  ;;  %v1565_v29 = vsub.f32 %v17382_v58, %v1564_v2 }
 0x150   : > { %14726 = vmatpush3.msra.mxu0 %v17198_v60  ;;  %14769 = vmatpush3.msra.mxu1 %v1657_v18  ;;  %v1692_v18 = vand.u32 4294901760, %v1691_v21  ;;  %v1574_v5 = vand.u32 4294901760, %v17386_v0  ;;  %v454_v21 = vld [vmem:[#allocation4 + $0xc8] sm:$0xff] }
 0x151   : > { %14727 = vmatprep.subr.mxu0 %v17222_v56  ;;  %14770 = vmatprep.subr.mxu1 %v1664_v1  ;;  %v1566_v53 = vand.u32 4294901760, %v1565_v29  ;;  %v453_v29 = vld [vmem:[#allocation4 + $0xc0] sm:$0xff] }
 0x152   : > { %14728 = vmatpush3.msra.mxu0 %v17222_v56  ;;  %14771 = vmatpush3.msra.mxu1 %v1664_v1  ;;  %v1575_v1 = vsub.f32 %v17386_v0, %v1574_v5 }
 0x153   : > { %14729 = vmatprep.subr.mxu0 %v17235_v49  ;;  %14772 = vmatprep.subr.mxu1 %v1671_v8 }
 0x154   : > { %14730 = vmatpush3.msra.mxu0 %v17235_v49  ;;  %14773 = vmatpush3.msra.mxu1 %v1671_v8  ;;  %v1576_v10 = vand.u32 4294901760, %v1575_v1  ;;  %v439_v8 = vld [vmem:[#allocation4 + $0x50] sm:$0xff] }
 0x155   : > { %14731 = vmatprep.subr.mxu0 %v17241_v17  ;;  %14774 = vmatprep.subr.mxu1 %v1678_v51 }
 0x156   : > { %14732 = vmatpush3.msra.mxu0 %v17241_v17  ;;  %14775 = vmatpush3.msra.mxu1 %v1678_v51 }
 0x157   : > { %14733 = vmatprep.subr.mxu0 %v17261_v33  ;;  %14776 = vmatprep.subr.mxu1 %v1685_v62 }
 0x158   : > { %14734 = vmatpush3.msra.mxu0 %v17261_v33  ;;  %14777 = vmatpush3.msra.mxu1 %v1685_v62 }
 0x159   : > { %14735 = vmatprep.subr.mxu0 %v17275_v61  ;;  %14778 = vmatprep.subr.mxu1 %v1692_v18 }
 0x15a   : > { %14736 = vmatpush3.msra.mxu0 %v17275_v61  ;;  %14779 = vmatpush3.msra.mxu1 %v1692_v18 }
 0x15b   : > { %14737 = vmatprep.subr.mxu0 %v17289_v22  ;;  %14780 = vmatprep.mubr.f32.mxu1 %v17371_v14 }
 0x15c   : > { %14818 = vmatprep.subr.mxu1 %v17118_v35  ;;  %14738 = vmatpush3.msra.mxu0 %v17289_v22 }
 0x15d   : > { %14781 = vmatmul.mubr.f32.vlgmr.msra.gmra.mxu1 %v17374_v4  ;;  %14739 = vmatprep.subr.mxu0 %v17301_v45 }
 0x15e   : > { %14819 = vmatpush3.msra.mxu1 %v17118_v35  ;;  %14740 = vmatpush3.msra.mxu0 %v17301_v45 }
 0x15f   : > { %14820 = vmatprep.subr.mxu1 %v17129_v24  ;;  %14741 = vmatprep.subr.mxu0 %v17314_v6 }
 0x160   : > { %14821 = vmatpush3.msra.mxu1 %v17129_v24  ;;  %14742 = vmatpush3.msra.mxu0 %v17314_v6 }
 0x161   : > { %14822 = vmatprep.subr.mxu1 %v17140_v26  ;;  %14743 = vmatprep.subr.mxu0 %v17326_v23 }
 0x162   : > { %14823 = vmatpush3.msra.mxu1 %v17140_v26  ;;  %14744 = vmatpush3.msra.mxu0 %v17326_v23 }
 0x163   : > { %14824 = vmatprep.subr.mxu1 %v17151_v36  ;;  %14745 = vmatprep.mubr.f32.mxu0 %v1566_v53 }
 0x164   : > { %14825 = vmatpush3.msra.mxu1 %v17151_v36  ;;  %14746 = vmatmul.mubr.f32.vlgmr.msra.gmra.mxu0 %v1576_v10  ;;  %v17595_v10 = vand.u32 4294901760, %v454_v21 }
 0x165   : > { %14783 = vmatprep.subr.mxu0 %v17135_v54  ;;  %14826 = vmatprep.subr.mxu1 %v17165_v50 }
 0x166   : > { %14784 = vmatpush3.msra.mxu0 %v17135_v54  ;;  %14827 = vmatpush3.msra.mxu1 %v17165_v50  ;;  %v424_v54 = vld [vmem:[#allocation3 + $0x8] sm:$0xff] }
 0x167   : > { %14785 = vmatprep.subr.mxu0 %v17149_v28  ;;  %14828 = vmatprep.subr.mxu1 %v17184_v63 }
 0x168   : > { %14786 = vmatpush3.msra.mxu0 %v17149_v28  ;;  %14829 = vmatpush3.msra.mxu1 %v17184_v63 }
 0x169   : > { %14787 = vmatprep.subr.mxu0 %v17163_v41  ;;  %14830 = vmatprep.subr.mxu1 %v17198_v60 }
 0x16a   : > { %14788 = vmatpush3.msra.mxu0 %v17163_v41  ;;  %14831 = vmatpush3.msra.mxu1 %v17198_v60  ;;  %v443_v41 = vld [vmem:[#allocation4 + $0x70] sm:$0xff] }
 0x16b   : > { %14789 = vmatprep.subr.mxu0 %v17177_v57  ;;  %14832 = vmatprep.subr.mxu1 %v17222_v56 }
 0x16c   : > { %14790 = vmatpush3.msra.mxu0 %v17177_v57  ;;  %14833 = vmatpush3.msra.mxu1 %v17222_v56 }
 0x16d   : > { %14791 = vmatprep.subr.mxu0 %v17193_v13  ;;  %14834 = vmatprep.subr.mxu1 %v17235_v49 }
 0x16e   : > { %14792 = vmatpush3.msra.mxu0 %v17193_v13  ;;  %14835 = vmatpush3.msra.mxu1 %v17235_v49 }
 0x16f   : > { %14793 = vmatprep.subr.mxu0 %v17212_v25  ;;  %14836 = vmatprep.subr.mxu1 %v17241_v17 }
 0x170   : > { %14794 = vmatpush3.msra.mxu0 %v17212_v25  ;;  %14837 = vmatpush3.msra.mxu1 %v17241_v17  ;;  %v17518_v25 = vand.u32 4294901760, %v443_v41 }
 0x171   : > { %14795 = vmatprep.subr.mxu0 %v17228_v38  ;;  %14838 = vmatprep.subr.mxu1 %v17261_v33 }
 0x172   : > { %14796 = vmatpush3.msra.mxu0 %v17228_v38  ;;  %14839 = vmatpush3.msra.mxu1 %v17261_v33  ;;  %v441_v38 = vld [vmem:[#allocation4 + $0x60] sm:$0xff] }
 0x173   : > { %14797 = vmatprep.subr.mxu0 %v17249_v31  ;;  %14840 = vmatprep.subr.mxu1 %v17275_v61 }
 0x174   : > { %14798 = vmatpush3.msra.mxu0 %v17249_v31  ;;  %14841 = vmatpush3.msra.mxu1 %v17275_v61 }
 0x175   : > { %14799 = vmatprep.subr.mxu0 %v17259_v19  ;;  %14842 = vmatprep.subr.mxu1 %v17289_v22 }
 0x176   : > { %14800 = vmatpush3.msra.mxu0 %v17259_v19  ;;  %14843 = vmatpush3.msra.mxu1 %v17289_v22 }
 0x177   : > { %14801 = vmatprep.subr.mxu0 %v17268_v43  ;;  %14844 = vmatprep.subr.mxu1 %v17301_v45 }
 0x178   : > { %14802 = vmatpush3.msra.mxu0 %v17268_v43  ;;  %14845 = vmatpush3.msra.mxu1 %v17301_v45  ;;  %v456_v43 = vld [vmem:[#allocation4 + $0xd8] sm:$0xff] }
 0x179   : > { %14803 = vmatprep.subr.mxu0 %v17287_v20  ;;  %14846 = vmatprep.subr.mxu1 %v17314_v6 }
 0x17a   : > { %14804 = vmatpush3.msra.mxu0 %v17287_v20  ;;  %14847 = vmatpush3.msra.mxu1 %v17314_v6 }
 0x17b   : > { %14805 = vmatprep.subr.mxu0 %v17299_v39  ;;  %14848 = vmatprep.subr.mxu1 %v17326_v23 }
 0x17c   : > { %14806 = vmatpush3.msra.mxu0 %v17299_v39  ;;  %14849 = vmatpush3.msra.mxu1 %v17326_v23  ;;  %v440_v39 = vld [vmem:[#allocation4 + $0x58] sm:$0xff] }
 0x17d   : > { %14807 = vmatprep.subr.mxu0 %v17312_v48  ;;  %14850 = vmatprep.mubr.f32.mxu1 %v1564_v2  ;;  %v17565_v51 = vand.u32 4294901760, %v440_v39 }
 0x17e   : > { %14888 = vmatprep.subr.mxu1 %v17118_v35  ;;  %14808 = vmatpush3.msra.mxu0 %v17312_v48  ;;  %v17543_v48 = vsub.f32 %v443_v41, %v17518_v25 }
 0x17f   : > { %14851 = vmatmul.mubr.f32.vlgmr.msra.gmra.mxu1 %v1574_v5  ;;  %14809 = vmatprep.subr.mxu0 %v17324_v32  ;;  %v17586_v5 = vand.u32 4294901760, %v439_v8 }
 0x180   : > { %14889 = vmatpush3.msra.mxu1 %v17118_v35  ;;  %14810 = vmatpush3.msra.mxu0 %v17324_v32  ;;  %v460_v35 = vld [vmem:[#allocation4 + $0xf8] sm:$0xff]  ;;  %24335 = vst [vmem:[#allocation23_spill] sm:$0xff] %v17543_v48  ;;  %v17545_v32 = vand.u32 4294901760, %v441_v38 }
 0x181   : > { %14890 = vmatprep.subr.mxu1 %v17129_v24  ;;  %14811 = vmatprep.subr.mxu0 %v17336_v12  ;;  %v17498_v28 = vand.u32 4294901760, %v460_v35 }
 0x182   : > { %14891 = vmatpush3.msra.mxu1 %v17129_v24  ;;  %14812 = vmatpush3.msra.mxu0 %v17336_v12  ;;  %v17490_v24 = vand.u32 4294901760, %v424_v54  ;;  %v17584_v2 = vsub.f32 %v441_v38, %v17545_v32 }
 0x183   : > { %14892 = vmatprep.subr.mxu1 %v17140_v26  ;;  %14813 = vmatprep.subr.mxu0 %v17347_v37  ;;  %v17516_v13 = vsub.f32 %v460_v35, %v17498_v28  ;;  %v17606_v35 = vsub.f32 %v440_v39, %v17565_v51 }
 0x184   : > { %14893 = vmatpush3.msra.mxu1 %v17140_v26  ;;  %14814 = vmatpush3.msra.mxu0 %v17347_v37  ;;  %24333 = vst [vmem:[#allocation19_spill] sm:$0xff] %v17490_v24  ;;  %v444_v26 = vld [vmem:[#allocation4 + $0x78] sm:$0xff]  ;;  %v17503_v57 = vsub.f32 %v424_v54, %v17490_v24  ;;  %v17552_v37 = vand.u32 4294901760, %v456_v43  ;;  %24339 = vst [vmem:[#allocation26_spill] sm:$0xff] %v17584_v2  ;;  %v23721_v38 = vand.u32 4294901760, %v17584_v2 }
 0x185   : > { %14894 = vmatprep.subr.mxu1 %v17151_v36  ;;  %14815 = vmatprep.mubr.f32.mxu0 %v17382_v58  ;;  %24341 = vst [vmem:[#allocation18_spill] sm:$0xff] %v17606_v35 }
 0x186   : > { %14895 = vmatpush3.msra.mxu1 %v17151_v36  ;;  %14816 = vmatmul.mubr.f32.vlgmr.msra.gmra.mxu0 %v17386_v0  ;;  %v459_v36 = vld [vmem:[#allocation4 + $0xf0] sm:$0xff]  ;;  %v23722_v31 = vand.u32 4294901760, %v17503_v57 }
 0x187   : > { %14853 = vmatprep.subr.mxu0 %v17157_v42  ;;  %14896 = vmatprep.subr.mxu1 %v17165_v50 }
 0x188   : > { %14854 = vmatpush3.msra.mxu0 %v17157_v42  ;;  %14897 = vmatpush3.msra.mxu1 %v17165_v50  ;;  %v17507_v42 = vand.u32 4294901760, %v444_v26  ;;  %v458_v50 = vld [vmem:[#allocation4 + $0xe8] sm:$0xff] }
 0x189   : > { %14855 = vmatprep.subr.mxu0 %v17174_v52  ;;  %14898 = vmatprep.subr.mxu1 %v17184_v63 }
 0x18a   : > { %14856 = vmatpush3.msra.mxu0 %v17174_v52  ;;  %14899 = vmatpush3.msra.mxu1 %v17184_v63  ;;  %v17511_v52 = vand.u32 4294901760, %v459_v36  ;;  %v442_v63 = vld [vmem:[#allocation4 + $0x68] sm:$0xff] }
 0x18b   : > { %14857 = vmatprep.subr.mxu0 %v17190_v46  ;;  %14900 = vmatprep.subr.mxu1 %v17198_v60  ;;  %v17530_v19 = vand.u32 4294901760, %v442_v63 }
 0x18c   : > { %14858 = vmatpush3.msra.mxu0 %v17190_v46  ;;  %14901 = vmatpush3.msra.mxu1 %v17198_v60  ;;  %v457_v46 = vld [vmem:[#allocation4 + $0xe0] sm:$0xff]  ;;  %v17522_v60 = vand.u32 4294901760, %v458_v50 }
 0x18d   : > { %14859 = vmatprep.subr.mxu0 %v17206_v9  ;;  %14902 = vmatprep.subr.mxu1 %v17222_v56  ;;  %v17537_v20 = vand.u32 4294901760, %v457_v46 }
 0x18e   : > { %14860 = vmatpush3.msra.mxu0 %v17206_v9  ;;  %14903 = vmatpush3.msra.mxu1 %v17222_v56  ;;  %v17528_v9 = vsub.f32 %v444_v26, %v17507_v42  ;;  %v17535_v56 = vsub.f32 %v459_v36, %v17511_v52  ;;  %v17550_v12 = vsub.f32 %v458_v50, %v17522_v60  ;;  %v437_v36 = vld [vmem:[#allocation4 + $0x40] sm:$0xff] }
 0x18f   : > { %14861 = vmatprep.subr.mxu0 %v17220_v40  ;;  %14904 = vmatprep.subr.mxu1 %v17235_v49  ;;  %v17571_v58 = vsub.f32 %v457_v46, %v17537_v20 }
 0x190   : > { %14862 = vmatpush3.msra.mxu0 %v17220_v40  ;;  %14905 = vmatpush3.msra.mxu1 %v17235_v49  ;;  %24334 = vst [vmem:[#allocation14_spill] sm:$0xff] %v17535_v56  ;;  %v23720_v40 = vand.u32 4294901760, %v17516_v13  ;;  %v455_v49 = vld [vmem:[#allocation4 + $0xd0] sm:$0xff]  ;;  %24336 = vst [vmem:[#allocation15_spill] sm:$0xff] %v17550_v12  ;;  %v23718_v27 = vand.u32 4294901760, %v17528_v9  ;;  %v23716_v62 = vand.u32 4294901760, %v17535_v56 }
 0x191   : > { %14863 = vmatprep.subr.mxu0 %v17239_v47  ;;  %14906 = vmatprep.subr.mxu1 %v17241_v17  ;;  %24338 = vst [vmem:[#allocation16_spill] sm:$0xff] %v17571_v58  ;;  %v17573_v0 = vand.u32 4294901760, %v455_v49  ;;  %v23715_v1 = vand.u32 4294901760, %v17550_v12  ;;  %v23719_v41 = vand.u32 4294901760, %v17571_v58 }
 0x192   : > { %14864 = vmatpush3.msra.mxu0 %v17239_v47  ;;  %14907 = vmatpush3.msra.mxu1 %v17241_v17  ;;  %v17557_v47 = vsub.f32 %v17503_v57, %v23722_v31  ;;  %v17563_v17 = vsub.f32 %v442_v63, %v17530_v19  ;;  %v17580_v18 = vsub.f32 %v17516_v13, %v23720_v40  ;;  %v17621_v63 = vand.u32 4294901760, %v453_v29  ;;  %v451_v40 = vld [vmem:[#allocation4 + $0xb0] sm:$0xff] }
 0x193   : > { %14865 = vmatprep.subr.mxu0 %v17254_v7  ;;  %14908 = vmatprep.subr.mxu1 %v17261_v33  ;;  %v17602_v54 = vsub.f32 %v17528_v9, %v23718_v27  ;;  %v17619_v50 = vsub.f32 %v455_v49, %v17573_v0  ;;  %v17644_v49 = vsub.f32 %v454_v21, %v17595_v10  ;;  %v436_v27 = vld [vmem:[#allocation4 + $0x38] sm:$0xff]  ;;  %v435_v31 = vld [vmem:[#allocation4 + $0x30] sm:$0xff] }
 0x194   : > { %14866 = vmatpush3.msra.mxu0 %v17254_v7  ;;  %24337 = vst [vmem:[#allocation25_spill] sm:$0xff] %v17563_v17  ;;  %14909 = vmatpush3.msra.mxu1 %v17261_v33  ;;  %v438_v7 = vld [vmem:[#allocation4 + $0x48] sm:$0xff]  ;;  %v23714_v33 = vand.u32 4294901760, %v17543_v48  ;;  %v17704_v53 = vand.u32 4294901760, %v436_v27 }
 0x195   : > { %14867 = vmatprep.subr.mxu0 %v17273_v44  ;;  %14910 = vmatprep.subr.mxu1 %v17275_v61  ;;  %v17608_v26 = vand.u32 4294901760, %v438_v7  ;;  %24342 = vst [vmem:[#allocation20_spill] sm:$0xff] %v17619_v50  ;;  %24344 = vst [vmem:[#allocation30_spill] sm:$0xff] %v17644_v49 }
 0x196   : > { %14868 = vmatpush3.msra.mxu0 %v17273_v44  ;;  %14911 = vmatpush3.msra.mxu1 %v17275_v61  ;;  %v17592_v44 = vsub.f32 %v456_v43, %v17552_v37  ;;  %v23717_v61 = vand.u32 4294901760, %v17563_v17  ;;  %v17629_v46 = vsub.f32 %v17543_v48, %v23714_v33  ;;  %v17633_v43 = vsub.f32 %v439_v8, %v17586_v5  ;;  %v452_v33 = vld [vmem:[#allocation4 + $0xb8] sm:$0xff] }
 0x197   : > { %14869 = vmatprep.subr.mxu0 %v17284_v3  ;;  %14912 = vmatprep.subr.mxu1 %v17289_v22 }
 0x198   : > { %24340 = vst [vmem:[#allocation17_spill] sm:$0xff] %v17592_v44  ;;  %14870 = vmatpush3.msra.mxu0 %v17284_v3  ;;  %14913 = vmatpush3.msra.mxu1 %v17289_v22  ;;  %v17615_v3 = vsub.f32 %v17535_v56, %v23716_v62  ;;  %v2409_v22 = vand.u32 4294901760, %v17580_v18  ;;  %24343 = vst [vmem:[#allocation22_spill] sm:$0xff] %v17633_v43  ;;  %v23723_v39 = vand.u32 4294901760, %v17592_v44  ;;  %v17646_v18 = vand.u32 4294901760, %v437_v36 }
 0x199   : > { %14871 = vmatprep.subr.mxu0 %v17293_v30  ;;  %14914 = vmatprep.subr.mxu1 %v17301_v45  ;;  %v17654_v8 = vsub.f32 %v17563_v17, %v23717_v61  ;;  %v17658_v62 = vsub.f32 %v438_v7, %v17608_v26  ;;  %v17670_v61 = vsub.f32 %v453_v29, %v17621_v63 }
 0x19a   : > { %14872 = vmatpush3.msra.mxu0 %v17293_v30  ;;  %14915 = vmatpush3.msra.mxu1 %v17301_v45  ;;  %v17640_v30 = vsub.f32 %v17550_v12, %v23715_v1  ;;  %v2297_v45 = vand.u32 4294901760, %v17602_v54  ;;  %v23726_v1 = vand.u32 4294901760, %v17606_v35  ;;  %v2416_v21 = vand.u32 4294901760, %v17615_v3 }
 0x19b   : > { %14873 = vmatprep.subr.mxu0 %v17309_v59  ;;  %14916 = vmatprep.subr.mxu1 %v17314_v6  ;;  %24345 = vst [vmem:[#allocation31_spill] sm:$0xff] %v17658_v62  ;;  %v23727_v54 = vand.u32 4294901760, %v17619_v50  ;;  %24346 = vst [vmem:[#allocation13_spill] sm:$0xff] %v17670_v61  ;;  %v17678_v7 = vsub.f32 %v17584_v2, %v23721_v38  ;;  %v17693_v38 = vsub.f32 %v437_v36, %v17646_v18 }
 0x19c   : > { %14874 = vmatpush3.msra.mxu0 %v17309_v59  ;;  %14917 = vmatpush3.msra.mxu1 %v17314_v6  ;;  %v17666_v59 = vsub.f32 %v17571_v58, %v23719_v41  ;;  %v2304_v6 = vand.u32 4294901760, %v17629_v46  ;;  %v17681_v41 = vand.u32 4294901760, %v452_v33  ;;  %v2423_v29 = vand.u32 4294901760, %v17640_v30  ;;  %v450_v46 = vld [vmem:[#allocation4 + $0xa8] sm:$0xff] }
 0x19d   : > { %14875 = vmatprep.subr.mxu0 %v17321_v16  ;;  %14918 = vmatprep.subr.mxu1 %v17326_v23  ;;  %24347 = vst [vmem:[#allocation27_spill] sm:$0xff] %v17693_v38  ;;  %v17701_v30 = vsub.f32 %v17606_v35, %v23726_v1  ;;  %v17711_v3 = vsub.f32 %v17619_v50, %v23727_v54  ;;  %v434_v1 = vld [vmem:[#allocation4 + $0x28] sm:$0xff]  ;;  %v17726_v54 = vand.u32 4294901760, %v435_v31  ;;  %v449_v50 = vld [vmem:[#allocation4 + $0xa0] sm:$0xff]  ;;  %v24353_v35 = vand.u32 4294901760, %v17658_v62 }
 0x19e   : > { %14876 = vmatpush3.msra.mxu0 %v17321_v16  ;;  %14919 = vmatpush3.msra.mxu1 %v17326_v23  ;;  %v17689_v16 = vsub.f32 %v17592_v44, %v23723_v39  ;;  %v2311_v23 = vand.u32 4294901760, %v17654_v8  ;;  %v2430_v36 = vand.u32 4294901760, %v17666_v59  ;;  %v17714_v44 = vand.u32 4294901760, %v451_v40 }
 0x19f   : > { %14920 = vmatprep.mubr.f32.mxu1 %v17371_v14  ;;  %14877 = vmatprep.subr.mxu0 %v17333_v55  ;;  %v2318_v39 = vand.u32 4294901760, %v17678_v7  ;;  %v17724_v59 = vsub.f32 %v452_v33, %v17681_v41  ;;  %24350 = vst [vmem:[#allocation21_spill] sm:$0xff] %v17726_v54  ;;  %v24351_v8 = vand.u32 4294901760, %v17644_v49  ;;  %v2325_v33 = vand.u32 4294901760, %v17701_v30 }
 0x1a0   : > { %14921 = vmatmul.mubr.f32.vlgmr.msra.gmra.mxu1 %v17374_v4  ;;  %12735 = vmatprep.subr.mxu1 %v2409_v22  ;;  %v24348_v22 = vand.u32 4294901760, %v17633_v43  ;;  %v17758_v30 = vsub.f32 %v451_v40, %v17714_v44 }
 0x1a1   : > { %14878 = vmatpush3.msra.mxu0 %v17333_v55  ;;  %12736 = vmatpush3.msra.mxu1 %v2297_v45  ;;  %24349 = vst [vmem:[#allocation28_spill] sm:$0xff] %v17724_v59  ;;  %v2437_v45 = vand.u32 4294901760, %v17689_v16  ;;  %v17733_v7 = vsub.f32 %v17644_v49, %v24351_v8  ;;  %v17746_v16 = vsub.f32 %v436_v27, %v17704_v53  ;;  %v17748_v8 = vand.u32 4294901760, %v434_v1  ;;  %v448_v49 = vld [vmem:[#allocation4 + $0x98] sm:$0xff] }
 0x1a2   : > { %2517 = vmatprep.mubr.f32.mxu1 %v17490_v24  ;;  %v17721_v55 = vsub.f32 %v17633_v43, %v24348_v22  ;;  %14879 = vmatprep.subr.mxu0 %v17344_v34  ;;  %v17736_v22 = vand.u32 4294901760, %v450_v46  ;;  %v433_v43 = vld [vmem:[#allocation4 + $0x20] sm:$0xff]  ;;  %v2444_v24 = vand.u32 4294901760, %v17711_v3  ;;  %24357 = vst [vmem:[#allocation35_spill] sm:$0xff] %v17758_v30  ;;  %v432_v27 = vld [vmem:[#allocation4 + $0x18] sm:$0xff]  ;;  %v17766_v3 = vsub.f32 %v435_v31, %v17726_v54  ;;  %v431_v31 = vld [vmem:[#allocation4 + $0x10] sm:$0xff] }
 0x1a3   : > { %12737 = vmatprep.subr.mxu1 %v2416_v21  ;;  %14880 = vmatpush3.msra.mxu0 %v17344_v34  ;;  %v17743_v21 = vsub.f32 %v17658_v62, %v24353_v35  ;;  %24354 = vst [vmem:[#allocation29_spill] sm:$0xff] %v17746_v16  ;;  %24355 = vst [vmem:[#allocation33_spill] sm:$0xff] %v17748_v8  ;;  %v24356_v34 = vand.u32 4294901760, %v17670_v61  ;;  %v17760_v35 = vand.u32 4294901760, %v449_v50  ;;  %v17768_v2 = vand.u32 4294901760, %v433_v43 }
 0x1a4   : > { %24352 = vst [vmem:[#allocation24_spill] sm:$0xff] %v17736_v22  ;;  %12738 = vmatpush3.msra.mxu1 %v2304_v6  ;;  %14881 = vmatprep.subr.mxu0 %v17354_v15  ;;  %v2332_v62 = vand.u32 4294901760, %v17721_v55  ;;  %v2451_v40 = vand.u32 4294901760, %v17733_v7  ;;  %v17780_v55 = vand.u32 4294901760, %v448_v49  ;;  %v17787_v7 = vsub.f32 %v434_v1, %v17748_v8 }
 0x1a5   : > { %12739 = vmatprep.subr.mxu1 %v2423_v29  ;;  %v17755_v6 = vsub.f32 %v17670_v61, %v24356_v34  ;;  %24358 = vst [vmem:[#allocation34_spill] sm:$0xff] %v17760_v35  ;;  %14882 = vmatpush3.msra.mxu0 %v17354_v15  ;;  %v447_v34 = vld [vmem:[#allocation4 + $0x90] sm:$0xff]  ;;  %v24359_v61 = vand.u32 4294901760, %v17693_v38  ;;  %v2339_v29 = vand.u32 4294901760, %v17743_v21  ;;  %v17789_v58 = vand.u32 4294901760, %v432_v27  ;;  %v430_v21 = vld [vmem:[#allocation4 + $0x8] sm:$0xff] }
 0x1a6   : > { %12740 = vmatpush3.msra.mxu1 %v2311_v23  ;;  %14883 = vmatprep.subr.mxu0 %v17363_v11  ;;  %v17778_v23 = vsub.f32 %v450_v46, %v17736_v22  ;;  %24360 = vst [vmem:[#allocation32_spill] sm:$0xff] %v17780_v55  ;;  %24361 = vst [vmem:[#allocation36_spill] sm:$0xff] %v17787_v7  ;;  %v24363_v1 = vand.u32 4294901760, %v17724_v59  ;;  %v17815_v12 = vsub.f32 %v448_v49, %v17780_v55 }
 0x1a7   : > { %12741 = vmatprep.subr.mxu1 %v2430_v36  ;;  %v17775_v15 = vsub.f32 %v17693_v38, %v24359_v61  ;;  %14884 = vmatpush3.msra.mxu0 %v17363_v11  ;;  %24362 = vst [vmem:[#allocation37_spill] sm:$0xff] %v17789_v58  ;;  %v446_v61 = vld [vmem:[#allocation4 + $0x88] sm:$0xff]  ;;  %v2458_v46 = vand.u32 4294901760, %v17755_v6  ;;  %v17795_v11 = vsub.f32 %v449_v50, %v17760_v35  ;;  %v17807_v6 = vand.u32 4294901760, %v431_v31  ;;  %v445_v38 = vld [vmem:[#allocation4 + $0x80] sm:$0xff] }
 0x1a8   : > { %14885 = vmatprep.mubr.f32.mxu0 %v17371_v14  ;;  %12742 = vmatpush3.msra.mxu1 %v2318_v39  ;;  %v17797_v14 = vand.u32 4294901760, %v447_v34  ;;  %v2464_v36 = vsub.f32 %v17724_v59, %v24363_v1  ;;  %v24365_v50 = vand.u32 4294901760, %v17557_v47  ;;  %v17817_v1 = vand.u32 4294901760, %v446_v61  ;;  %v429_v39 = vld [vmem:[#allocation4] sm:$0xff] }
 0x1a9   : > { %14886 = vmatmul.mubr.f32.vlgmr.msra.gmra.mxu0 %v17374_v4  ;;  %12697 = vmatprep.subr.mxu0 %v17498_v28  ;;  %v17805_v4 = vsub.f32 %v433_v43, %v17768_v2  ;;  %v2346_v17 = vand.u32 4294901760, %v17775_v15  ;;  %v24366_v43 = vand.u32 4294901760, %v17746_v16  ;;  %v17827_v15 = vand.u32 4294901760, %v430_v21 }
 0x1aa   : > { %12743 = vmatprep.subr.mxu1 %v2437_v45  ;;  %12698 = vmatpush3.msra.mxu0 %v17507_v42  ;;  %v24367_v49 = vand.u32 4294901760, %v17758_v30  ;;  %v17835_v48 = vsub.f32 %v447_v34, %v17797_v14  ;;  %v2465_v34 = vand.u32 4294901760, %v2464_v36  ;;  %v24370_v45 = vand.u32 4294901760, %v17778_v23 }
 0x1ab   : > { %24364 = vst [vmem:[#allocation38_spill] sm:$0xff] %v17805_v4  ;;  %2266 = vmatprep.mubr.f32.mxu0 %v24365_v50  ;;  %12744 = vmatpush3.msra.mxu1 %v2325_v33  ;;  %v2352_v59 = vsub.f32 %v17746_v16, %v24366_v43  ;;  %v17825_v50 = vsub.f32 %v432_v27, %v17789_v58  ;;  %v17837_v43 = vand.u32 4294901760, %v445_v38  ;;  %v24369_v27 = vand.u32 4294901760, %v17766_v3 }
 0x1ac   : > { %12699 = vmatprep.subr.mxu0 %v17511_v52  ;;  %12745 = vmatprep.subr.mxu1 %v2444_v24  ;;  %v2471_v33 = vsub.f32 %v17758_v30, %v24367_v49  ;;  %24368 = vst [vmem:[#allocation39_spill] sm:$0xff] %v17835_v48  ;;  %v17845_v16 = vsub.f32 %v431_v31, %v17807_v6  ;;  %v17847_v49 = vand.u32 4294901760, %v429_v39 }
 0x1ad   : > { %12700 = vmatpush3.msra.mxu0 %v17518_v25  ;;  %12746 = vmatpush3.msra.mxu1 %v2332_v62  ;;  %v2359_v24 = vsub.f32 %v17766_v3, %v24369_v27  ;;  %v2478_v62 = vsub.f32 %v17778_v23, %v24370_v45  ;;  %v17855_v56 = vsub.f32 %v446_v61, %v17817_v1  ;;  %v2353_v31 = vand.u32 4294901760, %v2352_v59 }
 0x1ae   : > { %12701 = vmatprep.subr.mxu0 %v17522_v60  ;;  %12747 = vmatprep.subr.mxu1 %v2451_v40  ;;  %v24372_v27 = vand.u32 4294901760, %v17787_v7  ;;  %v17863_v36 = vsub.f32 %v430_v21, %v17827_v15  ;;  %v2472_v45 = vand.u32 4294901760, %v2471_v33  ;;  %v24374_v61 = vand.u32 4294901760, %v17795_v11 }
 0x1af   : > { %12702 = vmatpush3.msra.mxu0 %v17530_v19  ;;  %24371 = vst [vmem:[#allocation40_spill] sm:$0xff] %v17855_v56  ;;  %12748 = vmatpush3.msra.mxu1 %v2339_v29  ;;  %v17871_v59 = vsub.f32 %v445_v38, %v17837_v43  ;;  %v24376_v21 = vand.u32 4294901760, %v17805_v4  ;;  %v17879_v33 = vsub.f32 %v429_v39, %v17847_v49  ;;  %v24377_v38 = vand.u32 4294901760, %v17815_v12 }
 0x1b0   : > { %12703 = vmatprep.subr.mxu0 %v17537_v20  ;;  %v2366_v40 = vsub.f32 %v17787_v7, %v24372_v27  ;;  %24373 = vst [vmem:[#allocation41_spill] sm:$0xff] %v17863_v36  ;;  %12749 = vmatprep.subr.mxu1 %v2458_v46  ;;  %v2485_v29 = vsub.f32 %v17795_v11, %v24374_v61  ;;  %v2360_v27 = vand.u32 4294901760, %v2359_v24  ;;  %v2479_v61 = vand.u32 4294901760, %v2478_v62 }
 0x1b1   : > { %12704 = vmatpush3.msra.mxu0 %v17545_v32  ;;  %24375 = vst [vmem:[#allocation42_spill] sm:$0xff] %v17871_v59  ;;  %12750 = vmatpush3.msra.mxu1 %v2346_v17  ;;  %v2373_v46 = vsub.f32 %v17805_v4, %v24376_v21  ;;  %v2492_v17 = vsub.f32 %v17815_v12, %v24377_v38  ;;  %v24378_v21 = vand.u32 4294901760, %v17825_v50  ;;  %v24379_v4 = vand.u32 4294901760, %v17835_v48 }
 0x1b2   : > { %12705 = vmatprep.subr.mxu0 %v17552_v37  ;;  %12751 = vmatprep.subr.mxu1 %v2465_v34  ;;  %v2367_v24 = vand.u32 4294901760, %v2366_v40  ;;  %v12431_v34 = vpop.f32.mrf.mxu1  ;;  %v2486_v62 = vand.u32 4294901760, %v2485_v29  ;;  %v24380_v30 = vand.u32 4294901760, %v17845_v16  ;;  %v24381_v29 = vand.u32 4294901760, %v17855_v56 }
 0x1b3   : > { %12706 = vmatpush3.msra.mxu0 %v17565_v51  ;;  %12752 = vmatpush3.msra.mxu1 %v2353_v31  ;;  %v2380_v47 = vsub.f32 %v17825_v50, %v24378_v21  ;;  %v2499_v38 = vsub.f32 %v17835_v48, %v24379_v4  ;;  %v2374_v40 = vand.u32 4294901760, %v2373_v46  ;;  %v24382_v46 = vand.u32 4294901760, %v17863_v36  ;;  %v16278_v48 = vld [vmem:[#allocation3 + $0x18] sm:$0xff] }
 0x1b4   : > { %12707 = vmatprep.subr.mxu0 %v17573_v0  ;;  %12753 = vmatprep.subr.mxu1 %v2472_v45  ;;  %v2387_v21 = vsub.f32 %v17845_v16, %v24380_v30  ;;  %v2493_v45 = vand.u32 4294901760, %v2492_v17  ;;  %v2506_v4 = vsub.f32 %v17855_v56, %v24381_v29  ;;  %v17909_v30 = vand.u32 4294901760, %v16278_v48  ;;  %v12432_v39 = vpop.f32.mrf.mxu1 }
 0x1b5   : > { %12708 = vmatpush3.msra.mxu0 %v17586_v5  ;;  %12754 = vmatpush3.msra.mxu1 %v2360_v27  ;;  %v2381_v27 = vand.u32 4294901760, %v2380_v47  ;;  %v2394_v31 = vsub.f32 %v17863_v36, %v24382_v46  ;;  %v24384_v17 = vand.u32 4294901760, %v17871_v59 }
 0x1b6   : > { %12709 = vmatprep.subr.mxu0 %v17595_v10  ;;  %12755 = vmatprep.subr.mxu1 %v2479_v61  ;;  %24383 = vst [vmem:[#allocation43_spill] sm:$0xff] %v17909_v30  ;;  %v2500_v61 = vand.u32 4294901760, %v2499_v38  ;;  %v2388_v47 = vand.u32 4294901760, %v2387_v21  ;;  %v12434_v36 = vpop.f32.mrf.mxu1 }
 0x1b7   : > { %12710 = vmatpush3.msra.mxu0 %v17608_v26  ;;  %12756 = vmatpush3.msra.mxu1 %v2367_v24  ;;  %v2513_v29 = vsub.f32 %v17871_v59, %v24384_v17  ;;  %v24385_v24 = vand.u32 4294901760, %v17879_v33  ;;  %v2395_v38 = vand.u32 4294901760, %v2394_v31  ;;  %v17922_v17 = vsub.f32 %v16278_v48, %v17909_v30 }
 0x1b8   : > { %12711 = vmatprep.subr.mxu0 %v17621_v63  ;;  %12757 = vmatprep.subr.mxu1 %v2486_v62  ;;  %v2507_v62 = vand.u32 4294901760, %v2506_v4  ;;  %v12433_v59 = vadd.f32 %v12432_v39, %v12431_v34  ;;  %v12435_v31 = vpop.f32.mrf.mxu1 }
 0x1b9   : > { %12712 = vmatpush3.msra.mxu0 %v17646_v18  ;;  %12758 = vmatpush3.msra.mxu1 %v2374_v40  ;;  %v2401_v46 = vsub.f32 %v17879_v33, %v24385_v24  ;;  %v17924_v40 = vld [vmem:[#allocation3 + $0x20] sm:$0xff]  ;;  %v17934_v48 = vand.u32 4294901760, %v17922_v17 }
 0x1ba   : > { %12713 = vmatprep.subr.mxu0 %v17681_v41  ;;  %12759 = vmatprep.subr.mxu1 %v2493_v45  ;;  %v12393_v56 = vpop.f32.mrf.mxu0  ;;  %24386 = vst [vmem:[#allocation44_spill] sm:$0xff] %v17924_v40  ;;  %v17927_v21 = vand.u32 4294901760, %v17924_v40  ;;  %v2514_v45 = vand.u32 4294901760, %v2513_v29 }
 0x1bb   : > { %12714 = vmatpush3.msra.mxu0 %v17704_v53  ;;  %12760 = vmatpush3.msra.mxu1 %v2381_v27  ;;  %v2402_v4 = vand.u32 4294901760, %v2401_v46 }
 0x1bc   : > { %12715 = vmatprep.subr.mxu0 %v17714_v44  ;;  %24387 = vst [vmem:[#allocation45_spill] sm:$0xff] %v17927_v21  ;;  %12761 = vmatprep.subr.mxu1 %v2500_v61  ;;  %v12394_v24 = vpop.f32.mrf.mxu0  ;;  %v17938_v39 = vsub.f32 %v17924_v40, %v17927_v21 }
 0x1bd   : > { %12716 = vmatpush3.msra.mxu0 %v17726_v54  ;;  %12762 = vmatpush3.msra.mxu1 %v2388_v47  ;;  %v12395_v27 = vadd.f32 %v12394_v24, %v12393_v56  ;;  %v12436_v56 = vadd.f32 %v12435_v31, %v12434_v36  ;;  %v24392_v31 = vld [vmem:[#allocation15_spill] sm:$0xff] }
 0x1be   : > { %12717 = vmatprep.subr.mxu0 %v17736_v22  ;;  %12763 = vmatprep.subr.mxu1 %v2507_v62  ;;  %v23772_v46 = vand.u32 4294901760, %v17938_v39 }
 0x1bf   : > { %12718 = vmatpush3.msra.mxu0 %v17748_v8  ;;  %12764 = vmatpush3.msra.mxu1 %v2395_v38  ;;  %v17940_v34 = vadd.f32 %v12433_v59, %v12395_v27  ;;  %v12396_v61 = vpop.f32.mrf.mxu0  ;;  %v2270_v59 = vsub.f32 %v17922_v17, %v17934_v48  ;;  %v24391_v27 = vld [vmem:[#allocation23_spill] sm:$0xff] }
 0x1c0   : > { %12719 = vmatprep.subr.mxu0 %v17760_v35  ;;  %12765 = vmatprep.subr.mxu1 %v2514_v45  ;;  %v2279_v38 = vsub.f32 %v17938_v39, %v23772_v46  ;;  %v24389_v45 = vand.u32 4294901760, %v17503_v57  ;;  %v24401_v46 = vld [vmem:[#allocation31_spill] sm:$0xff] }
 0x1c1   : > { %12720 = vmatpush3.msra.mxu0 %v17768_v2  ;;  %12766 = vmatpush3.msra.mxu1 %v2402_v4  ;;  %v12397_v29 = vpop.f32.mrf.mxu0  ;;  %v17961_v62 = vand.u32 4294901760, %v2270_v59  ;;  %v24390_v4 = vld [vmem:[#allocation14_spill] sm:$0xff] }
 0x1c2   : > { %12721 = vmatprep.subr.mxu0 %v17780_v55  ;;  %2519 = vmatmul.mubr.f32.vlgmr.msra.gmra.mxu1 %v17909_v30  ;;  %v12398_v47 = vadd.f32 %v12397_v29, %v12396_v61  ;;  %v2280_v24 = vand.u32 4294901760, %v2279_v38  ;;  %v24393_v61 = vld [vmem:[#allocation25_spill] sm:$0xff]  ;;  %v24395_v29 = vld [vmem:[#allocation26_spill] sm:$0xff] }
 0x1c3   : > { %12811 = vmatprep.subr.mxu1 %v17498_v28  ;;  %12722 = vmatpush3.msra.mxu0 %v17789_v58  ;;  %24388 = vst [vmem:[#allocation46_spill] sm:$0xff] %v17961_v62  ;;  %v24397_v59 = vld [vmem:[#allocation18_spill] sm:$0xff] }
 0x1c4   : > { %2524 = vmatprep.mubr.f32.mxu1 %v17927_v21  ;;  %12812 = vmatpush3.msra.mxu1 %v17507_v42  ;;  %v17953_v36 = vadd.f32 %v12436_v56, %v12398_v47  ;;  %v24394_v56 = vld [vmem:[#allocation16_spill] sm:$0xff]  ;;  %v24396_v47 = vld [vmem:[#allocation17_spill] sm:$0xff]  ;;  %v24403_v21 = vld [vmem:[#allocation27_spill] sm:$0xff] }
 0x1c5   : > { %12723 = vmatprep.subr.mxu0 %v17797_v14  ;;  %12813 = vmatprep.subr.mxu1 %v17511_v52 }
 0x1c6   : > { %12724 = vmatpush3.msra.mxu0 %v17807_v6  ;;  %12814 = vmatpush3.msra.mxu1 %v17518_v25 }
 0x1c7   : > { %12725 = vmatprep.subr.mxu0 %v17817_v1  ;;  %2526 = vmatmul.mubr.f32.gmra.mxu1 %v17909_v30  ;;  %v24404_v30 = vld [vmem:[#allocation28_spill] sm:$0xff] }
 0x1c8   : > { %12815 = vmatprep.subr.mxu1 %v17522_v60  ;;  %12726 = vmatpush3.msra.mxu0 %v17827_v15 }
 0x1c9   : > { %12816 = vmatpush3.msra.mxu1 %v17530_v19  ;;  %2777 = vmatprep.mubr.f32.mxu1 %v24389_v45  ;;  %v24399_v45 = vld [vmem:[#allocation22_spill] sm:$0xff] }
 0x1ca   : > { %12727 = vmatprep.subr.mxu0 %v17837_v43  ;;  %12817 = vmatprep.subr.mxu1 %v17537_v20 }
 0x1cb   : > { %12728 = vmatpush3.msra.mxu0 %v17847_v49  ;;  %12818 = vmatpush3.msra.mxu1 %v17545_v32 }
 0x1cc   : > { %2272 = vmatmul.mubr.f32.vlgmr.msra.gmra.mxu0 %v17961_v62  ;;  %12773 = vmatprep.subr.mxu0 %v17516_v13 }
 0x1cd   : > { %12819 = vmatprep.subr.mxu1 %v17552_v37  ;;  %2281 = vmatprep.mubr.f32.mxu0 %v2280_v24  ;;  %v24400_v24 = vld [vmem:[#allocation30_spill] sm:$0xff] }
 0x1ce   : > { %12774 = vmatpush3.msra.mxu0 %v17528_v9  ;;  %12820 = vmatpush3.msra.mxu1 %v17565_v51 }
 0x1cf   : > { %12775 = vmatprep.subr.mxu0 %v24390_v4  ;;  %12821 = vmatprep.subr.mxu1 %v17573_v0 }
 0x1d0   : > { %12776 = vmatpush3.msra.mxu0 %v24391_v27  ;;  %12822 = vmatpush3.msra.mxu1 %v17586_v5 }
 0x1d1   : > { %2287 = vmatmul.mubr.f32.gmra.mxu0 %v17961_v62  ;;  %12777 = vmatprep.subr.mxu0 %v24392_v31  ;;  %v24402_v62 = vld [vmem:[#allocation13_spill] sm:$0xff] }
 0x1d2   : > { %12823 = vmatprep.subr.mxu1 %v17595_v10  ;;  %12778 = vmatpush3.msra.mxu0 %v24393_v61 }
 0x1d3   : > { %2661 = vmatprep.mubr.f32.mxu0 %v17503_v57  ;;  %12824 = vmatpush3.msra.mxu1 %v17608_v26  ;;  %v24398_v57 = vld [vmem:[#allocation20_spill] sm:$0xff] }
 0x1d4   : > { %12779 = vmatprep.subr.mxu0 %v24394_v56  ;;  %12825 = vmatprep.subr.mxu1 %v17621_v63  ;;  %v12507_v38 = vpop.f32.mrf.mxu1 }
 0x1d5   : > { %12780 = vmatpush3.msra.mxu0 %v24395_v29  ;;  %12826 = vmatpush3.msra.mxu1 %v17646_v18 }
 0x1d6   : > { %12781 = vmatprep.subr.mxu0 %v24396_v47  ;;  %12827 = vmatprep.subr.mxu1 %v17681_v41  ;;  %v12508_v40 = vpop.f32.mrf.mxu1 }
 0x1d7   : > { %12782 = vmatpush3.msra.mxu0 %v24397_v59  ;;  %12828 = vmatpush3.msra.mxu1 %v17704_v53 }
 0x1d8   : > { %12783 = vmatprep.subr.mxu0 %v24398_v57  ;;  %12829 = vmatprep.subr.mxu1 %v17714_v44 }
 0x1d9   : > { %12784 = vmatpush3.msra.mxu0 %v24399_v45  ;;  %12830 = vmatpush3.msra.mxu1 %v17726_v54 }
 0x1da   : > { %12785 = vmatprep.subr.mxu0 %v24400_v24  ;;  %12831 = vmatprep.subr.mxu1 %v17736_v22  ;;  %v24405_v24 = vld [vmem:[#allocation29_spill] sm:$0xff]  ;;  %v12510_v22 = vpop.f32.mrf.mxu1 }
 0x1db   : > { %12786 = vmatpush3.msra.mxu0 %v24401_v46  ;;  %12832 = vmatpush3.msra.mxu1 %v17748_v8  ;;  %v24406_v46 = vld [vmem:[#allocation35_spill] sm:$0xff] }
 0x1dc   : > { %12787 = vmatprep.subr.mxu0 %v24402_v62  ;;  %12833 = vmatprep.subr.mxu1 %v17760_v35  ;;  %v12509_v35 = vadd.f32 %v12508_v40, %v12507_v38 }
 0x1dd   : > { %12788 = vmatpush3.msra.mxu0 %v24403_v21  ;;  %12834 = vmatpush3.msra.mxu1 %v17768_v2  ;;  %v12469_v54 = vpop.f32.mrf.mxu0 }
 0x1de   : > { %12789 = vmatprep.subr.mxu0 %v24404_v30  ;;  %12835 = vmatprep.subr.mxu1 %v17780_v55  ;;  %v12511_v55 = vpop.f32.mrf.mxu1 }
 0x1df   : > { %12790 = vmatpush3.msra.mxu0 %v24405_v24  ;;  %12836 = vmatpush3.msra.mxu1 %v17789_v58  ;;  %v12470_v8 = vpop.f32.mrf.mxu0 }
 0x1e0   : > { %12791 = vmatprep.subr.mxu0 %v24406_v46  ;;  %12837 = vmatprep.subr.mxu1 %v17797_v14  ;;  %v12471_v21 = vadd.f32 %v12470_v8, %v12469_v54  ;;  %v24407_v54 = vld [vmem:[#allocation38_spill] sm:$0xff] }
 0x1e1   : > { %12792 = vmatpush3.msra.mxu0 %v17766_v3  ;;  %12838 = vmatpush3.msra.mxu1 %v17807_v6 }
 0x1e2   : > { %12793 = vmatprep.subr.mxu0 %v17778_v23  ;;  %12839 = vmatprep.subr.mxu1 %v17817_v1  ;;  %v1064_v24 = vadd.f32 %v12471_v21, %v17940_v34  ;;  %v12472_v58 = vpop.f32.mrf.mxu0  ;;  %v24408_v21 = vand.u32 4294901760, %v17938_v39 }
 0x1e3   : > { %12794 = vmatpush3.msra.mxu0 %v17787_v7  ;;  %12840 = vmatpush3.msra.mxu1 %v17827_v15  ;;  %v12512_v7 = vadd.f32 %v12511_v55, %v12510_v22  ;;  %v24411_v22 = vld [vmem:[#allocation41_spill] sm:$0xff]  ;;  %v24413_v55 = vld [vmem:[#allocation42_spill] sm:$0xff] }
 0x1e4   : > { %12795 = vmatprep.subr.mxu0 %v17795_v11  ;;  %12841 = vmatprep.subr.mxu1 %v17837_v43  ;;  %v18025_v8 = vadd.f32 %v12509_v35, %v1064_v24  ;;  %v12473_v40 = vpop.f32.mrf.mxu0  ;;  %v24409_v35 = vld [vmem:[#allocation39_spill] sm:$0xff]  ;;  %v24433_v24 = vand.u32 4294901760, %v24402_v62 }
 0x1e5   : > { %12796 = vmatpush3.msra.mxu0 %v24407_v54  ;;  %12842 = vmatpush3.msra.mxu1 %v17847_v49  ;;  %v12474_v38 = vadd.f32 %v12473_v40, %v12472_v58 }
 0x1e6   : > { %12797 = vmatprep.subr.mxu0 %v17815_v12  ;;  %2781 = vmatmul.mubr.f32.vlgmr.msra.gmra.mxu1 %v17934_v48 }
 0x1e7   : > { %12887 = vmatprep.subr.mxu1 %v17498_v28  ;;  %12798 = vmatpush3.msra.mxu0 %v17825_v50  ;;  %v1073_v34 = vadd.f32 %v12474_v38, %v17953_v36  ;;  %v24410_v28 = vld [vmem:[#allocation40_spill] sm:$0xff]  ;;  %v24424_v36 = vand.u32 4294901760, %v24398_v57 }
 0x1e8   : > { %2788 = vmatprep.mubr.f32.mxu1 %v24408_v21  ;;  %12888 = vmatpush3.msra.mxu1 %v17507_v42  ;;  %v24412_v42 = vld [vmem:[#allocation19_spill] sm:$0xff]  ;;  %v471_v21 = vld [vmem:[#allocation4 + $0x150] sm:$0xff] }
 0x1e9   : > { %12799 = vmatprep.subr.mxu0 %v24409_v35  ;;  %12889 = vmatprep.subr.mxu1 %v17511_v52  ;;  %v18039_v58 = vadd.f32 %v12512_v7, %v1073_v34  ;;  %v24414_v52 = vand.u32 4294901760, %v17516_v13  ;;  %v24418_v13 = vand.u32 4294901760, %v24392_v31  ;;  %v24426_v31 = vld [vmem:[#allocation21_spill] sm:$0xff]  ;;  %v24434_v34 = vld [vmem:[#allocation34_spill] sm:$0xff] }
 0x1ea   : > { %12800 = vmatpush3.msra.mxu0 %v17845_v16  ;;  %12890 = vmatpush3.msra.mxu1 %v17518_v25  ;;  %v24415_v25 = vand.u32 4294901760, %v17528_v9  ;;  %v24419_v9 = vand.u32 4294901760, %v24393_v61  ;;  %v24427_v61 = vld [vmem:[#allocation30_spill] sm:$0xff] }
 0x1eb   : > { %12801 = vmatprep.subr.mxu0 %v24410_v28  ;;  %2792 = vmatmul.mubr.f32.gmra.mxu1 %v17934_v48 }
 0x1ec   : > { %12891 = vmatprep.subr.mxu1 %v17522_v60  ;;  %12802 = vmatpush3.msra.mxu0 %v24411_v22  ;;  %v24416_v60 = vand.u32 4294901760, %v24390_v4  ;;  %v24425_v4 = vand.u32 4294901760, %v24399_v45  ;;  %v24432_v45 = vld [vmem:[#allocation33_spill] sm:$0xff] }
 0x1ed   : > { %12892 = vmatpush3.msra.mxu1 %v17530_v19  ;;  %3069 = vmatprep.mubr.f32.mxu1 %v24412_v42  ;;  %v24417_v19 = vand.u32 4294901760, %v24391_v27 }
 0x1ee   : > { %12803 = vmatprep.subr.mxu0 %v24413_v55  ;;  %12893 = vmatprep.subr.mxu1 %v17537_v20  ;;  %v476_v20 = vld [vmem:[#allocation4 + $0x178] sm:$0xff] }
 0x1ef   : > { %12804 = vmatpush3.msra.mxu0 %v17879_v33  ;;  %12894 = vmatpush3.msra.mxu1 %v17545_v32  ;;  %v18073_v32 = vand.u32 4294901760, %v476_v20 }
 0x1f0   : > { %2664 = vmatmul.mubr.f32.vlgmr.msra.gmra.mxu0 %v17922_v17  ;;  %12849 = vmatprep.subr.mxu0 %v24414_v52 }
 0x1f1   : > { %12895 = vmatprep.subr.mxu1 %v17552_v37  ;;  %2670 = vmatprep.mubr.f32.mxu0 %v17938_v39  ;;  %v475_v37 = vld [vmem:[#allocation4 + $0x170] sm:$0xff]  ;;  %v18090_v39 = vsub.f32 %v476_v20, %v18073_v32 }
 0x1f2   : > { %12850 = vmatpush3.msra.mxu0 %v24415_v25  ;;  %12896 = vmatpush3.msra.mxu1 %v17565_v51  ;;  %v24420_v51 = vand.u32 4294901760, %v24394_v56  ;;  %v18084_v7 = vand.u32 4294901760, %v475_v37  ;;  %v24428_v56 = vand.u32 4294901760, %v24427_v61  ;;  %v24443_v61 = vand.u32 4294901760, %v17766_v3  ;;  %v24445_v3 = vld [vmem:[#allocation36_spill] sm:$0xff] }
 0x1f3   : > { %12851 = vmatprep.subr.mxu0 %v24416_v60  ;;  %12897 = vmatprep.subr.mxu1 %v17573_v0  ;;  %v24421_v0 = vand.u32 4294901760, %v24395_v29 }
 0x1f4   : > { %12852 = vmatpush3.msra.mxu0 %v24417_v19  ;;  %12898 = vmatpush3.msra.mxu1 %v17586_v5  ;;  %v474_v5 = vld [vmem:[#allocation4 + $0x168] sm:$0xff]  ;;  %v18104_v29 = vsub.f32 %v475_v37, %v18084_v7  ;;  %v24437_v19 = vand.u32 4294901760, %v24404_v30  ;;  %v24439_v37 = vld [vmem:[#allocation29_spill] sm:$0xff] }
 0x1f5   : > { %2673 = vmatmul.mubr.f32.gmra.mxu0 %v17922_v17  ;;  %12853 = vmatprep.subr.mxu0 %v24418_v13  ;;  %v470_v13 = vld [vmem:[#allocation4 + $0x148] sm:$0xff]  ;;  %v24441_v30 = vld [vmem:[#allocation37_spill] sm:$0xff] }
 0x1f6   : > { %12899 = vmatprep.subr.mxu1 %v17595_v10  ;;  %12854 = vmatpush3.msra.mxu0 %v24419_v9  ;;  %v24422_v10 = vand.u32 4294901760, %v24396_v47  ;;  %v24429_v47 = vld [vmem:[#allocation24_spill] sm:$0xff]  ;;  %v18129_v62 = vand.u32 4294901760, %v18104_v29 }
 0x1f7   : > { %2958 = vmatprep.mubr.f32.mxu0 %v24412_v42  ;;  %12900 = vmatpush3.msra.mxu1 %v17608_v26  ;;  %v24423_v26 = vand.u32 4294901760, %v24397_v59  ;;  %v24430_v59 = vld [vmem:[#allocation31_spill] sm:$0xff]  ;;  %v24438_v9 = vld [vmem:[#allocation32_spill] sm:$0xff] }
 0x1f8   : > { %12855 = vmatprep.subr.mxu0 %v24420_v51  ;;  %12901 = vmatprep.subr.mxu1 %v17621_v63  ;;  %v473_v63 = vld [vmem:[#allocation4 + $0x160] sm:$0xff]  ;;  %v12583_v27 = vpop.f32.mrf.mxu1  ;;  %v24431_v57 = vand.u32 4294901760, %v24430_v59  ;;  %v24440_v51 = vand.u32 4294901760, %v24439_v37 }
 0x1f9   : > { %12856 = vmatpush3.msra.mxu0 %v24421_v0  ;;  %12902 = vmatpush3.msra.mxu1 %v17646_v18  ;;  %v18095_v18 = vand.u32 4294901760, %v474_v5  ;;  %v24435_v42 = vld [vmem:[#allocation27_spill] sm:$0xff] }
 0x1fa   : > { %12857 = vmatprep.subr.mxu0 %v24422_v10  ;;  %12903 = vmatprep.subr.mxu1 %v17681_v41  ;;  %v472_v41 = vld [vmem:[#allocation4 + $0x158] sm:$0xff]  ;;  %v24436_v52 = vand.u32 4294901760, %v24435_v42  ;;  %v12584_v60 = vpop.f32.mrf.mxu1  ;;  %v24442_v10 = vand.u32 4294901760, %v24406_v46  ;;  %v24444_v46 = vand.u32 4294901760, %v17778_v23 }
 0x1fb   : > { %12858 = vmatpush3.msra.mxu0 %v24423_v26  ;;  %12904 = vmatpush3.msra.mxu1 %v17704_v53  ;;  %v18106_v53 = vand.u32 4294901760, %v473_v63  ;;  %v18118_v40 = vsub.f32 %v474_v5, %v18095_v18  ;;  %v18120_v38 = vand.u32 4294901760, %v472_v41 }
 0x1fc   : > { %12859 = vmatprep.subr.mxu0 %v24424_v36  ;;  %12905 = vmatprep.subr.mxu1 %v17714_v44  ;;  %v18112_v44 = vand.u32 4294901760, %v18090_v39 }
 0x1fd   : > { %12860 = vmatpush3.msra.mxu0 %v24425_v4  ;;  %12906 = vmatpush3.msra.mxu1 %v24426_v31  ;;  %v18132_v20 = vsub.f32 %v473_v63, %v18106_v53  ;;  %v18145_v26 = vand.u32 4294901760, %v18118_v40  ;;  %v18148_v63 = vsub.f32 %v472_v41, %v18120_v38  ;;  %v12585_v4 = vadd.f32 %v12584_v60, %v12583_v27  ;;  %v469_v31 = vld [vmem:[#allocation4 + $0x140] sm:$0xff] }
 0x1fe   : > { %12861 = vmatprep.subr.mxu0 %v24428_v56  ;;  %12907 = vmatprep.subr.mxu1 %v24429_v47  ;;  %v3188_v0 = vsub.f32 %v18090_v39, %v18112_v44  ;;  %v18153_v56 = vand.u32 4294901760, %v470_v13  ;;  %v3195_v47 = vsub.f32 %v18104_v29, %v18129_v62  ;;  %v18170_v23 = vand.u32 4294901760, %v469_v31 }
 0x1ff   : > { %12862 = vmatpush3.msra.mxu0 %v24431_v57  ;;  %12908 = vmatpush3.msra.mxu1 %v24432_v45  ;;  %v18161_v41 = vand.u32 4294901760, %v18132_v20  ;;  %v468_v45 = vld [vmem:[#allocation4 + $0x138] sm:$0xff]  ;;  %v24449_v60 = vand.u32 4294901760, %v17815_v12  ;;  %v466_v12 = vld [vmem:[#allocation4 + $0x128] sm:$0xff] }
 0x200   : > { %12863 = vmatprep.subr.mxu0 %v24433_v24  ;;  %12909 = vmatprep.subr.mxu1 %v24434_v34  ;;  %v3189_v57 = vand.u32 4294901760, %v3188_v0  ;;  %v24447_v24 = vand.u32 4294901760, %v17795_v11  ;;  %v18193_v37 = vand.u32 4294901760, %v468_v45  ;;  %v24451_v0 = vand.u32 4294901760, %v17825_v50 }
 0x201   : > { %12864 = vmatpush3.msra.mxu0 %v24436_v52  ;;  %v12545_v25 = vpop.f32.mrf.mxu0  ;;  %12910 = vmatpush3.msra.mxu1 %v17768_v2  ;;  %v18139_v2 = vand.u32 4294901760, %v471_v21  ;;  %v18186_v52 = vsub.f32 %v470_v13, %v18153_v56  ;;  %v24454_v50 = vand.u32 4294901760, %v17845_v16  ;;  %v464_v16 = vld [vmem:[#allocation4 + $0x118] sm:$0xff] }
 0x202   : > { %12865 = vmatprep.subr.mxu0 %v24437_v19  ;;  %12911 = vmatprep.subr.mxu1 %v24438_v9  ;;  %v3196_v19 = vand.u32 4294901760, %v3195_v47  ;;  %v3209_v9 = vsub.f32 %v18132_v20, %v18161_v41  ;;  %v18218_v47 = vsub.f32 %v468_v45, %v18193_v37 }
 0x203   : > { %12866 = vmatpush3.msra.mxu0 %v24440_v51  ;;  %v12546_v5 = vpop.f32.mrf.mxu0  ;;  %12912 = vmatpush3.msra.mxu1 %v24441_v30  ;;  %v18201_v51 = vsub.f32 %v469_v31, %v18170_v23  ;;  %v18213_v31 = vand.u32 4294901760, %v18186_v52 }
 0x204   : > { %12867 = vmatprep.subr.mxu0 %v24442_v10  ;;  %v12547_v36 = vadd.f32 %v12546_v5, %v12545_v25  ;;  %12913 = vmatprep.subr.mxu1 %v17797_v14  ;;  %v24446_v14 = vand.u32 4294901760, %v24445_v3  ;;  %v467_v25 = vld [vmem:[#allocation4 + $0x130] sm:$0xff] }
 0x205   : > { %12868 = vmatpush3.msra.mxu0 %v24443_v61  ;;  %12914 = vmatpush3.msra.mxu1 %v17807_v6  ;;  %v18168_v6 = vsub.f32 %v471_v21, %v18139_v2  ;;  %v24448_v21 = vand.u32 4294901760, %v24407_v54  ;;  %v24452_v5 = vld [vmem:[#allocation45_spill] sm:$0xff]  ;;  %v465_v61 = vld [vmem:[#allocation4 + $0x120] sm:$0xff] }
 0x206   : > { %12869 = vmatprep.subr.mxu0 %v24444_v46  ;;  %v1360_v27 = vadd.f32 %v12547_v36, %v18025_v8  ;;  %v12548_v59 = vpop.f32.mrf.mxu0  ;;  %12915 = vmatprep.subr.mxu1 %v17817_v1  ;;  %v3202_v8 = vsub.f32 %v18118_v40, %v18145_v26  ;;  %v18178_v1 = vand.u32 4294901760, %v18148_v63  ;;  %v3210_v46 = vand.u32 4294901760, %v3209_v9 }
 0x207   : > { %12870 = vmatpush3.msra.mxu0 %v24446_v14  ;;  %12916 = vmatpush3.msra.mxu1 %v17827_v15  ;;  %v18197_v54 = vand.u32 4294901760, %v18168_v6  ;;  %v18229_v14 = vand.u32 4294901760, %v18201_v51 }
 0x208   : > { %12871 = vmatprep.subr.mxu0 %v24447_v24  ;;  %v12549_v34 = vpop.f32.mrf.mxu0  ;;  %v18180_v42 = vadd.f32 %v12585_v4, %v1360_v27  ;;  %12917 = vmatprep.subr.mxu1 %v17837_v43  ;;  %v24450_v43 = vld [vmem:[#allocation43_spill] sm:$0xff]  ;;  %v3203_v30 = vand.u32 4294901760, %v3202_v8  ;;  %v3216_v10 = vsub.f32 %v18148_v63, %v18178_v1  ;;  %v18208_v4 = vand.u32 4294901760, %v467_v25 }
 0x209   : > { %12872 = vmatpush3.msra.mxu0 %v24448_v21  ;;  %v12550_v15 = vadd.f32 %v12549_v34, %v12548_v59  ;;  %v12586_v11 = vpop.f32.mrf.mxu1  ;;  %12918 = vmatpush3.msra.mxu1 %v17847_v49  ;;  %v18220_v27 = vand.u32 4294901760, %v466_v12  ;;  %v3223_v3 = vsub.f32 %v18168_v6, %v18197_v54  ;;  %v18236_v8 = vand.u32 4294901760, %v465_v61  ;;  %v463_v21 = vld [vmem:[#allocation4 + $0x110] sm:$0xff] }
 0x20a   : > { %12873 = vmatprep.subr.mxu0 %v24449_v60  ;;  %3071 = vmatmul.mubr.f32.vlgmr.msra.gmra.mxu1 %v24450_v43  ;;  %v3217_v45 = vand.u32 4294901760, %v3216_v10  ;;  %v18234_v24 = vsub.f32 %v467_v25, %v18208_v4  ;;  %v3230_v34 = vsub.f32 %v18186_v52, %v18213_v31  ;;  %v18250_v25 = vand.u32 4294901760, %v464_v16 }
 0x20b   : > { %14958 = vmatprep.subr.mxu1 %v3189_v57  ;;  %v1367_v13 = vadd.f32 %v12550_v15, %v18039_v58  ;;  %v12587_v49 = vpop.f32.mrf.mxu1  ;;  %12874 = vmatpush3.msra.mxu0 %v24451_v0  ;;  %v24453_v58 = vand.u32 4294901760, %v24409_v35  ;;  %v24455_v35 = vand.u32 4294901760, %v24410_v28  ;;  %v24457_v28 = vand.u32 4294901760, %v24413_v55 }
 0x20c   : > { %3076 = vmatprep.mubr.f32.mxu1 %v24452_v5  ;;  %v12588_v36 = vadd.f32 %v12587_v49, %v12586_v11  ;;  %14959 = vmatpush3.msra.mxu1 %v3189_v57  ;;  %v24456_v57 = vand.u32 4294901760, %v24411_v22  ;;  %v24458_v15 = vand.u32 4294901760, %v17879_v33  ;;  %v18245_v22 = vand.u32 4294901760, %v18218_v47 }
 0x20d   : > { %12875 = vmatprep.subr.mxu0 %v24453_v58  ;;  %14960 = vmatprep.subr.mxu1 %v3196_v19  ;;  %v18248_v11 = vsub.f32 %v466_v12, %v18220_v27  ;;  %v3224_v55 = vand.u32 4294901760, %v3223_v3  ;;  %v3237_v60 = vsub.f32 %v18201_v51, %v18229_v14  ;;  %v18257_v33 = vand.u32 4294901760, %v18234_v24  ;;  %v461_v12 = vld [vmem:[#allocation4 + $0x100] sm:$0xff] }
 0x20e   : > { %12876 = vmatpush3.msra.mxu0 %v24454_v50  ;;  %v18222_v59 = vadd.f32 %v12588_v36, %v1367_v13  ;;  %14961 = vmatpush3.msra.mxu1 %v3196_v19  ;;  %v462_v19 = vld [vmem:[#allocation4 + $0x108] sm:$0xff]  ;;  %v18260_v9 = vsub.f32 %v465_v61, %v18236_v8  ;;  %v18262_v13 = vand.u32 4294901760, %v463_v21  ;;  %v3231_v49 = vand.u32 4294901760, %v3230_v34 }
 0x20f   : > { %12877 = vmatprep.subr.mxu0 %v24455_v35  ;;  %14962 = vmatprep.subr.mxu1 %v3203_v30  ;;  %v3244_v0 = vsub.f32 %v18218_v47, %v18245_v22  ;;  %v18273_v10 = vsub.f32 %v464_v16, %v18250_v25  ;;  %v18275_v36 = vand.u32 4294901760, %v462_v19  ;;  %v3251_v58 = vsub.f32 %v18234_v24, %v18257_v33 }
 0x210   : > { %12878 = vmatpush3.msra.mxu0 %v24456_v57  ;;  %14963 = vmatpush3.msra.mxu1 %v3203_v30  ;;  %v18270_v30 = vand.u32 4294901760, %v18248_v11  ;;  %v18282_v61 = vand.u32 4294901760, %v18260_v9  ;;  %v18285_v50 = vsub.f32 %v463_v21, %v18262_v13 }
 0x211   : > { %12879 = vmatprep.subr.mxu0 %v24457_v28  ;;  %14964 = vmatprep.subr.mxu1 %v3210_v46  ;;  %v3245_v35 = vand.u32 4294901760, %v3244_v0  ;;  %v18294_v16 = vand.u32 4294901760, %v18273_v10  ;;  %v18297_v57 = vsub.f32 %v462_v19, %v18275_v36 }
 0x212   : > { %12880 = vmatpush3.msra.mxu0 %v24458_v15  ;;  %14965 = vmatpush3.msra.mxu1 %v3210_v46  ;;  %v18287_v46 = vand.u32 4294901760, %v461_v12  ;;  %v3258_v3 = vsub.f32 %v18248_v11, %v18270_v30  ;;  %v3265_v28 = vsub.f32 %v18260_v9, %v18282_v61  ;;  %v18305_v34 = vand.u32 4294901760, %v18285_v50 }
 0x213   : > { %2960 = vmatmul.mubr.f32.vlgmr.msra.gmra.mxu0 %v24450_v43  ;;  %14923 = vmatprep.subr.mxu0 %v18073_v32 }
 0x214   : > { %14966 = vmatprep.subr.mxu1 %v3217_v45  ;;  %2965 = vmatprep.mubr.f32.mxu0 %v24452_v5  ;;  %v3238_v5 = vand.u32 4294901760, %v3237_v60  ;;  %v18308_v21 = vsub.f32 %v461_v12, %v18287_v46  ;;  %v3259_v15 = vand.u32 4294901760, %v3258_v3  ;;  %v18315_v60 = vand.u32 4294901760, %v18297_v57 }
 0x215   : > { %14924 = vmatpush3.msra.mxu0 %v18073_v32  ;;  %14967 = vmatpush3.msra.mxu1 %v3217_v45  ;;  %v3252_v45 = vand.u32 4294901760, %v3251_v58  ;;  %v3266_v19 = vand.u32 4294901760, %v3265_v28 }
 0x216   : > { %14925 = vmatprep.subr.mxu0 %v18084_v7  ;;  %14968 = vmatprep.subr.mxu1 %v3224_v55  ;;  %v18322_v12 = vand.u32 4294901760, %v18308_v21 }
 0x217   : > { %14926 = vmatpush3.msra.mxu0 %v18084_v7  ;;  %14969 = vmatpush3.msra.mxu1 %v3224_v55  ;;  %v3272_v55 = vsub.f32 %v18273_v10, %v18294_v16 }
 0x218   : > { %2967 = vmatmul.mubr.f32.gmra.mxu0 %v24450_v43  ;;  %14927 = vmatprep.subr.mxu0 %v18095_v18 }
 0x219   : > { %14970 = vmatprep.subr.mxu1 %v3231_v49  ;;  %14928 = vmatpush3.msra.mxu0 %v18095_v18  ;;  %v3273_v0 = vand.u32 4294901760, %v3272_v55 }
 0x21a   : > { %14971 = vmatpush3.msra.mxu1 %v3231_v49  ;;  %14929 = vmatprep.subr.mxu0 %v18106_v53  ;;  %v3279_v49 = vsub.f32 %v18285_v50, %v18305_v34 }
 0x21b   : > { %3078 = vmatmul.mubr.f32.gmra.mxu1 %v24450_v43  ;;  %14972 = vmatprep.subr.mxu1 %v3238_v5 }
 0x21c   : > { %14930 = vmatpush3.msra.mxu0 %v18106_v53  ;;  %14973 = vmatpush3.msra.mxu1 %v3238_v5  ;;  %v3286_v5 = vsub.f32 %v18297_v57, %v18315_v60  ;;  %v3280_v58 = vand.u32 4294901760, %v3279_v49 }
 0x21d   : > { %14931 = vmatprep.subr.mxu0 %v18120_v38  ;;  %14974 = vmatprep.subr.mxu1 %v3245_v35 }
 0x21e   : > { %14932 = vmatpush3.msra.mxu0 %v18120_v38  ;;  %14975 = vmatpush3.msra.mxu1 %v3245_v35  ;;  %v3293_v35 = vsub.f32 %v18308_v21, %v18322_v12  ;;  %v3287_v28 = vand.u32 4294901760, %v3286_v5 }
 0x21f   : > { %14933 = vmatprep.subr.mxu0 %v18139_v2  ;;  %14976 = vmatprep.subr.mxu1 %v3252_v45 }
 0x220   : > { %14934 = vmatpush3.msra.mxu0 %v18139_v2  ;;  %14977 = vmatpush3.msra.mxu1 %v3252_v45  ;;  %v14782_v45 = vpop.f32.mrf.mxu1  ;;  %v3294_v55 = vand.u32 4294901760, %v3293_v35 }
 0x221   : > { %14935 = vmatprep.subr.mxu0 %v18153_v56  ;;  %14978 = vmatprep.subr.mxu1 %v3259_v15 }
 0x222   : > { %14936 = vmatpush3.msra.mxu0 %v18153_v56  ;;  %14979 = vmatpush3.msra.mxu1 %v3259_v15 }
 0x223   : > { %14937 = vmatprep.subr.mxu0 %v18170_v23  ;;  %14980 = vmatprep.subr.mxu1 %v3266_v19 }
 0x224   : > { %14938 = vmatpush3.msra.mxu0 %v18170_v23  ;;  %14981 = vmatpush3.msra.mxu1 %v3266_v19  ;;  %v14747_v3 = vpop.f32.mrf.mxu0 }
 0x225   : > { %14939 = vmatprep.subr.mxu0 %v18193_v37  ;;  %14982 = vmatprep.subr.mxu1 %v3273_v0  ;;  %v1579_v15 = vadd.f32 %v14747_v3, %v18222_v59  ;;  %v24459_v59 = vld [vmem:[#allocation46_spill] sm:$0xff]  ;;  %v3787_v3 = vld [vmem:[#allocation4 + $0x368] sm:$0xff] }
 0x226   : > { %14940 = vmatpush3.msra.mxu0 %v18193_v37  ;;  %14983 = vmatpush3.msra.mxu1 %v3273_v0 }
 0x227   : > { %14941 = vmatprep.subr.mxu0 %v18208_v4  ;;  %14984 = vmatprep.subr.mxu1 %v3280_v58  ;;  %v18337_v49 = vadd.f32 %v14782_v45, %v1579_v15  ;;  %v3802_v45 = vld [vmem:[#allocation4 + $0x3e0] sm:$0xff] }
 0x228   : > { %14942 = vmatpush3.msra.mxu0 %v18208_v4  ;;  %14985 = vmatpush3.msra.mxu1 %v3280_v58 }
 0x229   : > { %14943 = vmatprep.subr.mxu0 %v18220_v27  ;;  %14986 = vmatprep.subr.mxu1 %v3287_v28 }
 0x22a   : > { %14944 = vmatpush3.msra.mxu0 %v18220_v27  ;;  %14987 = vmatpush3.msra.mxu1 %v3287_v28 }
 0x22b   : > { %14945 = vmatprep.subr.mxu0 %v18236_v8  ;;  %14988 = vmatprep.subr.mxu1 %v3294_v55 }
 0x22c   : > { %14946 = vmatpush3.msra.mxu0 %v18236_v8  ;;  %14989 = vmatpush3.msra.mxu1 %v3294_v55  ;;  %v3786_v55 = vld [vmem:[#allocation4 + $0x360] sm:$0xff] }
 0x22d   : > { %14947 = vmatprep.subr.mxu0 %v18250_v25  ;;  %14990 = vmatprep.mubr.f32.mxu1 %v24450_v43 }
 0x22e   : > { %15028 = vmatprep.subr.mxu1 %v18073_v32  ;;  %14948 = vmatpush3.msra.mxu0 %v18250_v25 }
 0x22f   : > { %14991 = vmatmul.mubr.f32.vlgmr.msra.gmra.mxu1 %v24450_v43  ;;  %14949 = vmatprep.subr.mxu0 %v18262_v13 }
 0x230   : > { %15029 = vmatpush3.msra.mxu1 %v18073_v32  ;;  %14950 = vmatpush3.msra.mxu0 %v18262_v13 }
 0x231   : > { %15030 = vmatprep.subr.mxu1 %v18084_v7  ;;  %14951 = vmatprep.subr.mxu0 %v18275_v36 }
 0x232   : > { %15031 = vmatpush3.msra.mxu1 %v18084_v7  ;;  %14952 = vmatpush3.msra.mxu0 %v18275_v36 }
 0x233   : > { %15032 = vmatprep.subr.mxu1 %v18095_v18  ;;  %14953 = vmatprep.subr.mxu0 %v18287_v46 }
 0x234   : > { %15033 = vmatpush3.msra.mxu1 %v18095_v18  ;;  %14954 = vmatpush3.msra.mxu0 %v18287_v46 }
 0x235   : > { %15034 = vmatprep.subr.mxu1 %v18106_v53  ;;  %14955 = vmatprep.mubr.f32.mxu0 %v24459_v59 }
 0x236   : > { %15035 = vmatpush3.msra.mxu1 %v18106_v53  ;;  %14956 = vmatmul.mubr.f32.vlgmr.msra.gmra.mxu0 %v24459_v59  ;;  %v3801_v59 = vld [vmem:[#allocation4 + $0x3d8] sm:$0xff] }
 0x237   : > { %14993 = vmatprep.subr.mxu0 %v18090_v39  ;;  %15036 = vmatprep.subr.mxu1 %v18120_v38 }
 0x238   : > { %14994 = vmatpush3.msra.mxu0 %v18090_v39  ;;  %15037 = vmatpush3.msra.mxu1 %v18120_v38  ;;  %v1568_v39 = vpop.f32.mrf.mxu0 }
 0x239   : > { %14995 = vmatprep.subr.mxu0 %v18104_v29  ;;  %15038 = vmatprep.subr.mxu1 %v18139_v2 }
 0x23a   : > { %14996 = vmatpush3.msra.mxu0 %v18104_v29  ;;  %15039 = vmatpush3.msra.mxu1 %v18139_v2  ;;  %v1729_v29 = vpop.f32.mrf.mxu1 }
 0x23b   : > { %14997 = vmatprep.subr.mxu0 %v18118_v40  ;;  %15040 = vmatprep.subr.mxu1 %v18153_v56 }
 0x23c   : > { %14998 = vmatpush3.msra.mxu0 %v18118_v40  ;;  %15041 = vmatpush3.msra.mxu1 %v18153_v56  ;;  %v1569_v40 = vadd.f32 %v1568_v39, %v18180_v42  ;;  %v18497_v39 = vand.u32 4294901760, %v3786_v55 }
 0x23d   : > { %14999 = vmatprep.subr.mxu0 %v18132_v20  ;;  %15042 = vmatprep.subr.mxu1 %v18170_v23 }
 0x23e   : > { %15000 = vmatpush3.msra.mxu0 %v18132_v20  ;;  %15043 = vmatpush3.msra.mxu1 %v18170_v23 }
 0x23f   : > { %15001 = vmatprep.subr.mxu0 %v18148_v63  ;;  %15044 = vmatprep.subr.mxu1 %v18193_v37  ;;  %v14852_v20 = vpop.f32.mrf.mxu1 }
 0x240   : > { %15002 = vmatpush3.msra.mxu0 %v18148_v63  ;;  %15045 = vmatpush3.msra.mxu1 %v18193_v37 }
 0x241   : > { %15003 = vmatprep.subr.mxu0 %v18168_v6  ;;  %15046 = vmatprep.subr.mxu1 %v18208_v4  ;;  %v1935_v19 = vpop.f32.mrf.mxu1 }
 0x242   : > { %15004 = vmatpush3.msra.mxu0 %v18168_v6  ;;  %15047 = vmatpush3.msra.mxu1 %v18208_v4  ;;  %v1730_v6 = vadd.f32 %v1729_v29, %v1569_v40  ;;  %v3785_v40 = vld [vmem:[#allocation4 + $0x358] sm:$0xff] }
 0x243   : > { %15005 = vmatprep.subr.mxu0 %v18186_v52  ;;  %15048 = vmatprep.subr.mxu1 %v18220_v27 }
 0x244   : > { %15006 = vmatpush3.msra.mxu0 %v18186_v52  ;;  %15049 = vmatpush3.msra.mxu1 %v18220_v27 }
 0x245   : > { %15007 = vmatprep.subr.mxu0 %v18201_v51  ;;  %15050 = vmatprep.subr.mxu1 %v18236_v8 }
 0x246   : > { %15008 = vmatpush3.msra.mxu0 %v18201_v51  ;;  %15051 = vmatpush3.msra.mxu1 %v18236_v8  ;;  %v14817_v63 = vpop.f32.mrf.mxu0 }
 0x247   : > { %15009 = vmatprep.subr.mxu0 %v18218_v47  ;;  %15052 = vmatprep.subr.mxu1 %v18250_v25  ;;  %v1847_v42 = vadd.f32 %v14817_v63, %v18337_v49  ;;  %v18488_v49 = vand.u32 4294901760, %v3787_v3  ;;  %v3800_v63 = vld [vmem:[#allocation4 + $0x3d0] sm:$0xff] }
 0x248   : > { %15010 = vmatpush3.msra.mxu0 %v18218_v47  ;;  %15053 = vmatpush3.msra.mxu1 %v18250_v25  ;;  %v1839_v52 = vpop.f32.mrf.mxu0 }
 0x249   : > { %15011 = vmatprep.subr.mxu0 %v18234_v24  ;;  %15054 = vmatprep.subr.mxu1 %v18262_v13  ;;  %v18404_v51 = vadd.f32 %v14852_v20, %v1847_v42  ;;  %v1840_v0 = vadd.f32 %v1839_v52, %v1730_v6  ;;  %v18523_v6 = vsub.f32 %v3787_v3, %v18488_v49  ;;  %v18525_v42 = vand.u32 4294901760, %v3801_v59  ;;  %v3784_v52 = vld [vmem:[#allocation4 + $0x350] sm:$0xff]  ;;  %v3798_v3 = vld [vmem:[#allocation4 + $0x3c0] sm:$0xff] }
 0x24a   : > { %15012 = vmatpush3.msra.mxu0 %v18234_v24  ;;  %15055 = vmatpush3.msra.mxu1 %v18262_v13  ;;  %v3768_v24 = vld [vmem:[#allocation3 + $0x8] sm:$0xfc] }
 0x24b   : > { %15013 = vmatprep.subr.mxu0 %v18248_v11  ;;  %15056 = vmatprep.subr.mxu1 %v18275_v36  ;;  %v18410_v47 = vadd.f32 %v1935_v19, %v1840_v0  ;;  %24469 = vst [vmem:[#allocation20_spill] sm:$0xff] %v18523_v6  ;;  %24470 = vst [vmem:[#allocation22_spill] sm:$0xff] %v18525_v42  ;;  %v18532_v0 = vand.u32 4294901760, %v3785_v40 }
 0x24c   : > { %15014 = vmatpush3.msra.mxu0 %v18248_v11  ;;  %15057 = vmatpush3.msra.mxu1 %v18275_v36  ;;  %v24460_v11 = vld [vmem:[#allocation44_spill] sm:$0xff] }
 0x24d   : > { %15015 = vmatprep.subr.mxu0 %v18260_v9  ;;  %15058 = vmatprep.subr.mxu1 %v18287_v46  ;;  %v23793_v5 = vrot.slane %v24460_v11, 2 }
 0x24e   : > { %15016 = vmatpush3.msra.mxu0 %v18260_v9  ;;  %15059 = vmatpush3.msra.mxu1 %v18287_v46  ;;  %v3832_v9 = vrot.slane %v3768_v24, 2 }
 0x24f   : > { %15017 = vmatprep.subr.mxu0 %v18273_v10  ;;  %15060 = vmatprep.mubr.f32.mxu1 %v17934_v48 }
 0x250   : > { %15098 = vmatprep.subr.mxu1 %v18073_v32  ;;  %15018 = vmatpush3.msra.mxu0 %v18273_v10  ;;  %v3834_v10 = vsel %vm3828_vm4, %v3832_v9, %v23793_v5  ;;  %v18542_v9 = vsub.f32 %v3786_v55, %v18497_v39 }
 0x251   : > { %15061 = vmatmul.mubr.f32.vlgmr.msra.gmra.mxu1 %v17934_v48  ;;  %15019 = vmatprep.subr.mxu0 %v18285_v50  ;;  %v3805_v48 = vld [vmem:[#allocation4 + $0x3f8] sm:$0xff] }
 0x252   : > { %15099 = vmatpush3.msra.mxu1 %v18073_v32  ;;  %15020 = vmatpush3.msra.mxu0 %v18285_v50  ;;  %v3789_v32 = vld [vmem:[#allocation4 + $0x378] sm:$0xff]  ;;  %v18442_v50 = vand.u32 4294901760, %v3805_v48  ;;  %24472 = vst [vmem:[#allocation28_spill] sm:$0xff] %v18542_v9 }
 0x253   : > { %15100 = vmatprep.subr.mxu1 %v18084_v7  ;;  %15021 = vmatprep.subr.mxu0 %v18297_v57  ;;  %v18444_v58 = vand.u32 4294901760, %v3789_v32 }
 0x254   : > { %15101 = vmatpush3.msra.mxu1 %v18084_v7  ;;  %15022 = vmatpush3.msra.mxu0 %v18297_v57  ;;  %v18438_v7 = vand.u32 4294901760, %v3834_v10  ;;  %v3804_v57 = vld [vmem:[#allocation4 + $0x3f0] sm:$0xff] }
 0x255   : > { %15102 = vmatprep.subr.mxu1 %v18095_v18  ;;  %15023 = vmatprep.subr.mxu0 %v18308_v21  ;;  %v18463_v35 = vsub.f32 %v3789_v32, %v18444_v58  ;;  %v3783_v32 = vld [vmem:[#allocation4 + $0x348] sm:$0xff] }
 0x256   : > { %15103 = vmatpush3.msra.mxu1 %v18095_v18  ;;  %15024 = vmatpush3.msra.mxu0 %v18308_v21  ;;  %24461 = vst [vmem:[#allocation14_spill] sm:$0xff] %v18438_v7  ;;  %v3788_v18 = vld [vmem:[#allocation4 + $0x370] sm:$0xff]  ;;  %v18452_v21 = vand.u32 4294901760, %v3804_v57  ;;  %v18574_v5 = vand.u32 4294901760, %v3783_v32 }
 0x257   : > { %15104 = vmatprep.subr.mxu1 %v18106_v53  ;;  %15025 = vmatprep.mubr.f32.mxu0 %v17922_v17  ;;  %24464 = vst [vmem:[#allocation25_spill] sm:$0xff] %v18463_v35  ;;  %v23789_v15 = vand.u32 4294901760, %v18463_v35 }
 0x258   : > { %15105 = vmatpush3.msra.mxu1 %v18106_v53  ;;  %15026 = vmatmul.mubr.f32.vlgmr.msra.gmra.mxu0 %v17922_v17  ;;  %v18455_v53 = vsub.f32 %v3834_v10, %v18438_v7  ;;  %v18460_v17 = vsub.f32 %v3805_v48, %v18442_v50  ;;  %v18545_v48 = vand.u32 4294901760, %v3800_v63 }
 0x259   : > { %15063 = vmatprep.subr.mxu0 %v18112_v44  ;;  %15106 = vmatprep.subr.mxu1 %v18120_v38 }
 0x25a   : > { %15064 = vmatpush3.msra.mxu0 %v18112_v44  ;;  %15107 = vmatpush3.msra.mxu1 %v18120_v38  ;;  %24462 = vst [vmem:[#allocation23_spill] sm:$0xff] %v18455_v53  ;;  %24463 = vst [vmem:[#allocation15_spill] sm:$0xff] %v18460_v17  ;;  %v18467_v44 = vand.u32 4294901760, %v3788_v18  ;;  %v3803_v38 = vld [vmem:[#allocation4 + $0x3e8] sm:$0xff]  ;;  %v23790_v28 = vand.u32 4294901760, %v18460_v17 }
 0x25b   : > { %15065 = vmatprep.subr.mxu0 %v18129_v62  ;;  %15108 = vmatprep.subr.mxu1 %v18139_v2 }
 0x25c   : > { %15066 = vmatpush3.msra.mxu0 %v18129_v62  ;;  %15109 = vmatpush3.msra.mxu1 %v18139_v2  ;;  %v18474_v62 = vsub.f32 %v3804_v57, %v18452_v21  ;;  %v23791_v2 = vand.u32 4294901760, %v18455_v53 }
 0x25d   : > { %15067 = vmatprep.subr.mxu0 %v18145_v26  ;;  %15110 = vmatprep.subr.mxu1 %v18153_v56 }
 0x25e   : > { %15068 = vmatpush3.msra.mxu0 %v18145_v26  ;;  %15111 = vmatpush3.msra.mxu1 %v18153_v56  ;;  %24465 = vst [vmem:[#allocation16_spill] sm:$0xff] %v18474_v62  ;;  %v18481_v26 = vand.u32 4294901760, %v3803_v38  ;;  %v18486_v56 = vsub.f32 %v3788_v18, %v18467_v44  ;;  %v18502_v29 = vsub.f32 %v18455_v53, %v23791_v2  ;;  %v3771_v53 = vld [vmem:[#allocation3 + $0x38] sm:$0x3] }
 0x25f   : > { %15069 = vmatprep.subr.mxu0 %v18161_v41  ;;  %15112 = vmatprep.subr.mxu1 %v18170_v23 }
 0x260   : > { %15070 = vmatpush3.msra.mxu0 %v18161_v41  ;;  %15113 = vmatpush3.msra.mxu1 %v18170_v23  ;;  %24466 = vst [vmem:[#allocation26_spill] sm:$0xff] %v18486_v56  ;;  %v18492_v41 = vand.u32 4294901760, %v3802_v45  ;;  %v23788_v23 = vand.u32 4294901760, %v18474_v62  ;;  %v18517_v20 = vsub.f32 %v3803_v38, %v18481_v26  ;;  %v14922_v10 = vpop.f32.mrf.mxu1  ;;  %v18552_v38 = vand.u32 4294901760, %v3784_v52 }
 0x261   : > { %15071 = vmatprep.subr.mxu0 %v18178_v1  ;;  %15114 = vmatprep.subr.mxu1 %v18193_v37 }
 0x262   : > { %15072 = vmatpush3.msra.mxu0 %v18178_v1  ;;  %24467 = vst [vmem:[#allocation17_spill] sm:$0xff] %v18492_v41  ;;  %15115 = vmatpush3.msra.mxu1 %v18193_v37  ;;  %v18509_v1 = vsub.f32 %v18460_v17, %v23790_v28  ;;  %v18514_v37 = vsub.f32 %v18463_v35, %v23789_v15  ;;  %24468 = vst [vmem:[#allocation18_spill] sm:$0xff] %v18517_v20  ;;  %v23795_v18 = vand.u32 4294901760, %v18517_v20  ;;  %v3782_v28 = vld [vmem:[#allocation4 + $0x340] sm:$0xff] }
 0x263   : > { %15073 = vmatprep.subr.mxu0 %v18197_v54  ;;  %15116 = vmatprep.subr.mxu1 %v18208_v4  ;;  %v18530_v19 = vsub.f32 %v3802_v45, %v18492_v41  ;;  %v18539_v24 = vsub.f32 %v18474_v62, %v23788_v23  ;;  %v18563_v23 = vsub.f32 %v3801_v59, %v18525_v42  ;;  %v3797_v59 = vld [vmem:[#allocation4 + $0x3b8] sm:$0xff] }
 0x264   : > { %15074 = vmatpush3.msra.mxu0 %v18197_v54  ;;  %15117 = vmatpush3.msra.mxu1 %v18208_v4  ;;  %v23792_v54 = vand.u32 4294901760, %v18486_v56  ;;  %v3799_v4 = vld [vmem:[#allocation4 + $0x3c8] sm:$0xff] }
 0x265   : > { %15075 = vmatprep.subr.mxu0 %v18213_v31  ;;  %15118 = vmatprep.subr.mxu1 %v18220_v27  ;;  %24471 = vst [vmem:[#allocation13_spill] sm:$0xff] %v18530_v19  ;;  %24473 = vst [vmem:[#allocation35_spill] sm:$0xff] %v18563_v23  ;;  %v18565_v15 = vand.u32 4294901760, %v3799_v4 }
 0x266   : > { %15076 = vmatpush3.msra.mxu0 %v18213_v31  ;;  %15119 = vmatpush3.msra.mxu1 %v18220_v27  ;;  %v18559_v45 = vsub.f32 %v18486_v56, %v23792_v54  ;;  %v18572_v54 = vsub.f32 %v3785_v40, %v18532_v0  ;;  %v2155_v27 = vpop.f32.mrf.mxu1  ;;  %v18591_v40 = vsub.f32 %v3784_v52, %v18552_v38  ;;  %v3781_v31 = vld [vmem:[#allocation4 + $0x338] sm:$0xff]  ;;  %v3775_v56 = vld [vmem:[#allocation4 + $0x308] sm:$0xff] }
 0x267   : > { %15077 = vmatprep.subr.mxu0 %v18229_v14  ;;  %15120 = vmatprep.subr.mxu1 %v18236_v8 }
 0x268   : > { %15078 = vmatpush3.msra.mxu0 %v18229_v14  ;;  %15121 = vmatpush3.msra.mxu1 %v18236_v8  ;;  %v23794_v14 = vand.u32 4294901760, %v18523_v6  ;;  %24474 = vst [vmem:[#allocation38_spill] sm:$0xff] %v18572_v54  ;;  %v18583_v8 = vand.u32 4294901760, %v3798_v3  ;;  %24476 = vst [vmem:[#allocation40_spill] sm:$0xff] %v18591_v40 }
 0x269   : > { %15079 = vmatprep.subr.mxu0 %v18245_v22  ;;  %v14887_v55 = vpop.f32.mrf.mxu0  ;;  %15122 = vmatprep.subr.mxu1 %v18250_v25 }
 0x26a   : > { %15080 = vmatpush3.msra.mxu0 %v18245_v22  ;;  %v2069_v2 = vadd.f32 %v14887_v55, %v18404_v51  ;;  %15123 = vmatpush3.msra.mxu1 %v18250_v25  ;;  %v18581_v22 = vsub.f32 %v3800_v63, %v18545_v48  ;;  %v18593_v55 = vand.u32 4294901760, %v3782_v28  ;;  %v18600_v63 = vsub.f32 %v18517_v20, %v23795_v18  ;;  %v3796_v18 = vld [vmem:[#allocation4 + $0x3b0] sm:$0xff] }
 0x26b   : > { %15081 = vmatprep.subr.mxu0 %v18257_v33  ;;  %v2062_v57 = vpop.f32.mrf.mxu0  ;;  %15124 = vmatprep.subr.mxu1 %v18262_v13 }
 0x26c   : > { %24475 = vst [vmem:[#allocation39_spill] sm:$0xff] %v18581_v22  ;;  %15082 = vmatpush3.msra.mxu0 %v18257_v33  ;;  %v18587_v51 = vadd.f32 %v14922_v10, %v2069_v2  ;;  %v2063_v25 = vadd.f32 %v2062_v57, %v18410_v47  ;;  %15125 = vmatpush3.msra.mxu1 %v18262_v13  ;;  %v24478_v13 = vand.u32 4294901760, %v18530_v19  ;;  %v18630_v47 = vand.u32 4294901760, %v3797_v59 }
 0x26d   : > { %15083 = vmatprep.subr.mxu0 %v18270_v30  ;;  %v18605_v33 = vsub.f32 %v18523_v6, %v23794_v14  ;;  %v18609_v2 = vsub.f32 %v3799_v4, %v18565_v15  ;;  %15126 = vmatprep.subr.mxu1 %v18275_v36  ;;  %v18622_v14 = vsub.f32 %v3783_v32, %v18574_v5  ;;  %v3989_v32 = vand.u32 4294901760, %v18559_v45 }
 0x26e   : > { %15084 = vmatpush3.msra.mxu0 %v18270_v30  ;;  %v18616_v52 = vsub.f32 %v18530_v19, %v24478_v13  ;;  %v18619_v57 = vadd.f32 %v2155_v27, %v2063_v25  ;;  %15127 = vmatpush3.msra.mxu1 %v18275_v36  ;;  %v18628_v30 = vsub.f32 %v3798_v3, %v18583_v8  ;;  %v18632_v13 = vand.u32 4294901760, %v3781_v31 }
 0x26f   : > { %24477 = vst [vmem:[#allocation41_spill] sm:$0xff] %v18609_v2  ;;  %24479 = vst [vmem:[#allocation19_spill] sm:$0xff] %v18622_v14  ;;  %15085 = vmatprep.subr.mxu0 %v18282_v61  ;;  %15128 = vmatprep.subr.mxu1 %v18287_v46  ;;  %v24481_v27 = vand.u32 4294901760, %v18542_v9  ;;  %v18644_v3 = vsub.f32 %v3782_v28, %v18593_v55  ;;  %v4108_v4 = vand.u32 4294901760, %v18600_v63  ;;  %v24484_v63 = vand.u32 4294901760, %v18572_v54 }
 0x270   : > { %24480 = vst [vmem:[#allocation42_spill] sm:$0xff] %v18628_v30  ;;  %15086 = vmatpush3.msra.mxu0 %v18282_v61  ;;  %15129 = vmatpush3.msra.mxu1 %v18287_v46  ;;  %v24483_v61 = vand.u32 4294901760, %v18563_v23  ;;  %v3996_v46 = vand.u32 4294901760, %v18605_v33  ;;  %v4115_v28 = vand.u32 4294901760, %v18616_v52  ;;  %v24485_v10 = vand.u32 4294901760, %v18509_v1 }
 0x271   : > { %v18640_v36 = vsub.f32 %v18542_v9, %v24481_v27  ;;  %24482 = vst [vmem:[#allocation21_spill] sm:$0xff] %v18644_v3  ;;  %15130 = vmatprep.mubr.f32.mxu1 %v24450_v43  ;;  %v18655_v27 = vand.u32 4294901760, %v3796_v18  ;;  %v3780_v9 = vld [vmem:[#allocation4 + $0x330] sm:$0xff]  ;;  %15087 = vmatprep.subr.mxu0 %v18294_v16  ;;  %v18664_v25 = vsub.f32 %v18572_v54, %v24484_v63  ;;  %v24486_v19 = vand.u32 4294901760, %v18581_v22  ;;  %v3794_v54 = vld [vmem:[#allocation4 + $0x3a0] sm:$0xff] }
 0x272   : > { %v18652_v45 = vsub.f32 %v18563_v23, %v24483_v61  ;;  %15131 = vmatmul.mubr.f32.vlgmr.msra.gmra.mxu1 %v24450_v43  ;;  %v3795_v23 = vld [vmem:[#allocation4 + $0x3a8] sm:$0xff]  ;;  %13071 = vmatprep.subr.mxu1 %v24485_v10  ;;  %v18677_v52 = vsub.f32 %v3797_v59, %v18630_v47  ;;  %v18680_v63 = vsub.f32 %v3781_v31, %v18632_v13  ;;  %v24489_v1 = vand.u32 4294901760, %v18514_v37  ;;  %v3778_v59 = vld [vmem:[#allocation4 + $0x320] sm:$0xff] }
 0x273   : > { %15088 = vmatpush3.msra.mxu0 %v18294_v16  ;;  %v18673_v6 = vsub.f32 %v18581_v22, %v24486_v19  ;;  %v3779_v61 = vld [vmem:[#allocation4 + $0x328] sm:$0xff]  ;;  %4202 = vmatprep.mubr.f32.mxu1 %v18438_v7  ;;  %v4003_v16 = vand.u32 4294901760, %v18640_v36  ;;  %v24490_v19 = vand.u32 4294901760, %v18591_v40  ;;  %v18692_v33 = vand.u32 4294901760, %v3780_v9 }
 0x274   : > { %24487 = vst [vmem:[#allocation30_spill] sm:$0xff] %v18677_v52  ;;  %24488 = vst [vmem:[#allocation24_spill] sm:$0xff] %v18680_v63  ;;  %13072 = vmatpush3.msra.mxu1 %v24489_v1  ;;  %15089 = vmatprep.subr.mxu0 %v18305_v34  ;;  %v24491_v31 = vand.u32 4294901760, %v18539_v24  ;;  %v4122_v37 = vand.u32 4294901760, %v18652_v45  ;;  %v24492_v1 = vand.u32 4294901760, %v18609_v2  ;;  %v18704_v7 = vsub.f32 %v3796_v18, %v18655_v27 }
 0x275   : > { %v18689_v10 = vsub.f32 %v18591_v40, %v24490_v19  ;;  %v18706_v19 = vand.u32 4294901760, %v3795_v23  ;;  %15090 = vmatpush3.msra.mxu0 %v18305_v34  ;;  %v4010_v40 = vand.u32 4294901760, %v18664_v25  ;;  %v24495_v24 = vand.u32 4294901760, %v18622_v14  ;;  %15095 = vmatprep.mubr.f32.mxu0 %v24450_v43 }
 0x276   : > { %13073 = vmatprep.subr.mxu1 %v24491_v31  ;;  %v18701_v36 = vsub.f32 %v18609_v2, %v24492_v1  ;;  %24493 = vst [vmem:[#allocation31_spill] sm:$0xff] %v18704_v7  ;;  %v18715_v31 = vand.u32 4294901760, %v3779_v61  ;;  %v18717_v1 = vand.u32 4294901760, %v3794_v54  ;;  %v3793_v2 = vld [vmem:[#allocation4 + $0x398] sm:$0xff]  ;;  %15091 = vmatprep.subr.mxu0 %v18315_v60  ;;  %v4129_v18 = vand.u32 4294901760, %v18673_v6 }
 0x277   : > { %24494 = vst [vmem:[#allocation33_spill] sm:$0xff] %v18706_v19  ;;  %13074 = vmatpush3.msra.mxu1 %v3989_v32  ;;  %v18713_v45 = vsub.f32 %v18622_v14, %v24495_v24  ;;  %v24498_v34 = vand.u32 4294901760, %v18628_v30  ;;  %v3777_v14 = vld [vmem:[#allocation4 + $0x318] sm:$0xff]  ;;  %15092 = vmatpush3.msra.mxu0 %v18315_v60  ;;  %v4017_v22 = vand.u32 4294901760, %v18689_v10  ;;  %v24499_v20 = vand.u32 4294901760, %v18644_v3  ;;  %v3791_v60 = vld [vmem:[#allocation4 + $0x388] sm:$0xff] }
 0x278   : > { %24496 = vst [vmem:[#allocation34_spill] sm:$0xff] %v18715_v31  ;;  %24497 = vst [vmem:[#allocation27_spill] sm:$0xff] %v18717_v1  ;;  %13075 = vmatprep.subr.mxu1 %v4108_v4  ;;  %v18736_v6 = vsub.f32 %v3780_v9, %v18692_v33  ;;  %15093 = vmatprep.subr.mxu0 %v18322_v12  ;;  %v4136_v24 = vand.u32 4294901760, %v18701_v36  ;;  %v18746_v10 = vand.u32 4294901760, %v3793_v2  ;;  %v18757_v36 = vand.u32 4294901760, %v3777_v14 }
 0x279   : > { %v18724_v32 = vsub.f32 %v18628_v30, %v24498_v34  ;;  %13076 = vmatpush3.msra.mxu1 %v3996_v46  ;;  %v18733_v4 = vsub.f32 %v18644_v3, %v24499_v20  ;;  %v18738_v34 = vand.u32 4294901760, %v3778_v59  ;;  %v3792_v30 = vld [vmem:[#allocation4 + $0x390] sm:$0xff]  ;;  %v18744_v46 = vsub.f32 %v3795_v23, %v18706_v19  ;;  %15094 = vmatpush3.msra.mxu0 %v18322_v12 }
 0x27a   : > { %24500 = vst [vmem:[#allocation32_spill] sm:$0xff] %v18736_v6  ;;  %13077 = vmatprep.subr.mxu1 %v4115_v28  ;;  %24502 = vst [vmem:[#allocation37_spill] sm:$0xff] %v18746_v10  ;;  %v3776_v20 = vld [vmem:[#allocation4 + $0x310] sm:$0xff]  ;;  %v4024_v9 = vand.u32 4294901760, %v18713_v45  ;;  %v18752_v25 = vsub.f32 %v3779_v61, %v18715_v31  ;;  %v18755_v28 = vsub.f32 %v3794_v54, %v18717_v1  ;;  %15096 = vmatmul.mubr.f32.vlgmr.msra.gmra.mxu0 %v24450_v43 }
 0x27b   : > { %24501 = vst [vmem:[#allocation29_spill] sm:$0xff] %v18744_v46  ;;  %13078 = vmatpush3.msra.mxu1 %v4003_v16  ;;  %v4143_v23 = vand.u32 4294901760, %v18724_v32  ;;  %v24505_v12 = vand.u32 4294901760, %v18677_v52  ;;  %v24506_v45 = vand.u32 4294901760, %v18680_v63  ;;  %v18771_v54 = vand.u32 4294901760, %v3792_v30  ;;  %13033 = vmatprep.subr.mxu0 %v18442_v50  ;;  %v3774_v16 = vld [vmem:[#allocation4 + $0x300] sm:$0xff] }
 0x27c   : > { %24503 = vst [vmem:[#allocation36_spill] sm:$0xff] %v18752_v25  ;;  %24504 = vst [vmem:[#allocation43_spill] sm:$0xff] %v18755_v28  ;;  %13079 = vmatprep.subr.mxu1 %v4122_v37  ;;  %v4031_v43 = vand.u32 4294901760, %v18733_v4  ;;  %v18777_v32 = vsub.f32 %v3778_v59, %v18738_v34  ;;  %13034 = vmatpush3.msra.mxu0 %v18444_v58  ;;  %v18791_v4 = vsub.f32 %v3793_v2, %v18746_v10 }
 0x27d   : > { %v18764_v3 = vsub.f32 %v18677_v52, %v24505_v12  ;;  %v18769_v61 = vsub.f32 %v18680_v63, %v24506_v45  ;;  %v18779_v12 = vand.u32 4294901760, %v3776_v20  ;;  %v3790_v52 = vld [vmem:[#allocation4 + $0x380] sm:$0xff]  ;;  %v24507_v45 = vand.u32 4294901760, %v18502_v29  ;;  %13080 = vmatpush3.msra.mxu1 %v4010_v40  ;;  %13035 = vmatprep.subr.mxu0 %v18452_v21 }
 0x27e   : > { %v24508_v63 = vand.u32 4294901760, %v18704_v7  ;;  %v18793_v59 = vand.u32 4294901760, %v3791_v60  ;;  %13081 = vmatprep.subr.mxu1 %v4129_v18  ;;  %13036 = vmatpush3.msra.mxu0 %v18467_v44  ;;  %v18807_v40 = vsub.f32 %v3792_v30, %v18771_v54  ;;  %v24515_v18 = vand.u32 4294901760, %v18755_v28 }
 0x27f   : > { %3951 = vmatprep.mubr.f32.mxu0 %v24507_v45  ;;  %v18799_v45 = vsub.f32 %v3777_v14, %v18757_v36  ;;  %v4150_v2 = vand.u32 4294901760, %v18764_v3  ;;  %v4038_v37 = vand.u32 4294901760, %v18769_v61  ;;  %13082 = vmatpush3.msra.mxu1 %v4017_v22  ;;  %v24510_v14 = vand.u32 4294901760, %v18736_v6  ;;  %v3767_v61 = vld [vmem:[#allocation3] sm:$0xfc] }
 0x280   : > { %v18787_v62 = vsub.f32 %v18704_v7, %v24508_v63  ;;  %24509 = vst [vmem:[#allocation45_spill] sm:$0xff] %v18793_v59  ;;  %v18801_v63 = vand.u32 4294901760, %v3775_v56  ;;  %v18809_v7 = vand.u32 4294901760, %v3790_v52  ;;  %13037 = vmatprep.subr.mxu0 %v18481_v26  ;;  %v18817_v35 = vsub.f32 %v3776_v20, %v18779_v12  ;;  %13083 = vmatprep.subr.mxu1 %v4136_v24 }
 0x281   : > { %v4044_v29 = vsub.f32 %v18736_v6, %v24510_v14  ;;  %v18819_v3 = vand.u32 4294901760, %v3774_v16  ;;  %13038 = vmatpush3.msra.mxu0 %v18488_v49  ;;  %v24512_v22 = vand.u32 4294901760, %v18744_v46  ;;  %v18828_v14 = vsub.f32 %v3791_v60, %v18793_v59  ;;  %13084 = vmatpush3.msra.mxu1 %v4024_v9 }
 0x282   : > { %24511 = vst [vmem:[#allocation46_spill] sm:$0xff] %v18817_v35  ;;  %v4157_v30 = vand.u32 4294901760, %v18787_v62  ;;  %13039 = vmatprep.subr.mxu0 %v18492_v41  ;;  %v24514_v20 = vand.u32 4294901760, %v18752_v25  ;;  %v4170_v62 = vsub.f32 %v18755_v28, %v24515_v18  ;;  %13085 = vmatprep.subr.mxu1 %v4143_v23  ;;  %v18844_v9 = vsub.f32 %v3790_v52, %v18809_v7  ;;  %v12767_v41 = vpop.f32.mrf.mxu1  ;;  %v3770_v28 = vld [vmem:[#allocation3 + $0x30] sm:$0x3] }
 0x283   : > { %v4163_v17 = vsub.f32 %v18744_v46, %v24512_v22  ;;  %24513 = vst [vmem:[#allocation44_spill] sm:$0xff] %v18828_v14  ;;  %v18839_v22 = vsub.f32 %v3775_v56, %v18801_v63  ;;  %13040 = vmatpush3.msra.mxu0 %v18497_v39  ;;  %v3829_v46 = vrot.slane %v3767_v61, 2  ;;  %13086 = vmatpush3.msra.mxu1 %v4031_v43  ;;  %v4045_v18 = vand.u32 4294901760, %v4044_v29 }
 0x284   : > { %v4051_v24 = vsub.f32 %v18752_v25, %v24514_v20  ;;  %v16280_v20 = vld [vmem:[#allocation3 + $0x18] sm:$0xff]  ;;  %13041 = vmatprep.subr.mxu0 %v18525_v42  ;;  %v24518_v56 = vand.u32 4294901760, %v18777_v32  ;;  %v18854_v60 = vsub.f32 %v3774_v16, %v18819_v3  ;;  %13087 = vmatprep.subr.mxu1 %v4150_v2  ;;  %v24519_v61 = vand.u32 4294901760, %v18791_v4  ;;  %v12768_v42 = vpop.f32.mrf.mxu1 }
 0x285   : > { %24516 = vst [vmem:[#allocation47_spill] sm:$0xff] %v18839_v22  ;;  %v18846_v25 = vrot.slane %v16280_v20, 2  ;;  %13042 = vmatpush3.msra.mxu0 %v18532_v0  ;;  %v4164_v52 = vand.u32 4294901760, %v4163_v17  ;;  %v3840_v29 = vrot.slane %v3771_v53, 2  ;;  %13088 = vmatpush3.msra.mxu1 %v4038_v37  ;;  %v24520_v16 = vand.u32 4294901760, %v18799_v45 }
 0x286   : > { %v4058_v23 = vsub.f32 %v18777_v32, %v24518_v56  ;;  %v4177_v43 = vsub.f32 %v18791_v4, %v24519_v61  ;;  %13043 = vmatprep.subr.mxu0 %v18545_v48  ;;  %v4052_v56 = vand.u32 4294901760, %v4051_v24  ;;  %v18866_v17 = vadd.f32 %v12768_v42, %v12767_v41  ;;  %13089 = vmatprep.subr.mxu1 %v4157_v30 }
 0x287   : > { %24517 = vst [vmem:[#allocation48_spill] sm:$0xff] %v18846_v25  ;;  %v4065_v2 = vsub.f32 %v18799_v45, %v24520_v16  ;;  %13044 = vmatpush3.msra.mxu0 %v18552_v38  ;;  %v4171_v61 = vand.u32 4294901760, %v4170_v62  ;;  %v24521_v53 = vand.u32 4294901760, %v18807_v40  ;;  %v3831_v24 = vsel %vm3828_vm4, %v3829_v46, %v18846_v25  ;;  %13090 = vmatpush3.msra.mxu1 %v4045_v18  ;;  %v12770_v6 = vpop.f32.mrf.mxu1 }
 0x288   : > { %13045 = vmatprep.subr.mxu0 %v18565_v15  ;;  %v4059_v16 = vand.u32 4294901760, %v4058_v23  ;;  %v24522_v41 = vand.u32 4294901760, %v18817_v35  ;;  %v3838_v62 = vrot.slane %v3770_v28, 2  ;;  %13091 = vmatprep.subr.mxu1 %v4164_v52  ;;  %v24523_v37 = vand.u32 4294901760, %v18828_v14 }
 0x289   : > { %v4184_v20 = vsub.f32 %v18807_v40, %v24521_v53  ;;  %13046 = vmatpush3.msra.mxu0 %v18574_v5  ;;  %v4178_v53 = vand.u32 4294901760, %v4177_v43  ;;  %13092 = vmatpush3.msra.mxu1 %v4052_v56  ;;  %v4066_v18 = vand.u32 4294901760, %v4065_v2  ;;  %v24524_v23 = vand.u32 4294901760, %v18839_v22  ;;  %v12771_v28 = vpop.f32.mrf.mxu1 }
 0x28a   : > { %v4072_v42 = vsub.f32 %v18817_v35, %v24522_v41  ;;  %v4191_v46 = vsub.f32 %v18828_v14, %v24523_v37  ;;  %13047 = vmatprep.subr.mxu0 %v18583_v8  ;;  %v18888_v35 = vand.u32 4294901760, %v3831_v24  ;;  %13093 = vmatprep.subr.mxu1 %v4171_v61  ;;  %v24526_v43 = vand.u32 4294901760, %v18844_v9 }
 0x28b   : > { %v4079_v41 = vsub.f32 %v18839_v22, %v24524_v23  ;;  %13048 = vmatpush3.msra.mxu0 %v18593_v55  ;;  %v4185_v52 = vand.u32 4294901760, %v4184_v20  ;;  %v24527_v56 = vrot.slane %v24460_v11, 2  ;;  %v12772_v2 = vadd.f32 %v12771_v28, %v12770_v6  ;;  %13094 = vmatpush3.msra.mxu1 %v4059_v16 }
 0x28c   : > { %24525 = vst [vmem:[#allocation49_spill] sm:$0xff] %v18888_v35  ;;  %v4198_v30 = vsub.f32 %v18844_v9, %v24526_v43  ;;  %13049 = vmatprep.subr.mxu0 %v18630_v47  ;;  %v4073_v23 = vand.u32 4294901760, %v4072_v42  ;;  %v24528_v22 = vand.u32 4294901760, %v18854_v60  ;;  %v3839_v20 = vsel %vm3828_vm4, %v18846_v25, %v3838_v62  ;;  %v12729_v14 = vpop.f32.mrf.mxu0  ;;  %13095 = vmatprep.subr.mxu1 %v4178_v53  ;;  %v24548_v25 = vld [vmem:[#allocation19_spill] sm:$0xff] }
 0x28d   : > { %v3841_v37 = vsel %vm3828_vm4, %v24527_v56, %v3840_v29  ;;  %13050 = vmatpush3.msra.mxu0 %v18632_v13  ;;  %v4192_v43 = vand.u32 4294901760, %v4191_v46  ;;  %13096 = vmatpush3.msra.mxu1 %v4066_v18  ;;  %v4080_v11 = vand.u32 4294901760, %v4079_v41  ;;  %v18906_v6 = vsub.f32 %v3831_v24, %v18888_v35 }
 0x28e   : > { %v4086_v61 = vsub.f32 %v18854_v60, %v24528_v22  ;;  %13051 = vmatprep.subr.mxu0 %v18655_v27  ;;  %v18908_v29 = vand.u32 4294901760, %v3841_v37  ;;  %v12730_v16 = vpop.f32.mrf.mxu0  ;;  %13097 = vmatprep.subr.mxu1 %v4185_v52  ;;  %v4199_v22 = vand.u32 4294901760, %v4198_v30  ;;  %v18911_v42 = vand.u32 4294901760, %v3839_v20 }
 0x28f   : > { %13052 = vmatpush3.msra.mxu0 %v18692_v33  ;;  %v12731_v62 = vadd.f32 %v12730_v16, %v12729_v14  ;;  %13098 = vmatpush3.msra.mxu1 %v4073_v23  ;;  %v23858_v18 = vand.u32 4294901760, %v18906_v6 }
 0x290   : > { %24529 = vst [vmem:[#allocation50_spill] sm:$0xff] %v18908_v29  ;;  %24530 = vst [vmem:[#allocation51_spill] sm:$0xff] %v18911_v42  ;;  %13053 = vmatprep.subr.mxu0 %v18706_v19  ;;  %v4087_v53 = vand.u32 4294901760, %v4086_v61  ;;  %13099 = vmatprep.subr.mxu1 %v4192_v43  ;;  %v18919_v30 = vsub.f32 %v3841_v37, %v18908_v29  ;;  %v18926_v41 = vsub.f32 %v3839_v20, %v18911_v42  ;;  %v24531_v20 = vld [vmem:[#allocation23_spill] sm:$0xff] }
 0x291   : > { %13054 = vmatpush3.msra.mxu0 %v18715_v31  ;;  %v2274_v24 = vadd.f32 %v12731_v62, %v18619_v57  ;;  %v12732_v46 = vpop.f32.mrf.mxu0  ;;  %13100 = vmatpush3.msra.mxu1 %v4080_v11  ;;  %v24532_v43 = vand.u32 4294901760, %v24531_v20  ;;  %v24533_v11 = vld [vmem:[#allocation17_spill] sm:$0xff]  ;;  %v24535_v62 = vld [vmem:[#allocation22_spill] sm:$0xff] }
 0x292   : > { %13055 = vmatprep.subr.mxu0 %v18717_v1  ;;  %13101 = vmatprep.subr.mxu1 %v4199_v22  ;;  %v23857_v52 = vand.u32 4294901760, %v18919_v30  ;;  %v23856_v37 = vand.u32 4294901760, %v18926_v41  ;;  %v24534_v22 = vld [vmem:[#allocation15_spill] sm:$0xff] }
 0x293   : > { %13056 = vmatpush3.msra.mxu0 %v18738_v34  ;;  %v18923_v14 = vadd.f32 %v18866_v17, %v2274_v24  ;;  %v12733_v28 = vpop.f32.mrf.mxu0  ;;  %13102 = vmatpush3.msra.mxu1 %v4087_v53  ;;  %v3955_v17 = vsub.f32 %v18906_v6, %v23858_v18  ;;  %v24536_v24 = vld [vmem:[#allocation25_spill] sm:$0xff] }
 0x294   : > { %13057 = vmatprep.subr.mxu0 %v18746_v10  ;;  %v12734_v57 = vadd.f32 %v12733_v28, %v12732_v46  ;;  %4204 = vmatmul.mubr.f32.vlgmr.msra.gmra.mxu1 %v18888_v35  ;;  %v3964_v61 = vsub.f32 %v18919_v30, %v23857_v52  ;;  %v24537_v46 = vld [vmem:[#allocation16_spill] sm:$0xff]  ;;  %v24538_v28 = vld [vmem:[#allocation26_spill] sm:$0xff]  ;;  %v24547_v52 = vld [vmem:[#allocation41_spill] sm:$0xff] }
 0x295   : > { %13147 = vmatprep.subr.mxu1 %v18442_v50  ;;  %13058 = vmatpush3.msra.mxu0 %v18757_v36  ;;  %v24551_v35 = vld [vmem:[#allocation30_spill] sm:$0xff] }
 0x296   : > { %4209 = vmatprep.mubr.f32.mxu1 %v18908_v29  ;;  %v2289_v56 = vadd.f32 %v12734_v57, %v18587_v51  ;;  %13148 = vmatpush3.msra.mxu1 %v18444_v58  ;;  %v3956_v51 = vand.u32 4294901760, %v3955_v17  ;;  %v3965_v16 = vand.u32 4294901760, %v3964_v61  ;;  %v24539_v57 = vld [vmem:[#allocation18_spill] sm:$0xff]  ;;  %v24540_v17 = vld [vmem:[#allocation20_spill] sm:$0xff] }
 0x297   : > { %13059 = vmatprep.subr.mxu0 %v18771_v54  ;;  %13149 = vmatprep.subr.mxu1 %v18452_v21 }
 0x298   : > { %13060 = vmatpush3.msra.mxu0 %v18779_v12  ;;  %v18943_v23 = vadd.f32 %v12772_v2, %v2289_v56  ;;  %13150 = vmatpush3.msra.mxu1 %v18467_v44  ;;  %v3970_v2 = vsub.f32 %v18926_v41, %v23856_v37  ;;  %v24541_v56 = vld [vmem:[#allocation13_spill] sm:$0xff]  ;;  %v24546_v37 = vld [vmem:[#allocation40_spill] sm:$0xff] }
 0x299   : > { %13061 = vmatprep.subr.mxu0 %v18793_v59  ;;  %4211 = vmatmul.mubr.f32.gmra.mxu1 %v18911_v42  ;;  %v24549_v42 = vld [vmem:[#allocation42_spill] sm:$0xff] }
 0x29a   : > { %13151 = vmatprep.subr.mxu1 %v18481_v26  ;;  %13062 = vmatpush3.msra.mxu0 %v18801_v63  ;;  %v3971_v53 = vand.u32 4294901760, %v3970_v2  ;;  %v24543_v2 = vld [vmem:[#allocation35_spill] sm:$0xff] }
 0x29b   : > { %13152 = vmatpush3.msra.mxu1 %v18488_v49  ;;  %4462 = vmatprep.mubr.f32.mxu1 %v24532_v43  ;;  %v24544_v43 = vld [vmem:[#allocation38_spill] sm:$0xff] }
 0x29c   : > { %13063 = vmatprep.subr.mxu0 %v18809_v7  ;;  %13153 = vmatprep.subr.mxu1 %v24533_v11 }
 0x29d   : > { %13064 = vmatpush3.msra.mxu0 %v18819_v3  ;;  %13154 = vmatpush3.msra.mxu1 %v18497_v39 }
 0x29e   : > { %3957 = vmatmul.mubr.f32.vlgmr.msra.gmra.mxu0 %v3956_v51  ;;  %13109 = vmatprep.subr.mxu0 %v24534_v22  ;;  %v24542_v51 = vld [vmem:[#allocation28_spill] sm:$0xff] }
 0x29f   : > { %13155 = vmatprep.subr.mxu1 %v24535_v62  ;;  %3966 = vmatprep.mubr.f32.mxu0 %v3965_v16 }
 0x2a0   : > { %13110 = vmatpush3.msra.mxu0 %v24536_v24  ;;  %13156 = vmatpush3.msra.mxu1 %v18532_v0 }
 0x2a1   : > { %13111 = vmatprep.subr.mxu0 %v24537_v46  ;;  %13157 = vmatprep.subr.mxu1 %v18545_v48 }
 0x2a2   : > { %13112 = vmatpush3.msra.mxu0 %v24538_v28  ;;  %13158 = vmatpush3.msra.mxu1 %v18552_v38 }
 0x2a3   : > { %3972 = vmatmul.mubr.f32.gmra.mxu0 %v3971_v53  ;;  %13113 = vmatprep.subr.mxu0 %v24539_v57 }
 0x2a4   : > { %13159 = vmatprep.subr.mxu1 %v18565_v15  ;;  %13114 = vmatpush3.msra.mxu0 %v24540_v17 }
 0x2a5   : > { %4346 = vmatprep.mubr.f32.mxu0 %v24531_v20  ;;  %13160 = vmatpush3.msra.mxu1 %v18574_v5  ;;  %v24545_v20 = vld [vmem:[#allocation39_spill] sm:$0xff] }
 0x2a6   : > { %13115 = vmatprep.subr.mxu0 %v24541_v56  ;;  %13161 = vmatprep.subr.mxu1 %v18583_v8  ;;  %v12843_v61 = vpop.f32.mrf.mxu1 }
 0x2a7   : > { %13116 = vmatpush3.msra.mxu0 %v24542_v51  ;;  %13162 = vmatpush3.msra.mxu1 %v18593_v55 }
 0x2a8   : > { %13117 = vmatprep.subr.mxu0 %v24543_v2  ;;  %13163 = vmatprep.subr.mxu1 %v18630_v47  ;;  %v12844_v16 = vpop.f32.mrf.mxu1 }
 0x2a9   : > { %13118 = vmatpush3.msra.mxu0 %v24544_v43  ;;  %13164 = vmatpush3.msra.mxu1 %v18632_v13  ;;  %v12845_v53 = vadd.f32 %v12844_v16, %v12843_v61  ;;  %v24550_v61 = vld [vmem:[#allocation21_spill] sm:$0xff] }
 0x2aa   : > { %13119 = vmatprep.subr.mxu0 %v24545_v20  ;;  %13165 = vmatprep.subr.mxu1 %v18655_v27 }
 0x2ab   : > { %13120 = vmatpush3.msra.mxu0 %v24546_v37  ;;  %13166 = vmatpush3.msra.mxu1 %v18692_v33  ;;  %v12846_v18 = vpop.f32.mrf.mxu1 }
 0x2ac   : > { %13121 = vmatprep.subr.mxu0 %v24547_v52  ;;  %13167 = vmatprep.subr.mxu1 %v18706_v19  ;;  %v24552_v19 = vld [vmem:[#allocation24_spill] sm:$0xff] }
 0x2ad   : > { %13122 = vmatpush3.msra.mxu0 %v24548_v25  ;;  %13168 = vmatpush3.msra.mxu1 %v18715_v31  ;;  %v12847_v29 = vpop.f32.mrf.mxu1  ;;  %v24553_v31 = vld [vmem:[#allocation31_spill] sm:$0xff] }
 0x2ae   : > { %13123 = vmatprep.subr.mxu0 %v24549_v42  ;;  %13169 = vmatprep.subr.mxu1 %v18717_v1  ;;  %v12848_v16 = vadd.f32 %v12847_v29, %v12846_v18  ;;  %v24554_v1 = vld [vmem:[#allocation32_spill] sm:$0xff]  ;;  %v24555_v29 = vld [vmem:[#allocation29_spill] sm:$0xff] }
 0x2af   : > { %13124 = vmatpush3.msra.mxu0 %v24550_v61  ;;  %13170 = vmatpush3.msra.mxu1 %v18738_v34  ;;  %v24556_v18 = vld [vmem:[#allocation36_spill] sm:$0xff] }
 0x2b0   : > { %13125 = vmatprep.subr.mxu0 %v24551_v35  ;;  %v12805_v52 = vpop.f32.mrf.mxu0  ;;  %13171 = vmatprep.subr.mxu1 %v18746_v10 }
 0x2b1   : > { %13126 = vmatpush3.msra.mxu0 %v24552_v19  ;;  %13172 = vmatpush3.msra.mxu1 %v18757_v36 }
 0x2b2   : > { %13127 = vmatprep.subr.mxu0 %v24553_v31  ;;  %v12806_v42 = vpop.f32.mrf.mxu0  ;;  %13173 = vmatprep.subr.mxu1 %v18771_v54  ;;  %v24557_v31 = vld [vmem:[#allocation43_spill] sm:$0xff] }
 0x2b3   : > { %13128 = vmatpush3.msra.mxu0 %v24554_v1  ;;  %v12807_v61 = vadd.f32 %v12806_v42, %v12805_v52  ;;  %13174 = vmatpush3.msra.mxu1 %v18779_v12 }
 0x2b4   : > { %13129 = vmatprep.subr.mxu0 %v24555_v29  ;;  %13175 = vmatprep.subr.mxu1 %v18793_v59 }
 0x2b5   : > { %13130 = vmatpush3.msra.mxu0 %v24556_v18  ;;  %v2666_v19 = vadd.f32 %v12807_v61, %v18923_v14  ;;  %v12808_v10 = vpop.f32.mrf.mxu0  ;;  %13176 = vmatpush3.msra.mxu1 %v18801_v63  ;;  %v24558_v18 = vand.u32 4294901760, %v18906_v6  ;;  %v24559_v14 = vand.u32 4294901760, %v18919_v30 }
 0x2b6   : > { %13131 = vmatprep.subr.mxu0 %v24557_v31  ;;  %13177 = vmatprep.subr.mxu1 %v18809_v7 }
 0x2b7   : > { %13132 = vmatpush3.msra.mxu0 %v18777_v32  ;;  %v19012_v42 = vadd.f32 %v12845_v53, %v2666_v19  ;;  %v12809_v52 = vpop.f32.mrf.mxu0  ;;  %13178 = vmatpush3.msra.mxu1 %v18819_v3  ;;  %v24560_v19 = vld [vmem:[#allocation46_spill] sm:$0xff]  ;;  %v24562_v53 = vand.u32 4294901760, %v18926_v41 }
 0x2b8   : > { %13133 = vmatprep.subr.mxu0 %v18791_v4  ;;  %v12810_v59 = vadd.f32 %v12809_v52, %v12808_v10  ;;  %4466 = vmatmul.mubr.f32.vlgmr.msra.gmra.mxu1 %v24558_v18  ;;  %v3816_v52 = vld [vmem:[#allocation4 + $0x450] sm:$0xff] }
 0x2b9   : > { %13223 = vmatprep.subr.mxu1 %v18442_v50  ;;  %13134 = vmatpush3.msra.mxu0 %v18799_v45  ;;  %v24561_v50 = vld [vmem:[#allocation44_spill] sm:$0xff] }
 0x2ba   : > { %4473 = vmatprep.mubr.f32.mxu1 %v24559_v14  ;;  %v2675_v61 = vadd.f32 %v12810_v59, %v18943_v23  ;;  %13224 = vmatpush3.msra.mxu1 %v18444_v58  ;;  %v24563_v59 = vld [vmem:[#allocation47_spill] sm:$0xff]  ;;  %v24564_v58 = vld [vmem:[#allocation14_spill] sm:$0xff]  ;;  %v24571_v23 = vand.u32 4294901760, %v24541_v56 }
 0x2bb   : > { %13135 = vmatprep.subr.mxu0 %v18807_v40  ;;  %13225 = vmatprep.subr.mxu1 %v18452_v21  ;;  %v24565_v21 = vand.u32 4294901760, %v24534_v22  ;;  %v24584_v14 = vld [vmem:[#allocation27_spill] sm:$0xff] }
 0x2bc   : > { %13136 = vmatpush3.msra.mxu0 %v24560_v19  ;;  %v19027_v10 = vadd.f32 %v12848_v16, %v2675_v61  ;;  %13226 = vmatpush3.msra.mxu1 %v18467_v44  ;;  %v24566_v44 = vand.u32 4294901760, %v24536_v24  ;;  %v24585_v61 = vld [vmem:[#allocation21_spill] sm:$0xff] }
 0x2bd   : > { %13137 = vmatprep.subr.mxu0 %v24561_v50  ;;  %4477 = vmatmul.mubr.f32.gmra.mxu1 %v24562_v53  ;;  %v24586_v53 = vand.u32 4294901760, %v24585_v61 }
 0x2be   : > { %13227 = vmatprep.subr.mxu1 %v18481_v26  ;;  %13138 = vmatpush3.msra.mxu0 %v24563_v59  ;;  %v24567_v26 = vand.u32 4294901760, %v24537_v46  ;;  %v24575_v46 = vand.u32 4294901760, %v24545_v20  ;;  %v24582_v20 = vld [vmem:[#allocation42_spill] sm:$0xff] }
 0x2bf   : > { %13228 = vmatpush3.msra.mxu1 %v18488_v49  ;;  %4754 = vmatprep.mubr.f32.mxu1 %v24564_v58  ;;  %v24568_v49 = vand.u32 4294901760, %v24538_v28 }
 0x2c0   : > { %13139 = vmatprep.subr.mxu0 %v18844_v9  ;;  %13229 = vmatprep.subr.mxu1 %v24533_v11  ;;  %v24573_v11 = vand.u32 4294901760, %v24543_v2  ;;  %v24579_v2 = vld [vmem:[#allocation33_spill] sm:$0xff] }
 0x2c1   : > { %13140 = vmatpush3.msra.mxu0 %v18854_v60  ;;  %13230 = vmatpush3.msra.mxu1 %v18497_v39  ;;  %v3821_v39 = vld [vmem:[#allocation4 + $0x478] sm:$0xff] }
 0x2c2   : > { %4349 = vmatmul.mubr.f32.vlgmr.msra.gmra.mxu0 %v18906_v6  ;;  %13185 = vmatprep.subr.mxu0 %v24565_v21  ;;  %v24569_v6 = vand.u32 4294901760, %v24539_v57  ;;  %v3817_v57 = vld [vmem:[#allocation4 + $0x458] sm:$0xff] }
 0x2c3   : > { %13231 = vmatprep.subr.mxu1 %v24535_v62  ;;  %4355 = vmatprep.mubr.f32.mxu0 %v18919_v30  ;;  %v19062_v30 = vand.u32 4294901760, %v3821_v39  ;;  %v19109_v18 = vand.u32 4294901760, %v3817_v57 }
 0x2c4   : > { %13186 = vmatpush3.msra.mxu0 %v24566_v44  ;;  %13232 = vmatpush3.msra.mxu1 %v18532_v0  ;;  %v24570_v0 = vand.u32 4294901760, %v24540_v17  ;;  %v24577_v17 = vld [vmem:[#allocation41_spill] sm:$0xff] }
 0x2c5   : > { %13187 = vmatprep.subr.mxu0 %v24567_v26  ;;  %13233 = vmatprep.subr.mxu1 %v18545_v48  ;;  %v3820_v48 = vld [vmem:[#allocation4 + $0x470] sm:$0xff]  ;;  %v19079_v62 = vsub.f32 %v3821_v39, %v19062_v30  ;;  %v24578_v56 = vand.u32 4294901760, %v24577_v17  ;;  %v3815_v26 = vld [vmem:[#allocation4 + $0x448] sm:$0xff] }
 0x2c6   : > { %13188 = vmatpush3.msra.mxu0 %v24568_v49  ;;  %13234 = vmatpush3.msra.mxu1 %v18552_v38  ;;  %v24572_v38 = vand.u32 4294901760, %v24542_v51  ;;  %v19073_v22 = vand.u32 4294901760, %v3820_v48  ;;  %v24588_v49 = vld [vmem:[#allocation37_spill] sm:$0xff]  ;;  %v24589_v39 = vld [vmem:[#allocation24_spill] sm:$0xff] }
 0x2c7   : > { %4358 = vmatmul.mubr.f32.gmra.mxu0 %v18926_v41  ;;  %13189 = vmatprep.subr.mxu0 %v24569_v6  ;;  %v3819_v41 = vld [vmem:[#allocation4 + $0x468] sm:$0xff]  ;;  %v24590_v6 = vand.u32 4294901760, %v24589_v39 }
 0x2c8   : > { %13235 = vmatprep.subr.mxu1 %v18565_v15  ;;  %13190 = vmatpush3.msra.mxu0 %v24570_v0  ;;  %v19093_v51 = vsub.f32 %v3820_v48, %v19073_v22 }
 0x2c9   : > { %4643 = vmatprep.mubr.f32.mxu0 %v24564_v58  ;;  %13236 = vmatpush3.msra.mxu1 %v18574_v5  ;;  %v24574_v5 = vand.u32 4294901760, %v24544_v43  ;;  %v24580_v43 = vand.u32 4294901760, %v24548_v25  ;;  %v24587_v58 = vand.u32 4294901760, %v24551_v35  ;;  %v24591_v35 = vld [vmem:[#allocation31_spill] sm:$0xff] }
 0x2ca   : > { %13191 = vmatprep.subr.mxu0 %v24571_v23  ;;  %13237 = vmatprep.subr.mxu1 %v18583_v8  ;;  %v12919_v15 = vpop.f32.mrf.mxu1  ;;  %v3818_v8 = vld [vmem:[#allocation4 + $0x460] sm:$0xff]  ;;  %v19118_v21 = vand.u32 4294901760, %v19093_v51  ;;  %v24592_v23 = vand.u32 4294901760, %v24591_v35 }
 0x2cb   : > { %13192 = vmatpush3.msra.mxu0 %v24572_v38  ;;  %13238 = vmatpush3.msra.mxu1 %v18593_v55  ;;  %v19084_v55 = vand.u32 4294901760, %v3819_v41 }
 0x2cc   : > { %13193 = vmatprep.subr.mxu0 %v24573_v11  ;;  %13239 = vmatprep.subr.mxu1 %v18630_v47  ;;  %v12920_v24 = vpop.f32.mrf.mxu1  ;;  %v24576_v47 = vand.u32 4294901760, %v24546_v37  ;;  %v24581_v37 = vld [vmem:[#allocation34_spill] sm:$0xff]  ;;  %v24593_v11 = vand.u32 4294901760, %v24554_v1  ;;  %v24596_v1 = vld [vmem:[#allocation36_spill] sm:$0xff] }
 0x2cd   : > { %13194 = vmatpush3.msra.mxu0 %v24574_v5  ;;  %13240 = vmatpush3.msra.mxu1 %v18632_v13  ;;  %v12921_v28 = vadd.f32 %v12920_v24, %v12919_v15  ;;  %v19095_v13 = vand.u32 4294901760, %v3818_v8  ;;  %v19107_v16 = vsub.f32 %v3819_v41, %v19084_v55  ;;  %v19137_v41 = vsub.f32 %v3817_v57, %v19109_v18  ;;  %v24595_v57 = vld [vmem:[#allocation45_spill] sm:$0xff] }
 0x2ce   : > { %13195 = vmatprep.subr.mxu0 %v24575_v46  ;;  %13241 = vmatprep.subr.mxu1 %v18655_v27  ;;  %v19101_v27 = vand.u32 4294901760, %v19079_v62  ;;  %v19142_v5 = vand.u32 4294901760, %v3815_v26  ;;  %v4880_v24 = vsub.f32 %v19093_v51, %v19118_v21  ;;  %v24597_v17 = vand.u32 4294901760, %v24596_v1 }
 0x2cf   : > { %13196 = vmatpush3.msra.mxu0 %v24576_v47  ;;  %13242 = vmatpush3.msra.mxu1 %v18692_v33  ;;  %v24583_v33 = vand.u32 4294901760, %v24582_v20  ;;  %v19121_v44 = vsub.f32 %v3818_v8, %v19095_v13  ;;  %v19134_v38 = vand.u32 4294901760, %v19107_v16  ;;  %v3814_v8 = vld [vmem:[#allocation4 + $0x440] sm:$0xff]  ;;  %v24607_v1 = vand.u32 4294901760, %v24563_v59 }
 0x2d0   : > { %13197 = vmatprep.subr.mxu0 %v24578_v56  ;;  %13243 = vmatprep.subr.mxu1 %v24579_v2  ;;  %v4873_v0 = vsub.f32 %v19079_v62, %v19101_v27  ;;  %v24598_v2 = vand.u32 4294901760, %v24557_v31  ;;  %v19167_v20 = vand.u32 4294901760, %v3814_v8  ;;  %v19175_v31 = vsub.f32 %v3815_v26, %v19142_v5 }
 0x2d1   : > { %13198 = vmatpush3.msra.mxu0 %v24580_v43  ;;  %13244 = vmatpush3.msra.mxu1 %v24581_v37  ;;  %v19150_v46 = vand.u32 4294901760, %v19121_v44  ;;  %v4887_v43 = vsub.f32 %v19107_v16, %v19134_v38 }
 0x2d2   : > { %13199 = vmatprep.subr.mxu0 %v24583_v33  ;;  %13245 = vmatprep.subr.mxu1 %v24584_v14  ;;  %v4874_v56 = vand.u32 4294901760, %v4873_v0  ;;  %v3812_v33 = vld [vmem:[#allocation4 + $0x430] sm:$0xff]  ;;  %v19197_v35 = vsub.f32 %v3814_v8, %v19167_v20 }
 0x2d3   : > { %13200 = vmatpush3.msra.mxu0 %v24586_v53  ;;  %v12881_v25 = vpop.f32.mrf.mxu0  ;;  %13246 = vmatpush3.msra.mxu1 %v18738_v34  ;;  %v19128_v34 = vand.u32 4294901760, %v3816_v52  ;;  %v24600_v53 = vand.u32 4294901760, %v18791_v4  ;;  %v19189_v39 = vand.u32 4294901760, %v3812_v33  ;;  %v24602_v4 = vand.u32 4294901760, %v18799_v45 }
 0x2d4   : > { %13201 = vmatprep.subr.mxu0 %v24587_v58  ;;  %13247 = vmatprep.subr.mxu1 %v24588_v49  ;;  %v4888_v0 = vand.u32 4294901760, %v4887_v43  ;;  %v24605_v45 = vand.u32 4294901760, %v24560_v19  ;;  %v3809_v19 = vld [vmem:[#allocation4 + $0x418] sm:$0xff]  ;;  %v3808_v43 = vld [vmem:[#allocation4 + $0x410] sm:$0xff] }
 0x2d5   : > { %13202 = vmatpush3.msra.mxu0 %v24590_v6  ;;  %v12882_v48 = vpop.f32.mrf.mxu0  ;;  %13248 = vmatpush3.msra.mxu1 %v18757_v36  ;;  %v24594_v36 = vand.u32 4294901760, %v24555_v29  ;;  %v3813_v29 = vld [vmem:[#allocation4 + $0x438] sm:$0xff] }
 0x2d6   : > { %13203 = vmatprep.subr.mxu0 %v24592_v23  ;;  %v12883_v15 = vadd.f32 %v12882_v48, %v12881_v25  ;;  %13249 = vmatprep.subr.mxu1 %v18771_v54  ;;  %v4881_v25 = vand.u32 4294901760, %v4880_v24  ;;  %v19182_v58 = vand.u32 4294901760, %v3813_v29  ;;  %v24603_v6 = vld [vmem:[#allocation50_spill] sm:$0xff] }
 0x2d7   : > { %13204 = vmatpush3.msra.mxu0 %v24593_v11  ;;  %13250 = vmatpush3.msra.mxu1 %v18779_v12  ;;  %v19157_v12 = vsub.f32 %v3816_v52, %v19128_v34  ;;  %v24599_v52 = vand.u32 4294901760, %v18777_v32  ;;  %v3810_v11 = vld [vmem:[#allocation4 + $0x420] sm:$0xff] }
 0x2d8   : > { %13205 = vmatprep.subr.mxu0 %v24594_v36  ;;  %v2962_v47 = vadd.f32 %v12883_v15, %v19012_v42  ;;  %v12884_v54 = vpop.f32.mrf.mxu0  ;;  %13251 = vmatprep.subr.mxu1 %v24595_v57  ;;  %v19165_v42 = vand.u32 4294901760, %v19137_v41  ;;  %v19202_v15 = vand.u32 4294901760, %v19175_v31  ;;  %v19207_v24 = vsub.f32 %v3813_v29, %v19182_v58 }
 0x2d9   : > { %13206 = vmatpush3.msra.mxu0 %v24597_v17  ;;  %13252 = vmatpush3.msra.mxu1 %v18801_v63  ;;  %v19186_v32 = vand.u32 4294901760, %v19157_v12  ;;  %v19218_v57 = vsub.f32 %v3812_v33, %v19189_v39  ;;  %v19225_v29 = vand.u32 4294901760, %v3810_v11 }
 0x2da   : > { %13207 = vmatprep.subr.mxu0 %v24598_v2  ;;  %v12885_v37 = vpop.f32.mrf.mxu0  ;;  %v19169_v14 = vadd.f32 %v12921_v28, %v2962_v47  ;;  %13253 = vmatprep.subr.mxu1 %v18809_v7  ;;  %v4894_v28 = vsub.f32 %v19121_v44, %v19150_v46  ;;  %v24601_v7 = vld [vmem:[#allocation49_spill] sm:$0xff]  ;;  %v4901_v48 = vsub.f32 %v19137_v41, %v19165_v42  ;;  %v19234_v59 = vand.u32 4294901760, %v19207_v24 }
 0x2db   : > { %13208 = vmatpush3.msra.mxu0 %v24599_v52  ;;  %v12886_v63 = vadd.f32 %v12885_v37, %v12884_v54  ;;  %v12922_v61 = vpop.f32.mrf.mxu1  ;;  %13254 = vmatpush3.msra.mxu1 %v18819_v3  ;;  %v3811_v3 = vld [vmem:[#allocation4 + $0x428] sm:$0xff]  ;;  %v4908_v54 = vsub.f32 %v19157_v12, %v19186_v32  ;;  %v4915_v2 = vsub.f32 %v19175_v31, %v19202_v15  ;;  %v24609_v37 = vand.u32 4294901760, %v18854_v60 }
 0x2dc   : > { %13209 = vmatprep.subr.mxu0 %v24600_v53  ;;  %4756 = vmatmul.mubr.f32.vlgmr.msra.gmra.mxu1 %v24601_v7  ;;  %v4895_v36 = vand.u32 4294901760, %v4894_v28  ;;  %v19209_v47 = vand.u32 4294901760, %v3811_v3  ;;  %v4902_v17 = vand.u32 4294901760, %v4901_v48  ;;  %v19239_v52 = vand.u32 4294901760, %v3809_v19 }
 0x2dd   : > { %15168 = vmatprep.subr.mxu1 %v4874_v56  ;;  %v2969_v26 = vadd.f32 %v12886_v63, %v19027_v10  ;;  %v12923_v49 = vpop.f32.mrf.mxu1  ;;  %13210 = vmatpush3.msra.mxu0 %v24602_v4  ;;  %v24604_v10 = vand.u32 4294901760, %v18807_v40  ;;  %v24606_v40 = vand.u32 4294901760, %v24561_v50  ;;  %v24608_v50 = vand.u32 4294901760, %v18844_v9 }
 0x2de   : > { %4761 = vmatprep.mubr.f32.mxu1 %v24603_v6  ;;  %v12924_v23 = vadd.f32 %v12923_v49, %v12922_v61  ;;  %15169 = vmatpush3.msra.mxu1 %v4874_v56  ;;  %v19223_v56 = vand.u32 4294901760, %v19197_v35  ;;  %v19237_v33 = vsub.f32 %v3811_v3, %v19209_v47  ;;  %v4909_v9 = vand.u32 4294901760, %v4908_v54  ;;  %v3807_v61 = vld [vmem:[#allocation4 + $0x408] sm:$0xff] }
 0x2df   : > { %13211 = vmatprep.subr.mxu0 %v24604_v10  ;;  %15170 = vmatprep.subr.mxu1 %v4881_v25  ;;  %v19243_v63 = vand.u32 4294901760, %v19218_v57  ;;  %v19249_v53 = vsub.f32 %v3810_v11, %v19225_v29  ;;  %v4916_v28 = vand.u32 4294901760, %v4915_v2  ;;  %v19262_v3 = vsub.f32 %v3809_v19, %v19239_v52 }
 0x2e0   : > { %13212 = vmatpush3.msra.mxu0 %v24605_v45  ;;  %v19211_v8 = vadd.f32 %v12924_v23, %v2969_v26  ;;  %15171 = vmatpush3.msra.mxu1 %v4881_v25  ;;  %v4922_v60 = vsub.f32 %v19197_v35, %v19223_v56  ;;  %v19251_v25 = vand.u32 4294901760, %v3808_v43  ;;  %v4929_v26 = vsub.f32 %v19207_v24, %v19234_v59  ;;  %v3769_v45 = vld [vmem:[#allocation3 + $0x10] sm:$0xfc] }
 0x2e1   : > { %13213 = vmatprep.subr.mxu0 %v24606_v40  ;;  %15172 = vmatprep.subr.mxu1 %v4888_v0  ;;  %v19259_v49 = vand.u32 4294901760, %v19237_v33  ;;  %v19264_v4 = vand.u32 4294901760, %v3807_v61  ;;  %v19271_v23 = vand.u32 4294901760, %v19249_v53  ;;  %v19283_v19 = vand.u32 4294901760, %v19262_v3 }
 0x2e2   : > { %13214 = vmatpush3.msra.mxu0 %v24607_v1  ;;  %15173 = vmatpush3.msra.mxu1 %v4888_v0  ;;  %v24610_v0 = vld [vmem:[#allocation51_spill] sm:$0xff]  ;;  %v4923_v48 = vand.u32 4294901760, %v4922_v60  ;;  %v19274_v10 = vsub.f32 %v3808_v43, %v19251_v25  ;;  %v4930_v40 = vand.u32 4294901760, %v4929_v26  ;;  %v24614_v26 = vld [vmem:[#allocation48_spill] sm:$0xff] }
 0x2e3   : > { %13215 = vmatprep.subr.mxu0 %v24608_v50  ;;  %15174 = vmatprep.subr.mxu1 %v4895_v36  ;;  %v4943_v54 = vsub.f32 %v19237_v33, %v19259_v49  ;;  %24611 = vst [vmem:[#allocation23_spill] sm:$0xff] %v19283_v19  ;;  %v19286_v1 = vsub.f32 %v3807_v61, %v19264_v4  ;;  %v3835_v50 = vrot.slane %v3769_v45, 2 }
 0x2e4   : > { %13216 = vmatpush3.msra.mxu0 %v24609_v37  ;;  %15175 = vmatpush3.msra.mxu1 %v4895_v36  ;;  %v3772_v36 = vld [vmem:[#allocation3 + $0x40] sm:$0x3]  ;;  %v4950_v2 = vsub.f32 %v19249_v53, %v19271_v23  ;;  %v19294_v43 = vand.u32 4294901760, %v19274_v10  ;;  %v4957_v60 = vsub.f32 %v19262_v3, %v19283_v19 }
 0x2e5   : > { %4645 = vmatmul.mubr.f32.vlgmr.msra.gmra.mxu0 %v24601_v7  ;;  %15133 = vmatprep.subr.mxu0 %v19062_v30  ;;  %v3806_v7 = vld [vmem:[#allocation4 + $0x400] sm:$0xff]  ;;  %v4944_v61 = vand.u32 4294901760, %v4943_v54 }
 0x2e6   : > { %15176 = vmatprep.subr.mxu1 %v4902_v17  ;;  %4650 = vmatprep.mubr.f32.mxu0 %v24603_v6  ;;  %v4936_v6 = vsub.f32 %v19218_v57, %v19243_v63  ;;  %v19276_v11 = vand.u32 4294901760, %v3806_v7  ;;  %24612 = vst [vmem:[#allocation17_spill] sm:$0xff] %v19294_v43 }
 0x2e7   : > { %15134 = vmatpush3.msra.mxu0 %v19062_v30  ;;  %15177 = vmatpush3.msra.mxu1 %v4902_v17 }
 0x2e8   : > { %15135 = vmatprep.subr.mxu0 %v19073_v22  ;;  %15178 = vmatprep.subr.mxu1 %v4909_v9  ;;  %v4937_v17 = vand.u32 4294901760, %v4936_v6  ;;  %v19297_v37 = vsub.f32 %v3806_v7, %v19276_v11  ;;  %v3837_v7 = vsel %vm3828_vm4, %v3835_v50, %v24614_v26  ;;  %v4951_v6 = vand.u32 4294901760, %v4950_v2 }
 0x2e9   : > { %15136 = vmatpush3.msra.mxu0 %v19073_v22  ;;  %15179 = vmatpush3.msra.mxu1 %v4909_v9  ;;  %v3842_v9 = vrot.slane %v3772_v36, 2  ;;  %v4958_v36 = vand.u32 4294901760, %v4957_v60  ;;  %v19321_v54 = vand.u32 4294901760, %v3837_v7 }
 0x2ea   : > { %4652 = vmatmul.mubr.f32.gmra.mxu0 %v24610_v0  ;;  %15137 = vmatprep.subr.mxu0 %v19084_v55 }
 0x2eb   : > { %15180 = vmatprep.subr.mxu1 %v4916_v28  ;;  %15138 = vmatpush3.msra.mxu0 %v19084_v55  ;;  %v3843_v45 = vsel %vm3828_vm4, %v24614_v26, %v3842_v9  ;;  %v19332_v26 = vsub.f32 %v3837_v7, %v19321_v54 }
 0x2ec   : > { %15181 = vmatpush3.msra.mxu1 %v4916_v28  ;;  %15139 = vmatprep.subr.mxu0 %v19095_v13  ;;  %v19304_v28 = vand.u32 4294901760, %v19286_v1  ;;  %v19324_v50 = vand.u32 4294901760, %v3843_v45 }
 0x2ed   : > { %4763 = vmatmul.mubr.f32.gmra.mxu1 %v24610_v0  ;;  %15182 = vmatprep.subr.mxu1 %v4923_v48  ;;  %v4964_v0 = vsub.f32 %v19274_v10, %v19294_v43 }
 0x2ee   : > { %15140 = vmatpush3.msra.mxu0 %v19095_v13  ;;  %15183 = vmatpush3.msra.mxu1 %v4923_v48  ;;  %24613 = vst [vmem:[#allocation15_spill] sm:$0xff] %v19304_v28  ;;  %v19313_v48 = vand.u32 4294901760, %v19297_v37 }
 0x2ef   : > { %15141 = vmatprep.subr.mxu0 %v19109_v18  ;;  %15184 = vmatprep.subr.mxu1 %v4930_v40  ;;  %v14992_v2 = vpop.f32.mrf.mxu1 }
 0x2f0   : > { %15142 = vmatpush3.msra.mxu0 %v19109_v18  ;;  %15185 = vmatpush3.msra.mxu1 %v4930_v40  ;;  %24615 = vst [vmem:[#allocation22_spill] sm:$0xff] %v19313_v48  ;;  %v4971_v40 = vsub.f32 %v19286_v1, %v19304_v28  ;;  %v4978_v9 = vsub.f32 %v19297_v37, %v19313_v48 }
 0x2f1   : > { %15143 = vmatprep.subr.mxu0 %v19128_v34  ;;  %15186 = vmatprep.subr.mxu1 %v4937_v17 }
 0x2f2   : > { %15144 = vmatpush3.msra.mxu0 %v19128_v34  ;;  %15187 = vmatpush3.msra.mxu1 %v4937_v17  ;;  %v4965_v17 = vand.u32 4294901760, %v4964_v0  ;;  %v19337_v0 = vsub.f32 %v3843_v45, %v19324_v50  ;;  %v4979_v43 = vand.u32 4294901760, %v4978_v9  ;;  %v5474_v9 = vld [vmem:[#allocation4 + $0x4e8] sm:$0xff] }
 0x2f3   : > { %15145 = vmatprep.subr.mxu0 %v19142_v5  ;;  %15188 = vmatprep.subr.mxu1 %v4944_v61 }
 0x2f4   : > { %15146 = vmatpush3.msra.mxu0 %v19142_v5  ;;  %15189 = vmatpush3.msra.mxu1 %v4944_v61  ;;  %v4972_v61 = vand.u32 4294901760, %v4971_v40  ;;  %v4861_v45 = vand.u32 4294901760, %v19337_v0 }
 0x2f5   : > { %15147 = vmatprep.subr.mxu0 %v19167_v20  ;;  %15190 = vmatprep.subr.mxu1 %v4951_v6 }
 0x2f6   : > { %15148 = vmatpush3.msra.mxu0 %v19167_v20  ;;  %15191 = vmatpush3.msra.mxu1 %v4951_v6  ;;  %v14957_v60 = vpop.f32.mrf.mxu0  ;;  %v3331_v6 = vpop.f32.mrf.mxu1 }
 0x2f7   : > { %15149 = vmatprep.subr.mxu0 %v19182_v58  ;;  %15192 = vmatprep.subr.mxu1 %v4958_v36  ;;  %v3181_v28 = vadd.f32 %v14957_v60, %v19211_v8  ;;  %v4851_v8 = vand.u32 4294901760, %v19332_v26  ;;  %v5489_v60 = vld [vmem:[#allocation4 + $0x560] sm:$0xff] }
 0x2f8   : > { %15150 = vmatpush3.msra.mxu0 %v19182_v58  ;;  %15193 = vmatpush3.msra.mxu1 %v4958_v36  ;;  %v3170_v48 = vpop.f32.mrf.mxu0 }
 0x2f9   : > { %15151 = vmatprep.subr.mxu0 %v19189_v39  ;;  %15194 = vmatprep.subr.mxu1 %v4965_v17  ;;  %v19340_v19 = vadd.f32 %v14992_v2, %v3181_v28  ;;  %v3171_v40 = vadd.f32 %v3170_v48, %v19169_v14  ;;  %v4852_v14 = vsub.f32 %v19332_v26, %v4851_v8 }
 0x2fa   : > { %15152 = vmatpush3.msra.mxu0 %v19189_v39  ;;  %15195 = vmatpush3.msra.mxu1 %v4965_v17  ;;  %v4862_v28 = vsub.f32 %v19337_v0, %v4861_v45 }
 0x2fb   : > { %15153 = vmatprep.subr.mxu0 %v19209_v47  ;;  %15196 = vmatprep.subr.mxu1 %v4972_v61  ;;  %v19346_v7 = vadd.f32 %v3331_v6, %v3171_v40  ;;  %v19504_v6 = vand.u32 4294901760, %v5474_v9  ;;  %v5488_v40 = vld [vmem:[#allocation4 + $0x558] sm:$0xff] }
 0x2fc   : > { %15154 = vmatpush3.msra.mxu0 %v19209_v47  ;;  %15197 = vmatpush3.msra.mxu1 %v4972_v61  ;;  %v4863_v48 = vand.u32 4294901760, %v4862_v28  ;;  %v5487_v28 = vld [vmem:[#allocation4 + $0x550] sm:$0xff] }
 0x2fd   : > { %15155 = vmatprep.subr.mxu0 %v19225_v29  ;;  %15198 = vmatprep.subr.mxu1 %v4979_v43 }
 0x2fe   : > { %15156 = vmatpush3.msra.mxu0 %v19225_v29  ;;  %15199 = vmatpush3.msra.mxu1 %v4979_v43  ;;  %v4853_v43 = vand.u32 4294901760, %v4852_v14 }
 0x2ff   : > { %15157 = vmatprep.subr.mxu0 %v19239_v52  ;;  %15200 = vmatprep.mubr.f32.mxu1 %v19321_v54 }
 0x300   : > { %15238 = vmatprep.subr.mxu1 %v19062_v30  ;;  %15158 = vmatpush3.msra.mxu0 %v19239_v52 }
 0x301   : > { %15201 = vmatmul.mubr.f32.vlgmr.msra.gmra.mxu1 %v19324_v50  ;;  %15159 = vmatprep.subr.mxu0 %v19251_v25 }
 0x302   : > { %15239 = vmatpush3.msra.mxu1 %v19062_v30  ;;  %15160 = vmatpush3.msra.mxu0 %v19251_v25 }
 0x303   : > { %15240 = vmatprep.subr.mxu1 %v19073_v22  ;;  %15161 = vmatprep.subr.mxu0 %v19264_v4 }
 0x304   : > { %15241 = vmatpush3.msra.mxu1 %v19073_v22  ;;  %15162 = vmatpush3.msra.mxu0 %v19264_v4 }
 0x305   : > { %15242 = vmatprep.subr.mxu1 %v19084_v55  ;;  %15163 = vmatprep.subr.mxu0 %v19276_v11 }
 0x306   : > { %15243 = vmatpush3.msra.mxu1 %v19084_v55  ;;  %15164 = vmatpush3.msra.mxu0 %v19276_v11 }
 0x307   : > { %15244 = vmatprep.subr.mxu1 %v19095_v13  ;;  %15165 = vmatprep.mubr.f32.mxu0 %v4853_v43  ;;  %v19539_v43 = vsub.f32 %v5474_v9, %v19504_v6 }
 0x308   : > { %15245 = vmatpush3.msra.mxu1 %v19095_v13  ;;  %15166 = vmatmul.mubr.f32.vlgmr.msra.gmra.mxu0 %v4863_v48  ;;  %v19541_v48 = vand.u32 4294901760, %v5488_v40 }
 0x309   : > { %15203 = vmatprep.subr.mxu0 %v19079_v62  ;;  %15246 = vmatprep.subr.mxu1 %v19109_v18  ;;  %24622 = vst [vmem:[#allocation28_spill] sm:$0xff] %v19539_v43 }
 0x30a   : > { %15204 = vmatpush3.msra.mxu0 %v19079_v62  ;;  %15247 = vmatpush3.msra.mxu1 %v19109_v18  ;;  %24623 = vst [vmem:[#allocation35_spill] sm:$0xff] %v19541_v48  ;;  %v19579_v9 = vsub.f32 %v5488_v40, %v19541_v48  ;;  %v5484_v40 = vld [vmem:[#allocation4 + $0x538] sm:$0xff] }
 0x30b   : > { %15205 = vmatprep.subr.mxu0 %v19093_v51  ;;  %15248 = vmatprep.subr.mxu1 %v19128_v34 }
 0x30c   : > { %15206 = vmatpush3.msra.mxu0 %v19093_v51  ;;  %15249 = vmatpush3.msra.mxu1 %v19128_v34  ;;  %24626 = vst [vmem:[#allocation40_spill] sm:$0xff] %v19579_v9 }
 0x30d   : > { %15207 = vmatprep.subr.mxu0 %v19107_v16  ;;  %15250 = vmatprep.subr.mxu1 %v19142_v5 }
 0x30e   : > { %15208 = vmatpush3.msra.mxu0 %v19107_v16  ;;  %15251 = vmatpush3.msra.mxu1 %v19142_v5 }
 0x30f   : > { %15209 = vmatprep.subr.mxu0 %v19121_v44  ;;  %15252 = vmatprep.subr.mxu1 %v19167_v20 }
 0x310   : > { %15210 = vmatpush3.msra.mxu0 %v19121_v44  ;;  %15253 = vmatpush3.msra.mxu1 %v19167_v20 }
 0x311   : > { %15211 = vmatprep.subr.mxu0 %v19137_v41  ;;  %15254 = vmatprep.subr.mxu1 %v19182_v58  ;;  %v15062_v62 = vpop.f32.mrf.mxu1 }
 0x312   : > { %15212 = vmatpush3.msra.mxu0 %v19137_v41  ;;  %15255 = vmatpush3.msra.mxu1 %v19182_v58 }
 0x313   : > { %15213 = vmatprep.subr.mxu0 %v19157_v12  ;;  %15256 = vmatprep.subr.mxu1 %v19189_v39  ;;  %v3537_v41 = vpop.f32.mrf.mxu1 }
 0x314   : > { %15214 = vmatpush3.msra.mxu0 %v19157_v12  ;;  %15257 = vmatpush3.msra.mxu1 %v19189_v39 }
 0x315   : > { %15215 = vmatprep.subr.mxu0 %v19175_v31  ;;  %15258 = vmatprep.subr.mxu1 %v19209_v47 }
 0x316   : > { %15216 = vmatpush3.msra.mxu0 %v19175_v31  ;;  %15259 = vmatpush3.msra.mxu1 %v19209_v47 }
 0x317   : > { %15217 = vmatprep.subr.mxu0 %v19197_v35  ;;  %15260 = vmatprep.subr.mxu1 %v19225_v29 }
 0x318   : > { %15218 = vmatpush3.msra.mxu0 %v19197_v35  ;;  %15261 = vmatpush3.msra.mxu1 %v19225_v29  ;;  %v15027_v51 = vpop.f32.mrf.mxu0 }
 0x319   : > { %15219 = vmatprep.subr.mxu0 %v19207_v24  ;;  %15262 = vmatprep.subr.mxu1 %v19239_v52  ;;  %v3449_v16 = vadd.f32 %v15027_v51, %v19340_v19  ;;  %v5476_v19 = vld [vmem:[#allocation4 + $0x4f8] sm:$0xff] }
 0x31a   : > { %15220 = vmatpush3.msra.mxu0 %v19207_v24  ;;  %15263 = vmatpush3.msra.mxu1 %v19239_v52  ;;  %v3441_v44 = vpop.f32.mrf.mxu0  ;;  %v5455_v24 = vld [vmem:[#allocation3 + $0x8] sm:$0xf8]  ;;  %v19460_v36 = vand.u32 4294901760, %v5476_v19 }
 0x31b   : > { %15221 = vmatprep.subr.mxu0 %v19218_v57  ;;  %15264 = vmatprep.subr.mxu1 %v19251_v25  ;;  %v19415_v12 = vadd.f32 %v15062_v62, %v3449_v16  ;;  %v3442_v31 = vadd.f32 %v3441_v44, %v19346_v7  ;;  %v5471_v62 = vld [vmem:[#allocation4 + $0x4d0] sm:$0xff] }
 0x31c   : > { %15222 = vmatpush3.msra.mxu0 %v19218_v57  ;;  %15265 = vmatpush3.msra.mxu1 %v19251_v25  ;;  %v19433_v57 = vld [vmem:[#allocation3 + $0x20] sm:$0xff]  ;;  %v19479_v17 = vsub.f32 %v5476_v19, %v19460_v36  ;;  %v19568_v19 = vand.u32 4294901760, %v5471_v62 }
 0x31d   : > { %15223 = vmatprep.subr.mxu0 %v19237_v33  ;;  %15266 = vmatprep.subr.mxu1 %v19264_v4  ;;  %v19422_v35 = vadd.f32 %v3537_v41, %v3442_v31 }
 0x31e   : > { %15224 = vmatpush3.msra.mxu0 %v19237_v33  ;;  %15267 = vmatpush3.msra.mxu1 %v19264_v4  ;;  %v23885_v33 = vrot.slane %v19433_v57, 3  ;;  %24618 = vst [vmem:[#allocation26_spill] sm:$0xff] %v19479_v17 }
 0x31f   : > { %15225 = vmatprep.subr.mxu0 %v19249_v53  ;;  %15268 = vmatprep.subr.mxu1 %v19276_v11 }
 0x320   : > { %15226 = vmatpush3.msra.mxu0 %v19249_v53  ;;  %15269 = vmatpush3.msra.mxu1 %v19276_v11  ;;  %v5519_v53 = vrot.slane %v5455_v24, 3  ;;  %v19561_v24 = vand.u32 4294901760, %v5487_v28 }
 0x321   : > { %15227 = vmatprep.subr.mxu0 %v19262_v3  ;;  %15270 = vmatprep.mubr.f32.mxu1 %v4851_v8 }
 0x322   : > { %15308 = vmatprep.subr.mxu1 %v19062_v30  ;;  %15228 = vmatpush3.msra.mxu0 %v19262_v3  ;;  %v5521_v3 = vsel %vm5515_vm5, %v5519_v53, %v23885_v33  ;;  %v5470_v53 = vld [vmem:[#allocation4 + $0x4c8] sm:$0xff] }
 0x323   : > { %15271 = vmatmul.mubr.f32.vlgmr.msra.gmra.mxu1 %v4861_v45  ;;  %15229 = vmatprep.subr.mxu0 %v19274_v10  ;;  %v5472_v45 = vld [vmem:[#allocation4 + $0x4d8] sm:$0xff] }
 0x324   : > { %15309 = vmatpush3.msra.mxu1 %v19062_v30  ;;  %15230 = vmatpush3.msra.mxu0 %v19274_v10  ;;  %v5492_v30 = vld [vmem:[#allocation4 + $0x578] sm:$0xff]  ;;  %v19548_v16 = vand.u32 4294901760, %v5472_v45 }
 0x325   : > { %15310 = vmatprep.subr.mxu1 %v19073_v22  ;;  %15231 = vmatprep.subr.mxu0 %v19286_v1  ;;  %v19458_v10 = vand.u32 4294901760, %v5492_v30 }
 0x326   : > { %15311 = vmatpush3.msra.mxu1 %v19073_v22  ;;  %15232 = vmatpush3.msra.mxu0 %v19286_v1  ;;  %v19454_v22 = vand.u32 4294901760, %v5521_v3  ;;  %v5491_v1 = vld [vmem:[#allocation4 + $0x570] sm:$0xff] }
 0x327   : > { %15312 = vmatprep.subr.mxu1 %v19084_v55  ;;  %15233 = vmatprep.subr.mxu0 %v19297_v37  ;;  %v19476_v2 = vsub.f32 %v5492_v30, %v19458_v10 }
 0x328   : > { %15313 = vmatpush3.msra.mxu1 %v19084_v55  ;;  %15234 = vmatpush3.msra.mxu0 %v19297_v37  ;;  %24616 = vst [vmem:[#allocation25_spill] sm:$0xff] %v19454_v22  ;;  %v5475_v55 = vld [vmem:[#allocation4 + $0x4f0] sm:$0xff]  ;;  %v19468_v37 = vand.u32 4294901760, %v5491_v1 }
 0x329   : > { %15314 = vmatprep.subr.mxu1 %v19095_v13  ;;  %15235 = vmatprep.mubr.f32.mxu0 %v19332_v26  ;;  %24617 = vst [vmem:[#allocation16_spill] sm:$0xff] %v19476_v2  ;;  %v23883_v61 = vand.u32 4294901760, %v19476_v2  ;;  %v23882_v26 = vand.u32 4294901760, %v19479_v17 }
 0x32a   : > { %15315 = vmatpush3.msra.mxu1 %v19095_v13  ;;  %15236 = vmatmul.mubr.f32.vlgmr.msra.gmra.mxu0 %v19337_v0  ;;  %v19471_v13 = vsub.f32 %v5521_v3, %v19454_v22  ;;  %v5473_v0 = vld [vmem:[#allocation4 + $0x4e0] sm:$0xff]  ;;  %v5468_v3 = vld [vmem:[#allocation4 + $0x4b8] sm:$0xff] }
 0x32b   : > { %15273 = vmatprep.subr.mxu0 %v19101_v27  ;;  %15316 = vmatprep.subr.mxu1 %v19109_v18  ;;  %v19513_v8 = vand.u32 4294901760, %v5473_v0 }
 0x32c   : > { %15274 = vmatpush3.msra.mxu0 %v19101_v27  ;;  %15317 = vmatpush3.msra.mxu1 %v19109_v18  ;;  %v19483_v27 = vand.u32 4294901760, %v5475_v55  ;;  %v5490_v18 = vld [vmem:[#allocation4 + $0x568] sm:$0xff] }
 0x32d   : > { %15275 = vmatprep.subr.mxu0 %v19118_v21  ;;  %15318 = vmatprep.subr.mxu1 %v19128_v34  ;;  %v19558_v41 = vsub.f32 %v5473_v0, %v19513_v8  ;;  %v5469_v0 = vld [vmem:[#allocation4 + $0x4c0] sm:$0xff] }
 0x32e   : > { %15276 = vmatpush3.msra.mxu0 %v19118_v21  ;;  %15319 = vmatpush3.msra.mxu1 %v19128_v34  ;;  %v19490_v21 = vsub.f32 %v5491_v1, %v19468_v37  ;;  %v23884_v34 = vand.u32 4294901760, %v19471_v13  ;;  %v5485_v1 = vld [vmem:[#allocation4 + $0x540] sm:$0xff] }
 0x32f   : > { %15277 = vmatprep.subr.mxu0 %v19134_v38  ;;  %15320 = vmatprep.subr.mxu1 %v19142_v5  ;;  %24625 = vst [vmem:[#allocation39_spill] sm:$0xff] %v19558_v41 }
 0x330   : > { %15278 = vmatpush3.msra.mxu0 %v19134_v38  ;;  %15321 = vmatpush3.msra.mxu1 %v19142_v5  ;;  %24619 = vst [vmem:[#allocation18_spill] sm:$0xff] %v19490_v21  ;;  %v19497_v38 = vand.u32 4294901760, %v5490_v18  ;;  %v19502_v5 = vsub.f32 %v5475_v55, %v19483_v27  ;;  %v19518_v7 = vsub.f32 %v19471_v13, %v23884_v34 }
 0x331   : > { %15279 = vmatprep.subr.mxu0 %v19150_v46  ;;  %15322 = vmatprep.subr.mxu1 %v19167_v20 }
 0x332   : > { %15280 = vmatpush3.msra.mxu0 %v19150_v46  ;;  %15323 = vmatpush3.msra.mxu1 %v19167_v20  ;;  %24620 = vst [vmem:[#allocation20_spill] sm:$0xff] %v19502_v5  ;;  %v19508_v46 = vand.u32 4294901760, %v5489_v60  ;;  %v23880_v20 = vand.u32 4294901760, %v19490_v21  ;;  %v19533_v14 = vsub.f32 %v5490_v18, %v19497_v38  ;;  %v15132_v31 = vpop.f32.mrf.mxu1 }
 0x333   : > { %15281 = vmatprep.subr.mxu0 %v19165_v42  ;;  %15324 = vmatprep.subr.mxu1 %v19182_v58 }
 0x334   : > { %15282 = vmatpush3.msra.mxu0 %v19165_v42  ;;  %15325 = vmatpush3.msra.mxu1 %v19182_v58  ;;  %v19525_v42 = vsub.f32 %v19476_v2, %v23883_v61  ;;  %v19530_v58 = vsub.f32 %v19479_v17, %v23882_v26  ;;  %24621 = vst [vmem:[#allocation13_spill] sm:$0xff] %v19533_v14  ;;  %v23887_v30 = vand.u32 4294901760, %v19533_v14  ;;  %v19590_v26 = vand.u32 4294901760, %v5470_v53  ;;  %v3757_v33 = vpop.f32.mrf.mxu1  ;;  %v5458_v17 = vld [vmem:[#allocation3 + $0x38] sm:$0x7] }
 0x335   : > { %15283 = vmatprep.subr.mxu0 %v19186_v32  ;;  %15326 = vmatprep.subr.mxu1 %v19189_v39  ;;  %v19546_v51 = vsub.f32 %v5489_v60, %v19508_v46  ;;  %v19555_v44 = vsub.f32 %v19490_v21, %v23880_v20  ;;  %v23889_v61 = vand.u32 4294901760, %v19558_v41 }
 0x336   : > { %15284 = vmatpush3.msra.mxu0 %v19186_v32  ;;  %15327 = vmatpush3.msra.mxu1 %v19189_v39  ;;  %v23881_v32 = vand.u32 4294901760, %v19502_v5  ;;  %v5486_v39 = vld [vmem:[#allocation4 + $0x548] sm:$0xff] }
 0x337   : > { %15285 = vmatprep.subr.mxu0 %v19202_v15  ;;  %15328 = vmatprep.subr.mxu1 %v19209_v47  ;;  %24624 = vst [vmem:[#allocation38_spill] sm:$0xff] %v19546_v51  ;;  %v19581_v60 = vand.u32 4294901760, %v5486_v39 }
 0x338   : > { %15286 = vmatpush3.msra.mxu0 %v19202_v15  ;;  %15329 = vmatpush3.msra.mxu1 %v19209_v47  ;;  %v19575_v55 = vsub.f32 %v19502_v5, %v23881_v32  ;;  %v19588_v32 = vsub.f32 %v5472_v45, %v19548_v16  ;;  %v19599_v15 = vand.u32 4294901760, %v5485_v1  ;;  %v19607_v45 = vsub.f32 %v5471_v62, %v19568_v19  ;;  %v5482_v47 = vld [vmem:[#allocation4 + $0x528] sm:$0xff] }
 0x339   : > { %15287 = vmatprep.subr.mxu0 %v19223_v56  ;;  %15330 = vmatprep.subr.mxu1 %v19225_v29 }
 0x33a   : > { %15288 = vmatpush3.msra.mxu0 %v19223_v56  ;;  %15331 = vmatpush3.msra.mxu1 %v19225_v29  ;;  %v23886_v56 = vand.u32 4294901760, %v19539_v43  ;;  %v15097_v18 = vpop.f32.mrf.mxu0  ;;  %v23888_v29 = vand.u32 4294901760, %v19546_v51  ;;  %24627 = vst [vmem:[#allocation19_spill] sm:$0xff] %v19588_v32  ;;  %24630 = vst [vmem:[#allocation29_spill] sm:$0xff] %v19607_v45 }
 0x33b   : > { %15289 = vmatprep.subr.mxu0 %v19234_v59  ;;  %15332 = vmatprep.subr.mxu1 %v19239_v52  ;;  %v3671_v20 = vadd.f32 %v15097_v18, %v19415_v12  ;;  %v19609_v18 = vand.u32 4294901760, %v5469_v0 }
 0x33c   : > { %15290 = vmatpush3.msra.mxu0 %v19234_v59  ;;  %15333 = vmatpush3.msra.mxu1 %v19239_v52  ;;  %v3664_v34 = vpop.f32.mrf.mxu0  ;;  %v19597_v59 = vsub.f32 %v5487_v28, %v19561_v24  ;;  %v19616_v28 = vsub.f32 %v19533_v14, %v23887_v30  ;;  %v19646_v30 = vand.u32 4294901760, %v5484_v40 }
 0x33d   : > { %15291 = vmatprep.subr.mxu0 %v19243_v63  ;;  %15334 = vmatprep.subr.mxu1 %v19251_v25  ;;  %v19603_v12 = vadd.f32 %v15132_v31, %v3671_v20  ;;  %v3665_v52 = vadd.f32 %v3664_v34, %v19422_v35  ;;  %v23890_v35 = vand.u32 4294901760, %v19579_v9  ;;  %v19625_v34 = vsub.f32 %v5486_v39, %v19581_v60  ;;  %v5467_v39 = vld [vmem:[#allocation4 + $0x4b0] sm:$0xff] }
 0x33e   : > { %24628 = vst [vmem:[#allocation30_spill] sm:$0xff] %v19597_v59  ;;  %15292 = vmatpush3.msra.mxu0 %v19243_v63  ;;  %15335 = vmatpush3.msra.mxu1 %v19251_v25  ;;  %v19621_v63 = vsub.f32 %v19539_v43, %v23886_v56  ;;  %v19632_v25 = vsub.f32 %v19546_v51, %v23888_v29  ;;  %v23891_v20 = vand.u32 4294901760, %v19588_v32  ;;  %v5483_v56 = vld [vmem:[#allocation4 + $0x530] sm:$0xff]  ;;  %v19648_v29 = vand.u32 4294901760, %v5468_v3  ;;  %v5462_v43 = vld [vmem:[#allocation4 + $0x488] sm:$0xff] }
 0x33f   : > { %24629 = vst [vmem:[#allocation32_spill] sm:$0xff] %v19603_v12  ;;  %15293 = vmatprep.subr.mxu0 %v19259_v49  ;;  %24631 = vst [vmem:[#allocation43_spill] sm:$0xff] %v19625_v34  ;;  %15336 = vmatprep.subr.mxu1 %v19264_v4  ;;  %v19635_v62 = vadd.f32 %v3757_v33, %v3665_v52  ;;  %v19638_v31 = vsub.f32 %v5470_v53, %v19590_v26  ;;  %v5676_v33 = vand.u32 4294901760, %v19575_v55  ;;  %v24636_v53 = vld [vmem:[#allocation23_spill] sm:$0xff] }
 0x340   : > { %15294 = vmatpush3.msra.mxu0 %v19259_v49  ;;  %15337 = vmatpush3.msra.mxu1 %v19264_v4  ;;  %v19644_v49 = vsub.f32 %v5485_v1, %v19599_v15  ;;  %v19656_v4 = vsub.f32 %v19558_v41, %v23889_v61  ;;  %v19660_v1 = vsub.f32 %v5469_v0, %v19609_v18  ;;  %v5795_v52 = vand.u32 4294901760, %v19616_v28 }
 0x341   : > { %24632 = vst [vmem:[#allocation46_spill] sm:$0xff] %v19635_v62  ;;  %24633 = vst [vmem:[#allocation44_spill] sm:$0xff] %v19638_v31  ;;  %15295 = vmatprep.subr.mxu0 %v19271_v23  ;;  %15338 = vmatprep.subr.mxu1 %v19276_v11  ;;  %v19671_v61 = vand.u32 4294901760, %v5483_v56  ;;  %v5802_v0 = vand.u32 4294901760, %v19632_v25  ;;  %v19680_v28 = vsub.f32 %v19588_v32, %v23891_v20  ;;  %v24637_v55 = vand.u32 4294901760, %v19525_v42  ;;  %v5481_v32 = vld [vmem:[#allocation4 + $0x520] sm:$0xff] }
 0x342   : > { %24634 = vst [vmem:[#allocation47_spill] sm:$0xff] %v19644_v49  ;;  %15296 = vmatpush3.msra.mxu0 %v19271_v23  ;;  %24635 = vst [vmem:[#allocation14_spill] sm:$0xff] %v19660_v1  ;;  %15339 = vmatpush3.msra.mxu1 %v19276_v11  ;;  %v19668_v23 = vsub.f32 %v19579_v9, %v23890_v35  ;;  %v5683_v11 = vand.u32 4294901760, %v19621_v63  ;;  %v24638_v62 = vand.u32 4294901760, %v19597_v59  ;;  %v5466_v35 = vld [vmem:[#allocation4 + $0x4a8] sm:$0xff]  ;;  %v24641_v42 = vand.u32 4294901760, %v19530_v58 }
 0x343   : > { %15340 = vmatprep.mubr.f32.mxu1 %v19321_v54  ;;  %15297 = vmatprep.subr.mxu0 %v24636_v53  ;;  %v19693_v25 = vsub.f32 %v5484_v40, %v19646_v30  ;;  %v19696_v20 = vsub.f32 %v5468_v3, %v19648_v29  ;;  %v19708_v63 = vand.u32 4294901760, %v5467_v39  ;;  %v24643_v3 = vld [vmem:[#allocation17_spill] sm:$0xff]  ;;  %v5465_v40 = vld [vmem:[#allocation4 + $0x4a0] sm:$0xff]  ;;  %v24653_v51 = vand.u32 4294901760, %v19660_v1 }
 0x344   : > { %15341 = vmatmul.mubr.f32.vlgmr.msra.gmra.mxu1 %v19324_v50  ;;  %13407 = vmatprep.subr.mxu1 %v24637_v55  ;;  %v19689_v12 = vsub.f32 %v19597_v59, %v24638_v62  ;;  %v24642_v62 = vand.u32 4294901760, %v19607_v45  ;;  %v24644_v59 = vand.u32 4294901760, %v19555_v44  ;;  %v5809_v58 = vand.u32 4294901760, %v19668_v23 }
 0x345   : > { %15298 = vmatpush3.msra.mxu0 %v24636_v53  ;;  %24639 = vst [vmem:[#allocation41_spill] sm:$0xff] %v19693_v25  ;;  %24640 = vst [vmem:[#allocation33_spill] sm:$0xff] %v19696_v20  ;;  %13408 = vmatpush3.msra.mxu1 %v24641_v42  ;;  %v5690_v53 = vand.u32 4294901760, %v19656_v4  ;;  %v24645_v42 = vand.u32 4294901760, %v19625_v34  ;;  %v24648_v44 = vand.u32 4294901760, %v19638_v31  ;;  %v19731_v23 = vand.u32 4294901760, %v5466_v35 }
 0x346   : > { %5889 = vmatprep.mubr.f32.mxu1 %v19454_v22  ;;  %v19705_v55 = vsub.f32 %v19607_v45, %v24642_v62  ;;  %15299 = vmatprep.subr.mxu0 %v24643_v3  ;;  %v19720_v22 = vsub.f32 %v5483_v56, %v19671_v61  ;;  %v19722_v62 = vand.u32 4294901760, %v5482_v47  ;;  %v5697_v45 = vand.u32 4294901760, %v19680_v28  ;;  %v24651_v56 = vld [vmem:[#allocation15_spill] sm:$0xff]  ;;  %v24655_v28 = vld [vmem:[#allocation22_spill] sm:$0xff] }
 0x347   : > { %13409 = vmatprep.subr.mxu1 %v24644_v59  ;;  %v19717_v4 = vsub.f32 %v19625_v34, %v24645_v42  ;;  %15300 = vmatpush3.msra.mxu0 %v24643_v3  ;;  %v19729_v59 = vsub.f32 %v19638_v31, %v24648_v44  ;;  %24649 = vst [vmem:[#allocation27_spill] sm:$0xff] %v19731_v23  ;;  %v19733_v42 = vand.u32 4294901760, %v5481_v32  ;;  %v5480_v34 = vld [vmem:[#allocation4 + $0x518] sm:$0xff]  ;;  %v5816_v9 = vand.u32 4294901760, %v19689_v12 }
 0x348   : > { %24646 = vst [vmem:[#allocation34_spill] sm:$0xff] %v19720_v22  ;;  %24647 = vst [vmem:[#allocation42_spill] sm:$0xff] %v19722_v62  ;;  %13410 = vmatpush3.msra.mxu1 %v5676_v33  ;;  %15301 = vmatprep.subr.mxu0 %v24651_v56  ;;  %v24652_v3 = vand.u32 4294901760, %v19644_v49  ;;  %v5464_v31 = vld [vmem:[#allocation4 + $0x498] sm:$0xff]  ;;  %v5704_v41 = vand.u32 4294901760, %v19705_v55  ;;  %v19752_v12 = vsub.f32 %v5467_v39, %v19708_v63 }
 0x349   : > { %24650 = vst [vmem:[#allocation21_spill] sm:$0xff] %v19733_v42  ;;  %13411 = vmatprep.subr.mxu1 %v5795_v52  ;;  %15302 = vmatpush3.msra.mxu0 %v24651_v56  ;;  %v19749_v52 = vsub.f32 %v19660_v1, %v24653_v51  ;;  %v5823_v44 = vand.u32 4294901760, %v19717_v4  ;;  %v19760_v55 = vsub.f32 %v5482_v47, %v19722_v62  ;;  %v19762_v56 = vand.u32 4294901760, %v5480_v34  ;;  %v5463_v51 = vld [vmem:[#allocation4 + $0x490] sm:$0xff] }
 0x34a   : > { %v19740_v33 = vsub.f32 %v19644_v49, %v24652_v3  ;;  %13412 = vmatpush3.msra.mxu1 %v5683_v11  ;;  %24654 = vst [vmem:[#allocation37_spill] sm:$0xff] %v19752_v12  ;;  %v19754_v3 = vand.u32 4294901760, %v5465_v40  ;;  %v5479_v49 = vld [vmem:[#allocation4 + $0x510] sm:$0xff]  ;;  %15303 = vmatprep.subr.mxu0 %v24655_v28  ;;  %v5711_v39 = vand.u32 4294901760, %v19729_v59  ;;  %v19768_v1 = vsub.f32 %v5466_v35, %v19731_v23  ;;  %v5478_v11 = vld [vmem:[#allocation4 + $0x508] sm:$0xff] }
 0x34b   : > { %13413 = vmatprep.subr.mxu1 %v5802_v0  ;;  %24656 = vst [vmem:[#allocation24_spill] sm:$0xff] %v19760_v55  ;;  %24657 = vst [vmem:[#allocation31_spill] sm:$0xff] %v19762_v56  ;;  %15304 = vmatpush3.msra.mxu0 %v24655_v28  ;;  %v19771_v0 = vsub.f32 %v5481_v32, %v19733_v42  ;;  %v19773_v4 = vand.u32 4294901760, %v5464_v31  ;;  %v24660_v28 = vand.u32 4294901760, %v19693_v25  ;;  %v24661_v59 = vand.u32 4294901760, %v19696_v20 }
 0x34c   : > { %15305 = vmatprep.mubr.f32.mxu0 %v19321_v54  ;;  %24658 = vst [vmem:[#allocation45_spill] sm:$0xff] %v19768_v1  ;;  %13414 = vmatpush3.msra.mxu1 %v5690_v53  ;;  %v5830_v47 = vand.u32 4294901760, %v19740_v33  ;;  %v19787_v32 = vand.u32 4294901760, %v5479_v49  ;;  %v19793_v33 = vsub.f32 %v5465_v40, %v19754_v3  ;;  %v19809_v40 = vand.u32 4294901760, %v5478_v11  ;;  %v5461_v53 = vld [vmem:[#allocation4 + $0x480] sm:$0xff] }
 0x34d   : > { %24659 = vst [vmem:[#allocation36_spill] sm:$0xff] %v19771_v0  ;;  %15306 = vmatmul.mubr.f32.vlgmr.msra.gmra.mxu0 %v19324_v50  ;;  %v19780_v54 = vsub.f32 %v19693_v25, %v24660_v28  ;;  %v19785_v35 = vsub.f32 %v19696_v20, %v24661_v59  ;;  %13369 = vmatprep.subr.mxu0 %v19458_v10  ;;  %v5718_v50 = vand.u32 4294901760, %v19749_v52  ;;  %v19795_v28 = vand.u32 4294901760, %v5463_v51  ;;  %v5477_v25 = vld [vmem:[#allocation4 + $0x500] sm:$0xff] }
 0x34e   : > { %13415 = vmatprep.subr.mxu1 %v5809_v58  ;;  %13370 = vmatpush3.msra.mxu0 %v19460_v36  ;;  %v24662_v59 = vand.u32 4294901760, %v19518_v7  ;;  %v24663_v20 = vand.u32 4294901760, %v19720_v22  ;;  %v19807_v52 = vsub.f32 %v5480_v34, %v19762_v56  ;;  %24664 = vst [vmem:[#allocation49_spill] sm:$0xff] %v19809_v40 }
 0x34f   : > { %13416 = vmatpush3.msra.mxu1 %v5697_v45  ;;  %13371 = vmatprep.subr.mxu0 %v19468_v37  ;;  %v5837_v34 = vand.u32 4294901760, %v19780_v54  ;;  %v5725_v58 = vand.u32 4294901760, %v19785_v35  ;;  %v19823_v45 = vsub.f32 %v5479_v49, %v19787_v32  ;;  %v19833_v5 = vsub.f32 %v5463_v51, %v19795_v28  ;;  %v5454_v35 = vld [vmem:[#allocation3] sm:$0xf8] }
 0x350   : > { %5638 = vmatprep.mubr.f32.mxu0 %v24662_v59  ;;  %v19803_v14 = vsub.f32 %v19720_v22, %v24663_v20  ;;  %v19815_v59 = vsub.f32 %v5464_v31, %v19773_v4  ;;  %v19817_v20 = vand.u32 4294901760, %v5462_v43  ;;  %13417 = vmatprep.subr.mxu1 %v5816_v9  ;;  %v19825_v22 = vand.u32 4294901760, %v5477_v25 }
 0x351   : > { %13372 = vmatpush3.msra.mxu0 %v19483_v27  ;;  %13418 = vmatpush3.msra.mxu1 %v5704_v41  ;;  %v24665_v31 = vand.u32 4294901760, %v19752_v12  ;;  %24666 = vst [vmem:[#allocation50_spill] sm:$0xff] %v19833_v5  ;;  %v19835_v54 = vand.u32 4294901760, %v5461_v53  ;;  %v24667_v41 = vand.u32 4294901760, %v19760_v55  ;;  %v24669_v51 = vand.u32 4294901760, %v19768_v1 }
 0x352   : > { %13373 = vmatprep.subr.mxu0 %v19497_v38  ;;  %13419 = vmatprep.subr.mxu1 %v5823_v44  ;;  %v5844_v49 = vand.u32 4294901760, %v19803_v14  ;;  %v24670_v9 = vand.u32 4294901760, %v19771_v0 }
 0x353   : > { %v5731_v7 = vsub.f32 %v19752_v12, %v24665_v31  ;;  %13374 = vmatpush3.msra.mxu0 %v19504_v6  ;;  %v5850_v21 = vsub.f32 %v19760_v55, %v24667_v41  ;;  %v19844_v31 = vsub.f32 %v5478_v11, %v19809_v40  ;;  %13420 = vmatpush3.msra.mxu1 %v5711_v39  ;;  %v5516_v55 = vrot.slane %v5454_v35, 3 }
 0x354   : > { %13375 = vmatprep.subr.mxu0 %v19508_v46  ;;  %v5738_v44 = vsub.f32 %v19768_v1, %v24669_v51  ;;  %v5857_v14 = vsub.f32 %v19771_v0, %v24670_v9  ;;  %v19855_v41 = vsub.f32 %v5462_v43, %v19817_v20  ;;  %13421 = vmatprep.subr.mxu1 %v5830_v47  ;;  %v16282_v51 = vld [vmem:[#allocation3 + $0x18] sm:$0xff]  ;;  %v13103_v2 = vpop.f32.mrf.mxu1  ;;  %v24673_v43 = vand.u32 4294901760, %v19793_v33  ;;  %v5457_v0 = vld [vmem:[#allocation3 + $0x30] sm:$0x7] }
 0x355   : > { %24668 = vst [vmem:[#allocation51_spill] sm:$0xff] %v19844_v31  ;;  %13376 = vmatpush3.msra.mxu0 %v19513_v8  ;;  %v19860_v39 = vsub.f32 %v5477_v25, %v19825_v22  ;;  %v19862_v1 = vrot.slane %v16282_v51, 3  ;;  %13422 = vmatpush3.msra.mxu1 %v5718_v50  ;;  %v5732_v9 = vand.u32 4294901760, %v5731_v7  ;;  %v19870_v11 = vsub.f32 %v5461_v53, %v19835_v54 }
 0x356   : > { %24671 = vst [vmem:[#allocation48_spill] sm:$0xff] %v19855_v41  ;;  %13377 = vmatprep.subr.mxu0 %v19541_v48  ;;  %v5745_v47 = vsub.f32 %v19793_v33, %v24673_v43  ;;  %13423 = vmatprep.subr.mxu1 %v5837_v34  ;;  %v5851_v25 = vand.u32 4294901760, %v5850_v21  ;;  %v24674_v35 = vand.u32 4294901760, %v19807_v52  ;;  %v5527_v7 = vrot.slane %v5458_v17, 3  ;;  %v13104_v48 = vpop.f32.mrf.mxu1 }
 0x357   : > { %24672 = vst [vmem:[#allocation23_spill] sm:$0xff] %v19862_v1  ;;  %13378 = vmatpush3.msra.mxu0 %v19548_v16  ;;  %13424 = vmatpush3.msra.mxu1 %v5725_v58  ;;  %v5739_v43 = vand.u32 4294901760, %v5738_v44  ;;  %v24675_v53 = vand.u32 4294901760, %v19815_v59  ;;  %v13105_v21 = vadd.f32 %v13104_v48, %v13103_v2  ;;  %v24676_v51 = vand.u32 4294901760, %v19823_v45 }
 0x358   : > { %v5864_v50 = vsub.f32 %v19807_v52, %v24674_v35  ;;  %13379 = vmatprep.subr.mxu0 %v19561_v24  ;;  %13425 = vmatprep.subr.mxu1 %v5844_v49  ;;  %v5858_v35 = vand.u32 4294901760, %v5857_v14  ;;  %v5518_v44 = vsel %vm5515_vm5, %v5516_v55, %v19862_v1  ;;  %v24677_v12 = vand.u32 4294901760, %v19833_v5 }
 0x359   : > { %v5752_v34 = vsub.f32 %v19815_v59, %v24675_v53  ;;  %13380 = vmatpush3.msra.mxu0 %v19568_v19  ;;  %v5871_v17 = vsub.f32 %v19823_v45, %v24676_v51  ;;  %13426 = vmatpush3.msra.mxu1 %v5732_v9  ;;  %v5746_v53 = vand.u32 4294901760, %v5745_v47  ;;  %v5525_v49 = vrot.slane %v5457_v0, 3  ;;  %v13106_v14 = vpop.f32.mrf.mxu1 }
 0x35a   : > { %13381 = vmatprep.subr.mxu0 %v19581_v60  ;;  %v5759_v2 = vsub.f32 %v19833_v5, %v24677_v12  ;;  %13427 = vmatprep.subr.mxu1 %v5851_v25  ;;  %v5865_v51 = vand.u32 4294901760, %v5864_v50  ;;  %v24678_v58 = vand.u32 4294901760, %v19844_v31  ;;  %v24679_v47 = vand.u32 4294901760, %v19855_v41 }
 0x35b   : > { %13382 = vmatpush3.msra.mxu0 %v19590_v26  ;;  %13428 = vmatpush3.msra.mxu1 %v5739_v43  ;;  %v5753_v9 = vand.u32 4294901760, %v5752_v34  ;;  %v19902_v5 = vand.u32 4294901760, %v5518_v44  ;;  %v13107_v0 = vpop.f32.mrf.mxu1  ;;  %v5872_v25 = vand.u32 4294901760, %v5871_v17  ;;  %v24681_v50 = vand.u32 4294901760, %v19860_v39 }
 0x35c   : > { %v5878_v55 = vsub.f32 %v19844_v31, %v24678_v58  ;;  %13383 = vmatprep.subr.mxu0 %v19599_v15  ;;  %v5766_v12 = vsub.f32 %v19855_v41, %v24679_v47  ;;  %13429 = vmatprep.subr.mxu1 %v5858_v35  ;;  %v24682_v43 = vrot.slane %v19433_v57, 3  ;;  %v13108_v34 = vadd.f32 %v13107_v0, %v13106_v14 }
 0x35d   : > { %24680 = vst [vmem:[#allocation17_spill] sm:$0xff] %v19902_v5  ;;  %13384 = vmatpush3.msra.mxu0 %v19609_v18  ;;  %v5885_v48 = vsub.f32 %v19860_v39, %v24681_v50  ;;  %13430 = vmatpush3.msra.mxu1 %v5746_v53  ;;  %v5760_v47 = vand.u32 4294901760, %v5759_v2  ;;  %v24683_v41 = vand.u32 4294901760, %v19870_v11  ;;  %v5526_v17 = vsel %vm5515_vm5, %v19862_v1, %v5525_v49  ;;  %v24701_v1 = vld [vmem:[#allocation44_spill] sm:$0xff] }
 0x35e   : > { %v5528_v58 = vsel %vm5515_vm5, %v24682_v43, %v5527_v7  ;;  %13385 = vmatprep.subr.mxu0 %v19646_v30  ;;  %v13065_v31 = vpop.f32.mrf.mxu0  ;;  %13431 = vmatprep.subr.mxu1 %v5865_v51  ;;  %v5879_v50 = vand.u32 4294901760, %v5878_v55  ;;  %v5767_v57 = vand.u32 4294901760, %v5766_v12  ;;  %v19920_v7 = vsub.f32 %v5518_v44, %v19902_v5 }
 0x35f   : > { %v5773_v35 = vsub.f32 %v19870_v11, %v24683_v41  ;;  %13386 = vmatpush3.msra.mxu0 %v19648_v29  ;;  %13432 = vmatpush3.msra.mxu1 %v5753_v9  ;;  %v19922_v53 = vand.u32 4294901760, %v5528_v58  ;;  %v5886_v41 = vand.u32 4294901760, %v5885_v48  ;;  %v19925_v49 = vand.u32 4294901760, %v5526_v17 }
 0x360   : > { %13387 = vmatprep.subr.mxu0 %v19671_v61  ;;  %v13066_v2 = vpop.f32.mrf.mxu0  ;;  %13433 = vmatprep.subr.mxu1 %v5872_v25  ;;  %v23950_v9 = vand.u32 4294901760, %v19920_v7 }
 0x361   : > { %24684 = vst [vmem:[#allocation15_spill] sm:$0xff] %v19922_v53  ;;  %13388 = vmatpush3.msra.mxu0 %v19708_v63  ;;  %24685 = vst [vmem:[#allocation22_spill] sm:$0xff] %v19925_v49  ;;  %v13067_v14 = vadd.f32 %v13066_v2, %v13065_v31  ;;  %13434 = vmatpush3.msra.mxu1 %v5760_v47  ;;  %v5774_v51 = vand.u32 4294901760, %v5773_v35  ;;  %v19934_v48 = vsub.f32 %v5528_v58, %v19922_v53  ;;  %v24688_v2 = vld [vmem:[#allocation35_spill] sm:$0xff] }
 0x362   : > { %13389 = vmatprep.subr.mxu0 %v19722_v62  ;;  %13435 = vmatprep.subr.mxu1 %v5879_v50  ;;  %v19938_v31 = vsub.f32 %v5526_v17, %v19925_v49  ;;  %v5642_v0 = vsub.f32 %v19920_v7, %v23950_v9  ;;  %v24686_v17 = vand.u32 4294901760, %v19471_v13 }
 0x363   : > { %13390 = vmatpush3.msra.mxu0 %v19731_v23  ;;  %v19929_v55 = vadd.f32 %v13105_v21, %v13067_v14  ;;  %v13068_v44 = vpop.f32.mrf.mxu0  ;;  %13436 = vmatpush3.msra.mxu1 %v5767_v57  ;;  %v23949_v25 = vand.u32 4294901760, %v19934_v48  ;;  %v24687_v57 = vld [vmem:[#allocation16_spill] sm:$0xff]  ;;  %v24689_v14 = vld [vmem:[#allocation26_spill] sm:$0xff] }
 0x364   : > { %13391 = vmatprep.subr.mxu0 %v19733_v42  ;;  %13437 = vmatprep.subr.mxu1 %v5886_v41  ;;  %v23948_v58 = vand.u32 4294901760, %v19938_v31 }
 0x365   : > { %13392 = vmatpush3.msra.mxu0 %v19754_v3  ;;  %v13069_v12 = vpop.f32.mrf.mxu0  ;;  %13438 = vmatpush3.msra.mxu1 %v5774_v51  ;;  %v5651_v47 = vsub.f32 %v19934_v48, %v23949_v25  ;;  %v24690_v51 = vld [vmem:[#allocation18_spill] sm:$0xff]  ;;  %v24700_v25 = vld [vmem:[#allocation43_spill] sm:$0xff] }
 0x366   : > { %13393 = vmatprep.subr.mxu0 %v19762_v56  ;;  %v13070_v21 = vadd.f32 %v13069_v12, %v13068_v44  ;;  %5891 = vmatmul.mubr.f32.vlgmr.msra.gmra.mxu1 %v19902_v5  ;;  %v5657_v35 = vsub.f32 %v19938_v31, %v23948_v58  ;;  %v24691_v44 = vld [vmem:[#allocation20_spill] sm:$0xff]  ;;  %v24692_v12 = vld [vmem:[#allocation13_spill] sm:$0xff] }
 0x367   : > { %13483 = vmatprep.subr.mxu1 %v19458_v10  ;;  %13394 = vmatpush3.msra.mxu0 %v19773_v4  ;;  %v5652_v50 = vand.u32 4294901760, %v5651_v47  ;;  %v24699_v58 = vld [vmem:[#allocation29_spill] sm:$0xff] }
 0x368   : > { %5896 = vmatprep.mubr.f32.mxu1 %v19922_v53  ;;  %v19949_v43 = vadd.f32 %v13108_v34, %v13070_v21  ;;  %13484 = vmatpush3.msra.mxu1 %v19460_v36  ;;  %v5643_v34 = vand.u32 4294901760, %v5642_v0  ;;  %v5658_v41 = vand.u32 4294901760, %v5657_v35  ;;  %v24693_v21 = vld [vmem:[#allocation28_spill] sm:$0xff]  ;;  %v24694_v0 = vld [vmem:[#allocation38_spill] sm:$0xff]  ;;  %v24704_v5 = vld [vmem:[#allocation41_spill] sm:$0xff] }
 0x369   : > { %13395 = vmatprep.subr.mxu0 %v19787_v32  ;;  %13485 = vmatprep.subr.mxu1 %v19468_v37  ;;  %v24696_v35 = vld [vmem:[#allocation40_spill] sm:$0xff] }
 0x36a   : > { %13396 = vmatpush3.msra.mxu0 %v19795_v28  ;;  %13486 = vmatpush3.msra.mxu1 %v19483_v27 }
 0x36b   : > { %13397 = vmatprep.subr.mxu0 %v19809_v40  ;;  %5898 = vmatmul.mubr.f32.gmra.mxu1 %v19925_v49  ;;  %v24702_v49 = vld [vmem:[#allocation47_spill] sm:$0xff] }
 0x36c   : > { %13487 = vmatprep.subr.mxu1 %v19497_v38  ;;  %13398 = vmatpush3.msra.mxu0 %v19817_v20 }
 0x36d   : > { %13488 = vmatpush3.msra.mxu1 %v19504_v6  ;;  %6149 = vmatprep.mubr.f32.mxu1 %v24686_v17  ;;  %v24697_v17 = vld [vmem:[#allocation19_spill] sm:$0xff] }
 0x36e   : > { %13399 = vmatprep.subr.mxu0 %v19825_v22  ;;  %13489 = vmatprep.subr.mxu1 %v19508_v46 }
 0x36f   : > { %13400 = vmatpush3.msra.mxu0 %v19835_v54  ;;  %13490 = vmatpush3.msra.mxu1 %v19513_v8 }
 0x370   : > { %5644 = vmatmul.mubr.f32.vlgmr.msra.gmra.mxu0 %v5643_v34  ;;  %13445 = vmatprep.subr.mxu0 %v24687_v57  ;;  %v24695_v34 = vld [vmem:[#allocation39_spill] sm:$0xff] }
 0x371   : > { %13491 = vmatprep.subr.mxu1 %v24688_v2  ;;  %5653 = vmatprep.mubr.f32.mxu0 %v5652_v50 }
 0x372   : > { %13446 = vmatpush3.msra.mxu0 %v24689_v14  ;;  %13492 = vmatpush3.msra.mxu1 %v19548_v16 }
 0x373   : > { %13447 = vmatprep.subr.mxu0 %v24690_v51  ;;  %13493 = vmatprep.subr.mxu1 %v19561_v24 }
 0x374   : > { %13448 = vmatpush3.msra.mxu0 %v24691_v44  ;;  %13494 = vmatpush3.msra.mxu1 %v19568_v19 }
 0x375   : > { %5659 = vmatmul.mubr.f32.gmra.mxu0 %v5658_v41  ;;  %13449 = vmatprep.subr.mxu0 %v24692_v12 }
 0x376   : > { %13495 = vmatprep.subr.mxu1 %v19581_v60  ;;  %13450 = vmatpush3.msra.mxu0 %v24693_v21 }
 0x377   : > { %6033 = vmatprep.mubr.f32.mxu0 %v19471_v13  ;;  %13496 = vmatpush3.msra.mxu1 %v19590_v26  ;;  %v24698_v13 = vld [vmem:[#allocation30_spill] sm:$0xff] }
 0x378   : > { %13451 = vmatprep.subr.mxu0 %v24694_v0  ;;  %13497 = vmatprep.subr.mxu1 %v19599_v15  ;;  %v13179_v47 = vpop.f32.mrf.mxu1 }
 0x379   : > { %13452 = vmatpush3.msra.mxu0 %v24695_v34  ;;  %13498 = vmatpush3.msra.mxu1 %v19609_v18 }
 0x37a   : > { %13453 = vmatprep.subr.mxu0 %v24696_v35  ;;  %13499 = vmatprep.subr.mxu1 %v19646_v30  ;;  %v13180_v50 = vpop.f32.mrf.mxu1 }
 0x37b   : > { %13454 = vmatpush3.msra.mxu0 %v24697_v17  ;;  %13500 = vmatpush3.msra.mxu1 %v19648_v29  ;;  %v13181_v41 = vadd.f32 %v13180_v50, %v13179_v47  ;;  %v24703_v47 = vld [vmem:[#allocation14_spill] sm:$0xff] }
 0x37c   : > { %13455 = vmatprep.subr.mxu0 %v24698_v13  ;;  %13501 = vmatprep.subr.mxu1 %v19671_v61 }
 0x37d   : > { %13456 = vmatpush3.msra.mxu0 %v24699_v58  ;;  %13502 = vmatpush3.msra.mxu1 %v19708_v63  ;;  %v13182_v9 = vpop.f32.mrf.mxu1 }
 0x37e   : > { %13457 = vmatprep.subr.mxu0 %v24700_v25  ;;  %13503 = vmatprep.subr.mxu1 %v19722_v62  ;;  %v24705_v62 = vld [vmem:[#allocation33_spill] sm:$0xff] }
 0x37f   : > { %13458 = vmatpush3.msra.mxu0 %v24701_v1  ;;  %13504 = vmatpush3.msra.mxu1 %v19731_v23  ;;  %v13183_v53 = vpop.f32.mrf.mxu1  ;;  %v24706_v23 = vld [vmem:[#allocation34_spill] sm:$0xff] }
 0x380   : > { %13459 = vmatprep.subr.mxu0 %v24702_v49  ;;  %13505 = vmatprep.subr.mxu1 %v19733_v42  ;;  %v13184_v50 = vadd.f32 %v13183_v53, %v13182_v9  ;;  %v24707_v42 = vld [vmem:[#allocation37_spill] sm:$0xff]  ;;  %v24708_v53 = vld [vmem:[#allocation24_spill] sm:$0xff] }
 0x381   : > { %13460 = vmatpush3.msra.mxu0 %v24703_v47  ;;  %13506 = vmatpush3.msra.mxu1 %v19754_v3  ;;  %v24709_v9 = vld [vmem:[#allocation45_spill] sm:$0xff] }
 0x382   : > { %13461 = vmatprep.subr.mxu0 %v24704_v5  ;;  %v13141_v25 = vpop.f32.mrf.mxu0  ;;  %13507 = vmatprep.subr.mxu1 %v19762_v56 }
 0x383   : > { %13462 = vmatpush3.msra.mxu0 %v24705_v62  ;;  %13508 = vmatpush3.msra.mxu1 %v19773_v4 }
 0x384   : > { %13463 = vmatprep.subr.mxu0 %v24706_v23  ;;  %v13142_v49 = vpop.f32.mrf.mxu0  ;;  %13509 = vmatprep.subr.mxu1 %v19787_v32  ;;  %v24710_v23 = vld [vmem:[#allocation36_spill] sm:$0xff] }
 0x385   : > { %13464 = vmatpush3.msra.mxu0 %v24707_v42  ;;  %v13143_v47 = vadd.f32 %v13142_v49, %v13141_v25  ;;  %13510 = vmatpush3.msra.mxu1 %v19795_v28 }
 0x386   : > { %13465 = vmatprep.subr.mxu0 %v24708_v53  ;;  %13511 = vmatprep.subr.mxu1 %v19809_v40 }
 0x387   : > { %13466 = vmatpush3.msra.mxu0 %v24709_v9  ;;  %v4351_v62 = vadd.f32 %v13143_v47, %v19929_v55  ;;  %v13144_v56 = vpop.f32.mrf.mxu0  ;;  %13512 = vmatpush3.msra.mxu1 %v19817_v20  ;;  %v24711_v9 = vand.u32 4294901760, %v19920_v7  ;;  %v24712_v55 = vand.u32 4294901760, %v19934_v48 }
 0x388   : > { %13467 = vmatprep.subr.mxu0 %v24710_v23  ;;  %13513 = vmatprep.subr.mxu1 %v19825_v22 }
 0x389   : > { %13468 = vmatpush3.msra.mxu0 %v19793_v33  ;;  %v20023_v49 = vadd.f32 %v13181_v41, %v4351_v62  ;;  %v13145_v25 = vpop.f32.mrf.mxu0  ;;  %13514 = vmatpush3.msra.mxu1 %v19835_v54  ;;  %v24713_v62 = vld [vmem:[#allocation50_spill] sm:$0xff]  ;;  %v24715_v41 = vand.u32 4294901760, %v19938_v31 }
 0x38a   : > { %13469 = vmatprep.subr.mxu0 %v19807_v52  ;;  %v13146_v40 = vadd.f32 %v13145_v25, %v13144_v56  ;;  %6153 = vmatmul.mubr.f32.vlgmr.msra.gmra.mxu1 %v24711_v9  ;;  %v5503_v25 = vld [vmem:[#allocation4 + $0x5d0] sm:$0xff] }
 0x38b   : > { %13559 = vmatprep.subr.mxu1 %v19458_v10  ;;  %13470 = vmatpush3.msra.mxu0 %v19815_v59  ;;  %v24714_v10 = vld [vmem:[#allocation51_spill] sm:$0xff] }
 0x38c   : > { %6160 = vmatprep.mubr.f32.mxu1 %v24712_v55  ;;  %v4360_v47 = vadd.f32 %v13146_v40, %v19949_v43  ;;  %13560 = vmatpush3.msra.mxu1 %v19460_v36  ;;  %v24716_v40 = vld [vmem:[#allocation48_spill] sm:$0xff]  ;;  %v24717_v36 = vld [vmem:[#allocation25_spill] sm:$0xff]  ;;  %v24726_v43 = vand.u32 4294901760, %v24696_v35  ;;  %v24732_v35 = vld [vmem:[#allocation42_spill] sm:$0xff] }
 0x38d   : > { %13471 = vmatprep.subr.mxu0 %v19823_v45  ;;  %13561 = vmatprep.subr.mxu1 %v19468_v37  ;;  %v24718_v37 = vand.u32 4294901760, %v24687_v57  ;;  %v24737_v55 = vld [vmem:[#allocation21_spill] sm:$0xff] }
 0x38e   : > { %13472 = vmatpush3.msra.mxu0 %v24713_v62  ;;  %v20038_v56 = vadd.f32 %v13184_v50, %v4360_v47  ;;  %13562 = vmatpush3.msra.mxu1 %v19483_v27  ;;  %v24719_v27 = vand.u32 4294901760, %v24689_v14  ;;  %v24738_v47 = vld [vmem:[#allocation14_spill] sm:$0xff] }
 0x38f   : > { %13473 = vmatprep.subr.mxu0 %v24714_v10  ;;  %6164 = vmatmul.mubr.f32.gmra.mxu1 %v24715_v41  ;;  %v24739_v41 = vand.u32 4294901760, %v24738_v47 }
 0x390   : > { %13563 = vmatprep.subr.mxu1 %v19497_v38  ;;  %13474 = vmatpush3.msra.mxu0 %v24716_v40  ;;  %v24720_v38 = vand.u32 4294901760, %v24690_v51  ;;  %v24728_v51 = vand.u32 4294901760, %v24698_v13  ;;  %v24735_v13 = vld [vmem:[#allocation47_spill] sm:$0xff] }
 0x391   : > { %13564 = vmatpush3.msra.mxu1 %v19504_v6  ;;  %6441 = vmatprep.mubr.f32.mxu1 %v24717_v36  ;;  %v24721_v6 = vand.u32 4294901760, %v24691_v44 }
 0x392   : > { %13475 = vmatprep.subr.mxu0 %v19860_v39  ;;  %13565 = vmatprep.subr.mxu1 %v19508_v46  ;;  %v5508_v46 = vld [vmem:[#allocation4 + $0x5f8] sm:$0xff] }
 0x393   : > { %13476 = vmatpush3.msra.mxu0 %v19870_v11  ;;  %13566 = vmatpush3.msra.mxu1 %v19513_v8  ;;  %v24722_v8 = vand.u32 4294901760, %v24692_v12  ;;  %v5504_v12 = vld [vmem:[#allocation4 + $0x5d8] sm:$0xff] }
 0x394   : > { %6036 = vmatmul.mubr.f32.vlgmr.msra.gmra.mxu0 %v19920_v7  ;;  %13521 = vmatprep.subr.mxu0 %v24718_v37  ;;  %v20073_v7 = vand.u32 4294901760, %v5508_v46  ;;  %v20120_v9 = vand.u32 4294901760, %v5504_v12 }
 0x395   : > { %13567 = vmatprep.subr.mxu1 %v24688_v2  ;;  %6042 = vmatprep.mubr.f32.mxu0 %v19934_v48  ;;  %v24724_v48 = vand.u32 4294901760, %v24694_v0 }
 0x396   : > { %13522 = vmatpush3.msra.mxu0 %v24719_v27  ;;  %13568 = vmatpush3.msra.mxu1 %v19548_v16  ;;  %v24723_v16 = vand.u32 4294901760, %v24693_v21  ;;  %v20090_v2 = vsub.f32 %v5508_v46, %v20073_v7  ;;  %v24730_v21 = vld [vmem:[#allocation43_spill] sm:$0xff]  ;;  %v24742_v46 = vld [vmem:[#allocation33_spill] sm:$0xff] }
 0x397   : > { %13523 = vmatprep.subr.mxu0 %v24720_v38  ;;  %13569 = vmatprep.subr.mxu1 %v19561_v24  ;;  %v5507_v24 = vld [vmem:[#allocation4 + $0x5f0] sm:$0xff]  ;;  %v24731_v0 = vand.u32 4294901760, %v24730_v21  ;;  %v5502_v38 = vld [vmem:[#allocation4 + $0x5c8] sm:$0xff] }
 0x398   : > { %13524 = vmatpush3.msra.mxu0 %v24721_v6  ;;  %13570 = vmatpush3.msra.mxu1 %v19568_v19  ;;  %v24725_v19 = vand.u32 4294901760, %v24695_v34  ;;  %v20084_v57 = vand.u32 4294901760, %v5507_v24  ;;  %v24741_v6 = vld [vmem:[#allocation31_spill] sm:$0xff] }
 0x399   : > { %6045 = vmatmul.mubr.f32.gmra.mxu0 %v19938_v31  ;;  %13525 = vmatprep.subr.mxu0 %v24722_v8  ;;  %v5506_v31 = vld [vmem:[#allocation4 + $0x5e8] sm:$0xff]  ;;  %v24743_v8 = vand.u32 4294901760, %v24742_v46 }
 0x39a   : > { %13571 = vmatprep.subr.mxu1 %v19581_v60  ;;  %13526 = vmatpush3.msra.mxu0 %v24723_v16  ;;  %v20104_v34 = vsub.f32 %v5507_v24, %v20084_v57 }
 0x39b   : > { %6330 = vmatprep.mubr.f32.mxu0 %v24717_v36  ;;  %13572 = vmatpush3.msra.mxu1 %v19590_v26  ;;  %v24727_v26 = vand.u32 4294901760, %v24697_v17  ;;  %v24733_v17 = vand.u32 4294901760, %v24701_v1  ;;  %v24740_v36 = vand.u32 4294901760, %v24704_v5  ;;  %v24744_v5 = vld [vmem:[#allocation34_spill] sm:$0xff] }
 0x39c   : > { %13527 = vmatprep.subr.mxu0 %v24724_v48  ;;  %13573 = vmatprep.subr.mxu1 %v19599_v15  ;;  %v13255_v60 = vpop.f32.mrf.mxu1  ;;  %v5505_v15 = vld [vmem:[#allocation4 + $0x5e0] sm:$0xff]  ;;  %v20129_v37 = vand.u32 4294901760, %v20104_v34  ;;  %v24745_v48 = vand.u32 4294901760, %v24744_v5 }
 0x39d   : > { %13528 = vmatpush3.msra.mxu0 %v24725_v19  ;;  %13574 = vmatpush3.msra.mxu1 %v19609_v18  ;;  %v20095_v18 = vand.u32 4294901760, %v5506_v31 }
 0x39e   : > { %13529 = vmatprep.subr.mxu0 %v24726_v43  ;;  %13575 = vmatprep.subr.mxu1 %v19646_v30  ;;  %v13256_v14 = vpop.f32.mrf.mxu1  ;;  %v24729_v30 = vand.u32 4294901760, %v24699_v58  ;;  %v24734_v58 = vld [vmem:[#allocation27_spill] sm:$0xff]  ;;  %v24746_v43 = vand.u32 4294901760, %v24707_v42  ;;  %v24749_v42 = vld [vmem:[#allocation45_spill] sm:$0xff] }
 0x39f   : > { %13530 = vmatpush3.msra.mxu0 %v24727_v26  ;;  %13576 = vmatpush3.msra.mxu1 %v19648_v29  ;;  %v13257_v44 = vadd.f32 %v13256_v14, %v13255_v60  ;;  %v20106_v29 = vand.u32 4294901760, %v5505_v15  ;;  %v20118_v50 = vsub.f32 %v5506_v31, %v20095_v18  ;;  %v20148_v31 = vsub.f32 %v5504_v12, %v20120_v9  ;;  %v24748_v12 = vld [vmem:[#allocation49_spill] sm:$0xff] }
 0x3a0   : > { %13531 = vmatprep.subr.mxu0 %v24728_v51  ;;  %13577 = vmatprep.subr.mxu1 %v19671_v61  ;;  %v20112_v61 = vand.u32 4294901760, %v20090_v2  ;;  %v20153_v26 = vand.u32 4294901760, %v5502_v38  ;;  %v6567_v14 = vsub.f32 %v20104_v34, %v20129_v37  ;;  %v24750_v21 = vand.u32 4294901760, %v24749_v42 }
 0x3a1   : > { %13532 = vmatpush3.msra.mxu0 %v24729_v30  ;;  %13578 = vmatpush3.msra.mxu1 %v19708_v63  ;;  %v24736_v63 = vand.u32 4294901760, %v24735_v13  ;;  %v20132_v27 = vsub.f32 %v5505_v15, %v20106_v29  ;;  %v20145_v19 = vand.u32 4294901760, %v20118_v50  ;;  %v5501_v15 = vld [vmem:[#allocation4 + $0x5c0] sm:$0xff]  ;;  %v24760_v42 = vand.u32 4294901760, %v24716_v40 }
 0x3a2   : > { %13533 = vmatprep.subr.mxu0 %v24731_v0  ;;  %13579 = vmatprep.subr.mxu1 %v24732_v35  ;;  %v6560_v16 = vsub.f32 %v20090_v2, %v20112_v61  ;;  %v24751_v35 = vand.u32 4294901760, %v24710_v23  ;;  %v20178_v13 = vand.u32 4294901760, %v5501_v15  ;;  %v20186_v23 = vsub.f32 %v5502_v38, %v20153_v26 }
 0x3a3   : > { %13534 = vmatpush3.msra.mxu0 %v24733_v17  ;;  %13580 = vmatpush3.msra.mxu1 %v24734_v58  ;;  %v20161_v51 = vand.u32 4294901760, %v20132_v27  ;;  %v6574_v17 = vsub.f32 %v20118_v50, %v20145_v19 }
 0x3a4   : > { %13535 = vmatprep.subr.mxu0 %v24736_v63  ;;  %13581 = vmatprep.subr.mxu1 %v24737_v55  ;;  %v6561_v0 = vand.u32 4294901760, %v6560_v16  ;;  %v5499_v63 = vld [vmem:[#allocation4 + $0x5b0] sm:$0xff]  ;;  %v20208_v5 = vsub.f32 %v5501_v15, %v20178_v13 }
 0x3a5   : > { %13536 = vmatpush3.msra.mxu0 %v24739_v41  ;;  %v13217_v1 = vpop.f32.mrf.mxu0  ;;  %13582 = vmatpush3.msra.mxu1 %v19754_v3  ;;  %v20139_v3 = vand.u32 4294901760, %v5503_v25  ;;  %v24753_v41 = vand.u32 4294901760, %v19807_v52  ;;  %v20200_v46 = vand.u32 4294901760, %v5499_v63  ;;  %v24755_v52 = vand.u32 4294901760, %v19815_v59 }
 0x3a6   : > { %13537 = vmatprep.subr.mxu0 %v24740_v36  ;;  %13583 = vmatprep.subr.mxu1 %v24741_v6  ;;  %v6575_v16 = vand.u32 4294901760, %v6574_v17  ;;  %v24758_v59 = vand.u32 4294901760, %v24713_v62  ;;  %v5496_v62 = vld [vmem:[#allocation4 + $0x598] sm:$0xff]  ;;  %v5495_v17 = vld [vmem:[#allocation4 + $0x590] sm:$0xff] }
 0x3a7   : > { %13538 = vmatpush3.msra.mxu0 %v24743_v8  ;;  %v13218_v24 = vpop.f32.mrf.mxu0  ;;  %13584 = vmatpush3.msra.mxu1 %v19773_v4  ;;  %v24747_v4 = vand.u32 4294901760, %v24708_v53  ;;  %v5500_v53 = vld [vmem:[#allocation4 + $0x5b8] sm:$0xff]  ;;  %v24756_v8 = vld [vmem:[#allocation15_spill] sm:$0xff] }
 0x3a8   : > { %13539 = vmatprep.subr.mxu0 %v24745_v48  ;;  %v13219_v60 = vadd.f32 %v13218_v24, %v13217_v1  ;;  %13585 = vmatprep.subr.mxu1 %v19787_v32  ;;  %v6568_v1 = vand.u32 4294901760, %v6567_v14  ;;  %v20193_v36 = vand.u32 4294901760, %v5500_v53 }
 0x3a9   : > { %13540 = vmatpush3.msra.mxu0 %v24746_v43  ;;  %13586 = vmatpush3.msra.mxu1 %v19795_v28  ;;  %v20168_v28 = vsub.f32 %v5503_v25, %v20139_v3  ;;  %v24752_v25 = vand.u32 4294901760, %v19793_v33  ;;  %v5497_v43 = vld [vmem:[#allocation4 + $0x5a0] sm:$0xff] }
 0x3aa   : > { %13541 = vmatprep.subr.mxu0 %v24747_v4  ;;  %v4647_v30 = vadd.f32 %v13219_v60, %v20023_v49  ;;  %v13220_v32 = vpop.f32.mrf.mxu0  ;;  %13587 = vmatprep.subr.mxu1 %v24748_v12  ;;  %v20176_v49 = vand.u32 4294901760, %v20148_v31  ;;  %v20213_v60 = vand.u32 4294901760, %v20186_v23  ;;  %v20218_v14 = vsub.f32 %v5500_v53, %v20193_v36 }
 0x3ab   : > { %13542 = vmatpush3.msra.mxu0 %v24750_v21  ;;  %13588 = vmatpush3.msra.mxu1 %v19817_v20  ;;  %v20197_v33 = vand.u32 4294901760, %v20168_v28  ;;  %v20229_v12 = vsub.f32 %v5499_v63, %v20200_v46  ;;  %v20236_v53 = vand.u32 4294901760, %v5497_v43 }
 0x3ac   : > { %13543 = vmatprep.subr.mxu0 %v24751_v35  ;;  %v13221_v58 = vpop.f32.mrf.mxu0  ;;  %v20180_v55 = vadd.f32 %v13257_v44, %v4647_v30  ;;  %13589 = vmatprep.subr.mxu1 %v19825_v22  ;;  %v6581_v44 = vsub.f32 %v20132_v27, %v20161_v51  ;;  %v24754_v22 = vld [vmem:[#allocation17_spill] sm:$0xff]  ;;  %v6588_v24 = vsub.f32 %v20148_v31, %v20176_v49  ;;  %v20245_v40 = vand.u32 4294901760, %v20218_v14 }
 0x3ad   : > { %13544 = vmatpush3.msra.mxu0 %v24752_v25  ;;  %v13222_v20 = vadd.f32 %v13221_v58, %v13220_v32  ;;  %v13258_v47 = vpop.f32.mrf.mxu1  ;;  %13590 = vmatpush3.msra.mxu1 %v19835_v54  ;;  %v5498_v54 = vld [vmem:[#allocation4 + $0x5a8] sm:$0xff]  ;;  %v6595_v32 = vsub.f32 %v20168_v28, %v20197_v33  ;;  %v6602_v35 = vsub.f32 %v20186_v23, %v20213_v60  ;;  %v24762_v58 = vand.u32 4294901760, %v19870_v11 }
 0x3ae   : > { %13545 = vmatprep.subr.mxu0 %v24753_v41  ;;  %6443 = vmatmul.mubr.f32.vlgmr.msra.gmra.mxu1 %v24754_v22  ;;  %v6582_v4 = vand.u32 4294901760, %v6581_v44  ;;  %v20220_v30 = vand.u32 4294901760, %v5498_v54  ;;  %v6589_v21 = vand.u32 4294901760, %v6588_v24  ;;  %v20250_v25 = vand.u32 4294901760, %v5496_v62 }
 0x3af   : > { %15378 = vmatprep.subr.mxu1 %v6561_v0  ;;  %v4654_v38 = vadd.f32 %v13222_v20, %v20038_v56  ;;  %v13259_v6 = vpop.f32.mrf.mxu1  ;;  %13546 = vmatpush3.msra.mxu0 %v24755_v52  ;;  %v24757_v56 = vand.u32 4294901760, %v19823_v45  ;;  %v24759_v45 = vand.u32 4294901760, %v24714_v10  ;;  %v24761_v10 = vand.u32 4294901760, %v19860_v39 }
 0x3b0   : > { %6448 = vmatprep.mubr.f32.mxu1 %v24756_v8  ;;  %v13260_v48 = vadd.f32 %v13259_v6, %v13258_v47  ;;  %15379 = vmatpush3.msra.mxu1 %v6561_v0  ;;  %v20234_v0 = vand.u32 4294901760, %v20208_v5  ;;  %v20248_v63 = vsub.f32 %v5498_v54, %v20220_v30  ;;  %v6596_v39 = vand.u32 4294901760, %v6595_v32  ;;  %v5494_v47 = vld [vmem:[#allocation4 + $0x588] sm:$0xff] }
 0x3b1   : > { %13547 = vmatprep.subr.mxu0 %v24757_v56  ;;  %15380 = vmatprep.subr.mxu1 %v6568_v1  ;;  %v20254_v20 = vand.u32 4294901760, %v20229_v12  ;;  %v20260_v41 = vsub.f32 %v5497_v43, %v20236_v53  ;;  %v6603_v44 = vand.u32 4294901760, %v6602_v35  ;;  %v20273_v54 = vsub.f32 %v5496_v62, %v20250_v25 }
 0x3b2   : > { %13548 = vmatpush3.msra.mxu0 %v24758_v59  ;;  %v20222_v15 = vadd.f32 %v13260_v48, %v4654_v38  ;;  %15381 = vmatpush3.msra.mxu1 %v6568_v1  ;;  %v6609_v11 = vsub.f32 %v20208_v5, %v20234_v0  ;;  %v20262_v1 = vand.u32 4294901760, %v5495_v17  ;;  %v6616_v38 = vsub.f32 %v20218_v14, %v20245_v40  ;;  %v5456_v59 = vld [vmem:[#allocation3 + $0x10] sm:$0xf8] }
 0x3b3   : > { %13549 = vmatprep.subr.mxu0 %v24759_v45  ;;  %15382 = vmatprep.subr.mxu1 %v6575_v16  ;;  %v20270_v6 = vand.u32 4294901760, %v20248_v63  ;;  %v20275_v52 = vand.u32 4294901760, %v5494_v47  ;;  %v20282_v48 = vand.u32 4294901760, %v20260_v41  ;;  %v20294_v62 = vand.u32 4294901760, %v20273_v54 }
 0x3b4   : > { %13550 = vmatpush3.msra.mxu0 %v24760_v42  ;;  %15383 = vmatpush3.msra.mxu1 %v6575_v16  ;;  %v24763_v16 = vld [vmem:[#allocation22_spill] sm:$0xff]  ;;  %v6610_v24 = vand.u32 4294901760, %v6609_v11  ;;  %v20285_v56 = vsub.f32 %v5495_v17, %v20262_v1  ;;  %v6617_v45 = vand.u32 4294901760, %v6616_v38  ;;  %v24767_v38 = vld [vmem:[#allocation23_spill] sm:$0xff] }
 0x3b5   : > { %13551 = vmatprep.subr.mxu0 %v24761_v10  ;;  %15384 = vmatprep.subr.mxu1 %v6582_v4  ;;  %v6630_v32 = vsub.f32 %v20248_v63, %v20270_v6  ;;  %24764 = vst [vmem:[#allocation16_spill] sm:$0xff] %v20294_v62  ;;  %v20297_v42 = vsub.f32 %v5494_v47, %v20275_v52  ;;  %v5522_v10 = vrot.slane %v5456_v59, 3 }
 0x3b6   : > { %13552 = vmatpush3.msra.mxu0 %v24762_v58  ;;  %15385 = vmatpush3.msra.mxu1 %v6582_v4  ;;  %v5459_v4 = vld [vmem:[#allocation3 + $0x40] sm:$0x7]  ;;  %v6637_v35 = vsub.f32 %v20260_v41, %v20282_v48  ;;  %v20305_v17 = vand.u32 4294901760, %v20285_v56  ;;  %v6644_v11 = vsub.f32 %v20273_v54, %v20294_v62 }
 0x3b7   : > { %6332 = vmatmul.mubr.f32.vlgmr.msra.gmra.mxu0 %v24754_v22  ;;  %15343 = vmatprep.subr.mxu0 %v20073_v7  ;;  %v5493_v22 = vld [vmem:[#allocation4 + $0x580] sm:$0xff]  ;;  %v6631_v47 = vand.u32 4294901760, %v6630_v32 }
 0x3b8   : > { %15386 = vmatprep.subr.mxu1 %v6589_v21  ;;  %6337 = vmatprep.mubr.f32.mxu0 %v24756_v8  ;;  %v6623_v8 = vsub.f32 %v20229_v12, %v20254_v20  ;;  %v20287_v43 = vand.u32 4294901760, %v5493_v22  ;;  %24765 = vst [vmem:[#allocation35_spill] sm:$0xff] %v20305_v17 }
 0x3b9   : > { %15344 = vmatpush3.msra.mxu0 %v20073_v7  ;;  %15387 = vmatpush3.msra.mxu1 %v6589_v21 }
 0x3ba   : > { %15345 = vmatprep.subr.mxu0 %v20084_v57  ;;  %15388 = vmatprep.subr.mxu1 %v6596_v39  ;;  %v6624_v21 = vand.u32 4294901760, %v6623_v8  ;;  %v20308_v58 = vsub.f32 %v5493_v22, %v20287_v43  ;;  %v5524_v22 = vsel %vm5515_vm5, %v5522_v10, %v24767_v38  ;;  %v6638_v8 = vand.u32 4294901760, %v6637_v35 }
 0x3bb   : > { %15346 = vmatpush3.msra.mxu0 %v20084_v57  ;;  %15389 = vmatpush3.msra.mxu1 %v6596_v39  ;;  %v5529_v39 = vrot.slane %v5459_v4, 3  ;;  %v6645_v4 = vand.u32 4294901760, %v6644_v11  ;;  %v20332_v32 = vand.u32 4294901760, %v5524_v22 }
 0x3bc   : > { %6339 = vmatmul.mubr.f32.gmra.mxu0 %v24763_v16  ;;  %15347 = vmatprep.subr.mxu0 %v20095_v18 }
 0x3bd   : > { %15390 = vmatprep.subr.mxu1 %v6603_v44  ;;  %15348 = vmatpush3.msra.mxu0 %v20095_v18  ;;  %v5530_v59 = vsel %vm5515_vm5, %v24767_v38, %v5529_v39  ;;  %v20343_v38 = vsub.f32 %v5524_v22, %v20332_v32 }
 0x3be   : > { %15391 = vmatpush3.msra.mxu1 %v6603_v44  ;;  %15349 = vmatprep.subr.mxu0 %v20106_v29  ;;  %v20315_v44 = vand.u32 4294901760, %v20297_v42  ;;  %v20335_v10 = vand.u32 4294901760, %v5530_v59 }
 0x3bf   : > { %6450 = vmatmul.mubr.f32.gmra.mxu1 %v24763_v16  ;;  %15392 = vmatprep.subr.mxu1 %v6610_v24  ;;  %v6651_v16 = vsub.f32 %v20285_v56, %v20305_v17 }
 0x3c0   : > { %15350 = vmatpush3.msra.mxu0 %v20106_v29  ;;  %15393 = vmatpush3.msra.mxu1 %v6610_v24  ;;  %24766 = vst [vmem:[#allocation26_spill] sm:$0xff] %v20315_v44  ;;  %v20324_v24 = vand.u32 4294901760, %v20308_v58 }
 0x3c1   : > { %15351 = vmatprep.subr.mxu0 %v20120_v9  ;;  %15394 = vmatprep.subr.mxu1 %v6617_v45  ;;  %v15202_v35 = vpop.f32.mrf.mxu1 }
 0x3c2   : > { %15352 = vmatpush3.msra.mxu0 %v20120_v9  ;;  %15395 = vmatpush3.msra.mxu1 %v6617_v45  ;;  %24768 = vst [vmem:[#allocation18_spill] sm:$0xff] %v20324_v24  ;;  %v6658_v45 = vsub.f32 %v20297_v42, %v20315_v44  ;;  %v6665_v39 = vsub.f32 %v20308_v58, %v20324_v24 }
 0x3c3   : > { %15353 = vmatprep.subr.mxu0 %v20139_v3  ;;  %15396 = vmatprep.subr.mxu1 %v6624_v21 }
 0x3c4   : > { %15354 = vmatpush3.msra.mxu0 %v20139_v3  ;;  %15397 = vmatpush3.msra.mxu1 %v6624_v21  ;;  %v6652_v21 = vand.u32 4294901760, %v6651_v16  ;;  %v20348_v16 = vsub.f32 %v5530_v59, %v20335_v10  ;;  %v6666_v17 = vand.u32 4294901760, %v6665_v39 }
 0x3c5   : > { %15355 = vmatprep.subr.mxu0 %v20153_v26  ;;  %15398 = vmatprep.subr.mxu1 %v6631_v47 }
 0x3c6   : > { %15356 = vmatpush3.msra.mxu0 %v20153_v26  ;;  %15399 = vmatpush3.msra.mxu1 %v6631_v47  ;;  %v6659_v47 = vand.u32 4294901760, %v6658_v45  ;;  %v6548_v59 = vand.u32 4294901760, %v20348_v16 }
 0x3c7   : > { %15357 = vmatprep.subr.mxu0 %v20178_v13  ;;  %15400 = vmatprep.subr.mxu1 %v6638_v8 }
 0x3c8   : > { %15358 = vmatpush3.msra.mxu0 %v20178_v13  ;;  %15401 = vmatpush3.msra.mxu1 %v6638_v8  ;;  %v15167_v11 = vpop.f32.mrf.mxu0  ;;  %v5016_v8 = vpop.f32.mrf.mxu1 }
 0x3c9   : > { %15359 = vmatprep.subr.mxu0 %v20193_v36  ;;  %15402 = vmatprep.subr.mxu1 %v6645_v4  ;;  %v4866_v44 = vadd.f32 %v15167_v11, %v20222_v15  ;;  %v6538_v15 = vand.u32 4294901760, %v20343_v38 }
 0x3ca   : > { %15360 = vmatpush3.msra.mxu0 %v20193_v36  ;;  %15403 = vmatpush3.msra.mxu1 %v6645_v4  ;;  %v4855_v24 = vpop.f32.mrf.mxu0  ;;  %v7178_v4 = vld [vmem:[#allocation4 + $0x6f0] sm:$0xff] }
 0x3cb   : > { %15361 = vmatprep.subr.mxu0 %v20200_v46  ;;  %15404 = vmatprep.subr.mxu1 %v6652_v21  ;;  %v20351_v62 = vadd.f32 %v15202_v35, %v4866_v44  ;;  %v4856_v45 = vadd.f32 %v4855_v24, %v20180_v55  ;;  %v6539_v55 = vsub.f32 %v20343_v38, %v6538_v15  ;;  %v7162_v35 = vld [vmem:[#allocation4 + $0x670] sm:$0xff] }
 0x3cc   : > { %15362 = vmatpush3.msra.mxu0 %v20200_v46  ;;  %15405 = vmatpush3.msra.mxu1 %v6652_v21  ;;  %v6549_v44 = vsub.f32 %v20348_v16, %v6548_v59 }
 0x3cd   : > { %15363 = vmatprep.subr.mxu0 %v20220_v30  ;;  %15406 = vmatprep.subr.mxu1 %v6659_v47  ;;  %v20357_v22 = vadd.f32 %v5016_v8, %v4856_v45  ;;  %v7160_v45 = vld [vmem:[#allocation4 + $0x660] sm:$0xff] }
 0x3ce   : > { %15364 = vmatpush3.msra.mxu0 %v20220_v30  ;;  %15407 = vmatpush3.msra.mxu1 %v6659_v47  ;;  %v6550_v24 = vand.u32 4294901760, %v6549_v44  ;;  %v7159_v44 = vld [vmem:[#allocation4 + $0x658] sm:$0xff] }
 0x3cf   : > { %15365 = vmatprep.subr.mxu0 %v20236_v53  ;;  %15408 = vmatprep.subr.mxu1 %v6666_v17 }
 0x3d0   : > { %15366 = vmatpush3.msra.mxu0 %v20236_v53  ;;  %15409 = vmatpush3.msra.mxu1 %v6666_v17  ;;  %v6540_v17 = vand.u32 4294901760, %v6539_v55 }
 0x3d1   : > { %15367 = vmatprep.subr.mxu0 %v20250_v25  ;;  %15410 = vmatprep.mubr.f32.mxu1 %v20332_v32 }
 0x3d2   : > { %15448 = vmatprep.subr.mxu1 %v20073_v7  ;;  %15368 = vmatpush3.msra.mxu0 %v20250_v25 }
 0x3d3   : > { %15411 = vmatmul.mubr.f32.vlgmr.msra.gmra.mxu1 %v20335_v10  ;;  %15369 = vmatprep.subr.mxu0 %v20262_v1 }
 0x3d4   : > { %15449 = vmatpush3.msra.mxu1 %v20073_v7  ;;  %15370 = vmatpush3.msra.mxu0 %v20262_v1 }
 0x3d5   : > { %15450 = vmatprep.subr.mxu1 %v20084_v57  ;;  %15371 = vmatprep.subr.mxu0 %v20275_v52 }
 0x3d6   : > { %15451 = vmatpush3.msra.mxu1 %v20084_v57  ;;  %15372 = vmatpush3.msra.mxu0 %v20275_v52 }
 0x3d7   : > { %15452 = vmatprep.subr.mxu1 %v20095_v18  ;;  %15373 = vmatprep.subr.mxu0 %v20287_v43 }
 0x3d8   : > { %15453 = vmatpush3.msra.mxu1 %v20095_v18  ;;  %15374 = vmatpush3.msra.mxu0 %v20287_v43 }
 0x3d9   : > { %15454 = vmatprep.subr.mxu1 %v20106_v29  ;;  %15375 = vmatprep.mubr.f32.mxu0 %v6540_v17 }
 0x3da   : > { %15455 = vmatpush3.msra.mxu1 %v20106_v29  ;;  %15376 = vmatmul.mubr.f32.vlgmr.msra.gmra.mxu0 %v6550_v24  ;;  %v7174_v24 = vld [vmem:[#allocation4 + $0x6d0] sm:$0xff] }
 0x3db   : > { %15413 = vmatprep.subr.mxu0 %v20090_v2  ;;  %15456 = vmatprep.subr.mxu1 %v20120_v9 }
 0x3dc   : > { %15414 = vmatpush3.msra.mxu0 %v20090_v2  ;;  %15457 = vmatpush3.msra.mxu1 %v20120_v9 }
 0x3dd   : > { %15415 = vmatprep.subr.mxu0 %v20104_v34  ;;  %15458 = vmatprep.subr.mxu1 %v20139_v3 }
 0x3de   : > { %15416 = vmatpush3.msra.mxu0 %v20104_v34  ;;  %15459 = vmatpush3.msra.mxu1 %v20139_v3 }
 0x3df   : > { %15417 = vmatprep.subr.mxu0 %v20118_v50  ;;  %15460 = vmatprep.subr.mxu1 %v20153_v26 }
 0x3e0   : > { %15418 = vmatpush3.msra.mxu0 %v20118_v50  ;;  %15461 = vmatpush3.msra.mxu1 %v20153_v26 }
 0x3e1   : > { %15419 = vmatprep.subr.mxu0 %v20132_v27  ;;  %15462 = vmatprep.subr.mxu1 %v20178_v13 }
 0x3e2   : > { %15420 = vmatpush3.msra.mxu0 %v20132_v27  ;;  %15463 = vmatpush3.msra.mxu1 %v20178_v13 }
 0x3e3   : > { %15421 = vmatprep.subr.mxu0 %v20148_v31  ;;  %15464 = vmatprep.subr.mxu1 %v20193_v36  ;;  %v15272_v2 = vpop.f32.mrf.mxu1 }
 0x3e4   : > { %15422 = vmatpush3.msra.mxu0 %v20148_v31  ;;  %15465 = vmatpush3.msra.mxu1 %v20193_v36 }
 0x3e5   : > { %15423 = vmatprep.subr.mxu0 %v20168_v28  ;;  %15466 = vmatprep.subr.mxu1 %v20200_v46  ;;  %v5222_v31 = vpop.f32.mrf.mxu1 }
 0x3e6   : > { %15424 = vmatpush3.msra.mxu0 %v20168_v28  ;;  %15467 = vmatpush3.msra.mxu1 %v20200_v46 }
 0x3e7   : > { %15425 = vmatprep.subr.mxu0 %v20186_v23  ;;  %15468 = vmatprep.subr.mxu1 %v20220_v30 }
 0x3e8   : > { %15426 = vmatpush3.msra.mxu0 %v20186_v23  ;;  %15469 = vmatpush3.msra.mxu1 %v20220_v30 }
 0x3e9   : > { %15427 = vmatprep.subr.mxu0 %v20208_v5  ;;  %15470 = vmatprep.subr.mxu1 %v20236_v53 }
 0x3ea   : > { %15428 = vmatpush3.msra.mxu0 %v20208_v5  ;;  %15471 = vmatpush3.msra.mxu1 %v20236_v53  ;;  %v15237_v34 = vpop.f32.mrf.mxu0 }
 0x3eb   : > { %15429 = vmatprep.subr.mxu0 %v20218_v14  ;;  %15472 = vmatprep.subr.mxu1 %v20250_v25  ;;  %v5134_v50 = vadd.f32 %v15237_v34, %v20351_v62  ;;  %v7163_v62 = vld [vmem:[#allocation4 + $0x678] sm:$0xff] }
 0x3ec   : > { %15430 = vmatpush3.msra.mxu0 %v20218_v14  ;;  %15473 = vmatpush3.msra.mxu1 %v20250_v25  ;;  %v5126_v27 = vpop.f32.mrf.mxu0  ;;  %v7142_v14 = vld [vmem:[#allocation3 + $0x8] sm:$0xf0] }
 0x3ed   : > { %15431 = vmatprep.subr.mxu0 %v20229_v12  ;;  %15474 = vmatprep.subr.mxu1 %v20262_v1  ;;  %v20426_v28 = vadd.f32 %v15272_v2, %v5134_v50  ;;  %v5127_v23 = vadd.f32 %v5126_v27, %v20357_v22  ;;  %v7175_v22 = vld [vmem:[#allocation4 + $0x6d8] sm:$0xff]  ;;  %v7158_v50 = vld [vmem:[#allocation4 + $0x650] sm:$0xff] }
 0x3ee   : > { %15432 = vmatpush3.msra.mxu0 %v20229_v12  ;;  %15475 = vmatpush3.msra.mxu1 %v20262_v1  ;;  %v20444_v12 = vld [vmem:[#allocation3 + $0x20] sm:$0xff]  ;;  %v20560_v34 = vand.u32 4294901760, %v7175_v22 }
 0x3ef   : > { %15433 = vmatprep.subr.mxu0 %v20248_v63  ;;  %15476 = vmatprep.subr.mxu1 %v20275_v52  ;;  %v20433_v5 = vadd.f32 %v5222_v31, %v5127_v23  ;;  %v7173_v31 = vld [vmem:[#allocation4 + $0x6c8] sm:$0xff] }
 0x3f0   : > { %15434 = vmatpush3.msra.mxu0 %v20248_v63  ;;  %15477 = vmatpush3.msra.mxu1 %v20275_v52  ;;  %v23977_v63 = vrot.slane %v20444_v12, 4  ;;  %24777 = vst [vmem:[#allocation29_spill] sm:$0xff] %v20560_v34 }
 0x3f1   : > { %15435 = vmatprep.subr.mxu0 %v20260_v41  ;;  %15478 = vmatprep.subr.mxu1 %v20287_v43 }
 0x3f2   : > { %15436 = vmatpush3.msra.mxu0 %v20260_v41  ;;  %15479 = vmatpush3.msra.mxu1 %v20287_v43  ;;  %v7205_v41 = vrot.slane %v7142_v14, 4 }
 0x3f3   : > { %15437 = vmatprep.subr.mxu0 %v20273_v54  ;;  %15480 = vmatprep.mubr.f32.mxu1 %v6538_v15 }
 0x3f4   : > { %15518 = vmatprep.subr.mxu1 %v20073_v7  ;;  %15438 = vmatpush3.msra.mxu0 %v20273_v54  ;;  %v7207_v54 = vsel %vm195_vm0, %v7205_v41, %v23977_v63 }
 0x3f5   : > { %15481 = vmatmul.mubr.f32.vlgmr.msra.gmra.mxu1 %v6548_v59  ;;  %15439 = vmatprep.subr.mxu0 %v20285_v56  ;;  %v20528_v59 = vand.u32 4294901760, %v7160_v45 }
 0x3f6   : > { %15519 = vmatpush3.msra.mxu1 %v20073_v7  ;;  %15440 = vmatpush3.msra.mxu0 %v20285_v56  ;;  %v7179_v7 = vld [vmem:[#allocation4 + $0x6f8] sm:$0xff] }
 0x3f7   : > { %15520 = vmatprep.subr.mxu1 %v20084_v57  ;;  %15441 = vmatprep.subr.mxu0 %v20297_v42  ;;  %v20469_v56 = vand.u32 4294901760, %v7179_v7  ;;  %v20575_v14 = vsub.f32 %v7160_v45, %v20528_v59 }
 0x3f8   : > { %15521 = vmatpush3.msra.mxu1 %v20084_v57  ;;  %15442 = vmatpush3.msra.mxu0 %v20297_v42  ;;  %v20465_v57 = vand.u32 4294901760, %v7207_v54  ;;  %v20471_v42 = vand.u32 4294901760, %v7163_v62 }
 0x3f9   : > { %15522 = vmatprep.subr.mxu1 %v20095_v18  ;;  %15443 = vmatprep.subr.mxu0 %v20308_v58  ;;  %v20489_v39 = vsub.f32 %v7179_v7, %v20469_v56  ;;  %24778 = vst [vmem:[#allocation44_spill] sm:$0xff] %v20575_v14  ;;  %v7157_v7 = vld [vmem:[#allocation4 + $0x648] sm:$0xff] }
 0x3fa   : > { %15523 = vmatpush3.msra.mxu1 %v20095_v18  ;;  %15444 = vmatpush3.msra.mxu0 %v20308_v58  ;;  %24769 = vst [vmem:[#allocation20_spill] sm:$0xff] %v20465_v57  ;;  %v20475_v18 = vand.u32 4294901760, %v7178_v4  ;;  %v7177_v58 = vld [vmem:[#allocation4 + $0x6e8] sm:$0xff]  ;;  %v20484_v21 = vsub.f32 %v7207_v54, %v20465_v57  ;;  %v20492_v11 = vsub.f32 %v7163_v62, %v20471_v42  ;;  %v20578_v54 = vand.u32 4294901760, %v7174_v24  ;;  %v7155_v62 = vld [vmem:[#allocation4 + $0x638] sm:$0xff] }
 0x3fb   : > { %15524 = vmatprep.subr.mxu1 %v20106_v29  ;;  %15445 = vmatprep.mubr.f32.mxu0 %v20343_v38  ;;  %24770 = vst [vmem:[#allocation13_spill] sm:$0xff] %v20489_v39  ;;  %v20501_v47 = vand.u32 4294901760, %v7177_v58 }
 0x3fc   : > { %15525 = vmatpush3.msra.mxu1 %v20106_v29  ;;  %15446 = vmatmul.mubr.f32.vlgmr.msra.gmra.mxu0 %v20348_v16  ;;  %v20481_v29 = vand.u32 4294901760, %v7162_v35  ;;  %24771 = vst [vmem:[#allocation28_spill] sm:$0xff] %v20492_v11  ;;  %v23975_v16 = vand.u32 4294901760, %v20489_v39 }
 0x3fd   : > { %15483 = vmatprep.subr.mxu0 %v20112_v61  ;;  %15526 = vmatprep.subr.mxu1 %v20120_v9 }
 0x3fe   : > { %15484 = vmatpush3.msra.mxu0 %v20112_v61  ;;  %15527 = vmatpush3.msra.mxu1 %v20120_v9  ;;  %v20497_v61 = vsub.f32 %v7178_v4, %v20475_v18  ;;  %v7161_v9 = vld [vmem:[#allocation4 + $0x668] sm:$0xff]  ;;  %v20506_v38 = vsub.f32 %v7162_v35, %v20481_v29  ;;  %v20585_v35 = vand.u32 4294901760, %v7158_v50 }
 0x3ff   : > { %15485 = vmatprep.subr.mxu0 %v20129_v37  ;;  %15528 = vmatprep.subr.mxu1 %v20139_v3  ;;  %v20513_v8 = vand.u32 4294901760, %v7161_v9 }
 0x400   : > { %15486 = vmatpush3.msra.mxu0 %v20129_v37  ;;  %15529 = vmatpush3.msra.mxu1 %v20139_v3  ;;  %24772 = vst [vmem:[#allocation38_spill] sm:$0xff] %v20497_v61  ;;  %v7176_v37 = vld [vmem:[#allocation4 + $0x6e0] sm:$0xff]  ;;  %24773 = vst [vmem:[#allocation39_spill] sm:$0xff] %v20506_v38  ;;  %v23976_v3 = vand.u32 4294901760, %v20484_v21 }
 0x401   : > { %15487 = vmatprep.subr.mxu0 %v20145_v19  ;;  %15530 = vmatprep.subr.mxu1 %v20153_v26  ;;  %v20518_v15 = vand.u32 4294901760, %v7176_v37  ;;  %v20548_v17 = vsub.f32 %v7161_v9, %v20513_v8 }
 0x402   : > { %15488 = vmatpush3.msra.mxu0 %v20145_v19  ;;  %15531 = vmatpush3.msra.mxu1 %v20153_v26  ;;  %v23974_v19 = vand.u32 4294901760, %v20492_v11  ;;  %v23973_v26 = vand.u32 4294901760, %v20497_v61  ;;  %v20533_v55 = vsub.f32 %v20484_v21, %v23976_v3  ;;  %v20607_v3 = vand.u32 4294901760, %v7157_v7 }
 0x403   : > { %15489 = vmatprep.subr.mxu0 %v20161_v51  ;;  %15532 = vmatprep.subr.mxu1 %v20178_v13  ;;  %24775 = vst [vmem:[#allocation19_spill] sm:$0xff] %v20548_v17  ;;  %v20558_v2 = vsub.f32 %v7176_v37, %v20518_v15  ;;  %v23979_v4 = vand.u32 4294901760, %v20548_v17 }
 0x404   : > { %15490 = vmatpush3.msra.mxu0 %v20161_v51  ;;  %15533 = vmatpush3.msra.mxu1 %v20178_v13  ;;  %v20523_v51 = vsub.f32 %v7177_v58, %v20501_v47  ;;  %v23972_v13 = vand.u32 4294901760, %v20506_v38  ;;  %v15342_v41 = vpop.f32.mrf.mxu1  ;;  %v7172_v58 = vld [vmem:[#allocation4 + $0x6c0] sm:$0xff] }
 0x405   : > { %15491 = vmatprep.subr.mxu0 %v20176_v49  ;;  %15534 = vmatprep.subr.mxu1 %v20193_v36  ;;  %24776 = vst [vmem:[#allocation30_spill] sm:$0xff] %v20558_v2  ;;  %v23980_v37 = vand.u32 4294901760, %v20558_v2  ;;  %v20616_v9 = vand.u32 4294901760, %v7172_v58 }
 0x406   : > { %15492 = vmatpush3.msra.mxu0 %v20176_v49  ;;  %24774 = vst [vmem:[#allocation40_spill] sm:$0xff] %v20523_v51  ;;  %15535 = vmatpush3.msra.mxu1 %v20193_v36  ;;  %v20540_v49 = vsub.f32 %v20489_v39, %v23975_v16  ;;  %v20545_v36 = vsub.f32 %v20492_v11, %v23974_v19  ;;  %v23978_v27 = vand.u32 4294901760, %v20523_v51  ;;  %v7145_v11 = vld [vmem:[#allocation3 + $0x38] sm:$0xf] }
 0x407   : > { %15493 = vmatprep.subr.mxu0 %v20197_v33  ;;  %15536 = vmatprep.subr.mxu1 %v20200_v46  ;;  %v20572_v23 = vsub.f32 %v20506_v38, %v23972_v13  ;;  %v20594_v13 = vand.u32 4294901760, %v7173_v31 }
 0x408   : > { %15494 = vmatpush3.msra.mxu0 %v20197_v33  ;;  %15537 = vmatpush3.msra.mxu1 %v20200_v46  ;;  %v20555_v33 = vsub.f32 %v20497_v61, %v23973_v26  ;;  %v20565_v46 = vand.u32 4294901760, %v7159_v44  ;;  %v7156_v26 = vld [vmem:[#allocation4 + $0x640] sm:$0xff] }
 0x409   : > { %15495 = vmatprep.subr.mxu0 %v20213_v60  ;;  %15538 = vmatprep.subr.mxu1 %v20220_v30 }
 0x40a   : > { %15496 = vmatpush3.msra.mxu0 %v20213_v60  ;;  %15539 = vmatpush3.msra.mxu1 %v20220_v30  ;;  %v20605_v16 = vsub.f32 %v7159_v44, %v20565_v46  ;;  %v20614_v60 = vsub.f32 %v7174_v24, %v20578_v54  ;;  %v20622_v44 = vsub.f32 %v7158_v50, %v20585_v35 }
 0x40b   : > { %15497 = vmatprep.subr.mxu0 %v20234_v0  ;;  %15540 = vmatprep.subr.mxu1 %v20236_v53  ;;  %v20631_v24 = vsub.f32 %v20548_v17, %v23979_v4  ;;  %v20649_v4 = vsub.f32 %v7157_v7, %v20607_v3  ;;  %v20655_v30 = vsub.f32 %v7172_v58, %v20616_v9  ;;  %v7149_v17 = vld [vmem:[#allocation4 + $0x608] sm:$0xff] }
 0x40c   : > { %15498 = vmatpush3.msra.mxu0 %v20234_v0  ;;  %15541 = vmatpush3.msra.mxu1 %v20236_v53  ;;  %v20592_v0 = vsub.f32 %v7175_v22, %v20560_v34  ;;  %v20601_v53 = vsub.f32 %v20523_v51, %v23978_v27  ;;  %24780 = vst [vmem:[#allocation37_spill] sm:$0xff] %v20605_v16  ;;  %24781 = vst [vmem:[#allocation24_spill] sm:$0xff] %v20614_v60  ;;  %v5442_v27 = vpop.f32.mrf.mxu1  ;;  %v7171_v22 = vld [vmem:[#allocation4 + $0x6b8] sm:$0xff]  ;;  %v23983_v50 = vand.u32 4294901760, %v20605_v16 }
 0x40d   : > { %15499 = vmatprep.subr.mxu0 %v20245_v40  ;;  %v15307_v45 = vpop.f32.mrf.mxu0  ;;  %15542 = vmatprep.subr.mxu1 %v20250_v25  ;;  %24782 = vst [vmem:[#allocation36_spill] sm:$0xff] %v20622_v44  ;;  %24786 = vst [vmem:[#allocation48_spill] sm:$0xff] %v20649_v4 }
 0x40e   : > { %24779 = vst [vmem:[#allocation41_spill] sm:$0xff] %v20592_v0  ;;  %15500 = vmatpush3.msra.mxu0 %v20245_v40  ;;  %v5356_v19 = vadd.f32 %v15307_v45, %v20426_v28  ;;  %15543 = vmatpush3.msra.mxu1 %v20250_v25  ;;  %v23981_v40 = vand.u32 4294901760, %v20575_v14  ;;  %v20624_v45 = vand.u32 4294901760, %v7156_v26  ;;  %24787 = vst [vmem:[#allocation25_spill] sm:$0xff] %v20655_v30 }
 0x40f   : > { %15501 = vmatprep.subr.mxu0 %v20254_v20  ;;  %v5349_v63 = vpop.f32.mrf.mxu0  ;;  %15544 = vmatprep.subr.mxu1 %v20262_v1 }
 0x410   : > { %15502 = vmatpush3.msra.mxu0 %v20254_v20  ;;  %v5449_v28 = vadd.f32 %v15342_v41, %v5356_v19  ;;  %v5350_v25 = vadd.f32 %v5349_v63, %v20433_v5  ;;  %15545 = vmatpush3.msra.mxu1 %v20262_v1  ;;  %v20636_v20 = vsub.f32 %v20558_v2, %v23980_v37  ;;  %v23982_v5 = vand.u32 4294901760, %v20592_v0  ;;  %v24784_v1 = vld [vmem:[#allocation32_spill] sm:$0xff]  ;;  %v7170_v37 = vld [vmem:[#allocation4 + $0x6b0] sm:$0xff] }
 0x411   : > { %15503 = vmatprep.subr.mxu0 %v20270_v6  ;;  %v20640_v63 = vsub.f32 %v7173_v31, %v20594_v13  ;;  %15546 = vmatprep.subr.mxu1 %v20275_v52  ;;  %v20673_v58 = vsub.f32 %v7156_v26, %v20624_v45  ;;  %v7169_v31 = vld [vmem:[#allocation4 + $0x6a8] sm:$0xff] }
 0x412   : > { %15504 = vmatpush3.msra.mxu0 %v20270_v6  ;;  %v20645_v19 = vadd.f32 %v5449_v28, %v24784_v1  ;;  %v5443_v41 = vadd.f32 %v5442_v27, %v5350_v25  ;;  %15547 = vmatpush3.msra.mxu1 %v20275_v52  ;;  %v20657_v6 = vand.u32 4294901760, %v7171_v22  ;;  %v20659_v28 = vand.u32 4294901760, %v7155_v62  ;;  %v24788_v52 = vld [vmem:[#allocation46_spill] sm:$0xff]  ;;  %v24791_v25 = vld [vmem:[#allocation16_spill] sm:$0xff] }
 0x413   : > { %24783 = vst [vmem:[#allocation50_spill] sm:$0xff] %v20640_v63  ;;  %15505 = vmatprep.subr.mxu0 %v20282_v48  ;;  %15548 = vmatprep.subr.mxu1 %v20287_v43  ;;  %v20666_v27 = vsub.f32 %v20575_v14, %v23981_v40  ;;  %24790 = vst [vmem:[#allocation42_spill] sm:$0xff] %v20673_v58  ;;  %v7481_v1 = vand.u32 4294901760, %v20601_v53  ;;  %v7488_v26 = vand.u32 4294901760, %v20636_v20  ;;  %v24792_v40 = vand.u32 4294901760, %v20540_v49 }
 0x414   : > { %24785 = vst [vmem:[#allocation51_spill] sm:$0xff] %v20645_v19  ;;  %15506 = vmatpush3.msra.mxu0 %v20282_v48  ;;  %v20669_v7 = vadd.f32 %v5443_v41, %v24788_v52  ;;  %15549 = vmatpush3.msra.mxu1 %v20287_v43  ;;  %v20681_v48 = vsub.f32 %v20592_v0, %v23982_v5  ;;  %v20684_v41 = vand.u32 4294901760, %v7170_v37  ;;  %v7154_v52 = vld [vmem:[#allocation4 + $0x630] sm:$0xff]  ;;  %v7369_v43 = vand.u32 4294901760, %v20631_v24  ;;  %v7153_v5 = vld [vmem:[#allocation4 + $0x628] sm:$0xff]  ;;  %v24807_v0 = vld [vmem:[#allocation26_spill] sm:$0xff] }
 0x415   : > { %15550 = vmatprep.mubr.f32.mxu1 %v20332_v32  ;;  %15507 = vmatprep.subr.mxu0 %v24791_v25  ;;  %v20693_v53 = vsub.f32 %v20605_v16, %v23983_v50  ;;  %v20706_v20 = vsub.f32 %v7171_v22, %v20657_v6  ;;  %v20709_v50 = vsub.f32 %v7155_v62, %v20659_v28  ;;  %v7168_v16 = vld [vmem:[#allocation4 + $0x6a0] sm:$0xff]  ;;  %v24796_v49 = vand.u32 4294901760, %v20545_v36 }
 0x416   : > { %24789 = vst [vmem:[#allocation43_spill] sm:$0xff] %v20669_v7  ;;  %15551 = vmatmul.mubr.f32.vlgmr.msra.gmra.mxu1 %v20335_v10  ;;  %13743 = vmatprep.subr.mxu1 %v24792_v40  ;;  %v24793_v7 = vand.u32 4294901760, %v20614_v60  ;;  %v7376_v40 = vand.u32 4294901760, %v20666_v27  ;;  %v20721_v24 = vand.u32 4294901760, %v7154_v52  ;;  %v24798_v62 = vld [vmem:[#allocation35_spill] sm:$0xff]  ;;  %v7495_v36 = vand.u32 4294901760, %v20681_v48 }
 0x417   : > { %15508 = vmatpush3.msra.mxu0 %v24791_v25  ;;  %24794 = vst [vmem:[#allocation27_spill] sm:$0xff] %v20706_v20  ;;  %24795 = vst [vmem:[#allocation47_spill] sm:$0xff] %v20709_v50  ;;  %13744 = vmatpush3.msra.mxu1 %v24796_v49  ;;  %v24800_v49 = vand.u32 4294901760, %v20640_v63  ;;  %v7152_v22 = vld [vmem:[#allocation4 + $0x620] sm:$0xff]  ;;  %v24809_v2 = vand.u32 4294901760, %v20673_v58 }
 0x418   : > { %v20702_v19 = vsub.f32 %v20614_v60, %v24793_v7  ;;  %7575 = vmatprep.mubr.f32.mxu1 %v20465_v57  ;;  %v24797_v7 = vand.u32 4294901760, %v20622_v44  ;;  %15509 = vmatprep.subr.mxu0 %v24798_v62  ;;  %v24799_v60 = vand.u32 4294901760, %v20555_v33  ;;  %v20733_v57 = vsub.f32 %v7170_v37, %v20684_v41  ;;  %v7167_v37 = vld [vmem:[#allocation4 + $0x698] sm:$0xff] }
 0x419   : > { %v20730_v27 = vsub.f32 %v20640_v63, %v24800_v49  ;;  %15510 = vmatpush3.msra.mxu0 %v24798_v62  ;;  %v7383_v33 = vand.u32 4294901760, %v20693_v53  ;;  %v20746_v49 = vand.u32 4294901760, %v7153_v5  ;;  %v20748_v63 = vand.u32 4294901760, %v7168_v16  ;;  %v24811_v53 = vld [vmem:[#allocation18_spill] sm:$0xff]  ;;  %15515 = vmatprep.mubr.f32.mxu0 %v20332_v32 }
 0x41a   : > { %v20718_v25 = vsub.f32 %v20622_v44, %v24797_v7  ;;  %13745 = vmatprep.subr.mxu1 %v24799_v60  ;;  %24801 = vst [vmem:[#allocation21_spill] sm:$0xff] %v20733_v57  ;;  %v20735_v7 = vand.u32 4294901760, %v7169_v31  ;;  %v24803_v44 = vand.u32 4294901760, %v20572_v23  ;;  %v24804_v60 = vand.u32 4294901760, %v20649_v4  ;;  %15511 = vmatprep.subr.mxu0 %v24807_v0 }
 0x41b   : > { %24805 = vst [vmem:[#allocation31_spill] sm:$0xff] %v20746_v49  ;;  %24806 = vst [vmem:[#allocation33_spill] sm:$0xff] %v20748_v63  ;;  %v7502_v62 = vand.u32 4294901760, %v20702_v19  ;;  %v24808_v23 = vand.u32 4294901760, %v20655_v30  ;;  %15512 = vmatpush3.msra.mxu0 %v24807_v0  ;;  %v20767_v19 = vsub.f32 %v7154_v52, %v20721_v24  ;;  %v7165_v0 = vld [vmem:[#allocation4 + $0x688] sm:$0xff] }
 0x41c   : > { %24802 = vst [vmem:[#allocation14_spill] sm:$0xff] %v20735_v7  ;;  %13746 = vmatpush3.msra.mxu1 %v24803_v44  ;;  %v20744_v48 = vsub.f32 %v20649_v4, %v24804_v60  ;;  %v7151_v4 = vld [vmem:[#allocation4 + $0x618] sm:$0xff]  ;;  %v7390_v14 = vand.u32 4294901760, %v20718_v25  ;;  %15513 = vmatprep.subr.mxu0 %v24811_v53  ;;  %v7509_v60 = vand.u32 4294901760, %v20730_v27  ;;  %v20777_v25 = vand.u32 4294901760, %v7167_v37 }
 0x41d   : > { %13747 = vmatprep.subr.mxu1 %v7481_v1  ;;  %v20755_v44 = vsub.f32 %v20655_v30, %v24808_v23  ;;  %v20764_v1 = vsub.f32 %v20673_v58, %v24809_v2  ;;  %24810 = vst [vmem:[#allocation34_spill] sm:$0xff] %v20767_v19  ;;  %v20769_v23 = vand.u32 4294901760, %v7152_v22  ;;  %v7166_v30 = vld [vmem:[#allocation4 + $0x690] sm:$0xff]  ;;  %15514 = vmatpush3.msra.mxu0 %v24811_v53  ;;  %v20788_v27 = vand.u32 4294901760, %v7151_v4 }
 0x41e   : > { %13748 = vmatpush3.msra.mxu1 %v7369_v43  ;;  %v20775_v43 = vsub.f32 %v7169_v31, %v20735_v7  ;;  %24813 = vst [vmem:[#allocation45_spill] sm:$0xff] %v20777_v25  ;;  %v7150_v2 = vld [vmem:[#allocation4 + $0x610] sm:$0xff]  ;;  %v7397_v52 = vand.u32 4294901760, %v20744_v48  ;;  %v20783_v58 = vsub.f32 %v7153_v5, %v20746_v49  ;;  %15516 = vmatmul.mubr.f32.vlgmr.msra.gmra.mxu0 %v20335_v10  ;;  %v24816_v53 = vand.u32 4294901760, %v20706_v20 }
 0x41f   : > { %13749 = vmatprep.subr.mxu1 %v7488_v26  ;;  %v20786_v26 = vsub.f32 %v7168_v16, %v20748_v63  ;;  %v7516_v31 = vand.u32 4294901760, %v20755_v44  ;;  %v24817_v48 = vand.u32 4294901760, %v20709_v50  ;;  %v20802_v16 = vand.u32 4294901760, %v7166_v30  ;;  %13705 = vmatprep.subr.mxu0 %v20469_v56 }
 0x420   : > { %24812 = vst [vmem:[#allocation49_spill] sm:$0xff] %v20775_v43  ;;  %24814 = vst [vmem:[#allocation17_spill] sm:$0xff] %v20783_v58  ;;  %13750 = vmatpush3.msra.mxu1 %v7376_v40  ;;  %v20795_v32 = vsub.f32 %v20706_v20, %v24816_v53  ;;  %v7404_v10 = vand.u32 4294901760, %v20764_v1  ;;  %v20808_v44 = vsub.f32 %v7152_v22, %v20769_v23  ;;  %v20810_v53 = vand.u32 4294901760, %v7150_v2  ;;  %v7164_v20 = vld [vmem:[#allocation4 + $0x680] sm:$0xff] }
 0x421   : > { %24815 = vst [vmem:[#allocation15_spill] sm:$0xff] %v20786_v26  ;;  %v20800_v5 = vsub.f32 %v20709_v50, %v24817_v48  ;;  %13751 = vmatprep.subr.mxu1 %v7495_v36  ;;  %13706 = vmatpush3.msra.mxu0 %v20471_v42  ;;  %v24818_v48 = vand.u32 4294901760, %v20533_v55  ;;  %v24819_v50 = vand.u32 4294901760, %v20733_v57  ;;  %v20822_v1 = vsub.f32 %v7167_v37, %v20777_v25  ;;  %v7148_v40 = vld [vmem:[#allocation4 + $0x600] sm:$0xff] }
 0x422   : > { %v20824_v22 = vand.u32 4294901760, %v7165_v0  ;;  %13752 = vmatpush3.msra.mxu1 %v7383_v33  ;;  %13707 = vmatprep.subr.mxu0 %v20475_v18  ;;  %v7523_v37 = vand.u32 4294901760, %v20795_v32  ;;  %v20838_v33 = vsub.f32 %v7166_v30, %v20802_v16  ;;  %v20848_v38 = vsub.f32 %v7150_v2, %v20810_v53 }
 0x423   : > { %7324 = vmatprep.mubr.f32.mxu0 %v24818_v48  ;;  %v20818_v51 = vsub.f32 %v20733_v57, %v24819_v50  ;;  %v20830_v48 = vsub.f32 %v7151_v4, %v20788_v27  ;;  %v20832_v50 = vand.u32 4294901760, %v7149_v17  ;;  %13753 = vmatprep.subr.mxu1 %v7502_v62  ;;  %v7411_v36 = vand.u32 4294901760, %v20800_v5  ;;  %v7141_v5 = vld [vmem:[#allocation3] sm:$0xf0] }
 0x424   : > { %24820 = vst [vmem:[#allocation22_spill] sm:$0xff] %v20824_v22  ;;  %13708 = vmatpush3.msra.mxu0 %v20481_v29  ;;  %v20840_v57 = vand.u32 4294901760, %v7164_v20  ;;  %13754 = vmatpush3.msra.mxu1 %v7390_v14  ;;  %v24821_v4 = vand.u32 4294901760, %v20767_v19  ;;  %24822 = vst [vmem:[#allocation23_spill] sm:$0xff] %v20848_v38  ;;  %v20850_v32 = vand.u32 4294901760, %v7148_v40  ;;  %v24823_v14 = vand.u32 4294901760, %v20775_v43 }
 0x425   : > { %13709 = vmatprep.subr.mxu0 %v20501_v47  ;;  %13755 = vmatprep.subr.mxu1 %v7509_v60  ;;  %v7530_v30 = vand.u32 4294901760, %v20818_v51  ;;  %v24825_v2 = vand.u32 4294901760, %v20783_v58  ;;  %v24826_v62 = vand.u32 4294901760, %v20786_v26 }
 0x426   : > { %v7417_v55 = vsub.f32 %v20767_v19, %v24821_v4  ;;  %13710 = vmatpush3.msra.mxu0 %v20513_v8  ;;  %v7536_v61 = vsub.f32 %v20775_v43, %v24823_v14  ;;  %v20859_v4 = vsub.f32 %v7165_v0, %v20824_v22  ;;  %13756 = vmatpush3.msra.mxu1 %v7397_v52  ;;  %v7202_v43 = vrot.slane %v7141_v5, 4  ;;  %v13439_v39 = vpop.f32.mrf.mxu1 }
 0x427   : > { %13711 = vmatprep.subr.mxu0 %v20518_v15  ;;  %v7424_v60 = vsub.f32 %v20783_v58, %v24825_v2  ;;  %v7543_v51 = vsub.f32 %v20786_v26, %v24826_v62  ;;  %v20870_v14 = vsub.f32 %v7149_v17, %v20832_v50  ;;  %13757 = vmatprep.subr.mxu1 %v7516_v31  ;;  %v16284_v2 = vld [vmem:[#allocation3 + $0x18] sm:$0xff]  ;;  %v24829_v17 = vand.u32 4294901760, %v20808_v44  ;;  %v7144_v26 = vld [vmem:[#allocation3 + $0x30] sm:$0xf] }
 0x428   : > { %24824 = vst [vmem:[#allocation32_spill] sm:$0xff] %v20859_v4  ;;  %13712 = vmatpush3.msra.mxu0 %v20528_v59  ;;  %v20875_v52 = vsub.f32 %v7164_v20, %v20840_v57  ;;  %v20877_v58 = vrot.slane %v16284_v2, 4  ;;  %13758 = vmatpush3.msra.mxu1 %v7404_v10  ;;  %v7418_v62 = vand.u32 4294901760, %v7417_v55  ;;  %v20885_v0 = vsub.f32 %v7148_v40, %v20850_v32 }
 0x429   : > { %24827 = vst [vmem:[#allocation46_spill] sm:$0xff] %v20870_v14  ;;  %13713 = vmatprep.subr.mxu0 %v20560_v34  ;;  %v7431_v31 = vsub.f32 %v20808_v44, %v24829_v17  ;;  %13759 = vmatprep.subr.mxu1 %v7523_v37  ;;  %v7537_v20 = vand.u32 4294901760, %v7536_v61  ;;  %v24830_v5 = vand.u32 4294901760, %v20822_v1  ;;  %v7213_v55 = vrot.slane %v7145_v11, 4  ;;  %v13440_v34 = vpop.f32.mrf.mxu1 }
 0x42a   : > { %24828 = vst [vmem:[#allocation16_spill] sm:$0xff] %v20877_v58  ;;  %13714 = vmatpush3.msra.mxu0 %v20565_v46  ;;  %13760 = vmatpush3.msra.mxu1 %v7411_v36  ;;  %v7425_v17 = vand.u32 4294901760, %v7424_v60  ;;  %v24831_v40 = vand.u32 4294901760, %v20830_v48  ;;  %v13441_v61 = vadd.f32 %v13440_v34, %v13439_v39  ;;  %v24832_v2 = vand.u32 4294901760, %v20838_v33 }
 0x42b   : > { %v7550_v10 = vsub.f32 %v20822_v1, %v24830_v5  ;;  %13715 = vmatprep.subr.mxu0 %v20578_v54  ;;  %13761 = vmatprep.subr.mxu1 %v7530_v30  ;;  %v7544_v5 = vand.u32 4294901760, %v7543_v51  ;;  %v7204_v60 = vsel %vm195_vm0, %v7202_v43, %v20877_v58  ;;  %v24833_v19 = vand.u32 4294901760, %v20848_v38  ;;  %v13442_v51 = vpop.f32.mrf.mxu1 }
 0x42c   : > { %v7438_v37 = vsub.f32 %v20830_v48, %v24831_v40  ;;  %13716 = vmatpush3.msra.mxu0 %v20585_v35  ;;  %v7557_v11 = vsub.f32 %v20838_v33, %v24832_v2  ;;  %13762 = vmatpush3.msra.mxu1 %v7418_v62  ;;  %v7432_v40 = vand.u32 4294901760, %v7431_v31  ;;  %v7211_v30 = vrot.slane %v7144_v26, 4 }
 0x42d   : > { %13717 = vmatprep.subr.mxu0 %v20594_v13  ;;  %v7445_v39 = vsub.f32 %v20848_v38, %v24833_v19  ;;  %13763 = vmatprep.subr.mxu1 %v7537_v20  ;;  %v7551_v2 = vand.u32 4294901760, %v7550_v10  ;;  %v24834_v36 = vand.u32 4294901760, %v20859_v4  ;;  %v24835_v31 = vand.u32 4294901760, %v20870_v14  ;;  %v13443_v26 = vpop.f32.mrf.mxu1 }
 0x42e   : > { %13718 = vmatpush3.msra.mxu0 %v20607_v3  ;;  %13764 = vmatpush3.msra.mxu1 %v7425_v17  ;;  %v7439_v62 = vand.u32 4294901760, %v7438_v37  ;;  %v20917_v38 = vand.u32 4294901760, %v7204_v60  ;;  %v7558_v20 = vand.u32 4294901760, %v7557_v11  ;;  %v24837_v10 = vand.u32 4294901760, %v20875_v52 }
 0x42f   : > { %v7564_v43 = vsub.f32 %v20859_v4, %v24834_v36  ;;  %13719 = vmatprep.subr.mxu0 %v20616_v9  ;;  %v7452_v19 = vsub.f32 %v20870_v14, %v24835_v31  ;;  %13765 = vmatprep.subr.mxu1 %v7544_v5  ;;  %v24838_v17 = vrot.slane %v20444_v12, 4  ;;  %v13444_v37 = vadd.f32 %v13443_v26, %v13442_v51 }
 0x430   : > { %24836 = vst [vmem:[#allocation35_spill] sm:$0xff] %v20917_v38  ;;  %13720 = vmatpush3.msra.mxu0 %v20624_v45  ;;  %v7571_v34 = vsub.f32 %v20875_v52, %v24837_v10  ;;  %13766 = vmatpush3.msra.mxu1 %v7432_v40  ;;  %v7446_v31 = vand.u32 4294901760, %v7445_v39  ;;  %v24839_v14 = vand.u32 4294901760, %v20885_v0  ;;  %v7212_v11 = vsel %vm195_vm0, %v20877_v58, %v7211_v30  ;;  %v13401_v4 = vpop.f32.mrf.mxu0  ;;  %v24857_v58 = vld [vmem:[#allocation48_spill] sm:$0xff] }
 0x431   : > { %v7214_v36 = vsel %vm195_vm0, %v24838_v17, %v7213_v55  ;;  %13721 = vmatprep.subr.mxu0 %v20657_v6  ;;  %13767 = vmatprep.subr.mxu1 %v7551_v2  ;;  %v7565_v10 = vand.u32 4294901760, %v7564_v43  ;;  %v7453_v12 = vand.u32 4294901760, %v7452_v19  ;;  %v20935_v55 = vsub.f32 %v7204_v60, %v20917_v38 }
 0x432   : > { %v7459_v5 = vsub.f32 %v20885_v0, %v24839_v14  ;;  %13722 = vmatpush3.msra.mxu0 %v20659_v28  ;;  %13768 = vmatpush3.msra.mxu1 %v7439_v62  ;;  %v20937_v40 = vand.u32 4294901760, %v7214_v36  ;;  %v13402_v39 = vpop.f32.mrf.mxu0  ;;  %v7572_v14 = vand.u32 4294901760, %v7571_v34  ;;  %v20940_v30 = vand.u32 4294901760, %v7212_v11 }
 0x433   : > { %13723 = vmatprep.subr.mxu0 %v20684_v41  ;;  %13769 = vmatprep.subr.mxu1 %v7558_v20  ;;  %v13403_v51 = vadd.f32 %v13402_v39, %v13401_v4  ;;  %v24042_v62 = vand.u32 4294901760, %v20935_v55  ;;  %v24844_v39 = vld [vmem:[#allocation29_spill] sm:$0xff] }
 0x434   : > { %24840 = vst [vmem:[#allocation26_spill] sm:$0xff] %v20937_v40  ;;  %13724 = vmatpush3.msra.mxu0 %v20721_v24  ;;  %24841 = vst [vmem:[#allocation18_spill] sm:$0xff] %v20940_v30  ;;  %13770 = vmatpush3.msra.mxu1 %v7446_v31  ;;  %v7460_v2 = vand.u32 4294901760, %v7459_v5  ;;  %v20949_v34 = vsub.f32 %v7214_v36, %v20937_v40  ;;  %v20953_v4 = vsub.f32 %v7212_v11, %v20940_v30 }
 0x435   : > { %13725 = vmatprep.subr.mxu0 %v20735_v7  ;;  %13771 = vmatprep.subr.mxu1 %v7565_v10  ;;  %v20944_v43 = vadd.f32 %v13441_v61, %v13403_v51  ;;  %v13404_v60 = vpop.f32.mrf.mxu0  ;;  %v7328_v26 = vsub.f32 %v20935_v55, %v24042_v62  ;;  %v24842_v11 = vand.u32 4294901760, %v20484_v21  ;;  %v24845_v51 = vld [vmem:[#allocation28_spill] sm:$0xff] }
 0x436   : > { %13726 = vmatpush3.msra.mxu0 %v20746_v49  ;;  %13772 = vmatpush3.msra.mxu1 %v7453_v12  ;;  %v24041_v20 = vand.u32 4294901760, %v20949_v34  ;;  %v24040_v36 = vand.u32 4294901760, %v20953_v4  ;;  %v24843_v12 = vld [vmem:[#allocation13_spill] sm:$0xff] }
 0x437   : > { %13727 = vmatprep.subr.mxu0 %v20748_v63  ;;  %13773 = vmatprep.subr.mxu1 %v7572_v14  ;;  %v13405_v19 = vpop.f32.mrf.mxu0 }
 0x438   : > { %13728 = vmatpush3.msra.mxu0 %v20769_v23  ;;  %13774 = vmatpush3.msra.mxu1 %v7460_v2  ;;  %v13406_v61 = vadd.f32 %v13405_v19, %v13404_v60  ;;  %v7337_v31 = vsub.f32 %v20949_v34, %v24041_v20  ;;  %v7343_v5 = vsub.f32 %v20953_v4, %v24040_v36  ;;  %v24846_v2 = vld [vmem:[#allocation38_spill] sm:$0xff]  ;;  %v24847_v60 = vld [vmem:[#allocation39_spill] sm:$0xff]  ;;  %v24848_v19 = vld [vmem:[#allocation40_spill] sm:$0xff] }
 0x439   : > { %13729 = vmatprep.subr.mxu0 %v20777_v25  ;;  %7577 = vmatmul.mubr.f32.vlgmr.msra.gmra.mxu1 %v20917_v38  ;;  %v24855_v36 = vld [vmem:[#allocation36_spill] sm:$0xff]  ;;  %v24856_v20 = vld [vmem:[#allocation50_spill] sm:$0xff]  ;;  %v24860_v38 = vld [vmem:[#allocation27_spill] sm:$0xff] }
 0x43a   : > { %13819 = vmatprep.subr.mxu1 %v20469_v56  ;;  %13730 = vmatpush3.msra.mxu0 %v20788_v27  ;;  %v20964_v17 = vadd.f32 %v13444_v37, %v13406_v61  ;;  %v7329_v37 = vand.u32 4294901760, %v7328_v26  ;;  %v7338_v10 = vand.u32 4294901760, %v7337_v31  ;;  %v7344_v14 = vand.u32 4294901760, %v7343_v5  ;;  %v24849_v61 = vld [vmem:[#allocation19_spill] sm:$0xff]  ;;  %v24850_v26 = vld [vmem:[#allocation30_spill] sm:$0xff]  ;;  %v24852_v5 = vld [vmem:[#allocation41_spill] sm:$0xff] }
 0x43b   : > { %7582 = vmatprep.mubr.f32.mxu1 %v20937_v40  ;;  %13820 = vmatpush3.msra.mxu1 %v20471_v42 }
 0x43c   : > { %13731 = vmatprep.subr.mxu0 %v20802_v16  ;;  %13821 = vmatprep.subr.mxu1 %v20475_v18 }
 0x43d   : > { %13732 = vmatpush3.msra.mxu0 %v20810_v53  ;;  %13822 = vmatpush3.msra.mxu1 %v20481_v29 }
 0x43e   : > { %13733 = vmatprep.subr.mxu0 %v20824_v22  ;;  %7584 = vmatmul.mubr.f32.gmra.mxu1 %v20940_v30  ;;  %v24858_v30 = vld [vmem:[#allocation25_spill] sm:$0xff] }
 0x43f   : > { %13823 = vmatprep.subr.mxu1 %v20501_v47  ;;  %13734 = vmatpush3.msra.mxu0 %v20832_v50 }
 0x440   : > { %13824 = vmatpush3.msra.mxu1 %v20513_v8  ;;  %7835 = vmatprep.mubr.f32.mxu1 %v24842_v11  ;;  %v24853_v11 = vld [vmem:[#allocation37_spill] sm:$0xff] }
 0x441   : > { %13735 = vmatprep.subr.mxu0 %v20840_v57  ;;  %13825 = vmatprep.subr.mxu1 %v20518_v15 }
 0x442   : > { %13736 = vmatpush3.msra.mxu0 %v20850_v32  ;;  %13826 = vmatpush3.msra.mxu1 %v20528_v59 }
 0x443   : > { %7330 = vmatmul.mubr.f32.vlgmr.msra.gmra.mxu0 %v7329_v37  ;;  %13781 = vmatprep.subr.mxu0 %v24843_v12  ;;  %v24851_v37 = vld [vmem:[#allocation44_spill] sm:$0xff] }
 0x444   : > { %13827 = vmatprep.subr.mxu1 %v24844_v39  ;;  %7339 = vmatprep.mubr.f32.mxu0 %v7338_v10 }
 0x445   : > { %13782 = vmatpush3.msra.mxu0 %v24845_v51  ;;  %13828 = vmatpush3.msra.mxu1 %v20565_v46 }
 0x446   : > { %13783 = vmatprep.subr.mxu0 %v24846_v2  ;;  %13829 = vmatprep.subr.mxu1 %v20578_v54 }
 0x447   : > { %13784 = vmatpush3.msra.mxu0 %v24847_v60  ;;  %13830 = vmatpush3.msra.mxu1 %v20585_v35 }
 0x448   : > { %7345 = vmatmul.mubr.f32.gmra.mxu0 %v7344_v14  ;;  %13785 = vmatprep.subr.mxu0 %v24848_v19 }
 0x449   : > { %13831 = vmatprep.subr.mxu1 %v20594_v13  ;;  %13786 = vmatpush3.msra.mxu0 %v24849_v61 }
 0x44a   : > { %7719 = vmatprep.mubr.f32.mxu0 %v20484_v21  ;;  %13832 = vmatpush3.msra.mxu1 %v20607_v3  ;;  %v13515_v31 = vpop.f32.mrf.mxu1  ;;  %v24854_v21 = vld [vmem:[#allocation24_spill] sm:$0xff] }
 0x44b   : > { %13787 = vmatprep.subr.mxu0 %v24850_v26  ;;  %13833 = vmatprep.subr.mxu1 %v20616_v9 }
 0x44c   : > { %13788 = vmatpush3.msra.mxu0 %v24851_v37  ;;  %13834 = vmatpush3.msra.mxu1 %v20624_v45  ;;  %v13516_v10 = vpop.f32.mrf.mxu1 }
 0x44d   : > { %13789 = vmatprep.subr.mxu0 %v24852_v5  ;;  %13835 = vmatprep.subr.mxu1 %v20657_v6  ;;  %v13517_v14 = vadd.f32 %v13516_v10, %v13515_v31  ;;  %v24859_v31 = vld [vmem:[#allocation42_spill] sm:$0xff] }
 0x44e   : > { %13790 = vmatpush3.msra.mxu0 %v24853_v11  ;;  %13836 = vmatpush3.msra.mxu1 %v20659_v28 }
 0x44f   : > { %13791 = vmatprep.subr.mxu0 %v24854_v21  ;;  %13837 = vmatprep.subr.mxu1 %v20684_v41  ;;  %v13518_v62 = vpop.f32.mrf.mxu1 }
 0x450   : > { %13792 = vmatpush3.msra.mxu0 %v24855_v36  ;;  %13838 = vmatpush3.msra.mxu1 %v20721_v24 }
 0x451   : > { %13793 = vmatprep.subr.mxu0 %v24856_v20  ;;  %13839 = vmatprep.subr.mxu1 %v20735_v7  ;;  %v13519_v40 = vpop.f32.mrf.mxu1  ;;  %v24861_v7 = vld [vmem:[#allocation47_spill] sm:$0xff] }
 0x452   : > { %13794 = vmatpush3.msra.mxu0 %v24857_v58  ;;  %13840 = vmatpush3.msra.mxu1 %v20746_v49  ;;  %v13520_v10 = vadd.f32 %v13519_v40, %v13518_v62  ;;  %v24862_v49 = vld [vmem:[#allocation21_spill] sm:$0xff] }
 0x453   : > { %13795 = vmatprep.subr.mxu0 %v24858_v30  ;;  %13841 = vmatprep.subr.mxu1 %v20748_v63  ;;  %v24863_v63 = vld [vmem:[#allocation34_spill] sm:$0xff]  ;;  %v24864_v40 = vld [vmem:[#allocation49_spill] sm:$0xff] }
 0x454   : > { %13796 = vmatpush3.msra.mxu0 %v24859_v31  ;;  %13842 = vmatpush3.msra.mxu1 %v20769_v23  ;;  %v13477_v20 = vpop.f32.mrf.mxu0  ;;  %v24865_v62 = vld [vmem:[#allocation17_spill] sm:$0xff] }
 0x455   : > { %13797 = vmatprep.subr.mxu0 %v24860_v38  ;;  %13843 = vmatprep.subr.mxu1 %v20777_v25 }
 0x456   : > { %13798 = vmatpush3.msra.mxu0 %v24861_v7  ;;  %13844 = vmatpush3.msra.mxu1 %v20788_v27  ;;  %v13478_v30 = vpop.f32.mrf.mxu0 }
 0x457   : > { %13799 = vmatprep.subr.mxu0 %v24862_v49  ;;  %13845 = vmatprep.subr.mxu1 %v20802_v16  ;;  %v13479_v31 = vadd.f32 %v13478_v30, %v13477_v20  ;;  %v24866_v49 = vld [vmem:[#allocation15_spill] sm:$0xff] }
 0x458   : > { %13800 = vmatpush3.msra.mxu0 %v24863_v63  ;;  %13846 = vmatpush3.msra.mxu1 %v20810_v53 }
 0x459   : > { %13801 = vmatprep.subr.mxu0 %v24864_v40  ;;  %13847 = vmatprep.subr.mxu1 %v20824_v22  ;;  %v6038_v7 = vadd.f32 %v13479_v31, %v20944_v43  ;;  %v13480_v25 = vpop.f32.mrf.mxu0  ;;  %v24868_v43 = vand.u32 4294901760, %v20949_v34 }
 0x45a   : > { %13802 = vmatpush3.msra.mxu0 %v24865_v62  ;;  %13848 = vmatpush3.msra.mxu1 %v20832_v50  ;;  %v24867_v62 = vand.u32 4294901760, %v20935_v55 }
 0x45b   : > { %13803 = vmatprep.subr.mxu0 %v24866_v49  ;;  %13849 = vmatprep.subr.mxu1 %v20840_v57  ;;  %v21038_v30 = vadd.f32 %v13517_v14, %v6038_v7  ;;  %v13481_v20 = vpop.f32.mrf.mxu0  ;;  %v24869_v7 = vld [vmem:[#allocation23_spill] sm:$0xff]  ;;  %v24871_v14 = vand.u32 4294901760, %v20953_v4 }
 0x45c   : > { %13804 = vmatpush3.msra.mxu0 %v20808_v44  ;;  %13850 = vmatpush3.msra.mxu1 %v20850_v32  ;;  %v13482_v22 = vadd.f32 %v13481_v20, %v13480_v25  ;;  %v7190_v20 = vld [vmem:[#allocation4 + $0x750] sm:$0xff] }
 0x45d   : > { %13805 = vmatprep.subr.mxu0 %v20822_v1  ;;  %7839 = vmatmul.mubr.f32.vlgmr.msra.gmra.mxu1 %v24867_v62 }
 0x45e   : > { %13895 = vmatprep.subr.mxu1 %v20469_v56  ;;  %13806 = vmatpush3.msra.mxu0 %v20830_v48  ;;  %v6047_v31 = vadd.f32 %v13482_v22, %v20964_v17  ;;  %v24870_v56 = vld [vmem:[#allocation32_spill] sm:$0xff]  ;;  %v24872_v22 = vld [vmem:[#allocation46_spill] sm:$0xff]  ;;  %v24882_v17 = vand.u32 4294901760, %v24852_v5 }
 0x45f   : > { %7846 = vmatprep.mubr.f32.mxu1 %v24868_v43  ;;  %13896 = vmatpush3.msra.mxu1 %v20471_v42  ;;  %v24873_v42 = vld [vmem:[#allocation20_spill] sm:$0xff]  ;;  %v24888_v5 = vld [vmem:[#allocation14_spill] sm:$0xff]  ;;  %v24893_v43 = vld [vmem:[#allocation33_spill] sm:$0xff] }
 0x460   : > { %13807 = vmatprep.subr.mxu0 %v20838_v33  ;;  %13897 = vmatprep.subr.mxu1 %v20475_v18  ;;  %v21053_v25 = vadd.f32 %v13520_v10, %v6047_v31  ;;  %v24874_v18 = vand.u32 4294901760, %v24843_v12  ;;  %v24894_v31 = vld [vmem:[#allocation42_spill] sm:$0xff] }
 0x461   : > { %13808 = vmatpush3.msra.mxu0 %v24869_v7  ;;  %13898 = vmatpush3.msra.mxu1 %v20481_v29  ;;  %v24875_v29 = vand.u32 4294901760, %v24845_v51 }
 0x462   : > { %13809 = vmatprep.subr.mxu0 %v24870_v56  ;;  %7850 = vmatmul.mubr.f32.gmra.mxu1 %v24871_v14  ;;  %v24895_v14 = vand.u32 4294901760, %v24894_v31 }
 0x463   : > { %13899 = vmatprep.subr.mxu1 %v20501_v47  ;;  %13810 = vmatpush3.msra.mxu0 %v24872_v22  ;;  %v24876_v47 = vand.u32 4294901760, %v24846_v2  ;;  %v24884_v2 = vand.u32 4294901760, %v24854_v21  ;;  %v24891_v21 = vld [vmem:[#allocation25_spill] sm:$0xff] }
 0x464   : > { %13900 = vmatpush3.msra.mxu1 %v20513_v8  ;;  %8127 = vmatprep.mubr.f32.mxu1 %v24873_v42  ;;  %v24877_v8 = vand.u32 4294901760, %v24847_v60 }
 0x465   : > { %13811 = vmatprep.subr.mxu0 %v20875_v52  ;;  %13901 = vmatprep.subr.mxu1 %v20518_v15  ;;  %v7195_v15 = vld [vmem:[#allocation4 + $0x778] sm:$0xff] }
 0x466   : > { %13812 = vmatpush3.msra.mxu0 %v20885_v0  ;;  %13902 = vmatpush3.msra.mxu1 %v20528_v59  ;;  %v24878_v59 = vand.u32 4294901760, %v24848_v19  ;;  %v7191_v19 = vld [vmem:[#allocation4 + $0x758] sm:$0xff] }
 0x467   : > { %7722 = vmatmul.mubr.f32.vlgmr.msra.gmra.mxu0 %v20935_v55  ;;  %13857 = vmatprep.subr.mxu0 %v24874_v18  ;;  %v21088_v55 = vand.u32 4294901760, %v7195_v15  ;;  %v21135_v62 = vand.u32 4294901760, %v7191_v19 }
 0x468   : > { %13903 = vmatprep.subr.mxu1 %v24844_v39  ;;  %7728 = vmatprep.mubr.f32.mxu0 %v20949_v34  ;;  %v24880_v34 = vand.u32 4294901760, %v24850_v26 }
 0x469   : > { %13858 = vmatpush3.msra.mxu0 %v24875_v29  ;;  %13904 = vmatpush3.msra.mxu1 %v20565_v46  ;;  %v24879_v46 = vand.u32 4294901760, %v24849_v61  ;;  %v21105_v39 = vsub.f32 %v7195_v15, %v21088_v55  ;;  %v24886_v61 = vld [vmem:[#allocation50_spill] sm:$0xff]  ;;  %v24898_v15 = vld [vmem:[#allocation47_spill] sm:$0xff] }
 0x46a   : > { %13859 = vmatprep.subr.mxu0 %v24876_v47  ;;  %13905 = vmatprep.subr.mxu1 %v20578_v54  ;;  %v7194_v54 = vld [vmem:[#allocation4 + $0x770] sm:$0xff]  ;;  %v24887_v26 = vand.u32 4294901760, %v24886_v61  ;;  %v7189_v47 = vld [vmem:[#allocation4 + $0x748] sm:$0xff] }
 0x46b   : > { %13860 = vmatpush3.msra.mxu0 %v24877_v8  ;;  %13906 = vmatpush3.msra.mxu1 %v20585_v35  ;;  %v24881_v35 = vand.u32 4294901760, %v24851_v37  ;;  %v21099_v12 = vand.u32 4294901760, %v7194_v54  ;;  %v24897_v8 = vld [vmem:[#allocation45_spill] sm:$0xff] }
 0x46c   : > { %7731 = vmatmul.mubr.f32.gmra.mxu0 %v20953_v4  ;;  %13861 = vmatprep.subr.mxu0 %v24878_v59  ;;  %v7193_v4 = vld [vmem:[#allocation4 + $0x768] sm:$0xff]  ;;  %v24899_v59 = vand.u32 4294901760, %v24898_v15 }
 0x46d   : > { %13907 = vmatprep.subr.mxu1 %v20594_v13  ;;  %13862 = vmatpush3.msra.mxu0 %v24879_v46  ;;  %v21119_v37 = vsub.f32 %v7194_v54, %v21099_v12 }
 0x46e   : > { %8016 = vmatprep.mubr.f32.mxu0 %v24873_v42  ;;  %13908 = vmatpush3.msra.mxu1 %v20607_v3  ;;  %v13591_v13 = vpop.f32.mrf.mxu1  ;;  %v24883_v3 = vand.u32 4294901760, %v24853_v11  ;;  %v24889_v11 = vand.u32 4294901760, %v24857_v58  ;;  %v24896_v42 = vand.u32 4294901760, %v24860_v38  ;;  %v24900_v38 = vld [vmem:[#allocation21_spill] sm:$0xff] }
 0x46f   : > { %13863 = vmatprep.subr.mxu0 %v24880_v34  ;;  %13909 = vmatprep.subr.mxu1 %v20616_v9  ;;  %v7192_v9 = vld [vmem:[#allocation4 + $0x760] sm:$0xff]  ;;  %v21144_v18 = vand.u32 4294901760, %v21119_v37  ;;  %v24901_v34 = vand.u32 4294901760, %v24900_v38 }
 0x470   : > { %13864 = vmatpush3.msra.mxu0 %v24881_v35  ;;  %13910 = vmatpush3.msra.mxu1 %v20624_v45  ;;  %v13592_v51 = vpop.f32.mrf.mxu1  ;;  %v21110_v45 = vand.u32 4294901760, %v7193_v4 }
 0x471   : > { %13865 = vmatprep.subr.mxu0 %v24882_v17  ;;  %13911 = vmatprep.subr.mxu1 %v20657_v6  ;;  %v13593_v60 = vadd.f32 %v13592_v51, %v13591_v13  ;;  %v24885_v6 = vand.u32 4294901760, %v24855_v36  ;;  %v24890_v36 = vld [vmem:[#allocation31_spill] sm:$0xff]  ;;  %v24902_v17 = vand.u32 4294901760, %v24863_v63  ;;  %v8253_v51 = vsub.f32 %v21119_v37, %v21144_v18  ;;  %v24905_v63 = vld [vmem:[#allocation17_spill] sm:$0xff] }
 0x472   : > { %13866 = vmatpush3.msra.mxu0 %v24883_v3  ;;  %13912 = vmatpush3.msra.mxu1 %v20659_v28  ;;  %v21121_v28 = vand.u32 4294901760, %v7192_v9  ;;  %v21133_v10 = vsub.f32 %v7193_v4, %v21110_v45  ;;  %v21163_v4 = vsub.f32 %v7191_v19, %v21135_v62  ;;  %v21168_v3 = vand.u32 4294901760, %v7189_v47  ;;  %v24904_v19 = vld [vmem:[#allocation22_spill] sm:$0xff] }
 0x473   : > { %13867 = vmatprep.subr.mxu0 %v24884_v2  ;;  %13913 = vmatprep.subr.mxu1 %v20684_v41  ;;  %v21127_v41 = vand.u32 4294901760, %v21105_v39  ;;  %v24906_v61 = vand.u32 4294901760, %v24905_v63  ;;  %v24916_v63 = vand.u32 4294901760, %v24872_v22 }
 0x474   : > { %13868 = vmatpush3.msra.mxu0 %v24885_v6  ;;  %13914 = vmatpush3.msra.mxu1 %v20721_v24  ;;  %v24892_v24 = vand.u32 4294901760, %v24891_v21  ;;  %v21147_v29 = vsub.f32 %v7192_v9, %v21121_v28  ;;  %v21160_v35 = vand.u32 4294901760, %v21133_v10  ;;  %v7188_v9 = vld [vmem:[#allocation4 + $0x740] sm:$0xff] }
 0x475   : > { %13869 = vmatprep.subr.mxu0 %v24887_v26  ;;  %13915 = vmatprep.subr.mxu1 %v24888_v5  ;;  %v8246_v46 = vsub.f32 %v21105_v39, %v21127_v41  ;;  %v24907_v5 = vand.u32 4294901760, %v24866_v49  ;;  %v21193_v21 = vand.u32 4294901760, %v7188_v9  ;;  %v21201_v49 = vsub.f32 %v7189_v47, %v21168_v3 }
 0x476   : > { %13870 = vmatpush3.msra.mxu0 %v24889_v11  ;;  %13916 = vmatpush3.msra.mxu1 %v24890_v36  ;;  %v21176_v2 = vand.u32 4294901760, %v21147_v29  ;;  %v8260_v11 = vsub.f32 %v21133_v10, %v21160_v35 }
 0x477   : > { %13871 = vmatprep.subr.mxu0 %v24892_v24  ;;  %13917 = vmatprep.subr.mxu1 %v24893_v43  ;;  %v13553_v58 = vpop.f32.mrf.mxu0  ;;  %v8247_v26 = vand.u32 4294901760, %v8246_v46  ;;  %v7186_v24 = vld [vmem:[#allocation4 + $0x730] sm:$0xff]  ;;  %v21223_v38 = vsub.f32 %v7188_v9, %v21193_v21 }
 0x478   : > { %13872 = vmatpush3.msra.mxu0 %v24895_v14  ;;  %13918 = vmatpush3.msra.mxu1 %v20769_v23  ;;  %v21154_v23 = vand.u32 4294901760, %v7190_v20  ;;  %v24909_v14 = vand.u32 4294901760, %v20822_v1  ;;  %v21215_v15 = vand.u32 4294901760, %v7186_v24  ;;  %v24911_v1 = vand.u32 4294901760, %v20830_v48 }
 0x479   : > { %13873 = vmatprep.subr.mxu0 %v24896_v42  ;;  %13919 = vmatprep.subr.mxu1 %v24897_v8  ;;  %v13554_v54 = vpop.f32.mrf.mxu0  ;;  %v8261_v46 = vand.u32 4294901760, %v8260_v11  ;;  %v24914_v48 = vand.u32 4294901760, %v24869_v7  ;;  %v7183_v7 = vld [vmem:[#allocation4 + $0x718] sm:$0xff]  ;;  %v7182_v11 = vld [vmem:[#allocation4 + $0x710] sm:$0xff] }
 0x47a   : > { %13874 = vmatpush3.msra.mxu0 %v24899_v59  ;;  %13920 = vmatpush3.msra.mxu1 %v20788_v27  ;;  %v13555_v13 = vadd.f32 %v13554_v54, %v13553_v58  ;;  %v24903_v27 = vand.u32 4294901760, %v24864_v40  ;;  %v7187_v40 = vld [vmem:[#allocation4 + $0x738] sm:$0xff]  ;;  %v8254_v58 = vand.u32 4294901760, %v8253_v51 }
 0x47b   : > { %13875 = vmatprep.subr.mxu0 %v24901_v34  ;;  %13921 = vmatprep.subr.mxu1 %v20802_v16  ;;  %v21208_v42 = vand.u32 4294901760, %v7187_v40  ;;  %v24912_v59 = vld [vmem:[#allocation26_spill] sm:$0xff] }
 0x47c   : > { %13876 = vmatpush3.msra.mxu0 %v24902_v17  ;;  %13922 = vmatpush3.msra.mxu1 %v20810_v53  ;;  %v6334_v6 = vadd.f32 %v13555_v13, %v21038_v30  ;;  %v13556_v16 = vpop.f32.mrf.mxu0  ;;  %v21183_v53 = vsub.f32 %v7190_v20, %v21154_v23  ;;  %v21191_v30 = vand.u32 4294901760, %v21163_v4  ;;  %v24908_v20 = vand.u32 4294901760, %v20808_v44  ;;  %v7184_v17 = vld [vmem:[#allocation4 + $0x720] sm:$0xff] }
 0x47d   : > { %13877 = vmatprep.subr.mxu0 %v24903_v27  ;;  %13923 = vmatprep.subr.mxu1 %v24904_v19  ;;  %v21228_v13 = vand.u32 4294901760, %v21201_v49  ;;  %v21233_v51 = vsub.f32 %v7187_v40, %v21208_v42  ;;  %v21244_v19 = vsub.f32 %v7186_v24, %v21215_v15  ;;  %v21251_v40 = vand.u32 4294901760, %v7184_v17 }
 0x47e   : > { %13878 = vmatpush3.msra.mxu0 %v24906_v61  ;;  %13924 = vmatpush3.msra.mxu1 %v20832_v50  ;;  %v13557_v36 = vpop.f32.mrf.mxu0  ;;  %v21195_v43 = vadd.f32 %v13593_v60, %v6334_v6  ;;  %v8267_v60 = vsub.f32 %v21147_v29, %v21176_v2  ;;  %v21212_v44 = vand.u32 4294901760, %v21183_v53  ;;  %v8274_v54 = vsub.f32 %v21163_v4, %v21191_v30 }
 0x47f   : > { %13879 = vmatprep.subr.mxu0 %v24907_v5  ;;  %13925 = vmatprep.subr.mxu1 %v20840_v57  ;;  %v13558_v50 = vadd.f32 %v13557_v36, %v13556_v16  ;;  %v13594_v31 = vpop.f32.mrf.mxu1  ;;  %v24910_v57 = vld [vmem:[#allocation35_spill] sm:$0xff]  ;;  %v8288_v5 = vsub.f32 %v21201_v49, %v21228_v13  ;;  %v24918_v36 = vand.u32 4294901760, %v20885_v0  ;;  %v21260_v22 = vand.u32 4294901760, %v21233_v51 }
 0x480   : > { %13880 = vmatpush3.msra.mxu0 %v24908_v20  ;;  %13926 = vmatpush3.msra.mxu1 %v20850_v32  ;;  %v7185_v32 = vld [vmem:[#allocation4 + $0x728] sm:$0xff]  ;;  %v8268_v27 = vand.u32 4294901760, %v8267_v60  ;;  %v8281_v16 = vsub.f32 %v21183_v53, %v21212_v44  ;;  %v8275_v61 = vand.u32 4294901760, %v8274_v54  ;;  %v21265_v20 = vand.u32 4294901760, %v7183_v7 }
 0x481   : > { %13881 = vmatprep.subr.mxu0 %v24909_v14  ;;  %8129 = vmatmul.mubr.f32.vlgmr.msra.gmra.mxu1 %v24910_v57  ;;  %v6341_v47 = vadd.f32 %v13558_v50, %v21053_v25  ;;  %v13595_v8 = vpop.f32.mrf.mxu1  ;;  %v24913_v25 = vand.u32 4294901760, %v20838_v33  ;;  %v21235_v6 = vand.u32 4294901760, %v7185_v32  ;;  %v24915_v33 = vand.u32 4294901760, %v24870_v56 }
 0x482   : > { %15588 = vmatprep.subr.mxu1 %v8247_v26  ;;  %13882 = vmatpush3.msra.mxu0 %v24911_v1  ;;  %v13596_v34 = vadd.f32 %v13595_v8, %v13594_v31  ;;  %v24917_v56 = vand.u32 4294901760, %v20875_v52  ;;  %v8282_v52 = vand.u32 4294901760, %v8281_v16  ;;  %v21269_v50 = vand.u32 4294901760, %v21244_v19  ;;  %v7181_v31 = vld [vmem:[#allocation4 + $0x708] sm:$0xff] }
 0x483   : > { %8134 = vmatprep.mubr.f32.mxu1 %v24912_v59  ;;  %15589 = vmatpush3.msra.mxu1 %v8247_v26  ;;  %v21249_v26 = vand.u32 4294901760, %v21223_v38  ;;  %v21263_v24 = vsub.f32 %v7185_v32, %v21235_v6  ;;  %v21275_v14 = vsub.f32 %v7184_v17, %v21251_v40  ;;  %v8289_v60 = vand.u32 4294901760, %v8288_v5 }
 0x484   : > { %13883 = vmatprep.subr.mxu0 %v24913_v25  ;;  %15590 = vmatprep.subr.mxu1 %v8254_v58  ;;  %v21237_v9 = vadd.f32 %v13596_v34, %v6341_v47  ;;  %v8302_v47 = vsub.f32 %v21233_v51, %v21260_v22  ;;  %v21288_v32 = vsub.f32 %v7183_v7, %v21265_v20  ;;  %v21290_v1 = vand.u32 4294901760, %v7181_v31 }
 0x485   : > { %13884 = vmatpush3.msra.mxu0 %v24914_v48  ;;  %15591 = vmatpush3.msra.mxu1 %v8254_v58  ;;  %v8295_v0 = vsub.f32 %v21223_v38, %v21249_v26  ;;  %v21277_v58 = vand.u32 4294901760, %v7182_v11  ;;  %v21285_v8 = vand.u32 4294901760, %v21263_v24  ;;  %v21297_v34 = vand.u32 4294901760, %v21275_v14  ;;  %v7143_v48 = vld [vmem:[#allocation3 + $0x10] sm:$0xf0] }
 0x486   : > { %13885 = vmatprep.subr.mxu0 %v24915_v33  ;;  %15592 = vmatprep.subr.mxu1 %v8261_v46  ;;  %v8303_v33 = vand.u32 4294901760, %v8302_v47  ;;  %v21309_v7 = vand.u32 4294901760, %v21288_v32  ;;  %v24923_v47 = vld [vmem:[#allocation16_spill] sm:$0xff] }
 0x487   : > { %13886 = vmatpush3.msra.mxu0 %v24916_v63  ;;  %15593 = vmatpush3.msra.mxu1 %v8261_v46  ;;  %v24919_v46 = vld [vmem:[#allocation18_spill] sm:$0xff]  ;;  %v8296_v54 = vand.u32 4294901760, %v8295_v0  ;;  %v21300_v25 = vsub.f32 %v7182_v11, %v21277_v58  ;;  %v8316_v16 = vsub.f32 %v21263_v24, %v21285_v8  ;;  %v21312_v63 = vsub.f32 %v7181_v31, %v21290_v1 }
 0x488   : > { %13887 = vmatprep.subr.mxu0 %v24917_v56  ;;  %15594 = vmatprep.subr.mxu1 %v8268_v27  ;;  %24920 = vst [vmem:[#allocation13_spill] sm:$0xff] %v21309_v7  ;;  %v7208_v56 = vrot.slane %v7143_v48, 4  ;;  %v8323_v5 = vsub.f32 %v21275_v14, %v21297_v34  ;;  %v8330_v0 = vsub.f32 %v21288_v32, %v21309_v7 }
 0x489   : > { %13888 = vmatpush3.msra.mxu0 %v24918_v36  ;;  %15595 = vmatpush3.msra.mxu1 %v8268_v27  ;;  %v7146_v27 = vld [vmem:[#allocation3 + $0x40] sm:$0xf]  ;;  %v21320_v11 = vand.u32 4294901760, %v21300_v25  ;;  %v8317_v31 = vand.u32 4294901760, %v8316_v16 }
 0x48a   : > { %8018 = vmatmul.mubr.f32.vlgmr.msra.gmra.mxu0 %v24910_v57  ;;  %15553 = vmatprep.subr.mxu0 %v21088_v55  ;;  %v7180_v57 = vld [vmem:[#allocation4 + $0x700] sm:$0xff] }
 0x48b   : > { %15596 = vmatprep.subr.mxu1 %v8275_v61  ;;  %8023 = vmatprep.mubr.f32.mxu0 %v24912_v59  ;;  %v8309_v59 = vsub.f32 %v21244_v19, %v21269_v50  ;;  %v21302_v17 = vand.u32 4294901760, %v7180_v57  ;;  %24921 = vst [vmem:[#allocation29_spill] sm:$0xff] %v21320_v11 }
 0x48c   : > { %15554 = vmatpush3.msra.mxu0 %v21088_v55  ;;  %15597 = vmatpush3.msra.mxu1 %v8275_v61 }
 0x48d   : > { %15555 = vmatprep.subr.mxu0 %v21099_v12  ;;  %15598 = vmatprep.subr.mxu1 %v8282_v52  ;;  %v8310_v61 = vand.u32 4294901760, %v8309_v59  ;;  %v21323_v36 = vsub.f32 %v7180_v57, %v21302_v17  ;;  %v7210_v57 = vsel %vm195_vm0, %v7208_v56, %v24923_v47  ;;  %v8324_v59 = vand.u32 4294901760, %v8323_v5 }
 0x48e   : > { %15556 = vmatpush3.msra.mxu0 %v21099_v12  ;;  %15599 = vmatpush3.msra.mxu1 %v8282_v52  ;;  %v7215_v52 = vrot.slane %v7146_v27, 4  ;;  %v8331_v27 = vand.u32 4294901760, %v8330_v0  ;;  %v21347_v16 = vand.u32 4294901760, %v7210_v57 }
 0x48f   : > { %8025 = vmatmul.mubr.f32.gmra.mxu0 %v24919_v46  ;;  %15557 = vmatprep.subr.mxu0 %v21110_v45 }
 0x490   : > { %15600 = vmatprep.subr.mxu1 %v8289_v60  ;;  %15558 = vmatpush3.msra.mxu0 %v21110_v45  ;;  %v7216_v48 = vsel %vm195_vm0, %v24923_v47, %v7215_v52  ;;  %v21358_v47 = vsub.f32 %v7210_v57, %v21347_v16 }
 0x491   : > { %15601 = vmatpush3.msra.mxu1 %v8289_v60  ;;  %15559 = vmatprep.subr.mxu0 %v21121_v28  ;;  %v21330_v60 = vand.u32 4294901760, %v21312_v63  ;;  %v21350_v56 = vand.u32 4294901760, %v7216_v48 }
 0x492   : > { %8136 = vmatmul.mubr.f32.gmra.mxu1 %v24919_v46  ;;  %15602 = vmatprep.subr.mxu1 %v8296_v54  ;;  %v8337_v46 = vsub.f32 %v21300_v25, %v21320_v11 }
 0x493   : > { %15560 = vmatpush3.msra.mxu0 %v21121_v28  ;;  %15603 = vmatpush3.msra.mxu1 %v8296_v54  ;;  %24922 = vst [vmem:[#allocation28_spill] sm:$0xff] %v21330_v60  ;;  %v21339_v54 = vand.u32 4294901760, %v21323_v36  ;;  %v15412_v5 = vpop.f32.mrf.mxu1 }
 0x494   : > { %15561 = vmatprep.subr.mxu0 %v21135_v62  ;;  %15604 = vmatprep.subr.mxu1 %v8303_v33 }
 0x495   : > { %15562 = vmatpush3.msra.mxu0 %v21135_v62  ;;  %15605 = vmatpush3.msra.mxu1 %v8303_v33  ;;  %24924 = vst [vmem:[#allocation38_spill] sm:$0xff] %v21339_v54  ;;  %v8344_v33 = vsub.f32 %v21312_v63, %v21330_v60  ;;  %v8351_v52 = vsub.f32 %v21323_v36, %v21339_v54 }
 0x496   : > { %15563 = vmatprep.subr.mxu0 %v21154_v23  ;;  %15606 = vmatprep.subr.mxu1 %v8310_v61 }
 0x497   : > { %15564 = vmatpush3.msra.mxu0 %v21154_v23  ;;  %15607 = vmatpush3.msra.mxu1 %v8310_v61  ;;  %v8338_v61 = vand.u32 4294901760, %v8337_v46  ;;  %v21363_v46 = vsub.f32 %v7216_v48, %v21350_v56  ;;  %v8352_v11 = vand.u32 4294901760, %v8351_v52 }
 0x498   : > { %15565 = vmatprep.subr.mxu0 %v21168_v3  ;;  %15608 = vmatprep.subr.mxu1 %v8317_v31 }
 0x499   : > { %15566 = vmatpush3.msra.mxu0 %v21168_v3  ;;  %15609 = vmatpush3.msra.mxu1 %v8317_v31  ;;  %v8345_v31 = vand.u32 4294901760, %v8344_v33  ;;  %v8234_v48 = vand.u32 4294901760, %v21363_v46 }
 0x49a   : > { %15567 = vmatprep.subr.mxu0 %v21193_v21  ;;  %15610 = vmatprep.subr.mxu1 %v8324_v59  ;;  %v15377_v0 = vpop.f32.mrf.mxu0 }
 0x49b   : > { %15568 = vmatpush3.msra.mxu0 %v21193_v21  ;;  %15611 = vmatpush3.msra.mxu1 %v8324_v59  ;;  %v6553_v60 = vadd.f32 %v15377_v0, %v21237_v9  ;;  %v6703_v59 = vpop.f32.mrf.mxu1  ;;  %v8224_v9 = vand.u32 4294901760, %v21358_v47 }
 0x49c   : > { %15569 = vmatprep.subr.mxu0 %v21208_v42  ;;  %15612 = vmatprep.subr.mxu1 %v8331_v27  ;;  %v6542_v54 = vpop.f32.mrf.mxu0 }
 0x49d   : > { %15570 = vmatpush3.msra.mxu0 %v21208_v42  ;;  %15613 = vmatpush3.msra.mxu1 %v8331_v27  ;;  %v21366_v7 = vadd.f32 %v15412_v5, %v6553_v60  ;;  %v6543_v33 = vadd.f32 %v6542_v54, %v21195_v43  ;;  %v8225_v43 = vsub.f32 %v21358_v47, %v8224_v9  ;;  %v8864_v27 = vld [vmem:[#allocation4 + $0x870] sm:$0xff] }
 0x49e   : > { %15571 = vmatprep.subr.mxu0 %v21215_v15  ;;  %15614 = vmatprep.subr.mxu1 %v8338_v61  ;;  %v8235_v60 = vsub.f32 %v21363_v46, %v8234_v48  ;;  %v8848_v5 = vld [vmem:[#allocation4 + $0x7f0] sm:$0xff] }
 0x49f   : > { %15572 = vmatpush3.msra.mxu0 %v21215_v15  ;;  %15615 = vmatpush3.msra.mxu1 %v8338_v61  ;;  %v21372_v57 = vadd.f32 %v6703_v59, %v6543_v33  ;;  %v8846_v33 = vld [vmem:[#allocation4 + $0x7e0] sm:$0xff] }
 0x4a0   : > { %15573 = vmatprep.subr.mxu0 %v21235_v6  ;;  %15616 = vmatprep.subr.mxu1 %v8345_v31  ;;  %v8236_v54 = vand.u32 4294901760, %v8235_v60  ;;  %v8845_v60 = vld [vmem:[#allocation4 + $0x7d8] sm:$0xff] }
 0x4a1   : > { %15574 = vmatpush3.msra.mxu0 %v21235_v6  ;;  %15617 = vmatpush3.msra.mxu1 %v8345_v31 }
 0x4a2   : > { %15575 = vmatprep.subr.mxu0 %v21251_v40  ;;  %15618 = vmatprep.subr.mxu1 %v8352_v11 }
 0x4a3   : > { %15576 = vmatpush3.msra.mxu0 %v21251_v40  ;;  %15619 = vmatpush3.msra.mxu1 %v8352_v11  ;;  %v8226_v11 = vand.u32 4294901760, %v8225_v43 }
 0x4a4   : > { %15577 = vmatprep.subr.mxu0 %v21265_v20  ;;  %15620 = vmatprep.mubr.f32.mxu1 %v21347_v16 }
 0x4a5   : > { %15658 = vmatprep.subr.mxu1 %v21088_v55  ;;  %15578 = vmatpush3.msra.mxu0 %v21265_v20 }
 0x4a6   : > { %15621 = vmatmul.mubr.f32.vlgmr.msra.gmra.mxu1 %v21350_v56  ;;  %15579 = vmatprep.subr.mxu0 %v21277_v58 }
 0x4a7   : > { %15659 = vmatpush3.msra.mxu1 %v21088_v55  ;;  %15580 = vmatpush3.msra.mxu0 %v21277_v58 }
 0x4a8   : > { %15660 = vmatprep.subr.mxu1 %v21099_v12  ;;  %15581 = vmatprep.subr.mxu0 %v21290_v1 }
 0x4a9   : > { %15661 = vmatpush3.msra.mxu1 %v21099_v12  ;;  %15582 = vmatpush3.msra.mxu0 %v21290_v1 }
 0x4aa   : > { %15662 = vmatprep.subr.mxu1 %v21110_v45  ;;  %15583 = vmatprep.subr.mxu0 %v21302_v17 }
 0x4ab   : > { %15663 = vmatpush3.msra.mxu1 %v21110_v45  ;;  %15584 = vmatpush3.msra.mxu0 %v21302_v17 }
 0x4ac   : > { %15664 = vmatprep.subr.mxu1 %v21121_v28  ;;  %15585 = vmatprep.mubr.f32.mxu0 %v8226_v11 }
 0x4ad   : > { %15665 = vmatpush3.msra.mxu1 %v21121_v28  ;;  %15586 = vmatmul.mubr.f32.vlgmr.msra.gmra.mxu0 %v8236_v54  ;;  %v8860_v54 = vld [vmem:[#allocation4 + $0x850] sm:$0xff] }
 0x4ae   : > { %15623 = vmatprep.subr.mxu0 %v21105_v39  ;;  %15666 = vmatprep.subr.mxu1 %v21135_v62 }
 0x4af   : > { %15624 = vmatpush3.msra.mxu0 %v21105_v39  ;;  %15667 = vmatpush3.msra.mxu1 %v21135_v62 }
 0x4b0   : > { %15625 = vmatprep.subr.mxu0 %v21119_v37  ;;  %15668 = vmatprep.subr.mxu1 %v21154_v23 }
 0x4b1   : > { %15626 = vmatpush3.msra.mxu0 %v21119_v37  ;;  %15669 = vmatpush3.msra.mxu1 %v21154_v23 }
 0x4b2   : > { %15627 = vmatprep.subr.mxu0 %v21133_v10  ;;  %15670 = vmatprep.subr.mxu1 %v21168_v3 }
 0x4b3   : > { %15628 = vmatpush3.msra.mxu0 %v21133_v10  ;;  %15671 = vmatpush3.msra.mxu1 %v21168_v3 }
 0x4b4   : > { %15629 = vmatprep.subr.mxu0 %v21147_v29  ;;  %15672 = vmatprep.subr.mxu1 %v21193_v21 }
 0x4b5   : > { %15630 = vmatpush3.msra.mxu0 %v21147_v29  ;;  %15673 = vmatpush3.msra.mxu1 %v21193_v21  ;;  %v15482_v39 = vpop.f32.mrf.mxu1 }
 0x4b6   : > { %15631 = vmatprep.subr.mxu0 %v21163_v4  ;;  %15674 = vmatprep.subr.mxu1 %v21208_v42 }
 0x4b7   : > { %15632 = vmatpush3.msra.mxu0 %v21163_v4  ;;  %15675 = vmatpush3.msra.mxu1 %v21208_v42  ;;  %v6909_v4 = vpop.f32.mrf.mxu1 }
 0x4b8   : > { %15633 = vmatprep.subr.mxu0 %v21183_v53  ;;  %15676 = vmatprep.subr.mxu1 %v21215_v15 }
 0x4b9   : > { %15634 = vmatpush3.msra.mxu0 %v21183_v53  ;;  %15677 = vmatpush3.msra.mxu1 %v21215_v15 }
 0x4ba   : > { %15635 = vmatprep.subr.mxu0 %v21201_v49  ;;  %15678 = vmatprep.subr.mxu1 %v21235_v6 }
 0x4bb   : > { %15636 = vmatpush3.msra.mxu0 %v21201_v49  ;;  %15679 = vmatpush3.msra.mxu1 %v21235_v6 }
 0x4bc   : > { %15637 = vmatprep.subr.mxu0 %v21223_v38  ;;  %15680 = vmatprep.subr.mxu1 %v21251_v40  ;;  %v15447_v37 = vpop.f32.mrf.mxu0 }
 0x4bd   : > { %15638 = vmatpush3.msra.mxu0 %v21223_v38  ;;  %15681 = vmatpush3.msra.mxu1 %v21251_v40  ;;  %v6821_v10 = vadd.f32 %v15447_v37, %v21366_v7  ;;  %v8849_v7 = vld [vmem:[#allocation4 + $0x7f8] sm:$0xff] }
 0x4be   : > { %15639 = vmatprep.subr.mxu0 %v21233_v51  ;;  %15682 = vmatprep.subr.mxu1 %v21265_v20  ;;  %v6813_v29 = vpop.f32.mrf.mxu0 }
 0x4bf   : > { %15640 = vmatpush3.msra.mxu0 %v21233_v51  ;;  %15683 = vmatpush3.msra.mxu1 %v21265_v20  ;;  %v21441_v53 = vadd.f32 %v15482_v39, %v6821_v10  ;;  %v6814_v49 = vadd.f32 %v6813_v29, %v21372_v57  ;;  %v8828_v51 = vld [vmem:[#allocation3 + $0x8] sm:$0xe0]  ;;  %v8861_v57 = vld [vmem:[#allocation4 + $0x858] sm:$0xff]  ;;  %v8844_v10 = vld [vmem:[#allocation4 + $0x7d0] sm:$0xff] }
 0x4c0   : > { %15641 = vmatprep.subr.mxu0 %v21244_v19  ;;  %15684 = vmatprep.subr.mxu1 %v21277_v58  ;;  %v21575_v37 = vand.u32 4294901760, %v8861_v57 }
 0x4c1   : > { %15642 = vmatpush3.msra.mxu0 %v21244_v19  ;;  %15685 = vmatpush3.msra.mxu1 %v21277_v58  ;;  %v21448_v38 = vadd.f32 %v6909_v4, %v6814_v49  ;;  %v21459_v19 = vld [vmem:[#allocation3 + $0x20] sm:$0xff]  ;;  %v8859_v4 = vld [vmem:[#allocation4 + $0x848] sm:$0xff] }
 0x4c2   : > { %15643 = vmatprep.subr.mxu0 %v21263_v24  ;;  %15686 = vmatprep.subr.mxu1 %v21290_v1  ;;  %24933 = vst [vmem:[#allocation36_spill] sm:$0xff] %v21575_v37 }
 0x4c3   : > { %15644 = vmatpush3.msra.mxu0 %v21263_v24  ;;  %15687 = vmatpush3.msra.mxu1 %v21290_v1  ;;  %v24069_v24 = vrot.slane %v21459_v19, 5 }
 0x4c4   : > { %15645 = vmatprep.subr.mxu0 %v21275_v14  ;;  %15688 = vmatprep.subr.mxu1 %v21302_v17 }
 0x4c5   : > { %15646 = vmatpush3.msra.mxu0 %v21275_v14  ;;  %15689 = vmatpush3.msra.mxu1 %v21302_v17  ;;  %v8892_v14 = vrot.slane %v8828_v51, 5 }
 0x4c6   : > { %15647 = vmatprep.subr.mxu0 %v21288_v32  ;;  %15690 = vmatprep.mubr.f32.mxu1 %v8224_v9 }
 0x4c7   : > { %15728 = vmatprep.subr.mxu1 %v21088_v55  ;;  %15648 = vmatpush3.msra.mxu0 %v21288_v32  ;;  %v8894_v32 = vsel %vm8888_vm6, %v8892_v14, %v24069_v24 }
 0x4c8   : > { %15691 = vmatmul.mubr.f32.vlgmr.msra.gmra.mxu1 %v8234_v48  ;;  %15649 = vmatprep.subr.mxu0 %v21300_v25  ;;  %v21543_v48 = vand.u32 4294901760, %v8846_v33 }
 0x4c9   : > { %15729 = vmatpush3.msra.mxu1 %v21088_v55  ;;  %15650 = vmatpush3.msra.mxu0 %v21300_v25  ;;  %v8865_v55 = vld [vmem:[#allocation4 + $0x878] sm:$0xff] }
 0x4ca   : > { %15730 = vmatprep.subr.mxu1 %v21099_v12  ;;  %15651 = vmatprep.subr.mxu0 %v21312_v63  ;;  %v21484_v25 = vand.u32 4294901760, %v8865_v55  ;;  %v21590_v51 = vsub.f32 %v8846_v33, %v21543_v48 }
 0x4cb   : > { %15731 = vmatpush3.msra.mxu1 %v21099_v12  ;;  %15652 = vmatpush3.msra.mxu0 %v21312_v63  ;;  %v21480_v12 = vand.u32 4294901760, %v8894_v32  ;;  %v21486_v63 = vand.u32 4294901760, %v8849_v7 }
 0x4cc   : > { %15732 = vmatprep.subr.mxu1 %v21110_v45  ;;  %15653 = vmatprep.subr.mxu0 %v21323_v36  ;;  %v21504_v52 = vsub.f32 %v8865_v55, %v21484_v25  ;;  %24934 = vst [vmem:[#allocation48_spill] sm:$0xff] %v21590_v51  ;;  %v8843_v55 = vld [vmem:[#allocation4 + $0x7c8] sm:$0xff] }
 0x4cd   : > { %15733 = vmatpush3.msra.mxu1 %v21110_v45  ;;  %15654 = vmatpush3.msra.mxu0 %v21323_v36  ;;  %24925 = vst [vmem:[#allocation39_spill] sm:$0xff] %v21480_v12  ;;  %v21490_v45 = vand.u32 4294901760, %v8864_v27  ;;  %v8863_v36 = vld [vmem:[#allocation4 + $0x868] sm:$0xff]  ;;  %v21499_v61 = vsub.f32 %v8894_v32, %v21480_v12  ;;  %v21507_v0 = vsub.f32 %v8849_v7, %v21486_v63  ;;  %v21593_v32 = vand.u32 4294901760, %v8860_v54  ;;  %v8841_v7 = vld [vmem:[#allocation4 + $0x7b8] sm:$0xff] }
 0x4ce   : > { %15734 = vmatprep.subr.mxu1 %v21121_v28  ;;  %15655 = vmatprep.mubr.f32.mxu0 %v21358_v47  ;;  %24926 = vst [vmem:[#allocation40_spill] sm:$0xff] %v21504_v52  ;;  %v21516_v31 = vand.u32 4294901760, %v8863_v36 }
 0x4cf   : > { %15735 = vmatpush3.msra.mxu1 %v21121_v28  ;;  %15656 = vmatmul.mubr.f32.vlgmr.msra.gmra.mxu0 %v21363_v46  ;;  %v21496_v28 = vand.u32 4294901760, %v8848_v5  ;;  %24927 = vst [vmem:[#allocation19_spill] sm:$0xff] %v21507_v0  ;;  %v24067_v46 = vand.u32 4294901760, %v21504_v52 }
 0x4d0   : > { %15693 = vmatprep.subr.mxu0 %v21127_v41  ;;  %15736 = vmatprep.subr.mxu1 %v21135_v62 }
 0x4d1   : > { %15694 = vmatpush3.msra.mxu0 %v21127_v41  ;;  %15737 = vmatpush3.msra.mxu1 %v21135_v62  ;;  %v21512_v41 = vsub.f32 %v8864_v27, %v21490_v45  ;;  %v8847_v62 = vld [vmem:[#allocation4 + $0x7e8] sm:$0xff]  ;;  %v21521_v47 = vsub.f32 %v8848_v5, %v21496_v28  ;;  %v21600_v5 = vand.u32 4294901760, %v8844_v10 }
 0x4d2   : > { %15695 = vmatprep.subr.mxu0 %v21144_v18  ;;  %15738 = vmatprep.subr.mxu1 %v21154_v23  ;;  %v21528_v59 = vand.u32 4294901760, %v8847_v62 }
 0x4d3   : > { %15696 = vmatpush3.msra.mxu0 %v21144_v18  ;;  %15739 = vmatpush3.msra.mxu1 %v21154_v23  ;;  %24928 = vst [vmem:[#allocation30_spill] sm:$0xff] %v21512_v41  ;;  %v8862_v18 = vld [vmem:[#allocation4 + $0x860] sm:$0xff]  ;;  %24929 = vst [vmem:[#allocation44_spill] sm:$0xff] %v21521_v47  ;;  %v24068_v23 = vand.u32 4294901760, %v21499_v61 }
 0x4d4   : > { %15697 = vmatprep.subr.mxu0 %v21160_v35  ;;  %15740 = vmatprep.subr.mxu1 %v21168_v3  ;;  %v21533_v9 = vand.u32 4294901760, %v8862_v18  ;;  %v21563_v11 = vsub.f32 %v8847_v62, %v21528_v59 }
 0x4d5   : > { %15698 = vmatpush3.msra.mxu0 %v21160_v35  ;;  %15741 = vmatpush3.msra.mxu1 %v21168_v3  ;;  %v24066_v35 = vand.u32 4294901760, %v21507_v0  ;;  %v24065_v3 = vand.u32 4294901760, %v21512_v41  ;;  %v21548_v43 = vsub.f32 %v21499_v61, %v24068_v23  ;;  %v21622_v23 = vand.u32 4294901760, %v8843_v55 }
 0x4d6   : > { %15699 = vmatprep.subr.mxu0 %v21176_v2  ;;  %15742 = vmatprep.subr.mxu1 %v21193_v21  ;;  %24931 = vst [vmem:[#allocation37_spill] sm:$0xff] %v21563_v11  ;;  %v21573_v39 = vsub.f32 %v8862_v18, %v21533_v9  ;;  %v15552_v14 = vpop.f32.mrf.mxu1  ;;  %v24071_v27 = vand.u32 4294901760, %v21563_v11 }
 0x4d7   : > { %15700 = vmatpush3.msra.mxu0 %v21176_v2  ;;  %15743 = vmatpush3.msra.mxu1 %v21193_v21  ;;  %v21538_v2 = vsub.f32 %v8863_v36, %v21516_v31  ;;  %v24064_v21 = vand.u32 4294901760, %v21521_v47  ;;  %v8858_v36 = vld [vmem:[#allocation4 + $0x840] sm:$0xff] }
 0x4d8   : > { %15701 = vmatprep.subr.mxu0 %v21191_v30  ;;  %15744 = vmatprep.subr.mxu1 %v21208_v42  ;;  %24932 = vst [vmem:[#allocation24_spill] sm:$0xff] %v21573_v39  ;;  %v24072_v18 = vand.u32 4294901760, %v21573_v39  ;;  %v21631_v62 = vand.u32 4294901760, %v8858_v36 }
 0x4d9   : > { %15702 = vmatpush3.msra.mxu0 %v21191_v30  ;;  %24930 = vst [vmem:[#allocation41_spill] sm:$0xff] %v21538_v2  ;;  %15745 = vmatpush3.msra.mxu1 %v21208_v42  ;;  %v21555_v30 = vsub.f32 %v21504_v52, %v24067_v46  ;;  %v21560_v42 = vsub.f32 %v21507_v0, %v24066_v35  ;;  %v24070_v29 = vand.u32 4294901760, %v21538_v2  ;;  %v8831_v0 = vld [vmem:[#allocation3 + $0x38] sm:$0x1f] }
 0x4da   : > { %15703 = vmatprep.subr.mxu0 %v21212_v44  ;;  %15746 = vmatprep.subr.mxu1 %v21215_v15  ;;  %v21587_v49 = vsub.f32 %v21521_v47, %v24064_v21  ;;  %v21609_v21 = vand.u32 4294901760, %v8859_v4 }
 0x4db   : > { %15704 = vmatpush3.msra.mxu0 %v21212_v44  ;;  %15747 = vmatpush3.msra.mxu1 %v21215_v15  ;;  %v21570_v44 = vsub.f32 %v21512_v41, %v24065_v3  ;;  %v21580_v15 = vand.u32 4294901760, %v8845_v60  ;;  %v8842_v3 = vld [vmem:[#allocation4 + $0x7c0] sm:$0xff] }
 0x4dc   : > { %15705 = vmatprep.subr.mxu0 %v21228_v13  ;;  %15748 = vmatprep.subr.mxu1 %v21235_v6 }
 0x4dd   : > { %15706 = vmatpush3.msra.mxu0 %v21228_v13  ;;  %15749 = vmatpush3.msra.mxu1 %v21235_v6  ;;  %v21620_v46 = vsub.f32 %v8845_v60, %v21580_v15  ;;  %v21629_v13 = vsub.f32 %v8860_v54, %v21593_v32  ;;  %v21637_v60 = vsub.f32 %v8844_v10, %v21600_v5 }
 0x4de   : > { %15707 = vmatprep.subr.mxu0 %v21249_v26  ;;  %15750 = vmatprep.subr.mxu1 %v21251_v40  ;;  %v15517_v33 = vpop.f32.mrf.mxu0  ;;  %v21646_v54 = vsub.f32 %v21563_v11, %v24071_v27  ;;  %v21664_v27 = vsub.f32 %v8843_v55, %v21622_v23  ;;  %v21670_v6 = vsub.f32 %v8858_v36, %v21631_v62  ;;  %v8835_v11 = vld [vmem:[#allocation4 + $0x788] sm:$0xff] }
 0x4df   : > { %15708 = vmatpush3.msra.mxu0 %v21249_v26  ;;  %15751 = vmatpush3.msra.mxu1 %v21251_v40  ;;  %v21607_v26 = vsub.f32 %v8861_v57, %v21575_v37  ;;  %v21616_v40 = vsub.f32 %v21538_v2, %v24070_v29  ;;  %v7043_v35 = vadd.f32 %v15517_v33, %v21441_v53  ;;  %v7129_v29 = vpop.f32.mrf.mxu1  ;;  %v21639_v33 = vand.u32 4294901760, %v8842_v3  ;;  %v8857_v57 = vld [vmem:[#allocation4 + $0x838] sm:$0xff] }
 0x4e0   : > { %15709 = vmatprep.subr.mxu0 %v21260_v22  ;;  %15752 = vmatprep.subr.mxu1 %v21265_v20  ;;  %24936 = vst [vmem:[#allocation34_spill] sm:$0xff] %v21620_v46  ;;  %v7036_v24 = vpop.f32.mrf.mxu0  ;;  %24937 = vst [vmem:[#allocation49_spill] sm:$0xff] %v21629_v13  ;;  %v24075_v10 = vand.u32 4294901760, %v21620_v46 }
 0x4e1   : > { %24935 = vst [vmem:[#allocation27_spill] sm:$0xff] %v21607_v26  ;;  %15710 = vmatpush3.msra.mxu0 %v21260_v22  ;;  %15753 = vmatpush3.msra.mxu1 %v21265_v20  ;;  %v24073_v22 = vand.u32 4294901760, %v21590_v51  ;;  %v7136_v53 = vadd.f32 %v15552_v14, %v7043_v35  ;;  %v7037_v20 = vadd.f32 %v7036_v24, %v21448_v38  ;;  %24938 = vst [vmem:[#allocation15_spill] sm:$0xff] %v21637_v60 }
 0x4e2   : > { %15711 = vmatprep.subr.mxu0 %v21269_v50  ;;  %15754 = vmatprep.subr.mxu1 %v21277_v58  ;;  %v24074_v38 = vand.u32 4294901760, %v21607_v26  ;;  %v21655_v24 = vsub.f32 %v8859_v4, %v21609_v21  ;;  %24942 = vst [vmem:[#allocation46_spill] sm:$0xff] %v21664_v27  ;;  %24943 = vst [vmem:[#allocation20_spill] sm:$0xff] %v21670_v6  ;;  %v21688_v36 = vsub.f32 %v8842_v3, %v21639_v33  ;;  %v8855_v4 = vld [vmem:[#allocation4 + $0x828] sm:$0xff] }
 0x4e3   : > { %15712 = vmatpush3.msra.mxu0 %v21269_v50  ;;  %15755 = vmatpush3.msra.mxu1 %v21277_v58  ;;  %v21651_v50 = vsub.f32 %v21573_v39, %v24072_v18  ;;  %v24940_v58 = vld [vmem:[#allocation51_spill] sm:$0xff]  ;;  %v7130_v14 = vadd.f32 %v7129_v29, %v7037_v20  ;;  %v8856_v18 = vld [vmem:[#allocation4 + $0x830] sm:$0xff]  ;;  %v21681_v29 = vsub.f32 %v21590_v51, %v24073_v22  ;;  %v24948_v22 = vand.u32 4294901760, %v21555_v30 }
 0x4e4   : > { %15713 = vmatprep.subr.mxu0 %v21285_v8  ;;  %24939 = vst [vmem:[#allocation23_spill] sm:$0xff] %v21655_v24  ;;  %15756 = vmatprep.subr.mxu1 %v21290_v1  ;;  %v21660_v35 = vadd.f32 %v7136_v53, %v24940_v58  ;;  %v21674_v53 = vand.u32 4294901760, %v8841_v7  ;;  %24946 = vst [vmem:[#allocation14_spill] sm:$0xff] %v21688_v36  ;;  %v9168_v58 = vand.u32 4294901760, %v21616_v40  ;;  %v24947_v20 = vld [vmem:[#allocation13_spill] sm:$0xff]  ;;  %v24952_v30 = vand.u32 4294901760, %v21560_v42 }
 0x4e5   : > { %15714 = vmatpush3.msra.mxu0 %v21285_v8  ;;  %15757 = vmatpush3.msra.mxu1 %v21290_v1  ;;  %v21672_v8 = vand.u32 4294901760, %v8857_v57  ;;  %v24944_v1 = vld [vmem:[#allocation43_spill] sm:$0xff]  ;;  %v9175_v3 = vand.u32 4294901760, %v21651_v50  ;;  %v21708_v40 = vsub.f32 %v21620_v46, %v24075_v10  ;;  %v24965_v39 = vand.u32 4294901760, %v21688_v36 }
 0x4e6   : > { %24941 = vst [vmem:[#allocation32_spill] sm:$0xff] %v21660_v35  ;;  %15715 = vmatprep.subr.mxu0 %v21297_v34  ;;  %15758 = vmatprep.subr.mxu1 %v21302_v17  ;;  %v21684_v55 = vadd.f32 %v7130_v14, %v24944_v1  ;;  %v21699_v14 = vand.u32 4294901760, %v8856_v18  ;;  %v8840_v1 = vld [vmem:[#allocation4 + $0x7b0] sm:$0xff]  ;;  %v21724_v10 = vsub.f32 %v8841_v7, %v21674_v53  ;;  %v8854_v46 = vld [vmem:[#allocation4 + $0x820] sm:$0xff] }
 0x4e7   : > { %15716 = vmatpush3.msra.mxu0 %v21297_v34  ;;  %15759 = vmatpush3.msra.mxu1 %v21302_v17  ;;  %v21696_v34 = vsub.f32 %v21607_v26, %v24074_v38  ;;  %v9056_v17 = vand.u32 4294901760, %v21646_v54  ;;  %v21721_v50 = vsub.f32 %v8857_v57, %v21672_v8  ;;  %v8839_v38 = vld [vmem:[#allocation4 + $0x7a8] sm:$0xff]  ;;  %v21736_v54 = vand.u32 4294901760, %v8840_v1  ;;  %v24954_v7 = vld [vmem:[#allocation29_spill] sm:$0xff]  ;;  %v8838_v57 = vld [vmem:[#allocation4 + $0x7a0] sm:$0xff] }
 0x4e8   : > { %24945 = vst [vmem:[#allocation50_spill] sm:$0xff] %v21684_v55  ;;  %15760 = vmatprep.mubr.f32.mxu1 %v21347_v16  ;;  %15717 = vmatprep.subr.mxu0 %v24947_v20  ;;  %v24949_v55 = vand.u32 4294901760, %v21629_v13  ;;  %24951 = vst [vmem:[#allocation25_spill] sm:$0xff] %v21724_v10  ;;  %v24963_v26 = vld [vmem:[#allocation28_spill] sm:$0xff] }
 0x4e9   : > { %15761 = vmatmul.mubr.f32.vlgmr.msra.gmra.mxu1 %v21350_v56  ;;  %14079 = vmatprep.subr.mxu1 %v24948_v22  ;;  %24950 = vst [vmem:[#allocation31_spill] sm:$0xff] %v21721_v50  ;;  %v9063_v22 = vand.u32 4294901760, %v21681_v29  ;;  %v9182_v42 = vand.u32 4294901760, %v21696_v34 }
 0x4ea   : > { %15718 = vmatpush3.msra.mxu0 %v24947_v20  ;;  %v21717_v35 = vsub.f32 %v21629_v13, %v24949_v55  ;;  %14080 = vmatpush3.msra.mxu1 %v24952_v30  ;;  %v24953_v55 = vand.u32 4294901760, %v21637_v60  ;;  %v24955_v13 = vand.u32 4294901760, %v21570_v44  ;;  %v24956_v30 = vand.u32 4294901760, %v21655_v24 }
 0x4eb   : > { %9262 = vmatprep.mubr.f32.mxu1 %v21480_v12  ;;  %15719 = vmatprep.subr.mxu0 %v24954_v7  ;;  %v21748_v12 = vsub.f32 %v8856_v18, %v21699_v14  ;;  %v9070_v44 = vand.u32 4294901760, %v21708_v40  ;;  %v8853_v18 = vld [vmem:[#allocation4 + $0x818] sm:$0xff] }
 0x4ec   : > { %v21733_v20 = vsub.f32 %v21637_v60, %v24953_v55  ;;  %14081 = vmatprep.subr.mxu1 %v24955_v13  ;;  %v21745_v29 = vsub.f32 %v21655_v24, %v24956_v30  ;;  %v21750_v55 = vand.u32 4294901760, %v8855_v4  ;;  %15720 = vmatpush3.msra.mxu0 %v24954_v7  ;;  %v24959_v60 = vand.u32 4294901760, %v21587_v49  ;;  %v24967_v40 = vld [vmem:[#allocation38_spill] sm:$0xff] }
 0x4ed   : > { %24957 = vst [vmem:[#allocation33_spill] sm:$0xff] %v21748_v12  ;;  %v24960_v13 = vand.u32 4294901760, %v21664_v27  ;;  %v21761_v30 = vand.u32 4294901760, %v8839_v38  ;;  %v21763_v24 = vand.u32 4294901760, %v8854_v46  ;;  %15721 = vmatprep.subr.mxu0 %v24963_v26  ;;  %v9189_v7 = vand.u32 4294901760, %v21717_v35  ;;  %15725 = vmatprep.mubr.f32.mxu0 %v21347_v16 }
 0x4ee   : > { %24958 = vst [vmem:[#allocation42_spill] sm:$0xff] %v21750_v55  ;;  %14082 = vmatpush3.msra.mxu1 %v24959_v60  ;;  %v24964_v49 = vand.u32 4294901760, %v21670_v6  ;;  %15722 = vmatpush3.msra.mxu0 %v24963_v26  ;;  %v9077_v51 = vand.u32 4294901760, %v21733_v20  ;;  %v21782_v35 = vsub.f32 %v8840_v1, %v21736_v54  ;;  %v21792_v20 = vand.u32 4294901760, %v8853_v18  ;;  %v8851_v26 = vld [vmem:[#allocation4 + $0x808] sm:$0xff] }
 0x4ef   : > { %v21759_v34 = vsub.f32 %v21664_v27, %v24960_v13  ;;  %24961 = vst [vmem:[#allocation45_spill] sm:$0xff] %v21761_v30  ;;  %24962 = vst [vmem:[#allocation47_spill] sm:$0xff] %v21763_v24  ;;  %14083 = vmatprep.subr.mxu1 %v9168_v58  ;;  %v8837_v27 = vld [vmem:[#allocation4 + $0x798] sm:$0xff]  ;;  %v21779_v58 = vsub.f32 %v21688_v36, %v24965_v39  ;;  %15723 = vmatprep.subr.mxu0 %v24967_v40  ;;  %v9196_v13 = vand.u32 4294901760, %v21745_v29  ;;  %v8836_v39 = vld [vmem:[#allocation4 + $0x790] sm:$0xff] }
 0x4f0   : > { %v21770_v60 = vsub.f32 %v21670_v6, %v24964_v49  ;;  %14084 = vmatpush3.msra.mxu1 %v9056_v17  ;;  %24966 = vst [vmem:[#allocation21_spill] sm:$0xff] %v21782_v35  ;;  %v21784_v49 = vand.u32 4294901760, %v8838_v57  ;;  %v8852_v6 = vld [vmem:[#allocation4 + $0x810] sm:$0xff]  ;;  %v21790_v17 = vsub.f32 %v8855_v4, %v21750_v55  ;;  %24969 = vst [vmem:[#allocation17_spill] sm:$0xff] %v21792_v20  ;;  %15724 = vmatpush3.msra.mxu0 %v24967_v40 }
 0x4f1   : > { %14085 = vmatprep.subr.mxu1 %v9175_v3  ;;  %v9084_v1 = vand.u32 4294901760, %v21759_v34  ;;  %v21798_v36 = vsub.f32 %v8839_v38, %v21761_v30  ;;  %v21801_v3 = vsub.f32 %v8854_v46, %v21763_v24  ;;  %v21803_v29 = vand.u32 4294901760, %v8837_v27  ;;  %15726 = vmatmul.mubr.f32.vlgmr.msra.gmra.mxu0 %v21350_v56 }
 0x4f2   : > { %24968 = vst [vmem:[#allocation22_spill] sm:$0xff] %v21790_v17  ;;  %14086 = vmatpush3.msra.mxu1 %v9063_v22  ;;  %v9203_v4 = vand.u32 4294901760, %v21770_v60  ;;  %v24972_v40 = vand.u32 4294901760, %v21721_v50  ;;  %v24973_v34 = vand.u32 4294901760, %v21724_v10  ;;  %v21817_v46 = vand.u32 4294901760, %v8852_v6  ;;  %14041 = vmatprep.subr.mxu0 %v21484_v25  ;;  %v8834_v22 = vld [vmem:[#allocation4 + $0x780] sm:$0xff] }
 0x4f3   : > { %24970 = vst [vmem:[#allocation35_spill] sm:$0xff] %v21798_v36  ;;  %24971 = vst [vmem:[#allocation26_spill] sm:$0xff] %v21801_v3  ;;  %14087 = vmatprep.subr.mxu1 %v9182_v42  ;;  %v9091_v56 = vand.u32 4294901760, %v21779_v58  ;;  %v21823_v60 = vsub.f32 %v8838_v57, %v21784_v49  ;;  %14042 = vmatpush3.msra.mxu0 %v21486_v63  ;;  %v21837_v58 = vsub.f32 %v8853_v18, %v21792_v20 }
 0x4f4   : > { %v21810_v16 = vsub.f32 %v21721_v50, %v24972_v40  ;;  %v21815_v38 = vsub.f32 %v21724_v10, %v24973_v34  ;;  %v21825_v40 = vand.u32 4294901760, %v8836_v39  ;;  %v8850_v50 = vld [vmem:[#allocation4 + $0x800] sm:$0xff]  ;;  %v24974_v34 = vand.u32 4294901760, %v21548_v43  ;;  %14088 = vmatpush3.msra.mxu1 %v9070_v44  ;;  %14043 = vmatprep.subr.mxu0 %v21490_v45 }
 0x4f5   : > { %v24975_v10 = vand.u32 4294901760, %v21748_v12  ;;  %v21839_v57 = vand.u32 4294901760, %v8851_v26  ;;  %14089 = vmatprep.subr.mxu1 %v9189_v7  ;;  %14044 = vmatpush3.msra.mxu0 %v21496_v28  ;;  %v21853_v44 = vsub.f32 %v8852_v6, %v21817_v46  ;;  %v24982_v7 = vand.u32 4294901760, %v21801_v3 }
 0x4f6   : > { %9011 = vmatprep.mubr.f32.mxu0 %v24974_v34  ;;  %v21845_v34 = vsub.f32 %v8837_v27, %v21803_v29  ;;  %v9210_v18 = vand.u32 4294901760, %v21810_v16  ;;  %v9098_v42 = vand.u32 4294901760, %v21815_v38  ;;  %14090 = vmatpush3.msra.mxu1 %v9077_v51  ;;  %v24977_v27 = vand.u32 4294901760, %v21782_v35  ;;  %v8827_v38 = vld [vmem:[#allocation3] sm:$0xe0] }
 0x4f7   : > { %v21833_v2 = vsub.f32 %v21748_v12, %v24975_v10  ;;  %24976 = vst [vmem:[#allocation18_spill] sm:$0xff] %v21839_v57  ;;  %v21847_v10 = vand.u32 4294901760, %v8835_v11  ;;  %v21855_v12 = vand.u32 4294901760, %v8850_v50  ;;  %14045 = vmatprep.subr.mxu0 %v21516_v31  ;;  %v21863_v47 = vsub.f32 %v8836_v39, %v21825_v40  ;;  %14091 = vmatprep.subr.mxu1 %v9196_v13 }
 0x4f8   : > { %v9104_v43 = vsub.f32 %v21782_v35, %v24977_v27  ;;  %v21865_v16 = vand.u32 4294901760, %v8834_v22  ;;  %14046 = vmatpush3.msra.mxu0 %v21528_v59  ;;  %v24979_v51 = vand.u32 4294901760, %v21790_v17  ;;  %v21874_v27 = vsub.f32 %v8851_v26, %v21839_v57  ;;  %14092 = vmatpush3.msra.mxu1 %v9084_v1 }
 0x4f9   : > { %24978 = vst [vmem:[#allocation16_spill] sm:$0xff] %v21863_v47  ;;  %v9217_v6 = vand.u32 4294901760, %v21833_v2  ;;  %14047 = vmatprep.subr.mxu0 %v21533_v9  ;;  %v24981_v39 = vand.u32 4294901760, %v21798_v36  ;;  %v9230_v2 = vsub.f32 %v21801_v3, %v24982_v7  ;;  %14093 = vmatprep.subr.mxu1 %v9203_v4  ;;  %v21890_v1 = vsub.f32 %v8850_v50, %v21855_v12  ;;  %v13775_v52 = vpop.f32.mrf.mxu1  ;;  %v8830_v3 = vld [vmem:[#allocation3 + $0x30] sm:$0x1f] }
 0x4fa   : > { %v9223_v41 = vsub.f32 %v21790_v17, %v24979_v51  ;;  %24980 = vst [vmem:[#allocation51_spill] sm:$0xff] %v21874_v27  ;;  %v21885_v51 = vsub.f32 %v8835_v11, %v21847_v10  ;;  %14048 = vmatpush3.msra.mxu0 %v21543_v48  ;;  %v8889_v17 = vrot.slane %v8827_v38, 5  ;;  %14094 = vmatpush3.msra.mxu1 %v9091_v56  ;;  %v9105_v7 = vand.u32 4294901760, %v9104_v43 }
 0x4fb   : > { %v9111_v13 = vsub.f32 %v21798_v36, %v24981_v39  ;;  %v16286_v39 = vld [vmem:[#allocation3 + $0x18] sm:$0xff]  ;;  %14049 = vmatprep.subr.mxu0 %v21575_v37  ;;  %v24985_v11 = vand.u32 4294901760, %v21823_v60  ;;  %v21900_v26 = vsub.f32 %v8834_v22, %v21865_v16  ;;  %14095 = vmatprep.subr.mxu1 %v9210_v18  ;;  %v24986_v38 = vand.u32 4294901760, %v21837_v58  ;;  %v13776_v37 = vpop.f32.mrf.mxu1 }
 0x4fc   : > { %24983 = vst [vmem:[#allocation43_spill] sm:$0xff] %v21885_v51  ;;  %v21892_v36 = vrot.slane %v16286_v39, 5  ;;  %14050 = vmatpush3.msra.mxu0 %v21580_v15  ;;  %v9224_v50 = vand.u32 4294901760, %v9223_v41  ;;  %v8900_v43 = vrot.slane %v8831_v0, 5  ;;  %14096 = vmatpush3.msra.mxu1 %v9098_v42  ;;  %v24987_v22 = vand.u32 4294901760, %v21845_v34 }
 0x4fd   : > { %v9118_v4 = vsub.f32 %v21823_v60, %v24985_v11  ;;  %v9237_v56 = vsub.f32 %v21837_v58, %v24986_v38  ;;  %14051 = vmatprep.subr.mxu0 %v21593_v32  ;;  %v9112_v11 = vand.u32 4294901760, %v9111_v13  ;;  %v13777_v41 = vadd.f32 %v13776_v37, %v13775_v52  ;;  %14097 = vmatprep.subr.mxu1 %v9217_v6 }
 0x4fe   : > { %24984 = vst [vmem:[#allocation13_spill] sm:$0xff] %v21892_v36  ;;  %v9125_v18 = vsub.f32 %v21845_v34, %v24987_v22  ;;  %14052 = vmatpush3.msra.mxu0 %v21600_v5  ;;  %v9231_v38 = vand.u32 4294901760, %v9230_v2  ;;  %v24988_v39 = vand.u32 4294901760, %v21853_v44  ;;  %v8891_v13 = vsel %vm8888_vm6, %v8889_v17, %v21892_v36  ;;  %14098 = vmatpush3.msra.mxu1 %v9105_v7  ;;  %v13778_v2 = vpop.f32.mrf.mxu1 }
 0x4ff   : > { %14053 = vmatprep.subr.mxu0 %v21609_v21  ;;  %v9119_v22 = vand.u32 4294901760, %v9118_v4  ;;  %v24989_v35 = vand.u32 4294901760, %v21863_v47  ;;  %v8898_v6 = vrot.slane %v8830_v3, 5  ;;  %14099 = vmatprep.subr.mxu1 %v9224_v50  ;;  %v24990_v42 = vand.u32 4294901760, %v21874_v27 }
 0x500   : > { %v9244_v0 = vsub.f32 %v21853_v44, %v24988_v39  ;;  %14054 = vmatpush3.msra.mxu0 %v21622_v23  ;;  %v9238_v39 = vand.u32 4294901760, %v9237_v56  ;;  %14100 = vmatpush3.msra.mxu1 %v9112_v11  ;;  %v9126_v7 = vand.u32 4294901760, %v9125_v18  ;;  %v24991_v4 = vand.u32 4294901760, %v21885_v51  ;;  %v13779_v3 = vpop.f32.mrf.mxu1 }
 0x501   : > { %v9132_v52 = vsub.f32 %v21863_v47, %v24989_v35  ;;  %v9251_v17 = vsub.f32 %v21874_v27, %v24990_v42  ;;  %14055 = vmatprep.subr.mxu0 %v21631_v62  ;;  %v21932_v47 = vand.u32 4294901760, %v8891_v13  ;;  %14101 = vmatprep.subr.mxu1 %v9231_v38  ;;  %v24993_v56 = vand.u32 4294901760, %v21890_v1 }
 0x502   : > { %v9139_v35 = vsub.f32 %v21885_v51, %v24991_v4  ;;  %14056 = vmatpush3.msra.mxu0 %v21639_v33  ;;  %v9245_v50 = vand.u32 4294901760, %v9244_v0  ;;  %v24994_v11 = vrot.slane %v21459_v19, 5  ;;  %v13780_v18 = vadd.f32 %v13779_v3, %v13778_v2  ;;  %14102 = vmatpush3.msra.mxu1 %v9119_v22 }
 0x503   : > { %24992 = vst [vmem:[#allocation29_spill] sm:$0xff] %v21932_v47  ;;  %v9258_v37 = vsub.f32 %v21890_v1, %v24993_v56  ;;  %14057 = vmatprep.subr.mxu0 %v21672_v8  ;;  %v9133_v4 = vand.u32 4294901760, %v9132_v52  ;;  %v24995_v51 = vand.u32 4294901760, %v21900_v26  ;;  %v8899_v0 = vsel %vm8888_vm6, %v21892_v36, %v8898_v6  ;;  %v13737_v27 = vpop.f32.mrf.mxu0  ;;  %14103 = vmatprep.subr.mxu1 %v9238_v39  ;;  %v25013_v36 = vld [vmem:[#allocation46_spill] sm:$0xff] }
 0x504   : > { %v8901_v42 = vsel %vm8888_vm6, %v24994_v11, %v8900_v43  ;;  %14058 = vmatpush3.msra.mxu0 %v21674_v53  ;;  %v9252_v56 = vand.u32 4294901760, %v9251_v17  ;;  %14104 = vmatpush3.msra.mxu1 %v9126_v7  ;;  %v9140_v19 = vand.u32 4294901760, %v9139_v35  ;;  %v21950_v43 = vsub.f32 %v8891_v13, %v21932_v47 }
 0x505   : > { %v9146_v38 = vsub.f32 %v21900_v26, %v24995_v51  ;;  %14059 = vmatprep.subr.mxu0 %v21699_v14  ;;  %v21952_v22 = vand.u32 4294901760, %v8901_v42  ;;  %v13738_v52 = vpop.f32.mrf.mxu0  ;;  %14105 = vmatprep.subr.mxu1 %v9245_v50  ;;  %v9259_v51 = vand.u32 4294901760, %v9258_v37  ;;  %v21955_v6 = vand.u32 4294901760, %v8899_v0 }
 0x506   : > { %14060 = vmatpush3.msra.mxu0 %v21736_v54  ;;  %v13739_v2 = vadd.f32 %v13738_v52, %v13737_v27  ;;  %14106 = vmatpush3.msra.mxu1 %v9133_v4  ;;  %v24134_v7 = vand.u32 4294901760, %v21950_v43  ;;  %v25000_v52 = vld [vmem:[#allocation36_spill] sm:$0xff] }
 0x507   : > { %24996 = vst [vmem:[#allocation28_spill] sm:$0xff] %v21952_v22  ;;  %24997 = vst [vmem:[#allocation38_spill] sm:$0xff] %v21955_v6  ;;  %14061 = vmatprep.subr.mxu0 %v21750_v55  ;;  %v9147_v39 = vand.u32 4294901760, %v9146_v38  ;;  %14107 = vmatprep.subr.mxu1 %v9252_v56  ;;  %v21964_v37 = vsub.f32 %v8901_v42, %v21952_v22  ;;  %v21968_v27 = vsub.f32 %v8899_v0, %v21955_v6 }
 0x508   : > { %14062 = vmatpush3.msra.mxu0 %v21761_v30  ;;  %v21959_v17 = vadd.f32 %v13777_v41, %v13739_v2  ;;  %v13740_v13 = vpop.f32.mrf.mxu0  ;;  %14108 = vmatpush3.msra.mxu1 %v9140_v19  ;;  %v9015_v3 = vsub.f32 %v21950_v43, %v24134_v7  ;;  %v24998_v0 = vand.u32 4294901760, %v21499_v61  ;;  %v24999_v19 = vld [vmem:[#allocation40_spill] sm:$0xff]  ;;  %v25001_v2 = vld [vmem:[#allocation19_spill] sm:$0xff] }
 0x509   : > { %14063 = vmatprep.subr.mxu0 %v21763_v24  ;;  %14109 = vmatprep.subr.mxu1 %v9259_v51  ;;  %v24133_v50 = vand.u32 4294901760, %v21964_v37  ;;  %v24132_v42 = vand.u32 4294901760, %v21968_v27 }
 0x50a   : > { %14064 = vmatpush3.msra.mxu0 %v21784_v49  ;;  %v13741_v35 = vpop.f32.mrf.mxu0  ;;  %14110 = vmatpush3.msra.mxu1 %v9147_v39  ;;  %v25002_v39 = vld [vmem:[#allocation30_spill] sm:$0xff] }
 0x50b   : > { %14065 = vmatprep.subr.mxu0 %v21792_v20  ;;  %v13742_v41 = vadd.f32 %v13741_v35, %v13740_v13  ;;  %9264 = vmatmul.mubr.f32.vlgmr.msra.gmra.mxu1 %v21932_v47  ;;  %v9024_v4 = vsub.f32 %v21964_v37, %v24133_v50  ;;  %v9030_v38 = vsub.f32 %v21968_v27, %v24132_v42  ;;  %v25003_v13 = vld [vmem:[#allocation44_spill] sm:$0xff]  ;;  %v25004_v35 = vld [vmem:[#allocation41_spill] sm:$0xff]  ;;  %v25011_v42 = vld [vmem:[#allocation15_spill] sm:$0xff] }
 0x50c   : > { %14155 = vmatprep.subr.mxu1 %v21484_v25  ;;  %14066 = vmatpush3.msra.mxu0 %v21803_v29  ;;  %v25012_v50 = vld [vmem:[#allocation23_spill] sm:$0xff] }
 0x50d   : > { %9269 = vmatprep.mubr.f32.mxu1 %v21952_v22  ;;  %v21979_v11 = vadd.f32 %v13780_v18, %v13742_v41  ;;  %14156 = vmatpush3.msra.mxu1 %v21486_v63  ;;  %v9016_v18 = vand.u32 4294901760, %v9015_v3  ;;  %v9025_v56 = vand.u32 4294901760, %v9024_v4  ;;  %v9031_v51 = vand.u32 4294901760, %v9030_v38  ;;  %v25005_v41 = vld [vmem:[#allocation37_spill] sm:$0xff]  ;;  %v25006_v3 = vld [vmem:[#allocation24_spill] sm:$0xff]  ;;  %v25008_v38 = vld [vmem:[#allocation27_spill] sm:$0xff] }
 0x50e   : > { %14067 = vmatprep.subr.mxu0 %v21817_v46  ;;  %14157 = vmatprep.subr.mxu1 %v21490_v45  ;;  %v25016_v47 = vld [vmem:[#allocation31_spill] sm:$0xff] }
 0x50f   : > { %14068 = vmatpush3.msra.mxu0 %v21825_v40  ;;  %14158 = vmatpush3.msra.mxu1 %v21496_v28 }
 0x510   : > { %14069 = vmatprep.subr.mxu0 %v21839_v57  ;;  %9271 = vmatmul.mubr.f32.gmra.mxu1 %v21955_v6  ;;  %v25014_v6 = vld [vmem:[#allocation20_spill] sm:$0xff] }
 0x511   : > { %14159 = vmatprep.subr.mxu1 %v21516_v31  ;;  %14070 = vmatpush3.msra.mxu0 %v21847_v10 }
 0x512   : > { %14160 = vmatpush3.msra.mxu1 %v21528_v59  ;;  %9522 = vmatprep.mubr.f32.mxu1 %v24998_v0  ;;  %v25009_v0 = vld [vmem:[#allocation34_spill] sm:$0xff] }
 0x513   : > { %14071 = vmatprep.subr.mxu0 %v21855_v12  ;;  %14161 = vmatprep.subr.mxu1 %v21533_v9 }
 0x514   : > { %14072 = vmatpush3.msra.mxu0 %v21865_v16  ;;  %14162 = vmatpush3.msra.mxu1 %v21543_v48 }
 0x515   : > { %9017 = vmatmul.mubr.f32.vlgmr.msra.gmra.mxu0 %v9016_v18  ;;  %14117 = vmatprep.subr.mxu0 %v24999_v19  ;;  %v25007_v18 = vld [vmem:[#allocation48_spill] sm:$0xff] }
 0x516   : > { %14163 = vmatprep.subr.mxu1 %v25000_v52  ;;  %9026 = vmatprep.mubr.f32.mxu0 %v9025_v56 }
 0x517   : > { %14118 = vmatpush3.msra.mxu0 %v25001_v2  ;;  %14164 = vmatpush3.msra.mxu1 %v21580_v15 }
 0x518   : > { %14119 = vmatprep.subr.mxu0 %v25002_v39  ;;  %14165 = vmatprep.subr.mxu1 %v21593_v32 }
 0x519   : > { %14120 = vmatpush3.msra.mxu0 %v25003_v13  ;;  %14166 = vmatpush3.msra.mxu1 %v21600_v5 }
 0x51a   : > { %9032 = vmatmul.mubr.f32.gmra.mxu0 %v9031_v51  ;;  %14121 = vmatprep.subr.mxu0 %v25004_v35 }
 0x51b   : > { %14167 = vmatprep.subr.mxu1 %v21609_v21  ;;  %14122 = vmatpush3.msra.mxu0 %v25005_v41 }
 0x51c   : > { %9406 = vmatprep.mubr.f32.mxu0 %v21499_v61  ;;  %14168 = vmatpush3.msra.mxu1 %v21622_v23  ;;  %v25010_v61 = vld [vmem:[#allocation49_spill] sm:$0xff] }
 0x51d   : > { %14123 = vmatprep.subr.mxu0 %v25006_v3  ;;  %14169 = vmatprep.subr.mxu1 %v21631_v62  ;;  %v13851_v4 = vpop.f32.mrf.mxu1 }
 0x51e   : > { %14124 = vmatpush3.msra.mxu0 %v25007_v18  ;;  %14170 = vmatpush3.msra.mxu1 %v21639_v33 }
 0x51f   : > { %14125 = vmatprep.subr.mxu0 %v25008_v38  ;;  %14171 = vmatprep.subr.mxu1 %v21672_v8  ;;  %v13852_v56 = vpop.f32.mrf.mxu1 }
 0x520   : > { %14126 = vmatpush3.msra.mxu0 %v25009_v0  ;;  %14172 = vmatpush3.msra.mxu1 %v21674_v53  ;;  %v13853_v51 = vadd.f32 %v13852_v56, %v13851_v4  ;;  %v25015_v4 = vld [vmem:[#allocation14_spill] sm:$0xff] }
 0x521   : > { %14127 = vmatprep.subr.mxu0 %v25010_v61  ;;  %14173 = vmatprep.subr.mxu1 %v21699_v14 }
 0x522   : > { %14128 = vmatpush3.msra.mxu0 %v25011_v42  ;;  %14174 = vmatpush3.msra.mxu1 %v21736_v54  ;;  %v13854_v7 = vpop.f32.mrf.mxu1 }
 0x523   : > { %14129 = vmatprep.subr.mxu0 %v25012_v50  ;;  %14175 = vmatprep.subr.mxu1 %v21750_v55  ;;  %v25017_v55 = vld [vmem:[#allocation25_spill] sm:$0xff] }
 0x524   : > { %14130 = vmatpush3.msra.mxu0 %v25013_v36  ;;  %14176 = vmatpush3.msra.mxu1 %v21761_v30  ;;  %v13855_v22 = vpop.f32.mrf.mxu1  ;;  %v25018_v30 = vld [vmem:[#allocation33_spill] sm:$0xff] }
 0x525   : > { %14131 = vmatprep.subr.mxu0 %v25014_v6  ;;  %14177 = vmatprep.subr.mxu1 %v21763_v24  ;;  %v13856_v56 = vadd.f32 %v13855_v22, %v13854_v7  ;;  %v25019_v24 = vld [vmem:[#allocation21_spill] sm:$0xff]  ;;  %v25020_v22 = vld [vmem:[#allocation22_spill] sm:$0xff]  ;;  %v25021_v7 = vld [vmem:[#allocation35_spill] sm:$0xff] }
 0x526   : > { %14132 = vmatpush3.msra.mxu0 %v25015_v4  ;;  %14178 = vmatpush3.msra.mxu1 %v21784_v49 }
 0x527   : > { %14133 = vmatprep.subr.mxu0 %v25016_v47  ;;  %v13813_v50 = vpop.f32.mrf.mxu0  ;;  %14179 = vmatprep.subr.mxu1 %v21792_v20 }
 0x528   : > { %14134 = vmatpush3.msra.mxu0 %v25017_v55  ;;  %14180 = vmatpush3.msra.mxu1 %v21803_v29 }
 0x529   : > { %14135 = vmatprep.subr.mxu0 %v25018_v30  ;;  %v13814_v6 = vpop.f32.mrf.mxu0  ;;  %14181 = vmatprep.subr.mxu1 %v21817_v46  ;;  %v25022_v30 = vld [vmem:[#allocation26_spill] sm:$0xff] }
 0x52a   : > { %14136 = vmatpush3.msra.mxu0 %v25019_v24  ;;  %v13815_v4 = vadd.f32 %v13814_v6, %v13813_v50  ;;  %14182 = vmatpush3.msra.mxu1 %v21825_v40 }
 0x52b   : > { %14137 = vmatprep.subr.mxu0 %v25020_v22  ;;  %14183 = vmatprep.subr.mxu1 %v21839_v57 }
 0x52c   : > { %14138 = vmatpush3.msra.mxu0 %v25021_v7  ;;  %v7724_v55 = vadd.f32 %v13815_v4, %v21959_v17  ;;  %v13816_v20 = vpop.f32.mrf.mxu0  ;;  %14184 = vmatpush3.msra.mxu1 %v21847_v10  ;;  %v25023_v7 = vand.u32 4294901760, %v21950_v43  ;;  %v25024_v17 = vand.u32 4294901760, %v21964_v37 }
 0x52d   : > { %14139 = vmatprep.subr.mxu0 %v25022_v30  ;;  %14185 = vmatprep.subr.mxu1 %v21855_v12 }
 0x52e   : > { %14140 = vmatpush3.msra.mxu0 %v21823_v60  ;;  %v22053_v6 = vadd.f32 %v13853_v51, %v7724_v55  ;;  %v13817_v50 = vpop.f32.mrf.mxu0  ;;  %14186 = vmatpush3.msra.mxu1 %v21865_v16  ;;  %v25025_v55 = vld [vmem:[#allocation16_spill] sm:$0xff]  ;;  %v25027_v51 = vand.u32 4294901760, %v21968_v27 }
 0x52f   : > { %14141 = vmatprep.subr.mxu0 %v21837_v58  ;;  %v13818_v57 = vadd.f32 %v13817_v50, %v13816_v20  ;;  %9526 = vmatmul.mubr.f32.vlgmr.msra.gmra.mxu1 %v25023_v7  ;;  %v8876_v50 = vld [vmem:[#allocation4 + $0x8d0] sm:$0xff] }
 0x530   : > { %14231 = vmatprep.subr.mxu1 %v21484_v25  ;;  %14142 = vmatpush3.msra.mxu0 %v21845_v34  ;;  %v25026_v25 = vld [vmem:[#allocation51_spill] sm:$0xff] }
 0x531   : > { %9533 = vmatprep.mubr.f32.mxu1 %v25024_v17  ;;  %v7733_v4 = vadd.f32 %v13818_v57, %v21979_v11  ;;  %14232 = vmatpush3.msra.mxu1 %v21486_v63  ;;  %v25028_v57 = vld [vmem:[#allocation43_spill] sm:$0xff]  ;;  %v25038_v11 = vand.u32 4294901760, %v25008_v38  ;;  %v25044_v38 = vld [vmem:[#allocation42_spill] sm:$0xff] }
 0x532   : > { %14143 = vmatprep.subr.mxu0 %v21853_v44  ;;  %14233 = vmatprep.subr.mxu1 %v21490_v45  ;;  %v25029_v63 = vld [vmem:[#allocation39_spill] sm:$0xff]  ;;  %v25030_v45 = vand.u32 4294901760, %v24999_v19 }
 0x533   : > { %14144 = vmatpush3.msra.mxu0 %v25025_v55  ;;  %v22068_v20 = vadd.f32 %v13856_v56, %v7733_v4  ;;  %14234 = vmatpush3.msra.mxu1 %v21496_v28  ;;  %v25031_v28 = vand.u32 4294901760, %v25001_v2  ;;  %v25049_v17 = vld [vmem:[#allocation47_spill] sm:$0xff]  ;;  %v25050_v4 = vld [vmem:[#allocation14_spill] sm:$0xff] }
 0x534   : > { %14145 = vmatprep.subr.mxu0 %v25026_v25  ;;  %9537 = vmatmul.mubr.f32.gmra.mxu1 %v25027_v51  ;;  %v25051_v51 = vand.u32 4294901760, %v25050_v4 }
 0x535   : > { %14235 = vmatprep.subr.mxu1 %v21516_v31  ;;  %14146 = vmatpush3.msra.mxu0 %v25028_v57  ;;  %v25032_v31 = vand.u32 4294901760, %v25002_v39  ;;  %v25040_v39 = vand.u32 4294901760, %v25010_v61  ;;  %v25047_v61 = vld [vmem:[#allocation20_spill] sm:$0xff] }
 0x536   : > { %14236 = vmatpush3.msra.mxu1 %v21528_v59  ;;  %9814 = vmatprep.mubr.f32.mxu1 %v25029_v63  ;;  %v25033_v59 = vand.u32 4294901760, %v25003_v13 }
 0x537   : > { %14147 = vmatprep.subr.mxu0 %v21890_v1  ;;  %14237 = vmatprep.subr.mxu1 %v21533_v9  ;;  %v8881_v9 = vld [vmem:[#allocation4 + $0x8f8] sm:$0xff] }
 0x538   : > { %14148 = vmatpush3.msra.mxu0 %v21900_v26  ;;  %14238 = vmatpush3.msra.mxu1 %v21543_v48  ;;  %v25034_v48 = vand.u32 4294901760, %v25004_v35  ;;  %v8877_v35 = vld [vmem:[#allocation4 + $0x8d8] sm:$0xff] }
 0x539   : > { %9409 = vmatmul.mubr.f32.vlgmr.msra.gmra.mxu0 %v21950_v43  ;;  %14193 = vmatprep.subr.mxu0 %v25030_v45  ;;  %v22103_v43 = vand.u32 4294901760, %v8881_v9  ;;  %v22150_v7 = vand.u32 4294901760, %v8877_v35 }
 0x53a   : > { %14239 = vmatprep.subr.mxu1 %v25000_v52  ;;  %9415 = vmatprep.mubr.f32.mxu0 %v21964_v37  ;;  %v25036_v37 = vand.u32 4294901760, %v25006_v3 }
 0x53b   : > { %14194 = vmatpush3.msra.mxu0 %v25031_v28  ;;  %14240 = vmatpush3.msra.mxu1 %v21580_v15  ;;  %v25035_v15 = vand.u32 4294901760, %v25005_v41  ;;  %v22120_v52 = vsub.f32 %v8881_v9, %v22103_v43  ;;  %v25042_v41 = vld [vmem:[#allocation23_spill] sm:$0xff]  ;;  %v25054_v9 = vld [vmem:[#allocation25_spill] sm:$0xff] }
 0x53c   : > { %14195 = vmatprep.subr.mxu0 %v25032_v31  ;;  %14241 = vmatprep.subr.mxu1 %v21593_v32  ;;  %v8880_v32 = vld [vmem:[#allocation4 + $0x8f0] sm:$0xff]  ;;  %v25043_v3 = vand.u32 4294901760, %v25042_v41  ;;  %v8875_v31 = vld [vmem:[#allocation4 + $0x8c8] sm:$0xff] }
 0x53d   : > { %14196 = vmatpush3.msra.mxu0 %v25033_v59  ;;  %14242 = vmatpush3.msra.mxu1 %v21600_v5  ;;  %v25037_v5 = vand.u32 4294901760, %v25007_v18  ;;  %v22114_v19 = vand.u32 4294901760, %v8880_v32  ;;  %v25053_v59 = vld [vmem:[#allocation17_spill] sm:$0xff] }
 0x53e   : > { %9418 = vmatmul.mubr.f32.gmra.mxu0 %v21968_v27  ;;  %14197 = vmatprep.subr.mxu0 %v25034_v48  ;;  %v8879_v27 = vld [vmem:[#allocation4 + $0x8e8] sm:$0xff]  ;;  %v25055_v48 = vand.u32 4294901760, %v25054_v9 }
 0x53f   : > { %14243 = vmatprep.subr.mxu1 %v21609_v21  ;;  %14198 = vmatpush3.msra.mxu0 %v25035_v15  ;;  %v22134_v18 = vsub.f32 %v8880_v32, %v22114_v19 }
 0x540   : > { %9703 = vmatprep.mubr.f32.mxu0 %v25029_v63  ;;  %14244 = vmatpush3.msra.mxu1 %v21622_v23  ;;  %v25039_v23 = vand.u32 4294901760, %v25009_v0  ;;  %v25045_v0 = vand.u32 4294901760, %v25013_v36  ;;  %v25052_v63 = vand.u32 4294901760, %v25016_v47  ;;  %v25056_v47 = vld [vmem:[#allocation33_spill] sm:$0xff] }
 0x541   : > { %14199 = vmatprep.subr.mxu0 %v25036_v37  ;;  %14245 = vmatprep.subr.mxu1 %v21631_v62  ;;  %v13927_v21 = vpop.f32.mrf.mxu1  ;;  %v8878_v62 = vld [vmem:[#allocation4 + $0x8e0] sm:$0xff]  ;;  %v22159_v45 = vand.u32 4294901760, %v22134_v18  ;;  %v25057_v37 = vand.u32 4294901760, %v25056_v47 }
 0x542   : > { %14200 = vmatpush3.msra.mxu0 %v25037_v5  ;;  %14246 = vmatpush3.msra.mxu1 %v21639_v33  ;;  %v22125_v33 = vand.u32 4294901760, %v8879_v27 }
 0x543   : > { %14201 = vmatprep.subr.mxu0 %v25038_v11  ;;  %14247 = vmatprep.subr.mxu1 %v21672_v8  ;;  %v13928_v2 = vpop.f32.mrf.mxu1  ;;  %v25041_v8 = vand.u32 4294901760, %v25011_v42  ;;  %v25046_v42 = vld [vmem:[#allocation45_spill] sm:$0xff]  ;;  %v25058_v11 = vand.u32 4294901760, %v25019_v24  ;;  %v25061_v24 = vld [vmem:[#allocation35_spill] sm:$0xff] }
 0x544   : > { %14202 = vmatpush3.msra.mxu0 %v25039_v23  ;;  %14248 = vmatpush3.msra.mxu1 %v21674_v53  ;;  %v13929_v13 = vadd.f32 %v13928_v2, %v13927_v21  ;;  %v22136_v53 = vand.u32 4294901760, %v8878_v62  ;;  %v22148_v56 = vsub.f32 %v8879_v27, %v22125_v33  ;;  %v22178_v27 = vsub.f32 %v8877_v35, %v22150_v7  ;;  %v25060_v35 = vld [vmem:[#allocation18_spill] sm:$0xff] }
 0x545   : > { %14203 = vmatprep.subr.mxu0 %v25040_v39  ;;  %14249 = vmatprep.subr.mxu1 %v21699_v14  ;;  %v22142_v14 = vand.u32 4294901760, %v22120_v52  ;;  %v22183_v23 = vand.u32 4294901760, %v8875_v31  ;;  %v9940_v2 = vsub.f32 %v22134_v18, %v22159_v45  ;;  %v25062_v41 = vand.u32 4294901760, %v25061_v24 }
 0x546   : > { %14204 = vmatpush3.msra.mxu0 %v25041_v8  ;;  %14250 = vmatpush3.msra.mxu1 %v21736_v54  ;;  %v25048_v54 = vand.u32 4294901760, %v25047_v61  ;;  %v22162_v28 = vsub.f32 %v8878_v62, %v22136_v53  ;;  %v22175_v5 = vand.u32 4294901760, %v22148_v56  ;;  %v8874_v62 = vld [vmem:[#allocation4 + $0x8c0] sm:$0xff]  ;;  %v25072_v24 = vand.u32 4294901760, %v25028_v57 }
 0x547   : > { %14205 = vmatprep.subr.mxu0 %v25043_v3  ;;  %14251 = vmatprep.subr.mxu1 %v25044_v38  ;;  %v9933_v15 = vsub.f32 %v22120_v52, %v22142_v14  ;;  %v25063_v38 = vand.u32 4294901760, %v25022_v30  ;;  %v22208_v61 = vand.u32 4294901760, %v8874_v62  ;;  %v22216_v30 = vsub.f32 %v8875_v31, %v22183_v23 }
 0x548   : > { %14206 = vmatpush3.msra.mxu0 %v25045_v0  ;;  %14252 = vmatpush3.msra.mxu1 %v25046_v42  ;;  %v22191_v39 = vand.u32 4294901760, %v22162_v28  ;;  %v9947_v0 = vsub.f32 %v22148_v56, %v22175_v5 }
 0x549   : > { %14207 = vmatprep.subr.mxu0 %v25048_v54  ;;  %14253 = vmatprep.subr.mxu1 %v25049_v17  ;;  %v9934_v3 = vand.u32 4294901760, %v9933_v15  ;;  %v8872_v54 = vld [vmem:[#allocation4 + $0x8b0] sm:$0xff]  ;;  %v22238_v47 = vsub.f32 %v8874_v62, %v22208_v61 }
 0x54a   : > { %14208 = vmatpush3.msra.mxu0 %v25051_v51  ;;  %v13889_v36 = vpop.f32.mrf.mxu0  ;;  %14254 = vmatpush3.msra.mxu1 %v21784_v49  ;;  %v22169_v49 = vand.u32 4294901760, %v8876_v50  ;;  %v25065_v51 = vand.u32 4294901760, %v21837_v58  ;;  %v22230_v9 = vand.u32 4294901760, %v8872_v54  ;;  %v25067_v58 = vand.u32 4294901760, %v21845_v34 }
 0x54b   : > { %14209 = vmatprep.subr.mxu0 %v25052_v63  ;;  %14255 = vmatprep.subr.mxu1 %v25053_v59  ;;  %v9948_v15 = vand.u32 4294901760, %v9947_v0  ;;  %v25070_v34 = vand.u32 4294901760, %v25025_v55  ;;  %v8869_v55 = vld [vmem:[#allocation4 + $0x898] sm:$0xff]  ;;  %v8868_v0 = vld [vmem:[#allocation4 + $0x890] sm:$0xff] }
 0x54c   : > { %14210 = vmatpush3.msra.mxu0 %v25055_v48  ;;  %v13890_v32 = vpop.f32.mrf.mxu0  ;;  %14256 = vmatpush3.msra.mxu1 %v21803_v29  ;;  %v25059_v29 = vand.u32 4294901760, %v25020_v22  ;;  %v8873_v22 = vld [vmem:[#allocation4 + $0x8b8] sm:$0xff]  ;;  %v25068_v48 = vld [vmem:[#allocation28_spill] sm:$0xff] }
 0x54d   : > { %14211 = vmatprep.subr.mxu0 %v25057_v37  ;;  %v13891_v21 = vadd.f32 %v13890_v32, %v13889_v36  ;;  %14257 = vmatprep.subr.mxu1 %v21817_v46  ;;  %v9941_v36 = vand.u32 4294901760, %v9940_v2  ;;  %v22223_v63 = vand.u32 4294901760, %v8873_v22 }
 0x54e   : > { %14212 = vmatpush3.msra.mxu0 %v25058_v11  ;;  %14258 = vmatpush3.msra.mxu1 %v21825_v40  ;;  %v22198_v40 = vsub.f32 %v8876_v50, %v22169_v49  ;;  %v25064_v50 = vand.u32 4294901760, %v21823_v60  ;;  %v8870_v11 = vld [vmem:[#allocation4 + $0x8a0] sm:$0xff] }
 0x54f   : > { %14213 = vmatprep.subr.mxu0 %v25059_v29  ;;  %v8020_v8 = vadd.f32 %v13891_v21, %v22053_v6  ;;  %v13892_v46 = vpop.f32.mrf.mxu0  ;;  %14259 = vmatprep.subr.mxu1 %v25060_v35  ;;  %v22206_v6 = vand.u32 4294901760, %v22178_v27  ;;  %v22243_v21 = vand.u32 4294901760, %v22216_v30  ;;  %v22248_v2 = vsub.f32 %v8873_v22, %v22223_v63 }
 0x550   : > { %14214 = vmatpush3.msra.mxu0 %v25062_v41  ;;  %14260 = vmatpush3.msra.mxu1 %v21847_v10  ;;  %v22227_v60 = vand.u32 4294901760, %v22198_v40  ;;  %v22259_v35 = vsub.f32 %v8872_v54, %v22230_v9  ;;  %v22266_v22 = vand.u32 4294901760, %v8870_v11 }
 0x551   : > { %14215 = vmatprep.subr.mxu0 %v25063_v38  ;;  %v13893_v42 = vpop.f32.mrf.mxu0  ;;  %v22210_v17 = vadd.f32 %v13929_v13, %v8020_v8  ;;  %14261 = vmatprep.subr.mxu1 %v21855_v12  ;;  %v9954_v13 = vsub.f32 %v22162_v28, %v22191_v39  ;;  %v25066_v12 = vld [vmem:[#allocation29_spill] sm:$0xff]  ;;  %v9961_v32 = vsub.f32 %v22178_v27, %v22206_v6  ;;  %v22275_v57 = vand.u32 4294901760, %v22248_v2 }
 0x552   : > { %14216 = vmatpush3.msra.mxu0 %v25064_v50  ;;  %v13894_v10 = vadd.f32 %v13893_v42, %v13892_v46  ;;  %v13930_v4 = vpop.f32.mrf.mxu1  ;;  %14262 = vmatpush3.msra.mxu1 %v21865_v16  ;;  %v8871_v16 = vld [vmem:[#allocation4 + $0x8a8] sm:$0xff]  ;;  %v9968_v46 = vsub.f32 %v22198_v40, %v22227_v60  ;;  %v9975_v38 = vsub.f32 %v22216_v30, %v22243_v21  ;;  %v25074_v42 = vand.u32 4294901760, %v21900_v26 }
 0x553   : > { %14217 = vmatprep.subr.mxu0 %v25065_v51  ;;  %9816 = vmatmul.mubr.f32.vlgmr.msra.gmra.mxu1 %v25066_v12  ;;  %v9955_v29 = vand.u32 4294901760, %v9954_v13  ;;  %v22250_v8 = vand.u32 4294901760, %v8871_v16  ;;  %v9962_v41 = vand.u32 4294901760, %v9961_v32  ;;  %v22280_v50 = vand.u32 4294901760, %v8869_v55 }
 0x554   : > { %15798 = vmatprep.subr.mxu1 %v9934_v3  ;;  %v8027_v31 = vadd.f32 %v13894_v10, %v22068_v20  ;;  %v13931_v59 = vpop.f32.mrf.mxu1  ;;  %14218 = vmatpush3.msra.mxu0 %v25067_v58  ;;  %v25069_v20 = vand.u32 4294901760, %v21853_v44  ;;  %v25071_v44 = vand.u32 4294901760, %v25026_v25  ;;  %v25073_v25 = vand.u32 4294901760, %v21890_v1 }
 0x555   : > { %9821 = vmatprep.mubr.f32.mxu1 %v25068_v48  ;;  %v13932_v37 = vadd.f32 %v13931_v59, %v13930_v4  ;;  %15799 = vmatpush3.msra.mxu1 %v9934_v3  ;;  %v22264_v3 = vand.u32 4294901760, %v22238_v47  ;;  %v22278_v54 = vsub.f32 %v8871_v16, %v22250_v8  ;;  %v9969_v1 = vand.u32 4294901760, %v9968_v46  ;;  %v8867_v4 = vld [vmem:[#allocation4 + $0x888] sm:$0xff] }
 0x556   : > { %14219 = vmatprep.subr.mxu0 %v25069_v20  ;;  %15800 = vmatprep.subr.mxu1 %v9941_v36  ;;  %v22284_v10 = vand.u32 4294901760, %v22259_v35  ;;  %v22290_v51 = vsub.f32 %v8870_v11, %v22266_v22  ;;  %v9976_v13 = vand.u32 4294901760, %v9975_v38  ;;  %v22303_v16 = vsub.f32 %v8869_v55, %v22280_v50 }
 0x557   : > { %14220 = vmatpush3.msra.mxu0 %v25070_v34  ;;  %v22252_v62 = vadd.f32 %v13932_v37, %v8027_v31  ;;  %15801 = vmatpush3.msra.mxu1 %v9941_v36  ;;  %v9982_v26 = vsub.f32 %v22238_v47, %v22264_v3  ;;  %v22292_v36 = vand.u32 4294901760, %v8868_v0  ;;  %v9989_v31 = vsub.f32 %v22248_v2, %v22275_v57  ;;  %v8829_v34 = vld [vmem:[#allocation3 + $0x10] sm:$0xe0] }
 0x558   : > { %14221 = vmatprep.subr.mxu0 %v25071_v44  ;;  %15802 = vmatprep.subr.mxu1 %v9948_v15  ;;  %v22300_v59 = vand.u32 4294901760, %v22278_v54  ;;  %v22305_v58 = vand.u32 4294901760, %v8867_v4  ;;  %v22312_v37 = vand.u32 4294901760, %v22290_v51  ;;  %v22324_v55 = vand.u32 4294901760, %v22303_v16 }
 0x559   : > { %14222 = vmatpush3.msra.mxu0 %v25072_v24  ;;  %15803 = vmatpush3.msra.mxu1 %v9948_v15  ;;  %v25075_v15 = vld [vmem:[#allocation38_spill] sm:$0xff]  ;;  %v9983_v32 = vand.u32 4294901760, %v9982_v26  ;;  %v22315_v20 = vsub.f32 %v8868_v0, %v22292_v36  ;;  %v9990_v44 = vand.u32 4294901760, %v9989_v31  ;;  %v25079_v31 = vld [vmem:[#allocation13_spill] sm:$0xff] }
 0x55a   : > { %14223 = vmatprep.subr.mxu0 %v25073_v25  ;;  %15804 = vmatprep.subr.mxu1 %v9955_v29  ;;  %v10003_v46 = vsub.f32 %v22278_v54, %v22300_v59  ;;  %25076 = vst [vmem:[#allocation40_spill] sm:$0xff] %v22324_v55  ;;  %v22327_v24 = vsub.f32 %v8867_v4, %v22305_v58  ;;  %v8895_v25 = vrot.slane %v8829_v34, 5 }
 0x55b   : > { %14224 = vmatpush3.msra.mxu0 %v25074_v42  ;;  %15805 = vmatpush3.msra.mxu1 %v9955_v29  ;;  %v8832_v29 = vld [vmem:[#allocation3 + $0x40] sm:$0x1f]  ;;  %v10010_v38 = vsub.f32 %v22290_v51, %v22312_v37  ;;  %v22335_v0 = vand.u32 4294901760, %v22315_v20  ;;  %v10017_v26 = vsub.f32 %v22303_v16, %v22324_v55 }
 0x55c   : > { %9705 = vmatmul.mubr.f32.vlgmr.msra.gmra.mxu0 %v25066_v12  ;;  %15763 = vmatprep.subr.mxu0 %v22103_v43  ;;  %v8866_v12 = vld [vmem:[#allocation4 + $0x880] sm:$0xff]  ;;  %v10004_v4 = vand.u32 4294901760, %v10003_v46 }
 0x55d   : > { %15806 = vmatprep.subr.mxu1 %v9962_v41  ;;  %9710 = vmatprep.mubr.f32.mxu0 %v25068_v48  ;;  %v9996_v48 = vsub.f32 %v22259_v35, %v22284_v10  ;;  %v22317_v11 = vand.u32 4294901760, %v8866_v12  ;;  %25077 = vst [vmem:[#allocation36_spill] sm:$0xff] %v22335_v0 }
 0x55e   : > { %15764 = vmatpush3.msra.mxu0 %v22103_v43  ;;  %15807 = vmatpush3.msra.mxu1 %v9962_v41 }
 0x55f   : > { %15765 = vmatprep.subr.mxu0 %v22114_v19  ;;  %15808 = vmatprep.subr.mxu1 %v9969_v1  ;;  %v9997_v41 = vand.u32 4294901760, %v9996_v48  ;;  %v22338_v42 = vsub.f32 %v8866_v12, %v22317_v11  ;;  %v8897_v12 = vsel %vm8888_vm6, %v8895_v25, %v25079_v31  ;;  %v10011_v48 = vand.u32 4294901760, %v10010_v38 }
 0x560   : > { %15766 = vmatpush3.msra.mxu0 %v22114_v19  ;;  %15809 = vmatpush3.msra.mxu1 %v9969_v1  ;;  %v8902_v1 = vrot.slane %v8832_v29, 5  ;;  %v10018_v29 = vand.u32 4294901760, %v10017_v26  ;;  %v22362_v46 = vand.u32 4294901760, %v8897_v12 }
 0x561   : > { %9712 = vmatmul.mubr.f32.gmra.mxu0 %v25075_v15  ;;  %15767 = vmatprep.subr.mxu0 %v22125_v33 }
 0x562   : > { %15810 = vmatprep.subr.mxu1 %v9976_v13  ;;  %15768 = vmatpush3.msra.mxu0 %v22125_v33  ;;  %v8903_v34 = vsel %vm8888_vm6, %v25079_v31, %v8902_v1  ;;  %v22373_v31 = vsub.f32 %v8897_v12, %v22362_v46 }
 0x563   : > { %15811 = vmatpush3.msra.mxu1 %v9976_v13  ;;  %15769 = vmatprep.subr.mxu0 %v22136_v53  ;;  %v22345_v13 = vand.u32 4294901760, %v22327_v24  ;;  %v22365_v25 = vand.u32 4294901760, %v8903_v34 }
 0x564   : > { %9823 = vmatmul.mubr.f32.gmra.mxu1 %v25075_v15  ;;  %15812 = vmatprep.subr.mxu1 %v9983_v32  ;;  %v10024_v15 = vsub.f32 %v22315_v20, %v22335_v0 }
 0x565   : > { %15770 = vmatpush3.msra.mxu0 %v22136_v53  ;;  %15813 = vmatpush3.msra.mxu1 %v9983_v32  ;;  %25078 = vst [vmem:[#allocation19_spill] sm:$0xff] %v22345_v13  ;;  %v22354_v32 = vand.u32 4294901760, %v22338_v42 }
 0x566   : > { %15771 = vmatprep.subr.mxu0 %v22150_v7  ;;  %15814 = vmatprep.subr.mxu1 %v9990_v44  ;;  %v15622_v38 = vpop.f32.mrf.mxu1 }
 0x567   : > { %15772 = vmatpush3.msra.mxu0 %v22150_v7  ;;  %15815 = vmatpush3.msra.mxu1 %v9990_v44  ;;  %25080 = vst [vmem:[#allocation30_spill] sm:$0xff] %v22354_v32  ;;  %v10031_v44 = vsub.f32 %v22327_v24, %v22345_v13  ;;  %v10038_v1 = vsub.f32 %v22338_v42, %v22354_v32 }
 0x568   : > { %15773 = vmatprep.subr.mxu0 %v22169_v49  ;;  %15816 = vmatprep.subr.mxu1 %v9997_v41 }
 0x569   : > { %15774 = vmatpush3.msra.mxu0 %v22169_v49  ;;  %15817 = vmatpush3.msra.mxu1 %v9997_v41  ;;  %v10025_v41 = vand.u32 4294901760, %v10024_v15  ;;  %v22378_v15 = vsub.f32 %v8903_v34, %v22365_v25  ;;  %v10039_v0 = vand.u32 4294901760, %v10038_v1 }
 0x56a   : > { %15775 = vmatprep.subr.mxu0 %v22183_v23  ;;  %15818 = vmatprep.subr.mxu1 %v10004_v4 }
 0x56b   : > { %15776 = vmatpush3.msra.mxu0 %v22183_v23  ;;  %15819 = vmatpush3.msra.mxu1 %v10004_v4  ;;  %v10032_v4 = vand.u32 4294901760, %v10031_v44  ;;  %v9921_v34 = vand.u32 4294901760, %v22378_v15 }
 0x56c   : > { %15777 = vmatprep.subr.mxu0 %v22208_v61  ;;  %15820 = vmatprep.subr.mxu1 %v10011_v48 }
 0x56d   : > { %15778 = vmatpush3.msra.mxu0 %v22208_v61  ;;  %15821 = vmatpush3.msra.mxu1 %v10011_v48  ;;  %v15587_v26 = vpop.f32.mrf.mxu0  ;;  %v8389_v48 = vpop.f32.mrf.mxu1 }
 0x56e   : > { %15779 = vmatprep.subr.mxu0 %v22223_v63  ;;  %15822 = vmatprep.subr.mxu1 %v10018_v29  ;;  %v8239_v13 = vadd.f32 %v15587_v26, %v22252_v62  ;;  %v9911_v62 = vand.u32 4294901760, %v22373_v31 }
 0x56f   : > { %15780 = vmatpush3.msra.mxu0 %v22223_v63  ;;  %15823 = vmatpush3.msra.mxu1 %v10018_v29  ;;  %v8228_v32 = vpop.f32.mrf.mxu0  ;;  %v10551_v29 = vld [vmem:[#allocation4 + $0x9f0] sm:$0xff] }
 0x570   : > { %15781 = vmatprep.subr.mxu0 %v22230_v9  ;;  %15824 = vmatprep.subr.mxu1 %v10025_v41  ;;  %v22381_v55 = vadd.f32 %v15622_v38, %v8239_v13  ;;  %v8229_v44 = vadd.f32 %v8228_v32, %v22210_v17  ;;  %v9912_v17 = vsub.f32 %v22373_v31, %v9911_v62  ;;  %v10535_v38 = vld [vmem:[#allocation4 + $0x970] sm:$0xff] }
 0x571   : > { %15782 = vmatpush3.msra.mxu0 %v22230_v9  ;;  %15825 = vmatpush3.msra.mxu1 %v10025_v41  ;;  %v9922_v13 = vsub.f32 %v22378_v15, %v9921_v34 }
 0x572   : > { %15783 = vmatprep.subr.mxu0 %v22250_v8  ;;  %15826 = vmatprep.subr.mxu1 %v10032_v4  ;;  %v22387_v12 = vadd.f32 %v8389_v48, %v8229_v44  ;;  %v10533_v44 = vld [vmem:[#allocation4 + $0x960] sm:$0xff] }
 0x573   : > { %15784 = vmatpush3.msra.mxu0 %v22250_v8  ;;  %15827 = vmatpush3.msra.mxu1 %v10032_v4  ;;  %v9923_v32 = vand.u32 4294901760, %v9922_v13  ;;  %v10532_v13 = vld [vmem:[#allocation4 + $0x958] sm:$0xff] }
 0x574   : > { %15785 = vmatprep.subr.mxu0 %v22266_v22  ;;  %15828 = vmatprep.subr.mxu1 %v10039_v0 }
 0x575   : > { %15786 = vmatpush3.msra.mxu0 %v22266_v22  ;;  %15829 = vmatpush3.msra.mxu1 %v10039_v0  ;;  %v9913_v0 = vand.u32 4294901760, %v9912_v17 }
 0x576   : > { %15787 = vmatprep.subr.mxu0 %v22280_v50  ;;  %15830 = vmatprep.mubr.f32.mxu1 %v22362_v46 }
 0x577   : > { %15868 = vmatprep.subr.mxu1 %v22103_v43  ;;  %15788 = vmatpush3.msra.mxu0 %v22280_v50 }
 0x578   : > { %15831 = vmatmul.mubr.f32.vlgmr.msra.gmra.mxu1 %v22365_v25  ;;  %15789 = vmatprep.subr.mxu0 %v22292_v36 }
 0x579   : > { %15869 = vmatpush3.msra.mxu1 %v22103_v43  ;;  %15790 = vmatpush3.msra.mxu0 %v22292_v36 }
 0x57a   : > { %15870 = vmatprep.subr.mxu1 %v22114_v19  ;;  %15791 = vmatprep.subr.mxu0 %v22305_v58 }
 0x57b   : > { %15871 = vmatpush3.msra.mxu1 %v22114_v19  ;;  %15792 = vmatpush3.msra.mxu0 %v22305_v58 }
 0x57c   : > { %15872 = vmatprep.subr.mxu1 %v22125_v33  ;;  %15793 = vmatprep.subr.mxu0 %v22317_v11 }
 0x57d   : > { %15873 = vmatpush3.msra.mxu1 %v22125_v33  ;;  %15794 = vmatpush3.msra.mxu0 %v22317_v11 }
 0x57e   : > { %15874 = vmatprep.subr.mxu1 %v22136_v53  ;;  %15795 = vmatprep.mubr.f32.mxu0 %v9913_v0 }
 0x57f   : > { %15875 = vmatpush3.msra.mxu1 %v22136_v53  ;;  %15796 = vmatmul.mubr.f32.vlgmr.msra.gmra.mxu0 %v9923_v32  ;;  %v10547_v32 = vld [vmem:[#allocation4 + $0x9d0] sm:$0xff] }
 0x580   : > { %15833 = vmatprep.subr.mxu0 %v22120_v52  ;;  %15876 = vmatprep.subr.mxu1 %v22150_v7 }
 0x581   : > { %15834 = vmatpush3.msra.mxu0 %v22120_v52  ;;  %15877 = vmatpush3.msra.mxu1 %v22150_v7 }
 0x582   : > { %15835 = vmatprep.subr.mxu0 %v22134_v18  ;;  %15878 = vmatprep.subr.mxu1 %v22169_v49 }
 0x583   : > { %15836 = vmatpush3.msra.mxu0 %v22134_v18  ;;  %15879 = vmatpush3.msra.mxu1 %v22169_v49 }
 0x584   : > { %15837 = vmatprep.subr.mxu0 %v22148_v56  ;;  %15880 = vmatprep.subr.mxu1 %v22183_v23 }
 0x585   : > { %15838 = vmatpush3.msra.mxu0 %v22148_v56  ;;  %15881 = vmatpush3.msra.mxu1 %v22183_v23 }
 0x586   : > { %15839 = vmatprep.subr.mxu0 %v22162_v28  ;;  %15882 = vmatprep.subr.mxu1 %v22208_v61 }
 0x587   : > { %15840 = vmatpush3.msra.mxu0 %v22162_v28  ;;  %15883 = vmatpush3.msra.mxu1 %v22208_v61 }
 0x588   : > { %15841 = vmatprep.subr.mxu0 %v22178_v27  ;;  %15884 = vmatprep.subr.mxu1 %v22223_v63  ;;  %v15692_v52 = vpop.f32.mrf.mxu1 }
 0x589   : > { %15842 = vmatpush3.msra.mxu0 %v22178_v27  ;;  %15885 = vmatpush3.msra.mxu1 %v22223_v63 }
 0x58a   : > { %15843 = vmatprep.subr.mxu0 %v22198_v40  ;;  %15886 = vmatprep.subr.mxu1 %v22230_v9  ;;  %v8595_v27 = vpop.f32.mrf.mxu1 }
 0x58b   : > { %15844 = vmatpush3.msra.mxu0 %v22198_v40  ;;  %15887 = vmatpush3.msra.mxu1 %v22230_v9 }
 0x58c   : > { %15845 = vmatprep.subr.mxu0 %v22216_v30  ;;  %15888 = vmatprep.subr.mxu1 %v22250_v8 }
 0x58d   : > { %15846 = vmatpush3.msra.mxu0 %v22216_v30  ;;  %15889 = vmatpush3.msra.mxu1 %v22250_v8 }
 0x58e   : > { %15847 = vmatprep.subr.mxu0 %v22238_v47  ;;  %15890 = vmatprep.subr.mxu1 %v22266_v22 }
 0x58f   : > { %15848 = vmatpush3.msra.mxu0 %v22238_v47  ;;  %15891 = vmatpush3.msra.mxu1 %v22266_v22  ;;  %v15657_v18 = vpop.f32.mrf.mxu0 }
 0x590   : > { %15849 = vmatprep.subr.mxu0 %v22248_v2  ;;  %15892 = vmatprep.subr.mxu1 %v22280_v50  ;;  %v8507_v56 = vadd.f32 %v15657_v18, %v22381_v55  ;;  %v10536_v55 = vld [vmem:[#allocation4 + $0x978] sm:$0xff] }
 0x591   : > { %15850 = vmatpush3.msra.mxu0 %v22248_v2  ;;  %15893 = vmatpush3.msra.mxu1 %v22280_v50  ;;  %v8499_v28 = vpop.f32.mrf.mxu0  ;;  %v10515_v2 = vld [vmem:[#allocation3 + $0x8] sm:$0xc0] }
 0x592   : > { %15851 = vmatprep.subr.mxu0 %v22259_v35  ;;  %15894 = vmatprep.subr.mxu1 %v22292_v36  ;;  %v22456_v40 = vadd.f32 %v15692_v52, %v8507_v56  ;;  %v8500_v30 = vadd.f32 %v8499_v28, %v22387_v12  ;;  %v10548_v12 = vld [vmem:[#allocation4 + $0x9d8] sm:$0xff]  ;;  %v10531_v56 = vld [vmem:[#allocation4 + $0x950] sm:$0xff] }
 0x593   : > { %15852 = vmatpush3.msra.mxu0 %v22259_v35  ;;  %15895 = vmatpush3.msra.mxu1 %v22292_v36  ;;  %v22474_v35 = vld [vmem:[#allocation3 + $0x20] sm:$0xff]  ;;  %v22590_v18 = vand.u32 4294901760, %v10548_v12 }
 0x594   : > { %15853 = vmatprep.subr.mxu0 %v22278_v54  ;;  %15896 = vmatprep.subr.mxu1 %v22305_v58  ;;  %v22463_v47 = vadd.f32 %v8595_v27, %v8500_v30  ;;  %v10546_v27 = vld [vmem:[#allocation4 + $0x9c8] sm:$0xff] }
 0x595   : > { %15854 = vmatpush3.msra.mxu0 %v22278_v54  ;;  %15897 = vmatpush3.msra.mxu1 %v22305_v58  ;;  %v24161_v54 = vrot.slane %v22474_v35, 6 }
 0x596   : > { %15855 = vmatprep.subr.mxu0 %v22290_v51  ;;  %15898 = vmatprep.subr.mxu1 %v22317_v11 }
 0x597   : > { %15856 = vmatpush3.msra.mxu0 %v22290_v51  ;;  %15899 = vmatpush3.msra.mxu1 %v22317_v11  ;;  %v10579_v51 = vrot.slane %v10515_v2, 6 }
 0x598   : > { %15857 = vmatprep.subr.mxu0 %v22303_v16  ;;  %15900 = vmatprep.mubr.f32.mxu1 %v9911_v62 }
 0x599   : > { %15938 = vmatprep.subr.mxu1 %v22103_v43  ;;  %15858 = vmatpush3.msra.mxu0 %v22303_v16  ;;  %v10581_v16 = vsel %vm10575_vm7, %v10579_v51, %v24161_v54 }
 0x59a   : > { %15901 = vmatmul.mubr.f32.vlgmr.msra.gmra.mxu1 %v9921_v34  ;;  %15859 = vmatprep.subr.mxu0 %v22315_v20  ;;  %v22558_v34 = vand.u32 4294901760, %v10533_v44 }
 0x59b   : > { %15939 = vmatpush3.msra.mxu1 %v22103_v43  ;;  %15860 = vmatpush3.msra.mxu0 %v22315_v20  ;;  %v10552_v43 = vld [vmem:[#allocation4 + $0x9f8] sm:$0xff] }
 0x59c   : > { %15940 = vmatprep.subr.mxu1 %v22114_v19  ;;  %15861 = vmatprep.subr.mxu0 %v22327_v24  ;;  %v22499_v20 = vand.u32 4294901760, %v10552_v43  ;;  %v22605_v2 = vsub.f32 %v10533_v44, %v22558_v34 }
 0x59d   : > { %15941 = vmatpush3.msra.mxu1 %v22114_v19  ;;  %15862 = vmatpush3.msra.mxu0 %v22327_v24  ;;  %v22495_v19 = vand.u32 4294901760, %v10581_v16  ;;  %v22501_v24 = vand.u32 4294901760, %v10536_v55 }
 0x59e   : > { %15942 = vmatprep.subr.mxu1 %v22125_v33  ;;  %15863 = vmatprep.subr.mxu0 %v22338_v42  ;;  %v22519_v1 = vsub.f32 %v10552_v43, %v22499_v20  ;;  %25088 = vst [vmem:[#allocation49_spill] sm:$0xff] %v22605_v2  ;;  %v10530_v43 = vld [vmem:[#allocation4 + $0x948] sm:$0xff] }
 0x59f   : > { %15943 = vmatpush3.msra.mxu1 %v22125_v33  ;;  %15864 = vmatpush3.msra.mxu0 %v22338_v42  ;;  %25081 = vst [vmem:[#allocation44_spill] sm:$0xff] %v22495_v19  ;;  %v22505_v33 = vand.u32 4294901760, %v10551_v29  ;;  %v10550_v42 = vld [vmem:[#allocation4 + $0x9e8] sm:$0xff]  ;;  %v22514_v41 = vsub.f32 %v10581_v16, %v22495_v19  ;;  %v22522_v26 = vsub.f32 %v10536_v55, %v22501_v24  ;;  %v22608_v16 = vand.u32 4294901760, %v10547_v32  ;;  %v10528_v55 = vld [vmem:[#allocation4 + $0x938] sm:$0xff] }
 0x5a0   : > { %15944 = vmatprep.subr.mxu1 %v22136_v53  ;;  %15865 = vmatprep.mubr.f32.mxu0 %v22373_v31  ;;  %v22531_v4 = vand.u32 4294901760, %v10550_v42 }
 0x5a1   : > { %15945 = vmatpush3.msra.mxu1 %v22136_v53  ;;  %15866 = vmatmul.mubr.f32.vlgmr.msra.gmra.mxu0 %v22378_v15  ;;  %v22511_v53 = vand.u32 4294901760, %v10535_v38  ;;  %25082 = vst [vmem:[#allocation41_spill] sm:$0xff] %v22522_v26  ;;  %v24159_v15 = vand.u32 4294901760, %v22519_v1 }
 0x5a2   : > { %15903 = vmatprep.subr.mxu0 %v22142_v14  ;;  %15946 = vmatprep.subr.mxu1 %v22150_v7 }
 0x5a3   : > { %15904 = vmatpush3.msra.mxu0 %v22142_v14  ;;  %15947 = vmatpush3.msra.mxu1 %v22150_v7  ;;  %v22527_v14 = vsub.f32 %v10551_v29, %v22505_v33  ;;  %v10534_v7 = vld [vmem:[#allocation4 + $0x968] sm:$0xff]  ;;  %v22536_v31 = vsub.f32 %v10535_v38, %v22511_v53  ;;  %v22615_v38 = vand.u32 4294901760, %v10531_v56 }
 0x5a4   : > { %15905 = vmatprep.subr.mxu0 %v22159_v45  ;;  %15948 = vmatprep.subr.mxu1 %v22169_v49  ;;  %v22543_v48 = vand.u32 4294901760, %v10534_v7 }
 0x5a5   : > { %15906 = vmatpush3.msra.mxu0 %v22159_v45  ;;  %15949 = vmatpush3.msra.mxu1 %v22169_v49  ;;  %25083 = vst [vmem:[#allocation37_spill] sm:$0xff] %v22527_v14  ;;  %v10549_v45 = vld [vmem:[#allocation4 + $0x9e0] sm:$0xff]  ;;  %25084 = vst [vmem:[#allocation24_spill] sm:$0xff] %v22536_v31  ;;  %v24160_v49 = vand.u32 4294901760, %v22514_v41 }
 0x5a6   : > { %15907 = vmatprep.subr.mxu0 %v22175_v5  ;;  %15950 = vmatprep.subr.mxu1 %v22183_v23  ;;  %v22548_v62 = vand.u32 4294901760, %v10549_v45  ;;  %v22578_v0 = vsub.f32 %v10534_v7, %v22543_v48 }
 0x5a7   : > { %15908 = vmatpush3.msra.mxu0 %v22175_v5  ;;  %15951 = vmatpush3.msra.mxu1 %v22183_v23  ;;  %v24158_v5 = vand.u32 4294901760, %v22522_v26  ;;  %v24157_v23 = vand.u32 4294901760, %v22527_v14  ;;  %v22563_v17 = vsub.f32 %v22514_v41, %v24160_v49  ;;  %v22637_v49 = vand.u32 4294901760, %v10530_v43 }
 0x5a8   : > { %15909 = vmatprep.subr.mxu0 %v22191_v39  ;;  %15952 = vmatprep.subr.mxu1 %v22208_v61  ;;  %25086 = vst [vmem:[#allocation27_spill] sm:$0xff] %v22578_v0  ;;  %v22588_v52 = vsub.f32 %v10549_v45, %v22548_v62  ;;  %v24163_v29 = vand.u32 4294901760, %v22578_v0 }
 0x5a9   : > { %15910 = vmatpush3.msra.mxu0 %v22191_v39  ;;  %15953 = vmatpush3.msra.mxu1 %v22208_v61  ;;  %v22553_v39 = vsub.f32 %v10550_v42, %v22531_v4  ;;  %v24156_v61 = vand.u32 4294901760, %v22536_v31  ;;  %v15762_v51 = vpop.f32.mrf.mxu1  ;;  %v10545_v42 = vld [vmem:[#allocation4 + $0x9c0] sm:$0xff] }
 0x5aa   : > { %15911 = vmatprep.subr.mxu0 %v22206_v6  ;;  %15954 = vmatprep.subr.mxu1 %v22223_v63  ;;  %25087 = vst [vmem:[#allocation34_spill] sm:$0xff] %v22588_v52  ;;  %v24164_v45 = vand.u32 4294901760, %v22588_v52  ;;  %v22646_v7 = vand.u32 4294901760, %v10545_v42 }
 0x5ab   : > { %15912 = vmatpush3.msra.mxu0 %v22206_v6  ;;  %25085 = vst [vmem:[#allocation48_spill] sm:$0xff] %v22553_v39  ;;  %15955 = vmatpush3.msra.mxu1 %v22223_v63  ;;  %v22570_v6 = vsub.f32 %v22519_v1, %v24159_v15  ;;  %v22575_v63 = vsub.f32 %v22522_v26, %v24158_v5  ;;  %v24162_v28 = vand.u32 4294901760, %v22553_v39 }
 0x5ac   : > { %15913 = vmatprep.subr.mxu0 %v22227_v60  ;;  %15956 = vmatprep.subr.mxu1 %v22230_v9  ;;  %v22602_v30 = vsub.f32 %v22536_v31, %v24156_v61  ;;  %v22624_v61 = vand.u32 4294901760, %v10546_v27 }
 0x5ad   : > { %15914 = vmatpush3.msra.mxu0 %v22227_v60  ;;  %15957 = vmatpush3.msra.mxu1 %v22230_v9  ;;  %v22585_v60 = vsub.f32 %v22527_v14, %v24157_v23  ;;  %v22595_v9 = vand.u32 4294901760, %v10532_v13  ;;  %v10529_v23 = vld [vmem:[#allocation4 + $0x940] sm:$0xff] }
 0x5ae   : > { %15915 = vmatprep.subr.mxu0 %v22243_v21  ;;  %15958 = vmatprep.subr.mxu1 %v22250_v8 }
 0x5af   : > { %15916 = vmatpush3.msra.mxu0 %v22243_v21  ;;  %15959 = vmatpush3.msra.mxu1 %v22250_v8  ;;  %v22635_v15 = vsub.f32 %v10532_v13, %v22595_v9  ;;  %v22644_v21 = vsub.f32 %v10547_v32, %v22608_v16  ;;  %v22652_v13 = vsub.f32 %v10531_v56, %v22615_v38 }
 0x5b0   : > { %15917 = vmatprep.subr.mxu0 %v22264_v3  ;;  %15960 = vmatprep.subr.mxu1 %v22266_v22  ;;  %v22661_v32 = vsub.f32 %v22578_v0, %v24163_v29  ;;  %v22679_v29 = vsub.f32 %v10530_v43, %v22637_v49  ;;  %v22685_v8 = vsub.f32 %v10545_v42, %v22646_v7  ;;  %v10522_v0 = vld [vmem:[#allocation4 + $0x908] sm:$0xff] }
 0x5b1   : > { %15918 = vmatpush3.msra.mxu0 %v22264_v3  ;;  %15961 = vmatpush3.msra.mxu1 %v22266_v22  ;;  %v15727_v44 = vpop.f32.mrf.mxu0  ;;  %v22622_v3 = vsub.f32 %v10548_v12, %v22590_v18  ;;  %v22631_v22 = vsub.f32 %v22553_v39, %v24162_v28  ;;  %25090 = vst [vmem:[#allocation46_spill] sm:$0xff] %v22635_v15  ;;  %25091 = vst [vmem:[#allocation31_spill] sm:$0xff] %v22644_v21  ;;  %v8815_v28 = vpop.f32.mrf.mxu1  ;;  %v10544_v12 = vld [vmem:[#allocation4 + $0x9b8] sm:$0xff]  ;;  %v24167_v56 = vand.u32 4294901760, %v22635_v15 }
 0x5b2   : > { %15919 = vmatprep.subr.mxu0 %v22275_v57  ;;  %15962 = vmatprep.subr.mxu1 %v22280_v50  ;;  %v8729_v5 = vadd.f32 %v15727_v44, %v22456_v40  ;;  %25092 = vst [vmem:[#allocation21_spill] sm:$0xff] %v22652_v13  ;;  %v22654_v44 = vand.u32 4294901760, %v10529_v23  ;;  %25096 = vst [vmem:[#allocation16_spill] sm:$0xff] %v22679_v29  ;;  %v22860_v14 = vand.u32 4294901760, %v10522_v0 }
 0x5b3   : > { %25089 = vst [vmem:[#allocation15_spill] sm:$0xff] %v22622_v3  ;;  %15920 = vmatpush3.msra.mxu0 %v22275_v57  ;;  %15963 = vmatpush3.msra.mxu1 %v22280_v50  ;;  %v24165_v57 = vand.u32 4294901760, %v22605_v2  ;;  %v8722_v54 = vpop.f32.mrf.mxu0  ;;  %25097 = vst [vmem:[#allocation51_spill] sm:$0xff] %v22685_v8 }
 0x5b4   : > { %15921 = vmatprep.subr.mxu0 %v22284_v10  ;;  %15964 = vmatprep.subr.mxu1 %v22292_v36  ;;  %v8822_v40 = vadd.f32 %v15762_v51, %v8729_v5  ;;  %v8723_v50 = vadd.f32 %v8722_v54, %v22463_v47  ;;  %v24166_v47 = vand.u32 4294901760, %v22622_v3  ;;  %v22670_v54 = vsub.f32 %v10546_v27, %v22624_v61  ;;  %v10542_v27 = vld [vmem:[#allocation4 + $0x9a8] sm:$0xff] }
 0x5b5   : > { %15922 = vmatpush3.msra.mxu0 %v22284_v10  ;;  %15965 = vmatpush3.msra.mxu1 %v22292_v36  ;;  %v22666_v10 = vsub.f32 %v22588_v52, %v24164_v45  ;;  %v25094_v36 = vld [vmem:[#allocation32_spill] sm:$0xff]  ;;  %v10543_v45 = vld [vmem:[#allocation4 + $0x9b0] sm:$0xff]  ;;  %v22703_v42 = vsub.f32 %v10529_v23, %v22654_v44 }
 0x5b6   : > { %15923 = vmatprep.subr.mxu0 %v22300_v59  ;;  %25093 = vst [vmem:[#allocation22_spill] sm:$0xff] %v22670_v54  ;;  %15966 = vmatprep.subr.mxu1 %v22305_v58  ;;  %v22675_v5 = vadd.f32 %v8822_v40, %v25094_v36  ;;  %v8816_v51 = vadd.f32 %v8815_v28, %v8723_v50  ;;  %v22689_v40 = vand.u32 4294901760, %v10528_v55  ;;  %v10855_v36 = vand.u32 4294901760, %v22631_v22  ;;  %v25101_v50 = vld [vmem:[#allocation40_spill] sm:$0xff] }
 0x5b7   : > { %15924 = vmatpush3.msra.mxu0 %v22300_v59  ;;  %15967 = vmatpush3.msra.mxu1 %v22305_v58  ;;  %v22687_v59 = vand.u32 4294901760, %v10544_v12  ;;  %v22696_v28 = vsub.f32 %v22605_v2, %v24165_v57  ;;  %v25098_v58 = vld [vmem:[#allocation50_spill] sm:$0xff]  ;;  %25100 = vst [vmem:[#allocation39_spill] sm:$0xff] %v22703_v42  ;;  %v10862_v23 = vand.u32 4294901760, %v22666_v10  ;;  %v22723_v22 = vsub.f32 %v22635_v15, %v24167_v56  ;;  %v10541_v15 = vld [vmem:[#allocation4 + $0x9a0] sm:$0xff] }
 0x5b8   : > { %25095 = vst [vmem:[#allocation26_spill] sm:$0xff] %v22675_v5  ;;  %15925 = vmatprep.subr.mxu0 %v22312_v37  ;;  %15968 = vmatprep.subr.mxu1 %v22317_v11  ;;  %v22699_v43 = vadd.f32 %v8816_v51, %v25098_v58  ;;  %v22714_v51 = vand.u32 4294901760, %v10543_v45  ;;  %v10527_v58 = vld [vmem:[#allocation4 + $0x930] sm:$0xff]  ;;  %v25102_v57 = vand.u32 4294901760, %v22570_v6  ;;  %v22739_v56 = vsub.f32 %v10528_v55, %v22689_v40  ;;  %v25108_v55 = vld [vmem:[#allocation36_spill] sm:$0xff] }
 0x5b9   : > { %15926 = vmatpush3.msra.mxu0 %v22312_v37  ;;  %15969 = vmatpush3.msra.mxu1 %v22317_v11  ;;  %v22711_v37 = vsub.f32 %v22622_v3, %v24166_v47  ;;  %v10743_v11 = vand.u32 4294901760, %v22661_v32  ;;  %v22736_v10 = vsub.f32 %v10544_v12, %v22687_v59  ;;  %v10526_v47 = vld [vmem:[#allocation4 + $0x928] sm:$0xff]  ;;  %v25106_v6 = vand.u32 4294901760, %v22575_v63  ;;  %v10525_v12 = vld [vmem:[#allocation4 + $0x920] sm:$0xff] }
 0x5ba   : > { %25099 = vst [vmem:[#allocation43_spill] sm:$0xff] %v22699_v43  ;;  %15970 = vmatprep.mubr.f32.mxu1 %v22362_v46  ;;  %15927 = vmatprep.subr.mxu0 %v25101_v50  ;;  %v25103_v43 = vand.u32 4294901760, %v22644_v21  ;;  %25105 = vst [vmem:[#allocation42_spill] sm:$0xff] %v22739_v56  ;;  %v22751_v32 = vand.u32 4294901760, %v10527_v58  ;;  %v25114_v3 = vld [vmem:[#allocation19_spill] sm:$0xff]  ;;  %v25116_v52 = vand.u32 4294901760, %v22703_v42 }
 0x5bb   : > { %15971 = vmatmul.mubr.f32.vlgmr.msra.gmra.mxu1 %v22365_v25  ;;  %14415 = vmatprep.subr.mxu1 %v25102_v57  ;;  %25104 = vst [vmem:[#allocation23_spill] sm:$0xff] %v22736_v10  ;;  %v10750_v57 = vand.u32 4294901760, %v22696_v28  ;;  %v10869_v63 = vand.u32 4294901760, %v22711_v37 }
 0x5bc   : > { %15928 = vmatpush3.msra.mxu0 %v25101_v50  ;;  %v22732_v5 = vsub.f32 %v22644_v21, %v25103_v43  ;;  %14416 = vmatpush3.msra.mxu1 %v25106_v6  ;;  %v25107_v43 = vand.u32 4294901760, %v22652_v13  ;;  %v25109_v21 = vand.u32 4294901760, %v22585_v60  ;;  %v25110_v6 = vand.u32 4294901760, %v22670_v54 }
 0x5bd   : > { %10949 = vmatprep.mubr.f32.mxu1 %v22495_v19  ;;  %15929 = vmatprep.subr.mxu0 %v25108_v55  ;;  %v22763_v19 = vsub.f32 %v10543_v45, %v22714_v51  ;;  %v10757_v60 = vand.u32 4294901760, %v22723_v22  ;;  %v10540_v45 = vld [vmem:[#allocation4 + $0x998] sm:$0xff] }
 0x5be   : > { %v22748_v50 = vsub.f32 %v22652_v13, %v25107_v43  ;;  %14417 = vmatprep.subr.mxu1 %v25109_v21  ;;  %v22760_v28 = vsub.f32 %v22670_v54, %v25110_v6  ;;  %v22765_v43 = vand.u32 4294901760, %v10542_v27  ;;  %15930 = vmatpush3.msra.mxu0 %v25108_v55  ;;  %v25112_v13 = vand.u32 4294901760, %v22602_v30  ;;  %v25119_v22 = vld [vmem:[#allocation30_spill] sm:$0xff] }
 0x5bf   : > { %25111 = vst [vmem:[#allocation45_spill] sm:$0xff] %v22763_v19  ;;  %v25113_v21 = vand.u32 4294901760, %v22679_v29  ;;  %v22776_v6 = vand.u32 4294901760, %v10526_v47  ;;  %v22778_v54 = vand.u32 4294901760, %v10541_v15  ;;  %15931 = vmatprep.subr.mxu0 %v25114_v3  ;;  %v10876_v55 = vand.u32 4294901760, %v22732_v5  ;;  %15935 = vmatprep.mubr.f32.mxu0 %v22362_v46 }
 0x5c0   : > { %14418 = vmatpush3.msra.mxu1 %v25112_v13  ;;  %v25115_v30 = vand.u32 4294901760, %v22685_v8  ;;  %15932 = vmatpush3.msra.mxu0 %v25114_v3  ;;  %v10764_v2 = vand.u32 4294901760, %v22748_v50  ;;  %v22797_v5 = vsub.f32 %v10527_v58, %v22751_v32  ;;  %v22807_v50 = vand.u32 4294901760, %v10540_v45  ;;  %v10538_v3 = vld [vmem:[#allocation4 + $0x988] sm:$0xff] }
 0x5c1   : > { %v22774_v37 = vsub.f32 %v22679_v29, %v25113_v21  ;;  %14419 = vmatprep.subr.mxu1 %v10855_v36  ;;  %v10524_v29 = vld [vmem:[#allocation4 + $0x918] sm:$0xff]  ;;  %v22794_v36 = vsub.f32 %v22703_v42, %v25116_v52  ;;  %15933 = vmatprep.subr.mxu0 %v25119_v22  ;;  %v10883_v21 = vand.u32 4294901760, %v22760_v28  ;;  %v10523_v52 = vld [vmem:[#allocation4 + $0x910] sm:$0xff]  ;;  %v22813_v42 = vsub.f32 %v10526_v47, %v22776_v6 }
 0x5c2   : > { %v22785_v13 = vsub.f32 %v22685_v8, %v25115_v30  ;;  %14420 = vmatpush3.msra.mxu1 %v10743_v11  ;;  %25117 = vst [vmem:[#allocation20_spill] sm:$0xff] %v22797_v5  ;;  %v22799_v30 = vand.u32 4294901760, %v10525_v12  ;;  %v10539_v8 = vld [vmem:[#allocation4 + $0x990] sm:$0xff]  ;;  %v22805_v11 = vsub.f32 %v10542_v27, %v22765_v43  ;;  %15934 = vmatpush3.msra.mxu0 %v25119_v22  ;;  %v22818_v28 = vand.u32 4294901760, %v10524_v29 }
 0x5c3   : > { %14421 = vmatprep.subr.mxu1 %v10862_v23  ;;  %v10771_v58 = vand.u32 4294901760, %v22774_v37  ;;  %25121 = vst [vmem:[#allocation17_spill] sm:$0xff] %v22813_v42  ;;  %v22816_v23 = vsub.f32 %v10541_v15, %v22778_v54  ;;  %15936 = vmatmul.mubr.f32.vlgmr.msra.gmra.mxu0 %v22365_v25  ;;  %v25124_v22 = vand.u32 4294901760, %v22736_v10  ;;  %v25125_v37 = vand.u32 4294901760, %v22739_v56 }
 0x5c4   : > { %25118 = vst [vmem:[#allocation47_spill] sm:$0xff] %v22799_v30  ;;  %25120 = vst [vmem:[#allocation14_spill] sm:$0xff] %v22805_v11  ;;  %14422 = vmatpush3.msra.mxu1 %v10750_v57  ;;  %v10890_v27 = vand.u32 4294901760, %v22785_v13  ;;  %v22832_v15 = vand.u32 4294901760, %v10539_v8  ;;  %14377 = vmatprep.subr.mxu0 %v22499_v20  ;;  %v10778_v25 = vand.u32 4294901760, %v22794_v36  ;;  %v22838_v13 = vsub.f32 %v10525_v12, %v22799_v30  ;;  %v10521_v12 = vld [vmem:[#allocation4 + $0x900] sm:$0xff] }
 0x5c5   : > { %25122 = vst [vmem:[#allocation25_spill] sm:$0xff] %v22816_v23  ;;  %25123 = vst [vmem:[#allocation33_spill] sm:$0xff] %v22818_v28  ;;  %v22825_v46 = vsub.f32 %v22736_v10, %v25124_v22  ;;  %v22830_v47 = vsub.f32 %v22739_v56, %v25125_v37  ;;  %14423 = vmatprep.subr.mxu1 %v10869_v63  ;;  %v22840_v22 = vand.u32 4294901760, %v10523_v52  ;;  %v10537_v10 = vld [vmem:[#allocation4 + $0x980] sm:$0xff]  ;;  %14378 = vmatpush3.msra.mxu0 %v22501_v24 }
 0x5c6   : > { %25126 = vst [vmem:[#allocation18_spill] sm:$0xff] %v22838_v13  ;;  %v25128_v37 = vand.u32 4294901760, %v22563_v17  ;;  %v25129_v56 = vand.u32 4294901760, %v22763_v19  ;;  %v22850_v36 = vsub.f32 %v10540_v45, %v22807_v50  ;;  %v22852_v57 = vand.u32 4294901760, %v10538_v3  ;;  %14424 = vmatpush3.msra.mxu1 %v10757_v60  ;;  %14379 = vmatprep.subr.mxu0 %v22505_v33 }
 0x5c7   : > { %25127 = vst [vmem:[#allocation35_spill] sm:$0xff] %v22840_v22  ;;  %14425 = vmatprep.subr.mxu1 %v10876_v55  ;;  %14380 = vmatpush3.msra.mxu0 %v22511_v53  ;;  %v10785_v45 = vand.u32 4294901760, %v22830_v47  ;;  %v22866_v60 = vsub.f32 %v10539_v8, %v22832_v15  ;;  %v22868_v63 = vand.u32 4294901760, %v10537_v10  ;;  %v22876_v31 = vsub.f32 %v10523_v52, %v22840_v22  ;;  %v10514_v47 = vld [vmem:[#allocation3] sm:$0xc0] }
 0x5c8   : > { %10698 = vmatprep.mubr.f32.mxu0 %v25128_v37  ;;  %v10903_v39 = vsub.f32 %v22763_v19, %v25129_v56  ;;  %v22858_v37 = vsub.f32 %v10524_v29, %v22818_v28  ;;  %v10897_v56 = vand.u32 4294901760, %v22825_v46  ;;  %14426 = vmatpush3.msra.mxu1 %v10764_v2  ;;  %v25131_v29 = vand.u32 4294901760, %v22797_v5 }
 0x5c9   : > { %25130 = vst [vmem:[#allocation29_spill] sm:$0xff] %v22866_v60  ;;  %14381 = vmatprep.subr.mxu0 %v22531_v4  ;;  %v22878_v46 = vand.u32 4294901760, %v10521_v12  ;;  %14427 = vmatprep.subr.mxu1 %v10883_v21  ;;  %v25132_v2 = vand.u32 4294901760, %v22805_v11  ;;  %v25133_v52 = vand.u32 4294901760, %v22813_v42  ;;  %v25134_v21 = vand.u32 4294901760, %v22816_v23 }
 0x5ca   : > { %v10791_v17 = vsub.f32 %v22797_v5, %v25131_v29  ;;  %14382 = vmatpush3.msra.mxu0 %v22543_v48  ;;  %v10904_v8 = vand.u32 4294901760, %v10903_v39  ;;  %v22886_v29 = vsub.f32 %v10538_v3, %v22852_v57  ;;  %14428 = vmatpush3.msra.mxu1 %v10771_v58  ;;  %v22902_v58 = vsub.f32 %v10537_v10, %v22868_v63 }
 0x5cb   : > { %v10910_v19 = vsub.f32 %v22805_v11, %v25132_v2  ;;  %14383 = vmatprep.subr.mxu0 %v22548_v62  ;;  %v10798_v55 = vsub.f32 %v22813_v42, %v25133_v52  ;;  %v10917_v39 = vsub.f32 %v22816_v23, %v25134_v21  ;;  %v22897_v2 = vsub.f32 %v10522_v0, %v22860_v14  ;;  %v16288_v11 = vld [vmem:[#allocation3 + $0x18] sm:$0xff] }
 0x5cc   : > { %14429 = vmatprep.subr.mxu1 %v10890_v27  ;;  %14384 = vmatpush3.msra.mxu0 %v22558_v34  ;;  %v10576_v26 = vrot.slane %v10514_v47, 6  ;;  %v22904_v52 = vrot.slane %v16288_v11, 6  ;;  %v10518_v42 = vld [vmem:[#allocation3 + $0x38] sm:$0x3f]  ;;  %v10792_v21 = vand.u32 4294901760, %v10791_v17  ;;  %v25136_v0 = vand.u32 4294901760, %v22838_v13 }
 0x5cd   : > { %14430 = vmatpush3.msra.mxu1 %v10778_v25  ;;  %14385 = vmatprep.subr.mxu0 %v22590_v18  ;;  %v22912_v3 = vsub.f32 %v10521_v12, %v22878_v46  ;;  %v10911_v10 = vand.u32 4294901760, %v10910_v19  ;;  %v25137_v11 = vand.u32 4294901760, %v22850_v36  ;;  %v10517_v17 = vld [vmem:[#allocation3 + $0x30] sm:$0x3f]  ;;  %v25138_v5 = vand.u32 4294901760, %v22858_v37 }
 0x5ce   : > { %25135 = vst [vmem:[#allocation28_spill] sm:$0xff] %v22904_v52  ;;  %v10805_v27 = vsub.f32 %v22838_v13, %v25136_v0  ;;  %14431 = vmatprep.subr.mxu1 %v10897_v56  ;;  %14386 = vmatpush3.msra.mxu0 %v22595_v9  ;;  %v10799_v0 = vand.u32 4294901760, %v10798_v55  ;;  %v10587_v13 = vrot.slane %v10518_v42, 6  ;;  %v10918_v19 = vand.u32 4294901760, %v10917_v39 }
 0x5cf   : > { %v10924_v25 = vsub.f32 %v22850_v36, %v25137_v11  ;;  %14432 = vmatpush3.msra.mxu1 %v10785_v45  ;;  %14387 = vmatprep.subr.mxu0 %v22608_v16  ;;  %v10812_v12 = vsub.f32 %v22858_v37, %v25138_v5  ;;  %v25139_v11 = vand.u32 4294901760, %v22866_v60  ;;  %v10578_v55 = vsel %vm10575_vm7, %v10576_v26, %v22904_v52 }
 0x5d0   : > { %14433 = vmatprep.subr.mxu1 %v10904_v8  ;;  %14388 = vmatpush3.msra.mxu0 %v22615_v38  ;;  %v10806_v5 = vand.u32 4294901760, %v10805_v27  ;;  %v25140_v56 = vand.u32 4294901760, %v22876_v31  ;;  %v24216_v8 = vand.u32 4294901760, %v22912_v3  ;;  %v10585_v39 = vrot.slane %v10517_v17, 6 }
 0x5d1   : > { %v10931_v47 = vsub.f32 %v22866_v60, %v25139_v11  ;;  %14434 = vmatpush3.msra.mxu1 %v10792_v21  ;;  %14389 = vmatprep.subr.mxu0 %v22624_v61  ;;  %v10925_v11 = vand.u32 4294901760, %v10924_v25  ;;  %v25141_v45 = vand.u32 4294901760, %v22886_v29  ;;  %v10813_v26 = vand.u32 4294901760, %v10812_v12 }
 0x5d2   : > { %v10819_v42 = vsub.f32 %v22876_v31, %v25140_v56  ;;  %14435 = vmatprep.subr.mxu1 %v10911_v10  ;;  %14390 = vmatpush3.msra.mxu0 %v22637_v49  ;;  %v25142_v21 = vand.u32 4294901760, %v22897_v2  ;;  %v22944_v56 = vand.u32 4294901760, %v10578_v55  ;;  %v25144_v25 = vand.u32 4294901760, %v22902_v58 }
 0x5d3   : > { %v10938_v60 = vsub.f32 %v22886_v29, %v25141_v45  ;;  %14436 = vmatpush3.msra.mxu1 %v10799_v0  ;;  %14391 = vmatprep.subr.mxu0 %v22646_v7  ;;  %v10932_v10 = vand.u32 4294901760, %v10931_v47  ;;  %v25145_v45 = vrot.slane %v22474_v35, 6 }
 0x5d4   : > { %v10826_v27 = vsub.f32 %v22897_v2, %v25142_v21  ;;  %25143 = vst [vmem:[#allocation38_spill] sm:$0xff] %v22944_v56  ;;  %14437 = vmatprep.subr.mxu1 %v10918_v19  ;;  %14392 = vmatpush3.msra.mxu0 %v22654_v44  ;;  %v10945_v17 = vsub.f32 %v22902_v58, %v25144_v25  ;;  %v10820_v12 = vand.u32 4294901760, %v10819_v42 }
 0x5d5   : > { %v10588_v0 = vsel %vm10575_vm7, %v25145_v45, %v10587_v13  ;;  %14438 = vmatpush3.msra.mxu1 %v10806_v5  ;;  %14393 = vmatprep.subr.mxu0 %v22687_v59  ;;  %v10833_v21 = vsub.f32 %v22912_v3, %v24216_v8  ;;  %v10586_v19 = vsel %vm10575_vm7, %v22904_v52, %v10585_v39  ;;  %v10939_v47 = vand.u32 4294901760, %v10938_v60  ;;  %v25161_v8 = vld [vmem:[#allocation16_spill] sm:$0xff]  ;;  %v25165_v52 = vld [vmem:[#allocation42_spill] sm:$0xff] }
 0x5d6   : > { %14439 = vmatprep.subr.mxu1 %v10925_v11  ;;  %14394 = vmatpush3.msra.mxu0 %v22689_v40  ;;  %v10827_v35 = vand.u32 4294901760, %v10826_v27  ;;  %v22962_v13 = vsub.f32 %v10578_v55, %v22944_v56  ;;  %v22964_v5 = vand.u32 4294901760, %v10588_v0  ;;  %v10946_v42 = vand.u32 4294901760, %v10945_v17 }
 0x5d7   : > { %14440 = vmatpush3.msra.mxu1 %v10813_v26  ;;  %14395 = vmatprep.subr.mxu0 %v22714_v51  ;;  %v22967_v25 = vand.u32 4294901760, %v10586_v19  ;;  %v10834_v39 = vand.u32 4294901760, %v10833_v21 }
 0x5d8   : > { %25146 = vst [vmem:[#allocation13_spill] sm:$0xff] %v22964_v5  ;;  %14441 = vmatprep.subr.mxu1 %v10932_v10  ;;  %14396 = vmatpush3.msra.mxu0 %v22751_v32  ;;  %v24219_v60 = vand.u32 4294901760, %v22962_v13  ;;  %v22974_v55 = vsub.f32 %v10588_v0, %v22964_v5 }
 0x5d9   : > { %25147 = vst [vmem:[#allocation32_spill] sm:$0xff] %v22967_v25  ;;  %14442 = vmatpush3.msra.mxu1 %v10820_v12  ;;  %14397 = vmatprep.subr.mxu0 %v22765_v43  ;;  %v22978_v11 = vsub.f32 %v10586_v19, %v22967_v25  ;;  %v25148_v12 = vand.u32 4294901760, %v22514_v41 }
 0x5da   : > { %14443 = vmatprep.subr.mxu1 %v10939_v47  ;;  %14398 = vmatpush3.msra.mxu0 %v22776_v6  ;;  %v10702_v26 = vsub.f32 %v22962_v13, %v24219_v60  ;;  %v24218_v27 = vand.u32 4294901760, %v22974_v55  ;;  %v25149_v47 = vld [vmem:[#allocation41_spill] sm:$0xff]  ;;  %v25164_v60 = vld [vmem:[#allocation23_spill] sm:$0xff] }
 0x5db   : > { %14444 = vmatpush3.msra.mxu1 %v10827_v35  ;;  %14399 = vmatprep.subr.mxu0 %v22778_v54  ;;  %v24217_v10 = vand.u32 4294901760, %v22978_v11  ;;  %v25150_v35 = vld [vmem:[#allocation37_spill] sm:$0xff] }
 0x5dc   : > { %14445 = vmatprep.subr.mxu1 %v10946_v42  ;;  %14400 = vmatpush3.msra.mxu0 %v22799_v30  ;;  %v10703_v17 = vand.u32 4294901760, %v10702_v26  ;;  %v10711_v45 = vsub.f32 %v22974_v55, %v24218_v27  ;;  %v25151_v42 = vld [vmem:[#allocation24_spill] sm:$0xff]  ;;  %v25153_v26 = vld [vmem:[#allocation27_spill] sm:$0xff] }
 0x5dd   : > { %14446 = vmatpush3.msra.mxu1 %v10834_v39  ;;  %14401 = vmatprep.subr.mxu0 %v22807_v50  ;;  %v10717_v0 = vsub.f32 %v22978_v11, %v24217_v10  ;;  %v25152_v39 = vld [vmem:[#allocation48_spill] sm:$0xff]  ;;  %v25162_v10 = vld [vmem:[#allocation51_spill] sm:$0xff] }
 0x5de   : > { %10951 = vmatmul.mubr.f32.vlgmr.msra.gmra.mxu1 %v22944_v56  ;;  %14491 = vmatprep.subr.mxu1 %v22499_v20  ;;  %v10712_v21 = vand.u32 4294901760, %v10711_v45  ;;  %v25155_v45 = vld [vmem:[#allocation49_spill] sm:$0xff]  ;;  %v25163_v27 = vld [vmem:[#allocation39_spill] sm:$0xff]  ;;  %v25168_v56 = vld [vmem:[#allocation14_spill] sm:$0xff] }
 0x5df   : > { %14402 = vmatpush3.msra.mxu0 %v22818_v28  ;;  %10956 = vmatprep.mubr.f32.mxu1 %v22964_v5  ;;  %v10718_v19 = vand.u32 4294901760, %v10717_v0  ;;  %v25156_v0 = vld [vmem:[#allocation15_spill] sm:$0xff]  ;;  %v25167_v5 = vld [vmem:[#allocation20_spill] sm:$0xff] }
 0x5e0   : > { %14492 = vmatpush3.msra.mxu1 %v22501_v24  ;;  %14403 = vmatprep.subr.mxu0 %v22832_v15 }
 0x5e1   : > { %14493 = vmatprep.subr.mxu1 %v22505_v33  ;;  %14404 = vmatpush3.msra.mxu0 %v22840_v22 }
 0x5e2   : > { %14494 = vmatpush3.msra.mxu1 %v22511_v53  ;;  %14405 = vmatprep.subr.mxu0 %v22852_v57 }
 0x5e3   : > { %10958 = vmatmul.mubr.f32.gmra.mxu1 %v22967_v25  ;;  %14495 = vmatprep.subr.mxu1 %v22531_v4  ;;  %v25166_v25 = vld [vmem:[#allocation45_spill] sm:$0xff] }
 0x5e4   : > { %14406 = vmatpush3.msra.mxu0 %v22860_v14  ;;  %14496 = vmatpush3.msra.mxu1 %v22543_v48 }
 0x5e5   : > { %11209 = vmatprep.mubr.f32.mxu1 %v25148_v12  ;;  %14407 = vmatprep.subr.mxu0 %v22868_v63  ;;  %v25157_v12 = vld [vmem:[#allocation46_spill] sm:$0xff] }
 0x5e6   : > { %14497 = vmatprep.subr.mxu1 %v22548_v62  ;;  %14408 = vmatpush3.msra.mxu0 %v22878_v46 }
 0x5e7   : > { %14498 = vmatpush3.msra.mxu1 %v22558_v34  ;;  %10704 = vmatmul.mubr.f32.vlgmr.msra.gmra.mxu0 %v10703_v17  ;;  %v25154_v17 = vld [vmem:[#allocation34_spill] sm:$0xff] }
 0x5e8   : > { %14453 = vmatprep.subr.mxu0 %v22519_v1  ;;  %14499 = vmatprep.subr.mxu1 %v22590_v18 }
 0x5e9   : > { %10713 = vmatprep.mubr.f32.mxu0 %v10712_v21  ;;  %14454 = vmatpush3.msra.mxu0 %v25149_v47  ;;  %v25158_v21 = vld [vmem:[#allocation31_spill] sm:$0xff] }
 0x5ea   : > { %14500 = vmatpush3.msra.mxu1 %v22595_v9  ;;  %14455 = vmatprep.subr.mxu0 %v25150_v35 }
 0x5eb   : > { %14501 = vmatprep.subr.mxu1 %v22608_v16  ;;  %14456 = vmatpush3.msra.mxu0 %v25151_v42 }
 0x5ec   : > { %14502 = vmatpush3.msra.mxu1 %v22615_v38  ;;  %10719 = vmatmul.mubr.f32.gmra.mxu0 %v10718_v19  ;;  %v25160_v19 = vld [vmem:[#allocation22_spill] sm:$0xff] }
 0x5ed   : > { %14457 = vmatprep.subr.mxu0 %v25152_v39  ;;  %14503 = vmatprep.subr.mxu1 %v22624_v61 }
 0x5ee   : > { %14458 = vmatpush3.msra.mxu0 %v25153_v26  ;;  %11093 = vmatprep.mubr.f32.mxu0 %v22514_v41  ;;  %v25159_v41 = vld [vmem:[#allocation21_spill] sm:$0xff] }
 0x5ef   : > { %14504 = vmatpush3.msra.mxu1 %v22637_v49  ;;  %14459 = vmatprep.subr.mxu0 %v25154_v17 }
 0x5f0   : > { %14505 = vmatprep.subr.mxu1 %v22646_v7  ;;  %14460 = vmatpush3.msra.mxu0 %v25155_v45 }
 0x5f1   : > { %14506 = vmatpush3.msra.mxu1 %v22654_v44  ;;  %14461 = vmatprep.subr.mxu0 %v25156_v0 }
 0x5f2   : > { %14507 = vmatprep.subr.mxu1 %v22687_v59  ;;  %14462 = vmatpush3.msra.mxu0 %v25157_v12 }
 0x5f3   : > { %14508 = vmatpush3.msra.mxu1 %v22689_v40  ;;  %14463 = vmatprep.subr.mxu0 %v25158_v21 }
 0x5f4   : > { %14509 = vmatprep.subr.mxu1 %v22714_v51  ;;  %14464 = vmatpush3.msra.mxu0 %v25159_v41 }
 0x5f5   : > { %14510 = vmatpush3.msra.mxu1 %v22751_v32  ;;  %14465 = vmatprep.subr.mxu0 %v25160_v19 }
 0x5f6   : > { %14511 = vmatprep.subr.mxu1 %v22765_v43  ;;  %14466 = vmatpush3.msra.mxu0 %v25161_v8 }
 0x5f7   : > { %14512 = vmatpush3.msra.mxu1 %v22776_v6  ;;  %14467 = vmatprep.subr.mxu0 %v25162_v10 }
 0x5f8   : > { %14513 = vmatprep.subr.mxu1 %v22778_v54  ;;  %14468 = vmatpush3.msra.mxu0 %v25163_v27 }
 0x5f9   : > { %14514 = vmatpush3.msra.mxu1 %v22799_v30  ;;  %14469 = vmatprep.subr.mxu0 %v25164_v60  ;;  %v25169_v30 = vld [vmem:[#allocation17_spill] sm:$0xff] }
 0x5fa   : > { %14515 = vmatprep.subr.mxu1 %v22807_v50  ;;  %14470 = vmatpush3.msra.mxu0 %v25165_v52 }
 0x5fb   : > { %14516 = vmatpush3.msra.mxu1 %v22818_v28  ;;  %14471 = vmatprep.subr.mxu0 %v25166_v25  ;;  %v25170_v28 = vld [vmem:[#allocation18_spill] sm:$0xff] }
 0x5fc   : > { %14517 = vmatprep.subr.mxu1 %v22832_v15  ;;  %14472 = vmatpush3.msra.mxu0 %v25167_v5 }
 0x5fd   : > { %14518 = vmatpush3.msra.mxu1 %v22840_v22  ;;  %14473 = vmatprep.subr.mxu0 %v25168_v56  ;;  %v25171_v22 = vand.u32 4294901760, %v22962_v13 }
 0x5fe   : > { %14519 = vmatprep.subr.mxu1 %v22852_v57  ;;  %14474 = vmatpush3.msra.mxu0 %v25169_v30  ;;  %v25172_v30 = vand.u32 4294901760, %v22974_v55 }
 0x5ff   : > { %14520 = vmatpush3.msra.mxu1 %v22860_v14  ;;  %14475 = vmatprep.subr.mxu0 %v22816_v23  ;;  %v25173_v23 = vld [vmem:[#allocation29_spill] sm:$0xff] }
 0x600   : > { %14521 = vmatprep.subr.mxu1 %v22868_v63  ;;  %14476 = vmatpush3.msra.mxu0 %v25170_v28 }
 0x601   : > { %14522 = vmatpush3.msra.mxu1 %v22878_v46  ;;  %14477 = vmatprep.subr.mxu0 %v22850_v36 }
 0x602   : > { %11213 = vmatmul.mubr.f32.vlgmr.msra.gmra.mxu1 %v25171_v22  ;;  %14567 = vmatprep.subr.mxu1 %v22499_v20  ;;  %v25174_v22 = vand.u32 4294901760, %v22978_v11  ;;  %v25175_v20 = vld [vmem:[#allocation44_spill] sm:$0xff] }
 0x603   : > { %14478 = vmatpush3.msra.mxu0 %v22858_v37  ;;  %11220 = vmatprep.mubr.f32.mxu1 %v25172_v30 }
 0x604   : > { %14568 = vmatpush3.msra.mxu1 %v22501_v24  ;;  %14479 = vmatprep.subr.mxu0 %v25173_v23  ;;  %v25176_v24 = vand.u32 4294901760, %v22519_v1  ;;  %v25180_v1 = vand.u32 4294901760, %v25152_v39  ;;  %v25195_v39 = vld [vmem:[#allocation33_spill] sm:$0xff] }
 0x605   : > { %14569 = vmatprep.subr.mxu1 %v22505_v33  ;;  %14480 = vmatpush3.msra.mxu0 %v22876_v31  ;;  %v25177_v33 = vand.u32 4294901760, %v25149_v47  ;;  %v10565_v47 = vld [vmem:[#allocation4 + $0xa60] sm:$0xff] }
 0x606   : > { %14570 = vmatpush3.msra.mxu1 %v22511_v53  ;;  %14481 = vmatprep.subr.mxu0 %v22886_v29  ;;  %v25178_v53 = vand.u32 4294901760, %v25150_v35 }
 0x607   : > { %11224 = vmatmul.mubr.f32.gmra.mxu1 %v25174_v22  ;;  %14571 = vmatprep.subr.mxu1 %v22531_v4  ;;  %v25179_v4 = vand.u32 4294901760, %v25151_v42  ;;  %v25193_v42 = vand.u32 4294901760, %v25164_v60  ;;  %v25197_v60 = vand.u32 4294901760, %v25167_v5  ;;  %v10561_v22 = vld [vmem:[#allocation4 + $0xa40] sm:$0xff] }
 0x608   : > { %14482 = vmatpush3.msra.mxu0 %v22897_v2  ;;  %14572 = vmatpush3.msra.mxu1 %v22543_v48  ;;  %v10568_v48 = vld [vmem:[#allocation4 + $0xa78] sm:$0xff] }
 0x609   : > { %11501 = vmatprep.mubr.f32.mxu1 %v25175_v20  ;;  %14483 = vmatprep.subr.mxu0 %v22902_v58 }
 0x60a   : > { %14573 = vmatprep.subr.mxu1 %v22548_v62  ;;  %14484 = vmatpush3.msra.mxu0 %v22912_v3  ;;  %v25181_v62 = vand.u32 4294901760, %v25153_v26  ;;  %v25196_v26 = vand.u32 4294901760, %v25166_v25  ;;  %v25199_v25 = vand.u32 4294901760, %v25168_v56 }
 0x60b   : > { %14574 = vmatpush3.msra.mxu1 %v22558_v34  ;;  %11096 = vmatmul.mubr.f32.vlgmr.msra.gmra.mxu0 %v22962_v13  ;;  %v25182_v34 = vand.u32 4294901760, %v25154_v17  ;;  %v10563_v17 = vld [vmem:[#allocation4 + $0xa50] sm:$0xff] }
 0x60c   : > { %14529 = vmatprep.subr.mxu0 %v25176_v24  ;;  %14575 = vmatprep.subr.mxu1 %v22590_v18  ;;  %v10567_v18 = vld [vmem:[#allocation4 + $0xa70] sm:$0xff] }
 0x60d   : > { %11102 = vmatprep.mubr.f32.mxu0 %v22974_v55  ;;  %14530 = vmatpush3.msra.mxu0 %v25177_v33  ;;  %v23119_v30 = vand.u32 4294901760, %v10567_v18 }
 0x60e   : > { %14576 = vmatpush3.msra.mxu1 %v22595_v9  ;;  %14531 = vmatprep.subr.mxu0 %v25178_v53  ;;  %v25183_v9 = vand.u32 4294901760, %v25155_v45 }
 0x60f   : > { %14577 = vmatprep.subr.mxu1 %v22608_v16  ;;  %14532 = vmatpush3.msra.mxu0 %v25179_v4  ;;  %v23111_v16 = vand.u32 4294901760, %v10568_v48 }
 0x610   : > { %14578 = vmatpush3.msra.mxu1 %v22615_v38  ;;  %11105 = vmatmul.mubr.f32.gmra.mxu0 %v22978_v11  ;;  %v10566_v38 = vld [vmem:[#allocation4 + $0xa68] sm:$0xff]  ;;  %v25190_v11 = vand.u32 4294901760, %v25162_v10  ;;  %v25194_v10 = vand.u32 4294901760, %v25165_v52 }
 0x611   : > { %14533 = vmatprep.subr.mxu0 %v25180_v1  ;;  %14579 = vmatprep.subr.mxu1 %v22624_v61  ;;  %v25184_v61 = vand.u32 4294901760, %v25156_v0  ;;  %v23128_v13 = vsub.f32 %v10568_v48, %v23111_v16  ;;  %v23130_v55 = vand.u32 4294901760, %v10566_v38  ;;  %v10562_v0 = vld [vmem:[#allocation4 + $0xa48] sm:$0xff]  ;;  %v10560_v1 = vld [vmem:[#allocation4 + $0xa38] sm:$0xff]  ;;  %v23206_v48 = vand.u32 4294901760, %v10561_v22 }
 0x612   : > { %14534 = vmatpush3.msra.mxu0 %v25181_v62  ;;  %11390 = vmatprep.mubr.f32.mxu0 %v25175_v20  ;;  %v25202_v20 = vld [vmem:[#allocation25_spill] sm:$0xff]  ;;  %v23193_v56 = vand.u32 4294901760, %v10562_v0  ;;  %v25206_v62 = vld [vmem:[#allocation38_spill] sm:$0xff] }
 0x613   : > { %14580 = vmatpush3.msra.mxu1 %v22637_v49  ;;  %14535 = vmatprep.subr.mxu0 %v25182_v34  ;;  %v25185_v49 = vand.u32 4294901760, %v25157_v12  ;;  %v23148_v35 = vand.u32 4294901760, %v23128_v13  ;;  %v25198_v12 = vld [vmem:[#allocation35_spill] sm:$0xff]  ;;  %v25203_v24 = vand.u32 4294901760, %v25202_v20 }
 0x614   : > { %14581 = vmatprep.subr.mxu1 %v22646_v7  ;;  %14536 = vmatpush3.msra.mxu0 %v25183_v9  ;;  %v25186_v7 = vand.u32 4294901760, %v25158_v21  ;;  %v10559_v9 = vld [vmem:[#allocation4 + $0xa30] sm:$0xff] }
 0x615   : > { %14582 = vmatpush3.msra.mxu1 %v22654_v44  ;;  %14537 = vmatprep.subr.mxu0 %v25184_v61  ;;  %v25187_v44 = vand.u32 4294901760, %v25159_v41  ;;  %v25208_v61 = vld [vmem:[#allocation13_spill] sm:$0xff] }
 0x616   : > { %14583 = vmatprep.subr.mxu1 %v22687_v59  ;;  %14538 = vmatpush3.msra.mxu0 %v25185_v49  ;;  %v25188_v59 = vand.u32 4294901760, %v25160_v19  ;;  %v23188_v19 = vand.u32 4294901760, %v10563_v17 }
 0x617   : > { %14584 = vmatpush3.msra.mxu1 %v22689_v40  ;;  %14539 = vmatprep.subr.mxu0 %v25186_v7  ;;  %v25189_v40 = vand.u32 4294901760, %v25161_v8  ;;  %v25192_v8 = vld [vmem:[#allocation47_spill] sm:$0xff] }
 0x618   : > { %14585 = vmatprep.subr.mxu1 %v22714_v51  ;;  %14540 = vmatpush3.msra.mxu0 %v25187_v44  ;;  %v23139_v51 = vsub.f32 %v10567_v18, %v23119_v30  ;;  %v23215_v18 = vsub.f32 %v10563_v17, %v23188_v19  ;;  %v25211_v44 = vand.u32 4294901760, %v22886_v29  ;;  %v25213_v29 = vand.u32 4294901760, %v22902_v58  ;;  %v10516_v17 = vld [vmem:[#allocation3 + $0x10] sm:$0xc0] }
 0x619   : > { %14586 = vmatpush3.msra.mxu1 %v22751_v32  ;;  %14541 = vmatprep.subr.mxu0 %v25188_v59  ;;  %v25191_v32 = vand.u32 4294901760, %v25163_v27  ;;  %v23162_v27 = vand.u32 4294901760, %v10565_v47  ;;  %v23235_v59 = vand.u32 4294901760, %v10559_v9 }
 0x61a   : > { %14587 = vmatprep.subr.mxu1 %v22765_v43  ;;  %14542 = vmatpush3.msra.mxu0 %v25189_v40  ;;  %v23151_v43 = vsub.f32 %v10566_v38, %v23130_v55  ;;  %v23223_v38 = vand.u32 4294901760, %v10560_v1  ;;  %v10558_v40 = vld [vmem:[#allocation4 + $0xa28] sm:$0xff] }
 0x61b   : > { %14588 = vmatpush3.msra.mxu1 %v22776_v6  ;;  %14543 = vmatprep.subr.mxu0 %v25190_v11  ;;  %v10564_v6 = vld [vmem:[#allocation4 + $0xa58] sm:$0xff]  ;;  %v23186_v41 = vsub.f32 %v10565_v47, %v23162_v27  ;;  %v25212_v11 = vand.u32 4294901760, %v22897_v2  ;;  %v23242_v47 = vand.u32 4294901760, %v23215_v18  ;;  %v25214_v2 = vand.u32 4294901760, %v22912_v3 }
 0x61c   : > { %14589 = vmatprep.subr.mxu1 %v22778_v54  ;;  %14544 = vmatpush3.msra.mxu0 %v25191_v32  ;;  %v23160_v54 = vand.u32 4294901760, %v23139_v51  ;;  %v23173_v52 = vand.u32 4294901760, %v23151_v43  ;;  %v23175_v45 = vand.u32 4294901760, %v10564_v6 }
 0x61d   : > { %14590 = vmatpush3.msra.mxu1 %v25192_v8  ;;  %14545 = vmatprep.subr.mxu0 %v25193_v42  ;;  %v23212_v34 = vand.u32 4294901760, %v23186_v41  ;;  %v23250_v8 = vsub.f32 %v10560_v1, %v23223_v38  ;;  %v10557_v42 = vld [vmem:[#allocation4 + $0xa20] sm:$0xff] }
 0x61e   : > { %14591 = vmatprep.subr.mxu1 %v22807_v50  ;;  %14546 = vmatpush3.msra.mxu0 %v25194_v10  ;;  %v11620_v50 = vsub.f32 %v23128_v13, %v23148_v35  ;;  %v11627_v5 = vsub.f32 %v23139_v51, %v23160_v54  ;;  %v11634_v53 = vsub.f32 %v23151_v43, %v23173_v52  ;;  %v23256_v10 = vand.u32 4294901760, %v10558_v40 }
 0x61f   : > { %14592 = vmatpush3.msra.mxu1 %v25195_v39  ;;  %14547 = vmatprep.subr.mxu0 %v25196_v26  ;;  %v23201_v4 = vsub.f32 %v10564_v6, %v23175_v45  ;;  %v23264_v39 = vsub.f32 %v10559_v9, %v23235_v59  ;;  %v10556_v26 = vld [vmem:[#allocation4 + $0xa18] sm:$0xff] }
 0x620   : > { %14593 = vmatprep.subr.mxu1 %v22832_v15  ;;  %14548 = vmatpush3.msra.mxu0 %v25197_v60  ;;  %v25200_v15 = vld [vmem:[#allocation17_spill] sm:$0xff]  ;;  %v11621_v33 = vand.u32 4294901760, %v11620_v50  ;;  %v11635_v49 = vand.u32 4294901760, %v11634_v53  ;;  %v11655_v60 = vsub.f32 %v23215_v18, %v23242_v47  ;;  %v23270_v50 = vand.u32 4294901760, %v10557_v42  ;;  %v10554_v53 = vld [vmem:[#allocation4 + $0xa08] sm:$0xff] }
 0x621   : > { %14594 = vmatpush3.msra.mxu1 %v25198_v12  ;;  %14549 = vmatprep.subr.mxu0 %v25199_v25  ;;  %v25201_v21 = vand.u32 4294901760, %v25200_v15  ;;  %v23228_v7 = vand.u32 4294901760, %v23201_v4  ;;  %v23276_v12 = vand.u32 4294901760, %v23250_v8  ;;  %v10555_v25 = vld [vmem:[#allocation4 + $0xa10] sm:$0xff]  ;;  %v10519_v15 = vld [vmem:[#allocation3 + $0x40] sm:$0x3f] }
 0x622   : > { %14595 = vmatprep.subr.mxu1 %v22852_v57  ;;  %v25204_v57 = vand.u32 4294901760, %v25170_v28  ;;  %v25207_v28 = vand.u32 4294901760, %v22858_v37  ;;  %v25210_v37 = vand.u32 4294901760, %v22876_v31  ;;  %v11641_v31 = vsub.f32 %v23186_v41, %v23212_v34 }
 0x623   : > { %14550 = vmatpush3.msra.mxu0 %v25201_v21  ;;  %14596 = vmatpush3.msra.mxu1 %v22860_v14  ;;  %v25205_v14 = vand.u32 4294901760, %v22850_v36  ;;  %v25209_v36 = vand.u32 4294901760, %v25173_v23  ;;  %v23233_v23 = vsub.f32 %v10561_v22, %v23206_v48  ;;  %v11648_v6 = vsub.f32 %v23201_v4, %v23228_v7  ;;  %v25215_v21 = vld [vmem:[#allocation32_spill] sm:$0xff] }
 0x624   : > { %14551 = vmatprep.subr.mxu0 %v25203_v24  ;;  %14597 = vmatprep.subr.mxu1 %v22868_v63  ;;  %v11628_v63 = vand.u32 4294901760, %v11627_v5  ;;  %v11642_v3 = vand.u32 4294901760, %v11641_v31  ;;  %v23281_v22 = vsub.f32 %v10558_v40, %v23256_v10  ;;  %v23283_v20 = vand.u32 4294901760, %v10556_v26 }
 0x625   : > { %14552 = vmatpush3.msra.mxu0 %v25204_v57  ;;  %14598 = vmatpush3.msra.mxu1 %v22878_v46  ;;  %v23221_v46 = vsub.f32 %v10562_v0, %v23193_v56  ;;  %v23261_v58 = vand.u32 4294901760, %v23233_v23  ;;  %v11649_v5 = vand.u32 4294901760, %v11648_v6  ;;  %v10582_v24 = vrot.slane %v10516_v17, 6 }
 0x626   : > { %14553 = vmatprep.subr.mxu0 %v25205_v14  ;;  %11503 = vmatmul.mubr.f32.vlgmr.msra.gmra.mxu1 %v25206_v62  ;;  %v11656_v1 = vand.u32 4294901760, %v11655_v60  ;;  %v23294_v14 = vsub.f32 %v10557_v42, %v23270_v50  ;;  %v11676_v9 = vsub.f32 %v23250_v8, %v23276_v12 }
 0x627   : > { %14554 = vmatpush3.msra.mxu0 %v25207_v28  ;;  %11508 = vmatprep.mubr.f32.mxu1 %v25208_v61  ;;  %v23247_v32 = vand.u32 4294901760, %v23221_v46  ;;  %v11669_v57 = vsub.f32 %v23233_v23, %v23261_v58  ;;  %v10589_v28 = vrot.slane %v10519_v15, 6 }
 0x628   : > { %14555 = vmatprep.subr.mxu0 %v25209_v36  ;;  %16008 = vmatprep.subr.mxu1 %v11621_v33  ;;  %v23303_v36 = vand.u32 4294901760, %v23281_v22  ;;  %v11677_v17 = vand.u32 4294901760, %v11676_v9 }
 0x629   : > { %14556 = vmatpush3.msra.mxu0 %v25210_v37  ;;  %16009 = vmatpush3.msra.mxu1 %v11621_v33  ;;  %v11662_v0 = vsub.f32 %v23221_v46, %v23247_v32  ;;  %v23290_v33 = vand.u32 4294901760, %v23264_v39  ;;  %v23306_v37 = vsub.f32 %v10556_v26, %v23283_v20 }
 0x62a   : > { %14557 = vmatprep.subr.mxu0 %v25211_v44  ;;  %16010 = vmatprep.subr.mxu1 %v11628_v63  ;;  %v25216_v44 = vld [vmem:[#allocation28_spill] sm:$0xff] }
 0x62b   : > { %14558 = vmatpush3.msra.mxu0 %v25212_v11  ;;  %16011 = vmatpush3.msra.mxu1 %v11628_v63  ;;  %v11663_v63 = vand.u32 4294901760, %v11662_v0  ;;  %v10584_v40 = vsel %vm10575_vm7, %v10582_v24, %v25216_v44  ;;  %v11670_v11 = vand.u32 4294901760, %v11669_v57  ;;  %v11683_v31 = vsub.f32 %v23264_v39, %v23290_v33 }
 0x62c   : > { %14559 = vmatprep.subr.mxu0 %v25213_v29  ;;  %16012 = vmatprep.subr.mxu1 %v11635_v49  ;;  %v23317_v29 = vand.u32 4294901760, %v23294_v14  ;;  %v10590_v6 = vsel %vm10575_vm7, %v25216_v44, %v10589_v28  ;;  %v23327_v26 = vand.u32 4294901760, %v10584_v40  ;;  %v23333_v60 = vand.u32 4294901760, %v23306_v37 }
 0x62d   : > { %14560 = vmatpush3.msra.mxu0 %v25214_v2  ;;  %16013 = vmatpush3.msra.mxu1 %v11635_v49  ;;  %v23308_v49 = vand.u32 4294901760, %v10554_v53  ;;  %v11684_v15 = vand.u32 4294901760, %v11683_v31 }
 0x62e   : > { %11392 = vmatmul.mubr.f32.vlgmr.msra.gmra.mxu0 %v25206_v62  ;;  %15973 = vmatprep.subr.mxu0 %v23111_v16  ;;  %v23296_v62 = vand.u32 4294901760, %v10555_v25  ;;  %v23352_v57 = vsub.f32 %v10584_v40, %v23327_v26 }
 0x62f   : > { %11397 = vmatprep.mubr.f32.mxu0 %v25208_v61  ;;  %15974 = vmatpush3.msra.mxu0 %v23111_v16  ;;  %v10553_v61 = vld [vmem:[#allocation4 + $0xa00] sm:$0xff]  ;;  %v23336_v0 = vsub.f32 %v10554_v53, %v23308_v49 }
 0x630   : > { %15975 = vmatprep.subr.mxu0 %v23119_v30  ;;  %11510 = vmatmul.mubr.f32.gmra.mxu1 %v25215_v21  ;;  %v23320_v42 = vsub.f32 %v10555_v25, %v23296_v62  ;;  %v23322_v2 = vand.u32 4294901760, %v10553_v61  ;;  %v23339_v25 = vand.u32 4294901760, %v10590_v6  ;;  %v11598_v40 = vand.u32 4294901760, %v23352_v57 }
 0x631   : > { %15976 = vmatpush3.msra.mxu0 %v23119_v30  ;;  %16014 = vmatprep.subr.mxu1 %v11642_v3  ;;  %v23358_v28 = vand.u32 4294901760, %v23336_v0 }
 0x632   : > { %11399 = vmatmul.mubr.f32.gmra.mxu0 %v25215_v21  ;;  %15977 = vmatprep.subr.mxu0 %v23130_v55  ;;  %v11697_v21 = vsub.f32 %v23294_v14, %v23317_v29  ;;  %v23348_v24 = vsub.f32 %v10553_v61, %v23322_v2 }
 0x633   : > { %15978 = vmatpush3.msra.mxu0 %v23130_v55  ;;  %16015 = vmatpush3.msra.mxu1 %v11642_v3  ;;  %v11690_v3 = vsub.f32 %v23281_v22, %v23303_v36  ;;  %v11718_v31 = vsub.f32 %v23336_v0, %v23358_v28 }
 0x634   : > { %15979 = vmatprep.subr.mxu0 %v23162_v27  ;;  %16016 = vmatprep.subr.mxu1 %v11649_v5  ;;  %v11698_v9 = vand.u32 4294901760, %v11697_v21  ;;  %v23368_v44 = vand.u32 4294901760, %v23348_v24 }
 0x635   : > { %15980 = vmatpush3.msra.mxu0 %v23162_v27  ;;  %16017 = vmatpush3.msra.mxu1 %v11649_v5  ;;  %v23345_v5 = vand.u32 4294901760, %v23320_v42  ;;  %v11691_v53 = vand.u32 4294901760, %v11690_v3  ;;  %v11719_v21 = vand.u32 4294901760, %v11718_v31 }
 0x636   : > { %15981 = vmatprep.subr.mxu0 %v23175_v45  ;;  %16018 = vmatprep.subr.mxu1 %v11656_v1  ;;  %v11725_v3 = vsub.f32 %v23348_v24, %v23368_v44 }
 0x637   : > { %15982 = vmatpush3.msra.mxu0 %v23175_v45  ;;  %16019 = vmatpush3.msra.mxu1 %v11656_v1  ;;  %v11704_v1 = vsub.f32 %v23306_v37, %v23333_v60  ;;  %v11711_v61 = vsub.f32 %v23320_v42, %v23345_v5 }
 0x638   : > { %15983 = vmatprep.subr.mxu0 %v23188_v19  ;;  %16020 = vmatprep.subr.mxu1 %v11663_v63 }
 0x639   : > { %15984 = vmatpush3.msra.mxu0 %v23188_v19  ;;  %16021 = vmatpush3.msra.mxu1 %v11663_v63  ;;  %v23362_v63 = vsub.f32 %v10590_v6, %v23339_v25 }
 0x63a   : > { %15985 = vmatprep.subr.mxu0 %v23193_v56  ;;  %16022 = vmatprep.subr.mxu1 %v11670_v11 }
 0x63b   : > { %15986 = vmatpush3.msra.mxu0 %v23193_v56  ;;  %16023 = vmatpush3.msra.mxu1 %v11670_v11  ;;  %v11705_v11 = vand.u32 4294901760, %v11704_v1  ;;  %v11608_v6 = vand.u32 4294901760, %v23362_v63  ;;  %v11726_v1 = vand.u32 4294901760, %v11725_v3 }
 0x63c   : > { %15987 = vmatprep.subr.mxu0 %v23206_v48  ;;  %16024 = vmatprep.subr.mxu1 %v11677_v17 }
 0x63d   : > { %15988 = vmatpush3.msra.mxu0 %v23206_v48  ;;  %16025 = vmatpush3.msra.mxu1 %v11677_v17  ;;  %v11712_v17 = vand.u32 4294901760, %v11711_v61 }
 0x63e   : > { %15989 = vmatprep.subr.mxu0 %v23223_v38  ;;  %16026 = vmatprep.subr.mxu1 %v11684_v15 }
 0x63f   : > { %15990 = vmatpush3.msra.mxu0 %v23223_v38  ;;  %16027 = vmatpush3.msra.mxu1 %v11684_v15  ;;  %v11599_v15 = vsub.f32 %v23352_v57, %v11598_v40 }
 0x640   : > { %15991 = vmatprep.subr.mxu0 %v23235_v59  ;;  %16028 = vmatprep.subr.mxu1 %v11691_v53 }
 0x641   : > { %15992 = vmatpush3.msra.mxu0 %v23235_v59  ;;  %16029 = vmatpush3.msra.mxu1 %v11691_v53  ;;  %v11609_v53 = vsub.f32 %v23362_v63, %v11608_v6 }
 0x642   : > { %15993 = vmatprep.subr.mxu0 %v23256_v10  ;;  %16030 = vmatprep.subr.mxu1 %v11698_v9 }
 0x643   : > { %15994 = vmatpush3.msra.mxu0 %v23256_v10  ;;  %16031 = vmatpush3.msra.mxu1 %v11698_v9  ;;  %v11600_v9 = vand.u32 4294901760, %v11599_v15  ;;  %v11610_v61 = vand.u32 4294901760, %v11609_v53 }
 0x644   : > { %15995 = vmatprep.subr.mxu0 %v23270_v50  ;;  %16032 = vmatprep.subr.mxu1 %v11705_v11 }
 0x645   : > { %15996 = vmatpush3.msra.mxu0 %v23270_v50  ;;  %16033 = vmatpush3.msra.mxu1 %v11705_v11 }
 0x646   : > { %15997 = vmatprep.subr.mxu0 %v23283_v20  ;;  %16034 = vmatprep.subr.mxu1 %v11712_v17 }
 0x647   : > { %15998 = vmatpush3.msra.mxu0 %v23283_v20  ;;  %16035 = vmatpush3.msra.mxu1 %v11712_v17 }
 0x648   : > { %15999 = vmatprep.subr.mxu0 %v23296_v62  ;;  %16036 = vmatprep.subr.mxu1 %v11719_v21 }
 0x649   : > { %16000 = vmatpush3.msra.mxu0 %v23296_v62  ;;  %16037 = vmatpush3.msra.mxu1 %v11719_v21 }
 0x64a   : > { %16001 = vmatprep.subr.mxu0 %v23308_v49  ;;  %16038 = vmatprep.subr.mxu1 %v11726_v1 }
 0x64b   : > { %16002 = vmatpush3.msra.mxu0 %v23308_v49  ;;  %16005 = vmatprep.mubr.f32.mxu0 %v11600_v9 }
 0x64c   : > { %16003 = vmatprep.subr.mxu0 %v23322_v2  ;;  %16039 = vmatpush3.msra.mxu1 %v11726_v1 }
 0x64d   : > { %16004 = vmatpush3.msra.mxu0 %v23322_v2  ;;  %16040 = vmatprep.mubr.f32.mxu1 %v23327_v26 }
 0x64e   : > { %16006 = vmatmul.mubr.f32.vlgmr.msra.gmra.mxu0 %v11610_v61  ;;  %16043 = vmatprep.subr.mxu0 %v23128_v13 }
 0x64f   : > { %16078 = vmatprep.subr.mxu1 %v23111_v16  ;;  %16041 = vmatmul.mubr.f32.vlgmr.msra.gmra.mxu1 %v23339_v25 }
 0x650   : > { %16044 = vmatpush3.msra.mxu0 %v23128_v13  ;;  %16079 = vmatpush3.msra.mxu1 %v23111_v16 }
 0x651   : > { %16045 = vmatprep.subr.mxu0 %v23139_v51  ;;  %16080 = vmatprep.subr.mxu1 %v23119_v30 }
 0x652   : > { %16046 = vmatpush3.msra.mxu0 %v23139_v51  ;;  %16081 = vmatpush3.msra.mxu1 %v23119_v30 }
 0x653   : > { %16047 = vmatprep.subr.mxu0 %v23151_v43  ;;  %16082 = vmatprep.subr.mxu1 %v23130_v55 }
 0x654   : > { %16048 = vmatpush3.msra.mxu0 %v23151_v43  ;;  %16083 = vmatpush3.msra.mxu1 %v23130_v55 }
 0x655   : > { %16049 = vmatprep.subr.mxu0 %v23186_v41  ;;  %16084 = vmatprep.subr.mxu1 %v23162_v27 }
 0x656   : > { %16050 = vmatpush3.msra.mxu0 %v23186_v41  ;;  %16085 = vmatpush3.msra.mxu1 %v23162_v27 }
 0x657   : > { %16051 = vmatprep.subr.mxu0 %v23201_v4  ;;  %16086 = vmatprep.subr.mxu1 %v23175_v45 }
 0x658   : > { %16052 = vmatpush3.msra.mxu0 %v23201_v4  ;;  %16087 = vmatpush3.msra.mxu1 %v23175_v45 }
 0x659   : > { %16053 = vmatprep.subr.mxu0 %v23215_v18  ;;  %16088 = vmatprep.subr.mxu1 %v23188_v19 }
 0x65a   : > { %16054 = vmatpush3.msra.mxu0 %v23215_v18  ;;  %16089 = vmatpush3.msra.mxu1 %v23188_v19 }
 0x65b   : > { %16055 = vmatprep.subr.mxu0 %v23221_v46  ;;  %16090 = vmatprep.subr.mxu1 %v23193_v56 }
 0x65c   : > { %16056 = vmatpush3.msra.mxu0 %v23221_v46  ;;  %16091 = vmatpush3.msra.mxu1 %v23193_v56 }
 0x65d   : > { %16057 = vmatprep.subr.mxu0 %v23233_v23  ;;  %16092 = vmatprep.subr.mxu1 %v23206_v48 }
 0x65e   : > { %16058 = vmatpush3.msra.mxu0 %v23233_v23  ;;  %16093 = vmatpush3.msra.mxu1 %v23206_v48 }
 0x65f   : > { %16059 = vmatprep.subr.mxu0 %v23250_v8  ;;  %16094 = vmatprep.subr.mxu1 %v23223_v38 }
 0x660   : > { %16060 = vmatpush3.msra.mxu0 %v23250_v8  ;;  %16095 = vmatpush3.msra.mxu1 %v23223_v38 }
 0x661   : > { %16061 = vmatprep.subr.mxu0 %v23264_v39  ;;  %16096 = vmatprep.subr.mxu1 %v23235_v59 }
 0x662   : > { %16062 = vmatpush3.msra.mxu0 %v23264_v39  ;;  %16097 = vmatpush3.msra.mxu1 %v23235_v59 }
 0x663   : > { %16063 = vmatprep.subr.mxu0 %v23281_v22  ;;  %16098 = vmatprep.subr.mxu1 %v23256_v10 }
 0x664   : > { %16064 = vmatpush3.msra.mxu0 %v23281_v22  ;;  %16099 = vmatpush3.msra.mxu1 %v23256_v10 }
 0x665   : > { %16065 = vmatprep.subr.mxu0 %v23294_v14  ;;  %16100 = vmatprep.subr.mxu1 %v23270_v50 }
 0x666   : > { %16066 = vmatpush3.msra.mxu0 %v23294_v14  ;;  %16101 = vmatpush3.msra.mxu1 %v23270_v50 }
 0x667   : > { %16067 = vmatprep.subr.mxu0 %v23306_v37  ;;  %16102 = vmatprep.subr.mxu1 %v23283_v20 }
 0x668   : > { %16068 = vmatpush3.msra.mxu0 %v23306_v37  ;;  %16103 = vmatpush3.msra.mxu1 %v23283_v20 }
 0x669   : > { %16069 = vmatprep.subr.mxu0 %v23320_v42  ;;  %16104 = vmatprep.subr.mxu1 %v23296_v62 }
 0x66a   : > { %16070 = vmatpush3.msra.mxu0 %v23320_v42  ;;  %16105 = vmatpush3.msra.mxu1 %v23296_v62 }
 0x66b   : > { %16071 = vmatprep.subr.mxu0 %v23336_v0  ;;  %16106 = vmatprep.subr.mxu1 %v23308_v49 }
 0x66c   : > { %16072 = vmatpush3.msra.mxu0 %v23336_v0  ;;  %16107 = vmatpush3.msra.mxu1 %v23308_v49 }
 0x66d   : > { %16073 = vmatprep.subr.mxu0 %v23348_v24  ;;  %16108 = vmatprep.subr.mxu1 %v23322_v2 }
 0x66e   : > { %16074 = vmatpush3.msra.mxu0 %v23348_v24  ;;  %16075 = vmatprep.mubr.f32.mxu0 %v23352_v57 }
 0x66f   : > { %16109 = vmatpush3.msra.mxu1 %v23322_v2  ;;  %16076 = vmatmul.mubr.f32.vlgmr.msra.gmra.mxu0 %v23362_v63 }
 0x670   : > { %16110 = vmatprep.mubr.f32.mxu1 %v11598_v40  ;;  %16113 = vmatprep.subr.mxu0 %v23148_v35 }
 0x671   : > { %16148 = vmatprep.subr.mxu1 %v23111_v16  ;;  %16111 = vmatmul.mubr.f32.vlgmr.msra.gmra.mxu1 %v11608_v6 }
 0x672   : > { %16114 = vmatpush3.msra.mxu0 %v23148_v35  ;;  %16149 = vmatpush3.msra.mxu1 %v23111_v16  ;;  %v14073_v16 = vpop.f32.mrf.mxu0 }
 0x673   : > { %16115 = vmatprep.subr.mxu0 %v23160_v54  ;;  %16150 = vmatprep.subr.mxu1 %v23119_v30 }
 0x674   : > { %16116 = vmatpush3.msra.mxu0 %v23160_v54  ;;  %16151 = vmatpush3.msra.mxu1 %v23119_v30  ;;  %v14074_v30 = vpop.f32.mrf.mxu0 }
 0x675   : > { %16117 = vmatprep.subr.mxu0 %v23173_v52  ;;  %16152 = vmatprep.subr.mxu1 %v23130_v55  ;;  %v14075_v31 = vadd.f32 %v14074_v30, %v14073_v16 }
 0x676   : > { %16118 = vmatpush3.msra.mxu0 %v23173_v52  ;;  %16153 = vmatpush3.msra.mxu1 %v23130_v55  ;;  %v14076_v13 = vpop.f32.mrf.mxu0  ;;  %v14111_v55 = vpop.f32.mrf.mxu1 }
 0x677   : > { %16119 = vmatprep.subr.mxu0 %v23212_v34  ;;  %16154 = vmatprep.subr.mxu1 %v23162_v27 }
 0x678   : > { %16120 = vmatpush3.msra.mxu0 %v23212_v34  ;;  %16155 = vmatpush3.msra.mxu1 %v23162_v27  ;;  %v14077_v51 = vpop.f32.mrf.mxu0  ;;  %v14112_v35 = vpop.f32.mrf.mxu1 }
 0x679   : > { %16121 = vmatprep.subr.mxu0 %v23228_v7  ;;  %16156 = vmatprep.subr.mxu1 %v23175_v45  ;;  %v14113_v6 = vadd.f32 %v14112_v35, %v14111_v55 }
 0x67a   : > { %16122 = vmatpush3.msra.mxu0 %v23228_v7  ;;  %16157 = vmatpush3.msra.mxu1 %v23175_v45  ;;  %v14114_v43 = vpop.f32.mrf.mxu1  ;;  %v14149_v54 = vpop.f32.mrf.mxu0 }
 0x67b   : > { %16123 = vmatprep.subr.mxu0 %v23242_v47  ;;  %16158 = vmatprep.subr.mxu1 %v23188_v19  ;;  %v9266_v9 = vadd.f32 %v14113_v6, %v14075_v31 }
 0x67c   : > { %16124 = vmatpush3.msra.mxu0 %v23242_v47  ;;  %16159 = vmatpush3.msra.mxu1 %v23188_v19  ;;  %v14115_v27 = vpop.f32.mrf.mxu1  ;;  %v14150_v52 = vpop.f32.mrf.mxu0 }
 0x67d   : > { %16125 = vmatprep.subr.mxu0 %v23247_v32  ;;  %16160 = vmatprep.subr.mxu1 %v23193_v56  ;;  %v14116_v40 = vadd.f32 %v14115_v27, %v14114_v43  ;;  %v14151_v21 = vadd.f32 %v14150_v52, %v14149_v54 }
 0x67e   : > { %16126 = vmatpush3.msra.mxu0 %v23247_v32  ;;  %16161 = vmatpush3.msra.mxu1 %v23193_v56  ;;  %v14187_v45 = vpop.f32.mrf.mxu1  ;;  %v14152_v41 = vpop.f32.mrf.mxu0 }
 0x67f   : > { %16127 = vmatprep.subr.mxu0 %v23261_v58  ;;  %16162 = vmatprep.subr.mxu1 %v23206_v48 }
 0x680   : > { %16128 = vmatpush3.msra.mxu0 %v23261_v58  ;;  %16163 = vmatpush3.msra.mxu1 %v23206_v48  ;;  %v14188_v19 = vpop.f32.mrf.mxu1  ;;  %v14153_v56 = vpop.f32.mrf.mxu0 }
 0x681   : > { %16129 = vmatprep.subr.mxu0 %v23276_v12  ;;  %16164 = vmatprep.subr.mxu1 %v23223_v38  ;;  %v14154_v17 = vadd.f32 %v14153_v56, %v14152_v41 }
 0x682   : > { %16130 = vmatpush3.msra.mxu0 %v23276_v12  ;;  %16165 = vmatpush3.msra.mxu1 %v23223_v38  ;;  %v14190_v4 = vpop.f32.mrf.mxu1  ;;  %v14225_v48 = vpop.f32.mrf.mxu0 }
 0x683   : > { %16131 = vmatprep.subr.mxu0 %v23290_v33  ;;  %16166 = vmatprep.subr.mxu1 %v23235_v59 }
 0x684   : > { %16132 = vmatpush3.msra.mxu0 %v23290_v33  ;;  %16167 = vmatpush3.msra.mxu1 %v23235_v59  ;;  %v14191_v34 = vpop.f32.mrf.mxu1  ;;  %v14226_v18 = vpop.f32.mrf.mxu0 }
 0x685   : > { %16133 = vmatprep.subr.mxu0 %v23303_v36  ;;  %16168 = vmatprep.subr.mxu1 %v23256_v10  ;;  %v14227_v55 = vadd.f32 %v14226_v18, %v14225_v48 }
 0x686   : > { %16134 = vmatpush3.msra.mxu0 %v23303_v36  ;;  %16169 = vmatpush3.msra.mxu1 %v23256_v10  ;;  %v23536_v46 = vpop.f32.mrf.mxu1  ;;  %v14228_v38 = vpop.f32.mrf.mxu0 }
 0x687   : > { %16135 = vmatprep.subr.mxu0 %v23317_v29  ;;  %16170 = vmatprep.subr.mxu1 %v23270_v50 }
 0x688   : > { %16136 = vmatpush3.msra.mxu0 %v23317_v29  ;;  %16171 = vmatpush3.msra.mxu1 %v23270_v50  ;;  %v23538_v7 = vpop.f32.mrf.mxu1  ;;  %v14229_v23 = vpop.f32.mrf.mxu0 }
 0x689   : > { %16137 = vmatprep.subr.mxu0 %v23333_v60  ;;  %16172 = vmatprep.subr.mxu1 %v23283_v20 }
 0x68a   : > { %16138 = vmatpush3.msra.mxu0 %v23333_v60  ;;  %16173 = vmatpush3.msra.mxu1 %v23283_v20  ;;  %v14266_v59 = vpop.f32.mrf.mxu1  ;;  %v23540_v47 = vpop.f32.mrf.mxu0 }
 0x68b   : > { %16139 = vmatprep.subr.mxu0 %v23345_v5  ;;  %16174 = vmatprep.subr.mxu1 %v23296_v62 }
 0x68c   : > { %16140 = vmatpush3.msra.mxu0 %v23345_v5  ;;  %16175 = vmatpush3.msra.mxu1 %v23296_v62  ;;  %v14267_v32 = vpop.f32.mrf.mxu1  ;;  %v23542_v8 = vpop.f32.mrf.mxu0 }
 0x68d   : > { %16141 = vmatprep.subr.mxu0 %v23358_v28  ;;  %16176 = vmatprep.subr.mxu1 %v23308_v49 }
 0x68e   : > { %16142 = vmatpush3.msra.mxu0 %v23358_v28  ;;  %16177 = vmatpush3.msra.mxu1 %v23308_v49  ;;  %v23544_v10 = vpop.f32.mrf.mxu1  ;;  %v23546_v58 = vpop.f32.mrf.mxu0 }
 0x68f   : > { %16143 = vmatprep.subr.mxu0 %v23368_v44  ;;  %16178 = vmatprep.subr.mxu1 %v23322_v2 }
 0x690   : > { %16144 = vmatpush3.msra.mxu0 %v23368_v44  ;;  %16145 = vmatprep.mubr.f32.mxu0 %v23327_v26  ;;  %v23548_v39 = vpop.f32.mrf.mxu1  ;;  %v23550_v50 = vpop.f32.mrf.mxu0  ;;  %v14078_v44 = vadd.f32 %v14077_v51, %v14076_v13 }
 0x691   : > { %16179 = vmatpush3.msra.mxu1 %v23322_v2  ;;  %16180 = vmatprep.mubr.f32.mxu1 %v23327_v26  ;;  %25217 = vst [vmem:[#allocation50_spill] sm:$0xff] %v23550_v50 }
 0x692   : > { %16146 = vmatmul.mubr.f32.vlgmr.msra.gmra.mxu0 %v23339_v25  ;;  %16181 = vmatmul.mubr.f32.vlgmr.msra.gmra.mxu1 %v23339_v25  ;;  %v23552_v12 = vpop.f32.mrf.mxu1  ;;  %v23554_v22 = vpop.f32.mrf.mxu0  ;;  %v9273_v15 = vadd.f32 %v14116_v40, %v14078_v44  ;;  %v14268_v44 = vadd.f32 %v14267_v32, %v14266_v59 }
 0x693   : > { %25218 = vst [vmem:[#allocation40_spill] sm:$0xff] %v23552_v12  ;;  %25219 = vst [vmem:[#allocation36_spill] sm:$0xff] %v23554_v22  ;;  %v9411_v22 = vadd.f32 %v14151_v21, %v9266_v9  ;;  %v14230_v12 = vadd.f32 %v14229_v23, %v14228_v38 }
 0x694   : > { %v23556_v20 = vpop.f32.mrf.mxu1  ;;  %v23558_v33 = vpop.f32.mrf.mxu0  ;;  %v9420_v61 = vadd.f32 %v14154_v17, %v9273_v15 }
 0x695   : > { %25220 = vst [vmem:[#allocation19_spill] sm:$0xff] %v23556_v20  ;;  %25221 = vst [vmem:[#allocation30_spill] sm:$0xff] %v23558_v33  ;;  %v14189_v20 = vadd.f32 %v14188_v19, %v14187_v45  ;;  %v14265_v45 = vadd.f32 %v23538_v7, %v23536_v46 }
 0x696   : > { %v23560_v14 = vpop.f32.mrf.mxu1 }
 0x697   : > { %25222 = vst [vmem:[#allocation41_spill] sm:$0xff] %v23560_v14  ;;  %v9528_v54 = vadd.f32 %v14189_v20, %v9411_v22 }
 0x698   : > { %v23562_v36 = vpop.f32.mrf.mxu1 }
 0x699   : > { %25223 = vst [vmem:[#allocation37_spill] sm:$0xff] %v23562_v36  ;;  %v14192_v36 = vadd.f32 %v14191_v34, %v14190_v4 }
 0x69a   : > { %v25225_v40 = vld [vmem:[#allocation40_spill] sm:$0xff] }
 0x69b   : > { %v9539_v30 = vadd.f32 %v14192_v36, %v9420_v61  ;;  %v25227_v17 = vld [vmem:[#allocation36_spill] sm:$0xff] }
 0x69c   : > { %v25228_v21 = vld [vmem:[#allocation30_spill] sm:$0xff] }
 0x69d   : > { %v9714_v52 = vadd.f32 %v14230_v12, %v9539_v30 }
 0x69e   : > { %v14447_v49 = vpop.f32.mrf.mxu1  ;;  %v25229_v9 = vld [vmem:[#allocation41_spill] sm:$0xff] }
 0x69f   : > { %v9825_v36 = vadd.f32 %v14268_v44, %v9714_v52 }
 0x6a0   : > { %v14448_v42 = vpop.f32.mrf.mxu1 }
 0x6a1   : > { %v14449_v43 = vadd.f32 %v14448_v42, %v14447_v49  ;;  %v9926_v12 = vadd.f32 %v23540_v47, %v9825_v36 }
 0x6a3   : > { %v14450_v26 = vpop.f32.mrf.mxu1  ;;  %v10083_v46 = vadd.f32 %v23544_v10, %v9926_v12  ;;  %v25226_v10 = vld [vmem:[#allocation19_spill] sm:$0xff] }
 0x6a5   : > { %v14451_v0 = vpop.f32.mrf.mxu1 }
 0x6a6   : > { %v14452_v33 = vadd.f32 %v14451_v0, %v14450_v26  ;;  %v10194_v0 = vadd.f32 %v23546_v58, %v10083_v46 }
 0x6a7   : > { %v14409_v62 = vpop.f32.mrf.mxu0 }
 0x6a9   : > { %v14410_v37 = vpop.f32.mrf.mxu0 }
 0x6aa   : > { %v14411_v51 = vadd.f32 %v14410_v37, %v14409_v62 }
 0x6ac   : > { %v14412_v29 = vpop.f32.mrf.mxu0  ;;  %v10953_v4 = vadd.f32 %v14449_v43, %v14411_v51  ;;  %v25230_v43 = vld [vmem:[#allocation37_spill] sm:$0xff] }
 0x6ae   : > { %v14413_v2 = vpop.f32.mrf.mxu0 }
 0x6af   : > { %v14414_v14 = vadd.f32 %v14413_v2, %v14412_v29  ;;  %v9707_v2 = vadd.f32 %v14227_v55, %v9528_v54  ;;  %v25231_v54 = vld [vmem:[#allocation26_spill] sm:$0xff] }
 0x6b1   : > { %v10960_v35 = vadd.f32 %v14452_v33, %v14414_v14  ;;  %v9818_v33 = vadd.f32 %v14265_v45, %v9707_v2 }
 0x6b3   : > { %v9916_v14 = vadd.f32 %v23542_v8, %v9818_v33  ;;  %v10291_v8 = vadd.f32 %v25225_v40, %v10194_v0 }
 0x6c2   : > { %v14523_v25 = vpop.f32.mrf.mxu1 }
 0x6c4   : > { %v14524_v24 = vpop.f32.mrf.mxu1 }
 0x6c5   : > { %v14525_v38 = vadd.f32 %v14524_v24, %v14523_v25  ;;  %v25224_v24 = vld [vmem:[#allocation50_spill] sm:$0xff] }
 0x6c7   : > { %v14526_v63 = vpop.f32.mrf.mxu1 }
 0x6c9   : > { %v14527_v3 = vpop.f32.mrf.mxu1 }
 0x6ca   : > { %v14528_v29 = vadd.f32 %v14527_v3, %v14526_v63  ;;  %v10416_v3 = vadd.f32 %v25227_v17, %v10291_v8 }
 0x6cb   : > { %v14485_v60 = vpop.f32.mrf.mxu0 }
 0x6cc   : > { %v10509_v61 = vadd.f32 %v25229_v9, %v10416_v3 }
 0x6cd   : > { %v14486_v5 = vpop.f32.mrf.mxu0 }
 0x6ce   : > { %v14487_v27 = vadd.f32 %v14486_v5, %v14485_v60  ;;  %v10077_v60 = vadd.f32 %v23548_v39, %v9916_v14  ;;  %v10513_v52 = vadd.f32 %v10509_v61, %v25231_v54 }
 0x6d0   : > { %v14488_v57 = vpop.f32.mrf.mxu0  ;;  %v11098_v19 = vadd.f32 %v14487_v27, %v10953_v4  ;;  %v25232_v4 = vld [vmem:[#allocation43_spill] sm:$0xff] }
 0x6d2   : > { %v14489_v28 = vpop.f32.mrf.mxu0  ;;  %v11215_v22 = vadd.f32 %v14525_v38, %v11098_v19 }
 0x6d3   : > { %v14490_v16 = vadd.f32 %v14489_v28, %v14488_v57  ;;  %v10187_v57 = vadd.f32 %v25224_v24, %v10077_v60 }
 0x6d5   : > { %v11107_v34 = vadd.f32 %v14490_v16, %v10960_v35  ;;  %v10283_v6 = vadd.f32 %v25226_v10, %v10187_v57 }
 0x6d7   : > { %v11226_v48 = vadd.f32 %v14528_v29, %v11107_v34  ;;  %v10410_v58 = vadd.f32 %v25228_v21, %v10283_v6 }
 0x6d9   : > { %v10503_v16 = vadd.f32 %v25230_v43, %v10410_v58 }
 0x6db   : > { %v10512_v34 = vadd.f32 %v10503_v16, %v25232_v4 }
 0x6e6   : > { %v14599_v53 = vpop.f32.mrf.mxu1 }
 0x6e8   : > { %v14600_v50 = vpop.f32.mrf.mxu1 }
 0x6e9   : > { %v14601_v49 = vadd.f32 %v14600_v50, %v14599_v53 }
 0x6ee   : > { %v14561_v11 = vpop.f32.mrf.mxu0 }
 0x6f0   : > { %v14562_v1 = vpop.f32.mrf.mxu0  ;;  %v14602_v56 = vpop.f32.mrf.mxu1 }
 0x6f1   : > { %v14563_v18 = vadd.f32 %v14562_v1, %v14561_v11 }
 0x6f2   : > { %v14564_v13 = vpop.f32.mrf.mxu0  ;;  %v14603_v62 = vpop.f32.mrf.mxu1 }
 0x6f3   : > { %v14604_v59 = vadd.f32 %v14603_v62, %v14602_v56  ;;  %v11394_v37 = vadd.f32 %v14563_v18, %v11215_v22 }
 0x6f4   : > { %v14565_v41 = vpop.f32.mrf.mxu0 }
 0x6f5   : > { %v14566_v23 = vadd.f32 %v14565_v41, %v14564_v13  ;;  %v11505_v5 = vadd.f32 %v14601_v49, %v11394_v37 }
 0x6f7   : > { %v11401_v20 = vadd.f32 %v14566_v23, %v11226_v48 }
 0x6f9   : > { %v11512_v7 = vadd.f32 %v14604_v59, %v11401_v20 }
 0x70e   : > { %v16007_v32 = vpop.f32.mrf.mxu0 }
 0x70f   : > { %v16042_v42 = vpop.f32.mrf.mxu1  ;;  %v11613_v25 = vadd.f32 %v16007_v32, %v11512_v7 }
 0x710   : > { %v11602_v26 = vpop.f32.mrf.mxu0 }
 0x711   : > { %v11603_v28 = vadd.f32 %v11602_v26, %v11505_v5  ;;  %v11763_v63 = vpop.f32.mrf.mxu1  ;;  %v11770_v11 = vadd.f32 %v16042_v42, %v11613_v25 }
 0x713   : > { %v11764_v15 = vadd.f32 %v11763_v63, %v11603_v28 }
 0x72f   : > { %v16077_v47 = vpop.f32.mrf.mxu0 }
 0x730   : > { %v11881_v39 = vadd.f32 %v16077_v47, %v11770_v11 }
 0x731   : > { %v16112_v50 = vpop.f32.mrf.mxu1  ;;  %v11873_v31 = vpop.f32.mrf.mxu0 }
 0x732   : > { %v11874_v53 = vadd.f32 %v11873_v31, %v11764_v15  ;;  %v11978_v13 = vadd.f32 %v16112_v50, %v11881_v39 }
 0x733   : > { %v11969_v1 = vpop.f32.mrf.mxu1 }
 0x734   : > { %v11970_v30 = vadd.f32 %v11969_v1, %v11874_v53 }
 0x752   : > { %v16147_v51 = vpop.f32.mrf.mxu0  ;;  %v16182_v35 = vpop.f32.mrf.mxu1 }
 0x753   : > { %v12103_v55 = vadd.f32 %v16147_v51, %v11978_v13 }
 0x754   : > { %v12096_v27 = vpop.f32.mrf.mxu0  ;;  %v12189_v44 = vpop.f32.mrf.mxu1 }
 0x755   : > { %v12196_v41 = vadd.f32 %v16182_v35, %v12103_v55  ;;  %v12097_v56 = vadd.f32 %v12096_v27, %v11970_v30 }
 0x757   : > { %v12200_v29 = vadd.f32 %v12196_v41, %v10513_v52  ;;  %v12190_v2 = vadd.f32 %v12189_v44, %v12097_v56 }
 0x759   : > { %v12353_v45 = vmul.f32 -1.442695, %v12200_v29  ;;  %v12199_v19 = vadd.f32 %v12190_v2, %v10512_v34 }
 0x75b   : > { %16270 = vpow2.f32 %v12353_v45  ;;  %v12352_v38 = vmul.f32 -1.442695, %v12199_v19 }
 0x75d   : > { %16272 = vpow2.f32 %v12352_v38 }
 0x768   : > { %v16271_v23 = vpop.eup %16270 }
 0x769   : > { %v12208_v62 = vadd.f32 1.0, %v16271_v23 }
 0x76a   : > { %v16273_v36 = vpop.eup %16272 }
 0x76b   : > { %16274 = vrcp.f32 %v12208_v62  ;;  %v12207_v48 = vadd.f32 1.0, %v16273_v36 }
 0x76d   : > { %16276 = vrcp.f32 %v12207_v48 }
 0x778   : > { %v16275_v18 = vpop.eup %16274 }
 0x779   : > { %12215 = vst.msk [vmem:[%s190_s28 + $0x8] sm:$0xff] %vm12213_vm8, %v16275_v18 }
 0x77a   : > { %v16277_v33 = vpop.eup %16276 }
 0x77b   : > { %12214 = vst.msk [vmem:[%s190_s28] sm:$0xff] %vm12213_vm8, %v16277_v33 }
 0x77c   : > { %16356 = shalt.err (!%p16353_p5)
}
 0x77d   : > { %s16357_s19 = scalar_lea.hbm %s23585_s6, 256  ;;  %s16361_s23 = scalar_lea.hbm %s23637_s2, 512 }
 0x77e   : > { %p16358_p7 = scmp.ne.s32.totalorder %s23585_s6, %s16357_s19  ;;  %p16362_p9 = scmp.lt.s32.totalorder %s23585_s6, %s23637_s2 }
 0x77f   : > { %p16363_p11 = scmp.lt.s32.totalorder %s16361_s23, %s16357_s19 }
 0x780   : > { %p16359_p6 = pnand %p16358_p7, %p16547_p13 }
 0x781   : > { %p16364_p10 = por %p16363_p11, %p16362_p9 }
 0x782   : > { %p16360_p4 = pneg %p16359_p6 }
 0x784   : > { %p16365_p1 = pnand %p16364_p10, %p16360_p4 }
 0x786   : > { %16368 = shalt.err (!%p16365_p1)
}
 0x787   : > { %s16443_s27 = smov 128   ;;  %s16444_s18 = smov 8  }
 0x788   : > { %16189 = dma.vmem_to_hbm [thread:$0]  (%p16547_p13), %s23587_s29, 256, %s23585_s6, %s12217_s7, %s16443_s27, %s16443_s27, %s16444_s18  }
 0x789 PF: > { %s12245_s28 = sand.u32 1, %s16407_s9   ;;  %p25233_p8 = scmp.ne.s32.totalorder %s24235_s20, 0 }
 0x78a   : > { %p25234_p12 = scmp.ge.s32.totalorder %s16427_s14, 2  ;;  %s12246_s30 = scalar_lea.sflag [#allocation6], %s12245_s28 }
 0x78c   : > { %p16200_p0 = pnand %p25234_p12, %p25233_p8 }
 0x78e   : > { %p16201_p2 = pneg %p16200_p0 }
 0x790   : > { %16402 = dma.done.wait (%p16201_p2), %s12246_s30, 256  }
 0x791   : > { %16404 = vsyncadd (%p16201_p2), %s12246_s30, 4294967040  ;;  %s19_s14 = sadd.s32 1, %s16427_s14   ;;  %s25235_s9 = smov %s16411_s10 }
 0x792   : > { %p16_p3 = scmp.ge.s32.totalorder %s19_s14, 4   ;;  %s25236_s10 = smov %s16415_s11 }
 0x793   : > { %s25237_s11 = smov %s16556_s15  ;;  %s25238_s12 = smov %s16423_s13 }
 0x794   : > { %s25239_s13 = smov %s25241_s25  ;;  %18 = sbr.rel (!%p16_p3) target bundleno = 7 (0x7), region = 96 }
 0x799   :  { %12251 = vsyncpa [#allocation5], 1 }
 0x79a   :  { %12253 = vsyncpa [#allocation5 + $0x1], 1 }
 0x79b   :  { %12254 = vsyncpa [#allocation8], 1 }
 0x79c   :  { %12256 = vsyncpa [#allocation8 + $0x1], 1 }
 0x79d   :  { %12257 = vsyncpa [#allocation6], 1 }
 0x79e   :  { %12259 = vsyncpa [#allocation6 + $0x1], 1 }

</bundles_post_ra>
